<compile_context>
chip_gen: v7x
topology: tpu7x:2x2x1
jax: 0.10.0
libtpu: 0.0.40
codegen_flags: <defaults>
</compile_context>

<pallas_src>
import jax
import jax.numpy as jnp
from jax.experimental import pallas as pl
from jax.experimental.pallas import tpu as pltpu

B = 2              # batch
C_IN = 256         # input channels
H = W = 8
HW = H * W         # 64
C_POL = 128        # policy conv channels
P_HID = C_POL * HW # 8192  (flattened policy hidden)
P_OUT = HW * 73    # 4672  (policy logits)
V_HID = 64
BN_EPS = 1e-5
TK = 1024          # K-tile for the large fc matmul (8192 -> 4672), bf16 weight


# ---------------------------------------------------------------------------
# Kernel 1 (fused heads, per batch element):
#   value:  relu(bn(conv(s))) -> flatten -> relu(fc1) -> tanh(fc2)
#   policy: relu(bn1(conv1(s)))  (emitted in (C, HW) = Flatten() order, bf16)
# BN already folded into wv/bv and wp/bp by the wrapper.
# ---------------------------------------------------------------------------
def head_conv_kernel(x_ref, wv_ref, bv_ref, w1t_ref, b1_ref, w2t_ref, b2_ref,
                     wp_ref, bp_ref, v_ref, ph_ref):
    x = x_ref[0]                                                                  # (256, 64)

    # ----- value head -----
    h = jnp.dot(wv_ref[...], x, preferred_element_type=jnp.float32) + bv_ref[...]      # (1, 64)
    h = jnp.maximum(h, 0.0)                                                       # relu(bn(conv))
    h = jnp.dot(h, w1t_ref[...], preferred_element_type=jnp.float32) + b1_ref[...]     # (1, 64)
    h = jnp.maximum(h, 0.0)                                                       # relu(fc1)
    h = jnp.dot(h, w2t_ref[...], preferred_element_type=jnp.float32) + b2_ref[...]     # (1, 1)
    v_ref[0] = jnp.tanh(h)                                                        # tanh(fc2)

    # ----- policy 1x1 conv (256 -> 128) + folded BN + relu -----
    o = jnp.dot(wp_ref[...], x, preferred_element_type=jnp.float32) + bp_ref[...]      # (128, 64)
    ph_ref[0] = jnp.maximum(o, 0.0).astype(ph_ref.dtype)


# ---------------------------------------------------------------------------
# Kernel 2: large fc (8192 -> 4672) + logsoftmax().exp() == softmax.
# Grid = (P_HID // TK,): each bf16 weight K-tile is streamed from HBM exactly
# once and applied to all B rows; f32 accumulator lives in VMEM scratch.
# ---------------------------------------------------------------------------
def fc_softmax_kernel(h_ref, w_ref, b_ref, p_ref, acc_ref):
    k = pl.program_id(0)

    @pl.when(k == 0)
    def _():
        acc_ref[...] = jnp.zeros_like(acc_ref)

    acc_ref[...] += jnp.dot(h_ref[...], w_ref[...],
                            preferred_element_type=jnp.float32)                   # (B, 4672)

    @pl.when(k == pl.num_programs(0) - 1)
    def _():
        logits = acc_ref[...] + b_ref[...]
        m = jnp.max(logits, axis=-1, keepdims=True)
        e = jnp.exp(logits - m)
        s = jnp.sum(e, axis=-1, keepdims=True)
        p_ref[...] = (e * pl.reciprocal(s)).astype(p_ref.dtype)                   # exp(log_softmax)


# ---------------------------------------------------------------------------
# Wrapper
# ---------------------------------------------------------------------------
def fold_bn(w, b, gamma, beta, mean, var):
    scale = gamma / jnp.sqrt(var + BN_EPS)
    return w * scale[:, None], b * scale + (beta - mean * scale)


def prepare_params(params):
    """One-time parameter preprocessing OUTSIDE the jitted forward:
    pre-transpose the Linear weights and cast the big fc weight to bf16."""
    p = dict(params)
    p["fc_wt"] = jnp.asarray(params["fc_w"].T, dtype=jnp.bfloat16)   # (P_HID, P_OUT)
    p["fc1_wt"] = jnp.asarray(params["fc1_w"].T)                     # (HW, V_HID)
    p["fc2_wt"] = jnp.asarray(params["fc2_w"].T)                     # (V_HID, 1)
    for k in ("fc_w", "fc1_w", "fc2_w"):
        del p[k]
    return p


@jax.jit
def out_block_forward(s, params):
    x = s.reshape(B, C_IN, HW).astype(jnp.float32)        # (B, 256, 64), NCHW reshape

    # ---- fold BN into the 1x1 convs (tiny glue / parameter preprocessing) ----
    wv, bv = fold_bn(params["conv_w"], params["conv_b"],
                     params["bn_g"], params["bn_b"], params["bn_m"], params["bn_v"])
    wp, bp = fold_bn(params["conv1_w"], params["conv1_b"],
                     params["bn1_g"], params["bn1_b"], params["bn1_m"], params["bn1_v"])

    # ---------------- fused value head + policy conv (grid over B) -------------
    v, p_hid = pl.pallas_call(
        head_conv_kernel,
        out_shape=(jax.ShapeDtypeStruct((B, 1, 1), jnp.float32),
                   jax.ShapeDtypeStruct((B, C_POL, HW), jnp.bfloat16)),
        grid_spec=pltpu.PrefetchScalarGridSpec(
            num_scalar_prefetch=0,
            grid=(B,),
            in_specs=[
                pl.BlockSpec((1, C_IN, HW), lambda b: (b, 0, 0)),     # x
                pl.BlockSpec((1, C_IN), lambda b: (0, 0)),            # conv_v weight (1,256)
                pl.BlockSpec((1, 1), lambda b: (0, 0)),               # conv_v bias
                pl.BlockSpec((HW, V_HID), lambda b: (0, 0)),          # fc1 weight^T (64,64)
                pl.BlockSpec((1, V_HID), lambda b: (0, 0)),           # fc1 bias
                pl.BlockSpec((V_HID, 1), lambda b: (0, 0)),           # fc2 weight^T (64,1)
                pl.BlockSpec((1, 1), lambda b: (0, 0)),               # fc2 bias
                pl.BlockSpec((C_POL, C_IN), lambda b: (0, 0)),        # conv1 weight (128,256)
                pl.BlockSpec((C_POL, 1), lambda b: (0, 0)),           # conv1 bias
            ],
            out_specs=[
                pl.BlockSpec((1, 1, 1), lambda b: (b, 0, 0)),         # v
                pl.BlockSpec((1, C_POL, HW), lambda b: (b, 0, 0)),    # policy hidden
            ],
        ),
        compiler_params=pltpu.CompilerParams(dimension_semantics=("parallel",)),
    )(x, wv, bv.reshape(1, 1),
      params["fc1_wt"], params["fc1_b"].reshape(1, V_HID),
      params["fc2_wt"], params["fc2_b"].reshape(1, 1),
      wp, bp.reshape(C_POL, 1))
    v = v.reshape(B, 1)

    # Flatten(): (C, H, W) ordering preserved; contiguous reshape, no transpose.
    h = p_hid.reshape(B, P_HID)                            # (B, 8192) bf16

    # ----------------- big fc + softmax (hot path, K-tiled, batched) -----------
    p = pl.pallas_call(
        fc_softmax_kernel,
        out_shape=jax.ShapeDtypeStruct((B, P_OUT), jnp.float32),
        grid_spec=pltpu.PrefetchScalarGridSpec(
            num_scalar_prefetch=0,
            grid=(P_HID // TK,),
            in_specs=[
                pl.BlockSpec((B, TK), lambda k: (0, k)),              # hidden rows (all B)
                pl.BlockSpec((TK, P_OUT), lambda k: (k, 0)),          # bf16 fc weight^T tile
                pl.BlockSpec((1, P_OUT), lambda k: (0, 0)),           # fc bias
            ],
            out_specs=pl.BlockSpec((B, P_OUT), lambda k: (0, 0)),
            scratch_shapes=[pltpu.VMEM((B, P_OUT), jnp.float32)],
        ),
        compiler_params=pltpu.CompilerParams(
            dimension_semantics=("arbitrary",),
            vmem_limit_bytes=32 * 1024 * 1024,   # ~19 MiB needed; safe on v7x's 64 MiB VMEM
        ),
    )(h, params["fc_wt"], params["fc_b"].reshape(1, P_OUT))

    # TODO(synk): on v7x the P_OUT axis could additionally be split across the
    # two TensorCores with a small cross-core softmax combine.

    return {"p": p, "v": v}


def init_params(key):
    ks = jax.random.split(key, 12)
    f32 = jnp.float32
    return {
        # value head
        "conv_w": jax.random.normal(ks[0], (1, C_IN), f32) * 0.05,
        "conv_b": jax.random.normal(ks[1], (1,), f32) * 0.05,
        "bn_g": 1.0 + 0.1 * jax.random.normal(ks[2], (1,), f32),
        "bn_b": 0.1 * jax.random.normal(ks[3], (1,), f32),
        "bn_m": 0.1 * jax.random.normal(ks[4], (1,), f32),
        "bn_v": 0.5 + jax.random.uniform(ks[5], (1,), f32),
        "fc1_w": jax.random.normal(ks[6], (V_HID, HW), f32) * 0.05,
        "fc1_b": jnp.zeros((V_HID,), f32),
        "fc2_w": jax.random.normal(ks[7], (1, V_HID), f32) * 0.05,
        "fc2_b": jnp.zeros((1,), f32),
        # policy head
        "conv1_w": jax.random.normal(ks[8], (C_POL, C_IN), f32) * 0.05,
        "conv1_b": jnp.zeros((C_POL,), f32),
        "bn1_g": 1.0 + 0.1 * jax.random.normal(ks[9], (C_POL,), f32),
        "bn1_b": 0.1 * jax.random.normal(ks[10], (C_POL,), f32),
        "bn1_m": jnp.zeros((C_POL,), f32),
        "bn1_v": jnp.ones((C_POL,), f32),
        "fc_w": jax.random.normal(ks[11], (P_OUT, P_HID), f32) * 0.02,
        "fc_b": jnp.zeros((P_OUT,), f32),
    }


if __name__ == "__main__":
    key = jax.random.PRNGKey(0)
    k_in, k_par = jax.random.split(key)
    s = jax.random.normal(k_in, (B, C_IN, H, W), jnp.float32)   # NCHW, like PyTorch
    params = prepare_params(init_params(k_par))                  # one-time transpose + bf16 cast

    out = out_block_forward(s, params)
    jax.block_until_ready(out)

    p, v = out["p"], out["v"]
    assert p.shape == (B, P_OUT) and v.shape == (B, 1)
    assert bool(jnp.all(jnp.isfinite(p))) and bool(jnp.all(jnp.isfinite(v)))
    # softmax rows must sum to 1; tanh output must lie in [-1, 1]
    assert bool(jnp.all(jnp.abs(jnp.sum(p, axis=-1) - 1.0) < 1e-3))
    assert bool(jnp.all(jnp.abs(v) <= 1.0 + 1e-6))
    print("KERNEL_OK")
</pallas_src>

<mosaic_0001>
module attributes {stable_mosaic.version = 11 : i64} {
  func.func @head_conv_kernel(%arg0: i32, %arg1: memref<1x256x64xf32, #tpu.memory_space<vmem>>, %arg2: memref<1x256xf32, #tpu.memory_space<vmem>>, %arg3: memref<1x1xf32, #tpu.memory_space<vmem>>, %arg4: memref<64x64xf32, #tpu.memory_space<vmem>>, %arg5: memref<1x64xf32, #tpu.memory_space<vmem>>, %arg6: memref<64x1xf32, #tpu.memory_space<vmem>>, %arg7: memref<1x1xf32, #tpu.memory_space<vmem>>, %arg8: memref<128x256xf32, #tpu.memory_space<vmem>>, %arg9: memref<128x1xf32, #tpu.memory_space<vmem>>, %arg10: memref<1x1x1xf32, #tpu.memory_space<vmem>>, %arg11: memref<1x128x64xbf16, #tpu.memory_space<vmem>>) attributes {dimension_semantics = [#tpu.dimension_semantics<parallel>], iteration_bounds = array<i64: 2>, scalar_prefetch = 0 : i64, scratch_operands = 0 : i64, tpu.core_type = #tpu.core_type<tc>, window_params = [{transform_indices = @transform_0, window_bounds = array<i64: 1, 256, 64>}, {pipeline_mode = #tpu.pipeline_mode<synchronous>, transform_indices = @transform_1, window_bounds = array<i64: 1, 256>}, {pipeline_mode = #tpu.pipeline_mode<synchronous>, transform_indices = @transform_2, window_bounds = array<i64: 1, 1>}, {pipeline_mode = #tpu.pipeline_mode<synchronous>, transform_indices = @transform_3, window_bounds = array<i64: 64, 64>}, {pipeline_mode = #tpu.pipeline_mode<synchronous>, transform_indices = @transform_4, window_bounds = array<i64: 1, 64>}, {pipeline_mode = #tpu.pipeline_mode<synchronous>, transform_indices = @transform_5, window_bounds = array<i64: 64, 1>}, {pipeline_mode = #tpu.pipeline_mode<synchronous>, transform_indices = @transform_6, window_bounds = array<i64: 1, 1>}, {pipeline_mode = #tpu.pipeline_mode<synchronous>, transform_indices = @transform_7, window_bounds = array<i64: 128, 256>}, {pipeline_mode = #tpu.pipeline_mode<synchronous>, transform_indices = @transform_8, window_bounds = array<i64: 128, 1>}, {transform_indices = @transform_9, window_bounds = array<i64: 1, 1, 1>}, {transform_indices = @transform_10, window_bounds = array<i64: 1, 128, 64>}]} {
    %c0 = arith.constant 0 : index
    %c0_0 = arith.constant 0 : index
    %c0_1 = arith.constant 0 : index
    %0 = vector.load %arg1[%c0, %c0_0, %c0_1] : memref<1x256x64xf32, #tpu.memory_space<vmem>>, vector<1x256x64xf32>
    %1 = vector.shape_cast %0 : vector<1x256x64xf32> to vector<256x64xf32>
    %c0_2 = arith.constant 0 : index
    %c0_3 = arith.constant 0 : index
    %2 = vector.load %arg2[%c0_2, %c0_3] : memref<1x256xf32, #tpu.memory_space<vmem>>, vector<1x256xf32>
    %cst = arith.constant dense<0.000000e+00> : vector<1x64xf32>
    %3 = tpu.matmul %2, %1, %cst {dimension_numbers = #tpu.dot_dimension_numbers<[1], [0], [0], [1], [0, 0, 1, 1], [], []>} : vector<1x256xf32>, vector<256x64xf32>, vector<1x64xf32> -> vector<1x64xf32>
    %c0_4 = arith.constant 0 : index
    %c0_5 = arith.constant 0 : index
    %4 = vector.load %arg3[%c0_4, %c0_5] : memref<1x1xf32, #tpu.memory_space<vmem>>, vector<1x1xf32>
    %5 = vector.broadcast %4 : vector<1x1xf32> to vector<1x64xf32>
    %6 = arith.addf %3, %5 : vector<1x64xf32>
    %cst_6 = arith.constant 0.000000e+00 : f32
    %7 = vector.broadcast %cst_6 : f32 to vector<1x64xf32>
    %8 = arith.maximumf %6, %7 : vector<1x64xf32>
    %c0_7 = arith.constant 0 : index
    %c0_8 = arith.constant 0 : index
    %9 = vector.load %arg4[%c0_7, %c0_8] : memref<64x64xf32, #tpu.memory_space<vmem>>, vector<64x64xf32>
    %cst_9 = arith.constant dense<0.000000e+00> : vector<1x64xf32>
    %10 = tpu.matmul %8, %9, %cst_9 {dimension_numbers = #tpu.dot_dimension_numbers<[1], [0], [0], [1], [0, 0, 1, 1], [], []>} : vector<1x64xf32>, vector<64x64xf32>, vector<1x64xf32> -> vector<1x64xf32>
    %c0_10 = arith.constant 0 : index
    %c0_11 = arith.constant 0 : index
    %11 = vector.load %arg5[%c0_10, %c0_11] : memref<1x64xf32, #tpu.memory_space<vmem>>, vector<1x64xf32>
    %12 = arith.addf %10, %11 : vector<1x64xf32>
    %cst_12 = arith.constant 0.000000e+00 : f32
    %13 = vector.broadcast %cst_12 : f32 to vector<1x64xf32>
    %14 = arith.maximumf %12, %13 : vector<1x64xf32>
    %c0_13 = arith.constant 0 : index
    %c0_14 = arith.constant 0 : index
    %15 = vector.load %arg6[%c0_13, %c0_14] : memref<64x1xf32, #tpu.memory_space<vmem>>, vector<64x1xf32>
    %cst_15 = arith.constant dense<0.000000e+00> : vector<1x1xf32>
    %16 = tpu.matmul %14, %15, %cst_15 {dimension_numbers = #tpu.dot_dimension_numbers<[1], [0], [0], [1], [0, 0, 1, 1], [], []>} : vector<1x64xf32>, vector<64x1xf32>, vector<1x1xf32> -> vector<1x1xf32>
    %c0_16 = arith.constant 0 : index
    %c0_17 = arith.constant 0 : index
    %17 = vector.load %arg7[%c0_16, %c0_17] : memref<1x1xf32, #tpu.memory_space<vmem>>, vector<1x1xf32>
    %18 = arith.addf %16, %17 : vector<1x1xf32>
    %19 = math.tanh %18 : vector<1x1xf32>
    %c0_18 = arith.constant 0 : index
    %c0_19 = arith.constant 0 : index
    %c0_20 = arith.constant 0 : index
    %20 = vector.load %arg10[%c0_18, %c0_19, %c0_20] : memref<1x1x1xf32, #tpu.memory_space<vmem>>, vector<1x1x1xf32>
    %21 = vector.shape_cast %20 : vector<1x1x1xf32> to vector<1x1xf32>
    %22 = vector.shape_cast %19 : vector<1x1xf32> to vector<1x1x1xf32>
    tpu.vector_store %arg10[%c0_18, %c0_19, %c0_20], %22 {strides = array<i32>} : memref<1x1x1xf32, #tpu.memory_space<vmem>>, vector<1x1x1xf32>,
    %c0_21 = arith.constant 0 : index
    %c0_22 = arith.constant 0 : index
    %23 = vector.load %arg8[%c0_21, %c0_22] : memref<128x256xf32, #tpu.memory_space<vmem>>, vector<128x256xf32>
    %cst_23 = arith.constant dense<0.000000e+00> : vector<128x64xf32>
    %24 = tpu.matmul %23, %1, %cst_23 {dimension_numbers = #tpu.dot_dimension_numbers<[1], [0], [0], [1], [0, 0, 1, 1], [], []>} : vector<128x256xf32>, vector<256x64xf32>, vector<128x64xf32> -> vector<128x64xf32>
    %c0_24 = arith.constant 0 : index
    %c0_25 = arith.constant 0 : index
    %25 = vector.load %arg9[%c0_24, %c0_25] : memref<128x1xf32, #tpu.memory_space<vmem>>, vector<128x1xf32>
    %26 = vector.broadcast %25 : vector<128x1xf32> to vector<128x64xf32>
    %27 = arith.addf %24, %26 : vector<128x64xf32>
    %cst_26 = arith.constant 0.000000e+00 : f32
    %28 = vector.broadcast %cst_26 : f32 to vector<128x64xf32>
    %29 = arith.maximumf %27, %28 : vector<128x64xf32>
    %30 = arith.truncf %29 : vector<128x64xf32> to vector<128x64xbf16>
    %c0_27 = arith.constant 0 : index
    %c0_28 = arith.constant 0 : index
    %c0_29 = arith.constant 0 : index
    %31 = vector.load %arg11[%c0_27, %c0_28, %c0_29] : memref<1x128x64xbf16, #tpu.memory_space<vmem>>, vector<1x128x64xbf16>
    %32 = vector.shape_cast %31 : vector<1x128x64xbf16> to vector<128x64xbf16>
    %33 = vector.shape_cast %30 : vector<128x64xbf16> to vector<1x128x64xbf16>
    tpu.vector_store %arg11[%c0_27, %c0_28, %c0_29], %33 {strides = array<i32>} : memref<1x128x64xbf16, #tpu.memory_space<vmem>>, vector<1x128x64xbf16>,
    return
  }
  func.func @transform_0(%arg0: i32) -> (i32, i32, i32) {
    %c0_i32 = arith.constant 0 : i32
    %c0_i32_0 = arith.constant 0 : i32
    %c0_i32_1 = arith.constant 0 : i32
    return %arg0, %c0_i32, %c0_i32_0 : i32, i32, i32
  }
  func.func @transform_1(%arg0: i32) -> (i32, i32) {
    %c0_i32 = arith.constant 0 : i32
    %c0_i32_0 = arith.constant 0 : i32
    %c0_i32_1 = arith.constant 0 : i32
    return %c0_i32, %c0_i32_0 : i32, i32
  }
  func.func @transform_2(%arg0: i32) -> (i32, i32) {
    %c0_i32 = arith.constant 0 : i32
    %c0_i32_0 = arith.constant 0 : i32
    %c0_i32_1 = arith.constant 0 : i32
    return %c0_i32, %c0_i32_0 : i32, i32
  }
  func.func @transform_3(%arg0: i32) -> (i32, i32) {
    %c0_i32 = arith.constant 0 : i32
    %c0_i32_0 = arith.constant 0 : i32
    %c0_i32_1 = arith.constant 0 : i32
    return %c0_i32, %c0_i32_0 : i32, i32
  }
  func.func @transform_4(%arg0: i32) -> (i32, i32) {
    %c0_i32 = arith.constant 0 : i32
    %c0_i32_0 = arith.constant 0 : i32
    %c0_i32_1 = arith.constant 0 : i32
    return %c0_i32, %c0_i32_0 : i32, i32
  }
  func.func @transform_5(%arg0: i32) -> (i32, i32) {
    %c0_i32 = arith.constant 0 : i32
    %c0_i32_0 = arith.constant 0 : i32
    %c0_i32_1 = arith.constant 0 : i32
    return %c0_i32, %c0_i32_0 : i32, i32
  }
  func.func @transform_6(%arg0: i32) -> (i32, i32) {
    %c0_i32 = arith.constant 0 : i32
    %c0_i32_0 = arith.constant 0 : i32
    %c0_i32_1 = arith.constant 0 : i32
    return %c0_i32, %c0_i32_0 : i32, i32
  }
  func.func @transform_7(%arg0: i32) -> (i32, i32) {
    %c0_i32 = arith.constant 0 : i32
    %c0_i32_0 = arith.constant 0 : i32
    %c0_i32_1 = arith.constant 0 : i32
    return %c0_i32, %c0_i32_0 : i32, i32
  }
  func.func @transform_8(%arg0: i32) -> (i32, i32) {
    %c0_i32 = arith.constant 0 : i32
    %c0_i32_0 = arith.constant 0 : i32
    %c0_i32_1 = arith.constant 0 : i32
    return %c0_i32, %c0_i32_0 : i32, i32
  }
  func.func @transform_9(%arg0: i32) -> (i32, i32, i32) {
    %c0_i32 = arith.constant 0 : i32
    %c0_i32_0 = arith.constant 0 : i32
    %c0_i32_1 = arith.constant 0 : i32
    return %arg0, %c0_i32, %c0_i32_0 : i32, i32, i32
  }
  func.func @transform_10(%arg0: i32) -> (i32, i32, i32) {
    %c0_i32 = arith.constant 0 : i32
    %c0_i32_0 = arith.constant 0 : i32
    %c0_i32_1 = arith.constant 0 : i32
    return %arg0, %c0_i32, %c0_i32_0 : i32, i32, i32
  }
}

module attributes {stable_mosaic.version = 11 : i64} {
  func.func @fc_softmax_kernel(%arg0: i32, %arg1: memref<2x1024xbf16, #tpu.memory_space<vmem>>, %arg2: memref<1024x4672xbf16, #tpu.memory_space<vmem>>, %arg3: memref<1x4672xf32, #tpu.memory_space<vmem>>, %arg4: memref<2x4672xf32, #tpu.memory_space<vmem>>, %arg5: memref<2x4672xf32, #tpu.memory_space<vmem>>) attributes {dimension_semantics = [#tpu.dimension_semantics<arbitrary>], iteration_bounds = array<i64: 8>, scalar_prefetch = 0 : i64, scratch_operands = 1 : i64, tpu.core_type = #tpu.core_type<tc>, window_params = [{transform_indices = @transform_0, window_bounds = array<i64: 2, 1024>}, {transform_indices = @transform_1, window_bounds = array<i64: 1024, 4672>}, {pipeline_mode = #tpu.pipeline_mode<synchronous>, transform_indices = @transform_2, window_bounds = array<i64: 1, 4672>}, {pipeline_mode = #tpu.pipeline_mode<synchronous>, transform_indices = @transform_3, window_bounds = array<i64: 2, 4672>}]} {
    %c0_i32 = arith.constant 0 : i32
    %0 = arith.cmpi eq, %arg0, %c0_i32 : i32
    %1 = arith.extui %0 : i1 to i32
    %c0_i32_0 = arith.constant 0 : i32
    %2 = arith.cmpi ne, %1, %c0_i32_0 : i32
    scf.if %2 {
      %cst_9 = arith.constant 0.000000e+00 : f32
      %12 = vector.broadcast %cst_9 : f32 to vector<2x4672xf32>
      %c0_10 = arith.constant 0 : index
      %c0_11 = arith.constant 0 : index
      %13 = vector.load %arg5[%c0_10, %c0_11] : memref<2x4672xf32, #tpu.memory_space<vmem>>, vector<2x4672xf32>
      tpu.vector_store %arg5[%c0_10, %c0_11], %12 {strides = array<i32>} : memref<2x4672xf32, #tpu.memory_space<vmem>>, vector<2x4672xf32>,
    } else {
    }
    %c0 = arith.constant 0 : index
    %c0_1 = arith.constant 0 : index
    %3 = vector.load %arg5[%c0, %c0_1] : memref<2x4672xf32, #tpu.memory_space<vmem>>, vector<2x4672xf32>
    %c0_2 = arith.constant 0 : index
    %c0_3 = arith.constant 0 : index
    %4 = vector.load %arg1[%c0_2, %c0_3] : memref<2x1024xbf16, #tpu.memory_space<vmem>>, vector<2x1024xbf16>
    %c0_4 = arith.constant 0 : index
    %c0_5 = arith.constant 0 : index
    %5 = vector.load %arg2[%c0_4, %c0_5] : memref<1024x4672xbf16, #tpu.memory_space<vmem>>, vector<1024x4672xbf16>
    %cst = arith.constant dense<0.000000e+00> : vector<2x4672xf32>
    %6 = tpu.matmul %4, %5, %cst {dimension_numbers = #tpu.dot_dimension_numbers<[1], [0], [0], [1], [0, 0, 1, 1], [], []>} : vector<2x1024xbf16>, vector<1024x4672xbf16>, vector<2x4672xf32> -> vector<2x4672xf32>
    %7 = arith.addf %3, %6 : vector<2x4672xf32>
    %c0_6 = arith.constant 0 : index
    %c0_7 = arith.constant 0 : index
    %8 = vector.load %arg5[%c0_6, %c0_7] : memref<2x4672xf32, #tpu.memory_space<vmem>>, vector<2x4672xf32>
    tpu.vector_store %arg5[%c0_6, %c0_7], %7 {strides = array<i32>} : memref<2x4672xf32, #tpu.memory_space<vmem>>, vector<2x4672xf32>,
    %c7_i32 = arith.constant 7 : i32
    %9 = arith.cmpi eq, %arg0, %c7_i32 : i32
    %10 = arith.extui %9 : i1 to i32
    %c0_i32_8 = arith.constant 0 : i32
    %11 = arith.cmpi ne, %10, %c0_i32_8 : i32
    scf.if %11 {
      %c0_9 = arith.constant 0 : index
      %c0_10 = arith.constant 0 : index
      %12 = vector.load %arg5[%c0_9, %c0_10] : memref<2x4672xf32, #tpu.memory_space<vmem>>, vector<2x4672xf32>
      %c0_11 = arith.constant 0 : index
      %c0_12 = arith.constant 0 : index
      %13 = vector.load %arg3[%c0_11, %c0_12] : memref<1x4672xf32, #tpu.memory_space<vmem>>, vector<1x4672xf32>
      %14 = vector.broadcast %13 : vector<1x4672xf32> to vector<2x4672xf32>
      %15 = arith.addf %12, %14 : vector<2x4672xf32>
      %cst_13 = arith.constant dense<0xFF800000> : vector<2xf32>
      %16 = vector.multi_reduction <maximumf>, %15, %cst_13 [1] : vector<2x4672xf32> to vector<2xf32>
      %17 = vector.shape_cast %16 : vector<2xf32> to vector<2x1xf32>
      %18 = vector.broadcast %17 : vector<2x1xf32> to vector<2x4672xf32>
      %19 = arith.subf %15, %18 : vector<2x4672xf32>
      %20 = math.exp %19 : vector<2x4672xf32>
      %cst_14 = arith.constant dense<0.000000e+00> : vector<2xf32>
      %21 = vector.multi_reduction <add>, %20, %cst_14 [1] : vector<2x4672xf32> to vector<2xf32>
      %22 = vector.shape_cast %21 : vector<2xf32> to vector<2x1xf32>
      %23 = tpu.reciprocal %22 : vector<2x1xf32> -> vector<2x1xf32>
      %24 = vector.broadcast %23 : vector<2x1xf32> to vector<2x4672xf32>
      %25 = arith.mulf %20, %24 : vector<2x4672xf32>
      %c0_15 = arith.constant 0 : index
      %c0_16 = arith.constant 0 : index
      %26 = vector.load %arg4[%c0_15, %c0_16] : memref<2x4672xf32, #tpu.memory_space<vmem>>, vector<2x4672xf32>
      tpu.vector_store %arg4[%c0_15, %c0_16], %25 {strides = array<i32>} : memref<2x4672xf32, #tpu.memory_space<vmem>>, vector<2x4672xf32>,
    } else {
    }
    return
  }
  func.func @transform_0(%arg0: i32) -> (i32, i32) {
    %c0_i32 = arith.constant 0 : i32
    %c0_i32_0 = arith.constant 0 : i32
    return %c0_i32, %arg0 : i32, i32
  }
  func.func @transform_1(%arg0: i32) -> (i32, i32) {
    %c0_i32 = arith.constant 0 : i32
    %c0_i32_0 = arith.constant 0 : i32
    return %arg0, %c0_i32 : i32, i32
  }
  func.func @transform_2(%arg0: i32) -> (i32, i32) {
    %c0_i32 = arith.constant 0 : i32
    %c0_i32_0 = arith.constant 0 : i32
    %c0_i32_1 = arith.constant 0 : i32
    return %c0_i32, %c0_i32_0 : i32, i32
  }
  func.func @transform_3(%arg0: i32) -> (i32, i32) {
    %c0_i32 = arith.constant 0 : i32
    %c0_i32_0 = arith.constant 0 : i32
    %c0_i32_1 = arith.constant 0 : i32
    return %c0_i32, %c0_i32_0 : i32, i32
  }
}

</mosaic_0001>

<bundles_post_ra>
// kernel: out_block_forward.2
= control target key start
LH: loop header
LB: loop body
LE: loop exit
PB: predicated region body
PF: predicated region fallthrough
CT: control target
= control target key end

     0   :  { %s2042_s0 = inlined_call_operand.vmem [shape: f32[2,256,64], index: 0, kind: input, shape index: {}]   ;;  %s2043_s1 = inlined_call_operand.vmem [shape: f32[1,256], index: 1, kind: input, shape index: {}]   ;;  %s2044_s2 = inlined_call_operand.<no memory space> [shape: f32[1,1], index: 2, kind: input, shape index: {}]   ;;  %s2045_s3 = inlined_call_operand.hbm [shape: f32[64,64], index: 3, kind: input, shape index: {}]   ;;  %s2046_s4 = inlined_call_operand.hbm [shape: f32[1,64], index: 4, kind: input, shape index: {}]   ;;  %s2047_s5 = inlined_call_operand.vmem [shape: f32[64,1], index: 5, kind: input, shape index: {}]   ;;  %s2048_s7 = inlined_call_operand.vmem [shape: f32[128,256], index: 7, kind: input, shape index: {}]   ;;  %s2049_s8 = inlined_call_operand.vmem [shape: f32[128,1], index: 8, kind: input, shape index: {}]   ;;  %s2050_s9 = inlined_call_operand.vmem [shape: f32[2,1,1], index: 9, kind: output, shape index: {0}]   ;;  %s2051_s10 = inlined_call_operand.vmem [shape: bf16[2,128,64], index: 10, kind: output, shape index: {1}]   ;;  %s2052_s6 = inlined_call_operand.<no memory space> [shape: f32[1,1], index: 6, kind: input, shape index: {}]  }
   0x1   :  { %v16_v0 = vstv %s2044_s2  ;;  %v18_v1 = vstv %s2052_s6 }
   0x2   :  { %17 = vst [vmem:[#allocation2] sm:$0x1] %v16_v0  ;;  %19 = vst [vmem:[#allocation3] sm:$0x1] %v18_v1 }
   0x3   :  { %20 = vsyncpa [#allocation5], 0 }
   0x4   :  { %21 = vsyncpa [#allocation7], 0  ;;  %s1657_s17 = smov 0  }
   0x5 LB: > { %s1663_s18 = sadd.s32 4294967295, %s1586_s17   ;;  %p1169_p0 = scmp.ge.s32.totalorder %s1586_s17, 1  ;;  %s1586_s17 = sphi %s1657_s17, %s27_s17  }
   0x6   : > { %p278_p1 = scmp.lt.s32.totalorder %s1586_s17, 3  ;;  %s1588_s2 = smov [#allocation4]  }
   0x7   : > { %s296_s6 = sshll.u32 %s1588_s2, 4  ;;  %p2053_p3 = scmp.eq.s32.totalorder %s1663_s18, 0  ;;  %s297_s6 = int_to_ptr.vmem [resolvable:$true] %s296_s6 }
   0x8   : > { %p1667_p2 = pnand %p1169_p0, %p278_p1  ;;  %s1589_s20 = smov [#allocation6]  }
   0x9   : > { %s310_s21 = sshll.u32 %s1589_s20, 4  ;;  %s1516_s25 = scalar_lea.hbm %s2045_s3, 1024  ;;  %s1680_s21 = int_to_ptr.vmem [resolvable:$true] %s310_s21 }
   0xa   : > { %s2055_s19 = scalar_select %p1667_p2, 1, 0 }
   0xb   : > { %p1485_p4 = pneg %p1667_p2  ;;  %p1517_p6 = scmp.ne.s32.totalorder %s2045_s3, %s1516_s25 }
   0xc   : > { %p1523_p10 = scmp.lt.u32.totalorder %s1516_s25, %s2045_s3 }
   0xd   : > { %p1676_p5 = pnand %p2053_p3, %p1485_p4 }
   0xf   : > { %p1518_p7 = pneg %p1676_p5 }
  0x11   : > { %p1519_p8 = pnand %p1518_p7, %p1517_p6 }
  0x13   : > { %p1520_p9 = pneg %p1519_p8 }
  0x15   : > { %p1525_p11 = pnand %p1523_p10, %p1520_p9 }
  0x17   : > { %1528 = shalt.err (!%p1525_p11)
}
  0x18   : > { %s1529_s30 = scalar_lea.vmem %s297_s6, 1024  ;;  %p1537_p1 = scmp.lt.s32.totalorder %s297_s6, %s297_s6 }
  0x19   : > { %p1530_p12 = scmp.ne.s32.totalorder %s297_s6, %s1529_s30  ;;  %p1538_p4 = scmp.lt.s32.totalorder %s1529_s30, %s1529_s30 }
  0x1b   : > { %p1532_p13 = pnand %p1530_p12, %p1518_p7  ;;  %p1539_p3 = por %p1538_p4, %p1537_p1 }
  0x1d   : > { %p1533_p0 = pneg %p1532_p13 }
  0x1f   : > { %p1540_p2 = pnand %p1539_p3, %p1533_p0 }
  0x21   : > { %1543 = shalt.err (!%p1540_p2)
}
  0x22   : > { %s1590_s11 = smov 128   ;;  %s1591_s12 = smov 8  }
  0x23   : > { %1488 = dma.hbm_to_vmem [thread:$0]  (!%p1676_p5), %s2045_s3, 1024, %s297_s6, [#allocation5], %s1590_s11, %s1590_s11, %s1591_s12  }
  0x24   : > { %s1544_s2 = scalar_lea.hbm %s2046_s4, 16 }
  0x25   : > { %p1545_p6 = scmp.ne.s32.totalorder %s2046_s4, %s1544_s2  ;;  %p1551_p8 = scmp.lt.u32.totalorder %s1544_s2, %s2046_s4 }
  0x27   : > { %p1547_p2 = pnand %p1545_p6, %p1518_p7 }
  0x29   : > { %p1548_p3 = pneg %p1547_p2 }
  0x2b   : > { %p1553_p9 = pnand %p1551_p8, %p1548_p3 }
  0x2d   : > { %1556 = shalt.err (!%p1553_p9)
}
  0x2e   : > { %s1557_s6 = scalar_lea.vmem %s1680_s21, 16  ;;  %s1564_s26 = scalar_lea.vmem %s1680_s21, 32 }
  0x2f   : > { %p1558_p10 = scmp.ne.s32.totalorder %s1680_s21, %s1557_s6  ;;  %p1565_p13 = scmp.lt.s32.totalorder %s1680_s21, %s1680_s21 }
  0x30   : > { %p1566_p0 = scmp.lt.s32.totalorder %s1564_s26, %s1557_s6 }
  0x31   : > { %p1560_p11 = pnand %p1558_p10, %p1518_p7 }
  0x32   : > { %p1567_p1 = por %p1566_p0, %p1565_p13 }
  0x33   : > { %p1561_p12 = pneg %p1560_p11 }
  0x35   : > { %p1568_p4 = pnand %p1567_p1, %p1561_p12 }
  0x37   : > { %1571 = shalt.err (!%p1568_p4)
}
  0x38   : > { %1491 = dma.hbm_to_vmem [thread:$0]  (!%p1676_p5), %s2046_s4, 16, %s1680_s21, [#allocation7]  }
  0x39   : > { %p2057_p6 = scmp.ne.s32.totalorder %s2055_s19, 0 }
  0x3a   : > { %p2058_p7 = scmp.eq.s32.totalorder (!%p2057_p6), %s1663_s18, 0 }
  0x3b   : > { %343 = sbr.rel (%p2057_p6) target bundleno = 772 (0x304), region = 56 }
  0x42   : > { %1577 = dma.done.wait (%p2058_p7), [#allocation5], 1024   ;;  %p2059_p2 = pmov %p2058_p7 }
  0x44   : > { %1579 = vsyncadd (%p2059_p2), [#allocation5], 4294966272  ;;  %p2060_p3 = pmov %p2059_p2 }
  0x45   : > { %p2061_p8 = pmov %p2059_p2 }
  0x46   : > { %1581 = dma.done.wait (%p2060_p3), [#allocation7], 16  }
  0x47   : > { %1583 = vsyncadd (%p2061_p8), [#allocation7], 4294967280  ;;  %p388_p9 = scmp.lt.s32.totalorder %s1663_s18, 1  ;;  %v1592_v2 = vmov 0   ;;  %v440_v3 = vlaneseq  ;;  %v433_v31 = vld [vmem:[%s2043_s1] sm:$0x3] }
  0x48   : > { %1512 = vset.pattern.permute.xlu0 %v1592_v2  ;;  %1513 = vset.pattern.permute.xlu1 %v1592_v2  ;;  %v696_v33 = vld [vmem:[%s2048_s7 + $0x8] sm:$0xff]  ;;  %v434_v47 = vld [vmem:[#allocation2] sm:$0x1]  ;;  %v730_v59 = vld [vmem:[%s2049_s8 + $0x18] sm:$0xff]  ;;  %vm1594_vm0 = vmmov 0   ;;  %vm535_vm1 = vcmask 523264  }
  0x49   : > { %s2063_s18 = smov (!%p388_p9, %s1663_s18), 1  ;;  %v1760_v17 = vshrl.u32 %v440_v3, 7  ;;  %887 = vmatprep.mubr.f32.mxu0 %v696_v33  ;;  %437 = vperm.xlu0 %1512, %v434_v47   ;;  %v727_v53 = vld [vmem:[%s2049_s8] sm:$0xff]  ;;  %v732_v62 = vld [vmem:[%s2049_s8 + $0x28] sm:$0xff]  ;;  %v698_v0 = vld [vmem:[%s2048_s7 + $0x18] sm:$0xff]  ;;  %vm1048_vm2 = vcmask 519168  }
  0x4a   : > { %s1200_s19 = sshll.u32 %s2063_s18, 8  ;;  %v695_v63 = vld [vmem:[%s2048_s7] sm:$0xff]  ;;  %v734_v1 = vld [vmem:[%s2049_s8 + $0x38] sm:$0xff]  ;;  %v697_v2 = vld [vmem:[%s2048_s7 + $0x10] sm:$0xff]  ;;  %s1201_s16 = sshll.u32 %s2063_s18, 6  ;;  %vm693_vm3 = vcmask 0  }
  0x4b   : > { %s1748_s29 = scalar_lea.vmem %s2042_s0, %s1200_s19  ;;  %v451_v24 = vsub.s32 1, %v1760_v17  ;;  %v442_v58 = vsub.s32 0, %v1760_v17  ;;  %v700_v3 = vld [vmem:[%s2048_s7 + $0x28] sm:$0xff]  ;;  %v718_v33 = vld [vmem:[%s2048_s7 + $0xb8] sm:$0xff]  ;;  %s1937_s26 = scalar_lea.vmem %s2051_s10, %s1201_s16 }
  0x4c   : > { %v417_v4 = vld [vmem:[%s1748_s29 + $0x80] sm:$0xff]  ;;  %v418_v5 = vld [vmem:[%s1748_s29 + $0x88] sm:$0xff]  ;;  %v419_v9 = vld [vmem:[%s1748_s29 + $0x90] sm:$0xff]  ;;  %s395_s11 = scalar_lea.vmem %s2050_s9, %s2063_s18 }
  0x4d   : > { %v401_v6 = vld [vmem:[%s1748_s29] sm:$0xff]  ;;  %v1389_v7 = vpack.c.bf16 %v418_v5, %v417_v4  ;;  %v402_v8 = vld [vmem:[%s1748_s29 + $0x8] sm:$0xff]  ;;  %v420_v10 = vld [vmem:[%s1748_s29 + $0x98] sm:$0xff]  ;;  %v452_v32 = vrot.slane %v433_v31, %v451_v24  ;;  %745 = vperm.xlu0 %1512, %v727_v53   ;;  %v448_v61 = vrot.slane %v433_v31, %v442_v58 }
  0x4e   : > { %v1391_v11 = vpack.c.bf16 %v402_v8, %v401_v6  ;;  %v1393_v12 = vpack.c.bf16 %v420_v10, %v419_v9  ;;  %v403_v13 = vld [vmem:[%s1748_s29 + $0x10] sm:$0xff]  ;;  %v404_v14 = vld [vmem:[%s1748_s29 + $0x18] sm:$0xff]  ;;  %v421_v15 = vld [vmem:[%s1748_s29 + $0xa0] sm:$0xff] }
  0x4f   : > { %1390 = vmatprep.subr.bf16.mxu1 %v1389_v7  ;;  %1446 = vmatprep.subr.bf16.mxu0 %v1389_v7  ;;  %v422_v16 = vld [vmem:[%s1748_s29 + $0xa8] sm:$0xff]  ;;  %v1395_v18 = vpack.c.bf16 %v404_v14, %v403_v13  ;;  %v405_v20 = vld [vmem:[%s1748_s29 + $0x20] sm:$0xff]  ;;  %v423_v22 = vld [vmem:[%s1748_s29 + $0xb0] sm:$0xff]  ;;  %v1593_v7 = vmov 0.0|0.0  }
  0x50   : > { %1392 = vmatpush3.bf16.msra.mxu1 %v1391_v11  ;;  %1448 = vmatpush3.bf16.msra.mxu0 %v1391_v11  ;;  %v1397_v19 = vpack.c.bf16 %v422_v16, %v421_v15  ;;  %v406_v21 = vld [vmem:[%s1748_s29 + $0x28] sm:$0xff]  ;;  %v424_v23 = vld [vmem:[%s1748_s29 + $0xb8] sm:$0xff]  ;;  %v407_v27 = vld [vmem:[%s1748_s29 + $0x30] sm:$0xff] }
  0x51   : > { %1394 = vmatprep.subr.bf16.mxu1 %v1393_v12  ;;  %1450 = vmatprep.subr.bf16.mxu0 %v1393_v12  ;;  %v1399_v25 = vpack.c.bf16 %v406_v21, %v405_v20  ;;  %v1401_v26 = vpack.c.bf16 %v424_v23, %v423_v22  ;;  %v408_v28 = vld [vmem:[%s1748_s29 + $0x38] sm:$0xff]  ;;  %v425_v29 = vld [vmem:[%s1748_s29 + $0xc0] sm:$0xff]  ;;  %v426_v30 = vld [vmem:[%s1748_s29 + $0xc8] sm:$0xff] }
  0x52   : > { %v1403_v34 = vpack.c.bf16 %v408_v28, %v407_v27  ;;  %v1405_v35 = vpack.c.bf16 %v426_v30, %v425_v29  ;;  %v409_v36 = vld [vmem:[%s1748_s29 + $0x40] sm:$0xff]  ;;  %v410_v37 = vld [vmem:[%s1748_s29 + $0x48] sm:$0xff]  ;;  %v427_v38 = vld [vmem:[%s1748_s29 + $0xd0] sm:$0xff]  ;;  %519 = vmatprep.mubr.f32.mxu1 %v452_v32  ;;  %760 = vperm.xlu0 %1512, %v730_v59  }
  0x53   : > { %v428_v39 = vld [vmem:[%s1748_s29 + $0xd8] sm:$0xff]  ;;  %v1407_v40 = vpack.c.bf16 %v410_v37, %v409_v36  ;;  %v411_v42 = vld [vmem:[%s1748_s29 + $0x50] sm:$0xff]  ;;  %v429_v44 = vld [vmem:[%s1748_s29 + $0xe0] sm:$0xff] }
  0x54   : > { %1396 = vmatpush3.bf16.msra.mxu1 %v1395_v18  ;;  %1452 = vmatpush3.bf16.msra.mxu0 %v1395_v18  ;;  %v1409_v41 = vpack.c.bf16 %v428_v39, %v427_v38  ;;  %v412_v43 = vld [vmem:[%s1748_s29 + $0x58] sm:$0xff]  ;;  %v430_v45 = vld [vmem:[%s1748_s29 + $0xe8] sm:$0xff]  ;;  %v413_v49 = vld [vmem:[%s1748_s29 + $0x60] sm:$0xff] }
  0x55   : > { %1398 = vmatprep.subr.bf16.mxu1 %v1397_v19  ;;  %1454 = vmatprep.subr.bf16.mxu0 %v1397_v19  ;;  %v1411_v46 = vpack.c.bf16 %v412_v43, %v411_v42  ;;  %v1413_v48 = vpack.c.bf16 %v430_v45, %v429_v44  ;;  %v414_v50 = vld [vmem:[%s1748_s29 + $0x68] sm:$0xff]  ;;  %v431_v51 = vld [vmem:[%s1748_s29 + $0xf0] sm:$0xff]  ;;  %v432_v52 = vld [vmem:[%s1748_s29 + $0xf8] sm:$0xff] }
  0x56   : > { %v1415_v54 = vpack.c.bf16 %v414_v50, %v413_v49  ;;  %v1417_v55 = vpack.c.bf16 %v432_v52, %v431_v51  ;;  %v415_v56 = vld [vmem:[%s1748_s29 + $0x70] sm:$0xff]  ;;  %v416_v57 = vld [vmem:[%s1748_s29 + $0x78] sm:$0xff]  ;;  %770 = vperm.xlu0 %1512, %v732_v62   ;;  %v736_v4 = vld [vmem:[%s2049_s8 + $0x48] sm:$0xff]  ;;  %v1595_v49 = vmov 0.0  }
  0x57   : > { %v1419_v60 = vpack.c.bf16 %v416_v57, %v415_v56  ;;  %v699_v5 = vld [vmem:[%s2048_s7 + $0x20] sm:$0xff]  ;;  %v702_v6 = vld [vmem:[%s2048_s7 + $0x38] sm:$0xff]  ;;  %v701_v9 = vld [vmem:[%s2048_s7 + $0x30] sm:$0xff] }
  0x58   : > { %1400 = vmatpush3.bf16.msra.mxu1 %v1399_v25  ;;  %1456 = vmatpush3.bf16.msra.mxu0 %v1399_v25  ;;  %v738_v8 = vld [vmem:[%s2049_s8 + $0x58] sm:$0xff]  ;;  %v704_v10 = vld [vmem:[%s2048_s7 + $0x48] sm:$0xff]  ;;  %v703_v15 = vld [vmem:[%s2048_s7 + $0x40] sm:$0xff] }
  0x59   : > { %1402 = vmatprep.subr.bf16.mxu1 %v1401_v26  ;;  %1458 = vmatprep.subr.bf16.mxu0 %v1401_v26  ;;  %v526_v11 = vld [vmem:[#allocation4] sm:$0xff]  ;;  %v527_v12 = vld [vmem:[#allocation4 + $0x8] sm:$0xff]  ;;  %v706_v16 = vld [vmem:[%s2048_s7 + $0x58] sm:$0xff] }
  0x5a   : > { %780 = vperm.xlu0 %1512, %v734_v1   ;;  %v1422_v13 = vpack.c.bf16 %v527_v12, %v526_v11  ;;  %v740_v14 = vld [vmem:[%s2049_s8 + $0x68] sm:$0xff]  ;;  %v528_v18 = vld [vmem:[#allocation4 + $0x10] sm:$0xff]  ;;  %v529_v19 = vld [vmem:[#allocation4 + $0x18] sm:$0xff] }
  0x5b   : > { %v1425_v20 = vpack.c.bf16 %v529_v19, %v528_v18  ;;  %v742_v21 = vld [vmem:[%s2049_s8 + $0x78] sm:$0xff]  ;;  %v705_v22 = vld [vmem:[%s2048_s7 + $0x50] sm:$0xff]  ;;  %v708_v23 = vld [vmem:[%s2048_s7 + $0x68] sm:$0xff] }
  0x5c   : > { %1404 = vmatpush3.bf16.msra.mxu1 %v1403_v34  ;;  %1460 = vmatpush3.bf16.msra.mxu0 %v1403_v34  ;;  %v707_v24 = vld [vmem:[%s2048_s7 + $0x60] sm:$0xff]  ;;  %v710_v25 = vld [vmem:[%s2048_s7 + $0x78] sm:$0xff]  ;;  %v709_v26 = vld [vmem:[%s2048_s7 + $0x70] sm:$0xff] }
  0x5d   : > { %1406 = vmatprep.subr.bf16.mxu1 %v1405_v35  ;;  %1462 = vmatprep.subr.bf16.mxu0 %v1405_v35  ;;  %v712_v27 = vld [vmem:[%s2048_s7 + $0x88] sm:$0xff]  ;;  %v711_v28 = vld [vmem:[%s2048_s7 + $0x80] sm:$0xff]  ;;  %v714_v29 = vld [vmem:[%s2048_s7 + $0x98] sm:$0xff] }
  0x5e   : > { %790 = vperm.xlu0 %1512, %v736_v4   ;;  %v713_v30 = vld [vmem:[%s2048_s7 + $0x90] sm:$0xff]  ;;  %v716_v31 = vld [vmem:[%s2048_s7 + $0xa8] sm:$0xff]  ;;  %v715_v32 = vld [vmem:[%s2048_s7 + $0xa0] sm:$0xff] }
  0x5f   : > { %v717_v34 = vld [vmem:[%s2048_s7 + $0xb0] sm:$0xff]  ;;  %v720_v35 = vld [vmem:[%s2048_s7 + $0xc8] sm:$0xff]  ;;  %v719_v36 = vld [vmem:[%s2048_s7 + $0xc0] sm:$0xff] }
  0x60   : > { %1408 = vmatpush3.bf16.msra.mxu1 %v1407_v40  ;;  %1464 = vmatpush3.bf16.msra.mxu0 %v1407_v40  ;;  %v722_v37 = vld [vmem:[%s2048_s7 + $0xd8] sm:$0xff]  ;;  %v721_v38 = vld [vmem:[%s2048_s7 + $0xd0] sm:$0xff]  ;;  %v724_v39 = vld [vmem:[%s2048_s7 + $0xe8] sm:$0xff] }
  0x61   : > { %1410 = vmatprep.subr.bf16.mxu1 %v1409_v41  ;;  %1466 = vmatprep.subr.bf16.mxu0 %v1409_v41  ;;  %v723_v40 = vld [vmem:[%s2048_s7 + $0xe0] sm:$0xff]  ;;  %v726_v41 = vld [vmem:[%s2048_s7 + $0xf8] sm:$0xff]  ;;  %v725_v42 = vld [vmem:[%s2048_s7 + $0xf0] sm:$0xff] }
  0x62   : > { %800 = vperm.xlu0 %1512, %v738_v8   ;;  %v530_v43 = vld [vmem:[#allocation4 + $0x20] sm:$0xff]  ;;  %v531_v44 = vld [vmem:[#allocation4 + $0x28] sm:$0xff]  ;;  %v533_v47 = vld [vmem:[#allocation4 + $0x38] sm:$0xff] }
  0x63   : > { %v1428_v45 = vpack.c.bf16 %v531_v44, %v530_v43  ;;  %v610_v59 = vld [vmem:[%s2047_s5] sm:$0xff]  ;;  %v612_v4 = vld [vmem:[%s2047_s5 + $0x10] sm:$0xff] }
  0x64   : > { %1412 = vmatpush3.bf16.msra.mxu1 %v1411_v46  ;;  %1468 = vmatpush3.bf16.msra.mxu0 %v1411_v46  ;;  %v532_v46 = vld [vmem:[#allocation4 + $0x30] sm:$0xff]  ;;  %v614_v12 = vld [vmem:[%s2047_s5 + $0x20] sm:$0xff] }
  0x65   : > { %1414 = vmatprep.subr.bf16.mxu1 %v1413_v48  ;;  %1470 = vmatprep.subr.bf16.mxu0 %v1413_v48  ;;  %v1431_v48 = vpack.c.bf16 %v533_v47, %v532_v46 }
  0x66   : > { %810 = vperm.xlu0 %1512, %v740_v14  }
  0x68   : > { %1416 = vmatpush3.bf16.msra.mxu1 %v1415_v54  ;;  %1472 = vmatpush3.bf16.msra.mxu0 %v1415_v54 }
  0x69   : > { %1418 = vmatprep.subr.bf16.mxu1 %v1417_v55  ;;  %1474 = vmatprep.subr.bf16.mxu0 %v1417_v55 }
  0x6a   : > { %820 = vperm.xlu0 %1512, %v742_v21  }
  0x6c   : > { %1420 = vmatpush3.bf16.msra.mxu1 %v1419_v60  ;;  %1476 = vmatpush3.bf16.msra.mxu0 %v1419_v60  ;;  %v611_v60 = vld [vmem:[%s2047_s5 + $0x8] sm:$0xff] }
  0x6d   : > { %1421 = vmatprep.subr.bf16.mxu1 %v1593_v7 }
  0x6f   : > { %520 = vmatmul.mubr.f32.vlgmr.msra.gmra.mrb[0].mxu1 %v448_v61  ;;  %888 = vmatmul.mubr.f32.vlgmr.msra.gmra.mrb[0].mxu0 %v695_v63 }
  0x70   : > { %892 = vmatprep.mubr.f32.mxu0 %v698_v0  ;;  %1423 = vmatpush3.bf16.msra.mxu1 %v1422_v13  ;;  %v1434_v0 = vpack.c.bf16 %v611_v60, %v610_v59  ;;  %v615_v13 = vld [vmem:[%s2047_s5 + $0x28] sm:$0xff] }
  0x71   : > { %1424 = vmatprep.subr.bf16.mxu1 %v1593_v7  ;;  %1367 = vmatprep.mubr.msk.f32.mxu1 %vm1594_vm0, %v1595_v49 }
  0x73   : > { %893 = vmatmul.mubr.f32.gmra.mrb[2].mxu0 %v697_v2 }
  0x74   : > { %897 = vmatprep.mubr.f32.mxu0 %v700_v3  ;;  %1426 = vmatpush3.bf16.msra.mxu1 %v1425_v20 }
  0x75   : > { %1427 = vmatprep.subr.bf16.mxu1 %v1593_v7 }
  0x77   : > { %898 = vmatmul.mubr.f32.gmra.mrb[4].mxu0 %v699_v5  ;;  %v613_v5 = vld [vmem:[%s2047_s5 + $0x18] sm:$0xff] }
  0x78   : > { %902 = vmatprep.mubr.f32.mxu0 %v702_v6  ;;  %1429 = vmatpush3.bf16.msra.mxu1 %v1428_v45 }
  0x79   : > { %1430 = vmatprep.subr.bf16.mxu1 %v1593_v7 }
  0x7b   : > { %903 = vmatmul.mubr.f32.gmra.mrb[6].mxu0 %v701_v9 }
  0x7c   : > { %907 = vmatprep.mubr.f32.mxu0 %v704_v10  ;;  %1432 = vmatpush3.bf16.msra.mxu1 %v1431_v48  ;;  %v1437_v10 = vpack.c.bf16 %v613_v5, %v612_v4 }
  0x7d   : > { %1433 = vmatprep.subr.bf16.mxu1 %v1593_v7 }
  0x7f   : > { %908 = vmatmul.mubr.f32.gmra.mrb[8].mxu0 %v703_v15 }
  0x80   : > { %912 = vmatprep.mubr.f32.mxu0 %v706_v16  ;;  %v1440_v16 = vpack.c.bf16 %v615_v13, %v614_v12 }
  0x83   : > { %913 = vmatmul.mubr.f32.gmra.mrb[10].mxu0 %v705_v22 }
  0x84   : > { %917 = vmatprep.mubr.f32.mxu0 %v708_v23 }
  0x87   : > { %918 = vmatmul.mubr.f32.gmra.mrb[12].mxu0 %v707_v24 }
  0x88   : > { %922 = vmatprep.mubr.f32.mxu0 %v710_v25 }
  0x8b   : > { %923 = vmatmul.mubr.f32.gmra.mrb[14].mxu0 %v709_v26 }
  0x8c   : > { %927 = vmatprep.mubr.f32.mxu0 %v712_v27 }
  0x8f   : > { %928 = vmatmul.mubr.f32.gmra.mrb[16].mxu0 %v711_v28 }
  0x90   : > { %932 = vmatprep.mubr.f32.mxu0 %v714_v29 }
  0x93   : > { %933 = vmatmul.mubr.f32.gmra.mrb[18].mxu0 %v713_v30 }
  0x94   : > { %937 = vmatprep.mubr.f32.mxu0 %v716_v31 }
  0x97   : > { %938 = vmatmul.mubr.f32.gmra.mrb[20].mxu0 %v715_v32 }
  0x98   : > { %942 = vmatprep.mubr.f32.mxu0 %v718_v33 }
  0x9b   : > { %943 = vmatmul.mubr.f32.gmra.mrb[22].mxu0 %v717_v34 }
  0x9c   : > { %947 = vmatprep.mubr.f32.mxu0 %v720_v35 }
  0x9f   : > { %948 = vmatmul.mubr.f32.gmra.mrb[24].mxu0 %v719_v36 }
  0xa0   : > { %952 = vmatprep.mubr.f32.mxu0 %v722_v37 }
  0xa3   : > { %953 = vmatmul.mubr.f32.gmra.mrb[26].mxu0 %v721_v38 }
  0xa4   : > { %957 = vmatprep.mubr.f32.mxu0 %v724_v39 }
  0xa7   : > { %958 = vmatmul.mubr.f32.gmra.mrb[28].mxu0 %v723_v40 }
  0xa8   : > { %962 = vmatprep.mubr.f32.mxu0 %v726_v41 }
  0xab   : > { %963 = vmatmul.mubr.f32.gmra.mrb[30].mxu0 %v725_v42 }
  0xc8   : > { %v438_v50 = vpop.permute.xlu0 %437 }
  0xc9   : > { %v443_v51 = vrot.slane %v438_v50, %v442_v58 }
  0xcc   : > { %v746_v61 = vpop.permute.xlu0 %745 }
  0xd1   : > { %v761_v19 = vpop.permute.xlu0 %760 }
  0xd5   : > { %v771_v29 = vpop.permute.xlu0 %770 }
  0xd9   : > { %v781_v38 = vpop.permute.xlu0 %780 }
  0xdd   : > { %v791_v48 = vpop.permute.xlu0 %790 }
  0xe1   : > { %v801_v59 = vpop.permute.xlu0 %800 }
  0xe5   : > { %v811_v4 = vpop.permute.xlu0 %810 }
 0x142   : > { %v1250_v52 = vpop.f32.mrb[0].mxu1  ;;  %v1303_v53 = vpop.f32.mrb[0].mxu0 }
 0x143   : > { %v1251_v54 = vpop.f32.mrb[1].mxu1  ;;  %v1304_v55 = vpop.f32.mrb[1].mxu0 }
 0x144   : > { %v1252_v56 = vadd.f32 %v1251_v54, %v1250_v52  ;;  %v1305_v57 = vadd.f32 %v1304_v55, %v1303_v53 }
 0x146   : > { %v522_v62 = vadd.f32 %v1252_v56, %v443_v51  ;;  %v890_v63 = vadd.f32 %v1305_v57, %v746_v61  ;;  %v1306_v17 = vpop.f32.mrb[2].mxu0 }
 0x147   : > { %v1307_v58 = vpop.f32.mrb[3].mxu0 }
 0x148   : > { %v525_v1 = vmax.f32 %v522_v62, 0.0  ;;  %v968_v2 = vmax.f32 %v890_v63, 0.0  ;;  %v1926_v3 = vadd.f32 %v1307_v58, %v1306_v17 }
 0x14a   : > { %v1202_v6 = vpack.c.bf16 %v968_v2, %v968_v2  ;;  %1368 = vmatmul.mubr.msk.f32.vlgmr.msra.gmra.mrb[2].mxu1 %vm535_vm1, %v525_v1  ;;  %v1309_v8 = vpop.f32.mrb[4].mxu0 }
 0x14b   : > { %v1310_v9 = vpop.f32.mrb[5].mxu0  ;;  %1435 = vmatpush3.bf16.msra.mxu1 %v1434_v0  ;;  %1386 = vmatprep.mubr.msk.f32.mxu1 %vm1594_vm0, %v1595_v49 }
 0x14c   : > { %1049 = vst.msk [vmem:[%s1937_s26] sm:$0xf] %vm1048_vm2, %v1202_v6  ;;  %v1943_v11 = vadd.f32 %v1310_v9, %v1309_v8  ;;  %1436 = vmatprep.subr.bf16.mxu1 %v1593_v7 }
 0x14e   : > { %v1312_v14 = vpop.f32.mrb[6].mxu0 }
 0x14f   : > { %v1313_v15 = vpop.f32.mrb[7].mxu0  ;;  %1438 = vmatpush3.bf16.msra.mxu1 %v1437_v10 }
 0x150   : > { %v1314_v18 = vadd.f32 %v1313_v15, %v1312_v14  ;;  %1439 = vmatprep.subr.bf16.mxu1 %v1593_v7 }
 0x152   : > { %v905_v20 = vadd.f32 %v1314_v18, %v761_v19  ;;  %v1315_v21 = vpop.f32.mrb[8].mxu0 }
 0x153   : > { %v1316_v22 = vpop.f32.mrb[9].mxu0  ;;  %1441 = vmatpush3.bf16.msra.mxu1 %v1440_v16  ;;  %v821_v16 = vpop.permute.xlu0 %820 }
 0x154   : > { %v971_v23 = vmax.f32 %v905_v20, 0.0  ;;  %v1953_v24 = vadd.f32 %v1316_v22, %v1315_v21  ;;  %1442 = vmatprep.subr.bf16.mxu1 %v1593_v7  ;;  %v616_v21 = vld [vmem:[%s2047_s5 + $0x30] sm:$0xff]  ;;  %v617_v22 = vld [vmem:[%s2047_s5 + $0x38] sm:$0xff] }
 0x156   : > { %v1205_v25 = vpack.c.bf16 %v971_v23, %v971_v23  ;;  %v1318_v26 = vpop.f32.mrb[10].mxu0  ;;  %v1443_v23 = vpack.c.bf16 %v617_v22, %v616_v21 }
 0x157   : > { %v1319_v27 = vpop.f32.mrb[11].mxu0 }
 0x158   : > { %1052 = vst.msk [vmem:[%s1937_s26 + $0xc] sm:$0xf] %vm1048_vm2, %v1205_v25  ;;  %v1320_v28 = vadd.f32 %v1319_v27, %v1318_v26  ;;  %1444 = vmatpush3.bf16.msra.mxu1 %v1443_v23  ;;  %v728_v25 = vld [vmem:[%s2049_s8 + $0x8] sm:$0xff]  ;;  %v729_v26 = vld [vmem:[%s2049_s8 + $0x10] sm:$0xff]  ;;  %v731_v27 = vld [vmem:[%s2049_s8 + $0x20] sm:$0xff] }
 0x159   : > { %750 = vperm.xlu1 %1513, %v728_v25  }
 0x15a   : > { %v915_v30 = vadd.f32 %v1320_v28, %v771_v29  ;;  %v1321_v31 = vpop.f32.mrb[12].mxu0  ;;  %v733_v28 = vld [vmem:[%s2049_s8 + $0x30] sm:$0xff]  ;;  %v735_v29 = vld [vmem:[%s2049_s8 + $0x40] sm:$0xff] }
 0x15b   : > { %v1322_v32 = vpop.f32.mrb[13].mxu0 }
 0x15c   : > { %v973_v33 = vmax.f32 %v915_v30, 0.0  ;;  %v1958_v34 = vadd.f32 %v1322_v32, %v1321_v31  ;;  %v737_v30 = vld [vmem:[%s2049_s8 + $0x50] sm:$0xff]  ;;  %v739_v31 = vld [vmem:[%s2049_s8 + $0x60] sm:$0xff] }
 0x15d   : > { %755 = vperm.xlu1 %1513, %v729_v26   ;;  %v741_v32 = vld [vmem:[%s2049_s8 + $0x70] sm:$0xff] }
 0x15e   : > { %v1207_v35 = vpack.c.bf16 %v973_v33, %v973_v33  ;;  %v1324_v36 = vpop.f32.mrb[14].mxu0  ;;  %v534_v33 = vld [vmem:[#allocation6] sm:$0x1] }
 0x15f   : > { %v1325_v37 = vpop.f32.mrb[15].mxu0 }
 0x160   : > { %1054 = vst.msk [vmem:[%s1937_s26 + $0x14] sm:$0xf] %vm1048_vm2, %v1207_v35  ;;  %v1326_v7 = vadd.f32 %v1325_v37, %v1324_v36 }
 0x161   : > { %765 = vperm.xlu1 %1513, %v731_v27  }
 0x162   : > { %v925_v39 = vadd.f32 %v1326_v7, %v781_v38  ;;  %v1327_v40 = vpop.f32.mrb[16].mxu0 }
 0x163   : > { %v1328_v41 = vpop.f32.mrb[17].mxu0 }
 0x164   : > { %v975_v42 = vmax.f32 %v925_v39, 0.0  ;;  %v1962_v43 = vadd.f32 %v1328_v41, %v1327_v40 }
 0x165   : > { %775 = vperm.xlu1 %1513, %v733_v28  }
 0x166   : > { %v1209_v44 = vpack.c.bf16 %v975_v42, %v975_v42  ;;  %v1330_v45 = vpop.f32.mrb[18].mxu0 }
 0x167   : > { %v1331_v46 = vpop.f32.mrb[19].mxu0 }
 0x168   : > { %1056 = vst.msk [vmem:[%s1937_s26 + $0x1c] sm:$0xf] %vm1048_vm2, %v1209_v44  ;;  %v1332_v47 = vadd.f32 %v1331_v46, %v1330_v45 }
 0x169   : > { %785 = vperm.xlu1 %1513, %v735_v29  }
 0x16a   : > { %v935_v49 = vadd.f32 %v1332_v47, %v791_v48  ;;  %v1333_v50 = vpop.f32.mrb[20].mxu0 }
 0x16b   : > { %v1334_v51 = vpop.f32.mrb[21].mxu0 }
 0x16c   : > { %v977_v52 = vmax.f32 %v935_v49, 0.0  ;;  %v1966_v53 = vadd.f32 %v1334_v51, %v1333_v50 }
 0x16d   : > { %795 = vperm.xlu1 %1513, %v737_v30  }
 0x16e   : > { %v1211_v54 = vpack.c.bf16 %v977_v52, %v977_v52  ;;  %v1336_v55 = vpop.f32.mrb[22].mxu0 }
 0x16f   : > { %v1337_v56 = vpop.f32.mrb[23].mxu0 }
 0x170   : > { %1058 = vst.msk [vmem:[%s1937_s26 + $0x24] sm:$0xf] %vm1048_vm2, %v1211_v54  ;;  %v1338_v57 = vadd.f32 %v1337_v56, %v1336_v55 }
 0x171   : > { %805 = vperm.xlu1 %1513, %v739_v31  }
 0x172   : > { %v945_v60 = vadd.f32 %v1338_v57, %v801_v59  ;;  %v1339_v61 = vpop.f32.mrb[24].mxu0 }
 0x173   : > { %v1340_v62 = vpop.f32.mrb[25].mxu0 }
 0x174   : > { %v979_v63 = vmax.f32 %v945_v60, 0.0  ;;  %v1970_v17 = vadd.f32 %v1340_v62, %v1339_v61 }
 0x175   : > { %815 = vperm.xlu1 %1513, %v741_v32  }
 0x176   : > { %v1213_v58 = vpack.c.bf16 %v979_v63, %v979_v63  ;;  %v1342_v0 = vpop.f32.mrb[26].mxu0 }
 0x177   : > { %v1343_v1 = vpop.f32.mrb[27].mxu0 }
 0x178   : > { %1060 = vst.msk [vmem:[%s1937_s26 + $0x2c] sm:$0xf] %vm1048_vm2, %v1213_v58  ;;  %v1344_v2 = vadd.f32 %v1343_v1, %v1342_v0 }
 0x17a   : > { %v955_v5 = vadd.f32 %v1344_v2, %v811_v4  ;;  %v1345_v6 = vpop.f32.mrb[28].mxu0 }
 0x17b   : > { %v1346_v8 = vpop.f32.mrb[29].mxu0 }
 0x17c   : > { %v981_v9 = vmax.f32 %v955_v5, 0.0  ;;  %v1974_v10 = vadd.f32 %v1346_v8, %v1345_v6 }
 0x17e   : > { %v1215_v12 = vpack.c.bf16 %v981_v9, %v981_v9  ;;  %v1348_v13 = vpop.f32.mrb[30].mxu0 }
 0x17f   : > { %v1349_v14 = vpop.f32.mrb[31].mxu0 }
 0x180   : > { %1062 = vst.msk [vmem:[%s1937_s26 + $0x34] sm:$0xf] %vm1048_vm2, %v1215_v12  ;;  %v1350_v15 = vadd.f32 %v1349_v14, %v1348_v13 }
 0x182   : > { %v965_v18 = vadd.f32 %v1350_v15, %v821_v16 }
 0x184   : > { %v983_v19 = vmax.f32 %v965_v18, 0.0 }
 0x186   : > { %v1217_v20 = vpack.c.bf16 %v983_v19, %v983_v19 }
 0x188   : > { %1064 = vst.msk [vmem:[%s1937_s26 + $0x3c] sm:$0xf] %vm1048_vm2, %v1217_v20 }
 0x1d8   : > { %v751_v38 = vpop.permute.xlu1 %750 }
 0x1d9   : > { %v895_v39 = vadd.f32 %v1926_v3, %v751_v38 }
 0x1db   : > { %v969_v40 = vmax.f32 %v895_v39, 0.0 }
 0x1dc   : > { %v756_v41 = vpop.permute.xlu1 %755 }
 0x1dd   : > { %v1203_v42 = vpack.c.bf16 %v969_v40, %v969_v40  ;;  %v900_v44 = vadd.f32 %v1943_v11, %v756_v41 }
 0x1df   : > { %1050 = vst.msk [vmem:[%s1937_s26 + $0x4] sm:$0xf] %vm1048_vm2, %v1203_v42  ;;  %v970_v45 = vmax.f32 %v900_v44, 0.0 }
 0x1e0   : > { %v766_v46 = vpop.permute.xlu1 %765 }
 0x1e1   : > { %v1204_v47 = vpack.c.bf16 %v970_v45, %v970_v45  ;;  %v910_v48 = vadd.f32 %v1953_v24, %v766_v46 }
 0x1e3   : > { %1051 = vst.msk [vmem:[%s1937_s26 + $0x8] sm:$0xf] %vm1048_vm2, %v1204_v47  ;;  %v972_v49 = vmax.f32 %v910_v48, 0.0 }
 0x1e4   : > { %v776_v50 = vpop.permute.xlu1 %775 }
 0x1e5   : > { %v1206_v51 = vpack.c.bf16 %v972_v49, %v972_v49  ;;  %v920_v3 = vadd.f32 %v1958_v34, %v776_v50 }
 0x1e7   : > { %1053 = vst.msk [vmem:[%s1937_s26 + $0x10] sm:$0xf] %vm1048_vm2, %v1206_v51  ;;  %v974_v11 = vmax.f32 %v920_v3, 0.0 }
 0x1e8   : > { %v786_v52 = vpop.permute.xlu1 %785 }
 0x1e9   : > { %v1208_v54 = vpack.c.bf16 %v974_v11, %v974_v11  ;;  %v930_v55 = vadd.f32 %v1962_v43, %v786_v52 }
 0x1eb   : > { %1055 = vst.msk [vmem:[%s1937_s26 + $0x18] sm:$0xf] %vm1048_vm2, %v1208_v54  ;;  %v976_v24 = vmax.f32 %v930_v55, 0.0 }
 0x1ec   : > { %v796_v56 = vpop.permute.xlu1 %795 }
 0x1ed   : > { %v1210_v57 = vpack.c.bf16 %v976_v24, %v976_v24  ;;  %v940_v59 = vadd.f32 %v1966_v53, %v796_v56  ;;  %v618_v53 = vld [vmem:[#allocation3] sm:$0x1] }
 0x1ef   : > { %1057 = vst.msk [vmem:[%s1937_s26 + $0x20] sm:$0xf] %vm1048_vm2, %v1210_v57  ;;  %v978_v34 = vmax.f32 %v940_v59, 0.0 }
 0x1f0   : > { %v806_v60 = vpop.permute.xlu1 %805 }
 0x1f1   : > { %v1212_v61 = vpack.c.bf16 %v978_v34, %v978_v34  ;;  %v950_v62 = vadd.f32 %v1970_v17, %v806_v60 }
 0x1f3   : > { %1059 = vst.msk [vmem:[%s1937_s26 + $0x28] sm:$0xf] %vm1048_vm2, %v1212_v61  ;;  %v980_v43 = vmax.f32 %v950_v62, 0.0 }
 0x1f4   : > { %v816_v63 = vpop.permute.xlu1 %815 }
 0x1f5   : > { %v1214_v58 = vpack.c.bf16 %v980_v43, %v980_v43  ;;  %v960_v0 = vadd.f32 %v1974_v10, %v816_v63 }
 0x1f7   : > { %1061 = vst.msk [vmem:[%s1937_s26 + $0x30] sm:$0xf] %vm1048_vm2, %v1214_v58  ;;  %v982_v1 = vmax.f32 %v960_v0, 0.0 }
 0x1f9   : > { %v1216_v2 = vpack.c.bf16 %v982_v1, %v982_v1 }
 0x1fb   : > { %1063 = vst.msk [vmem:[%s1937_s26 + $0x38] sm:$0xf] %vm1048_vm2, %v1216_v2 }
 0x21d   : > { %v605_v35 = vpop.f32.mrb[2].mxu1 }
 0x21e   : > { %v606_v36 = vadd.f32 %v605_v35, %v534_v33  ;;  %v1369_v37 = vpop.f32.mrb[3].mxu1 }
 0x220   : > { %v609_v7 = vmax.f32 %v606_v36, 0.0 }
 0x222   : > { %1387 = vmatmul.mubr.msk.f32.vlgmr.msra.gmra.mrb[4].mxu1 %vm535_vm1, %v609_v7 }
 0x2f5   : > { %v688_v4 = vpop.f32.mrb[4].mxu1 }
 0x2f6   : > { %v689_v5 = vadd.f32 %v688_v4, %v618_v53  ;;  %v1388_v6 = vpop.f32.mrb[5].mxu1 }
 0x2f8   : > { %1514 = vtanh.f32 %v689_v5 }
 0x302   : > { %v1515_v17 = vpop.eup %1514 }
 0x303   : > { %694 = vst.msk [vmem:[%s395_s11] sm:$0x1] %vm693_vm3, %v1515_v17 }
 0x304 PF: > { %s27_s17 = sadd.s32 1, %s1586_s17  }
 0x305   : > { %p24_p5 = scmp.ge.s32.totalorder %s27_s17, 4  }
 0x307   :  { %26 = sbr.rel (!%p24_p5) target bundleno = 5 (0x5), region = 107 }
 0x30e   :  { %1098 = vsyncpa [#allocation5], 1 }
 0x30f   :  { %1100 = vsyncpa [#allocation5 + $0x1], 1 }
 0x310   :  { %1101 = vsyncpa [#allocation7], 1 }

// kernel: out_block_forward.3
= control target key start
LH: loop header
LB: loop body
LE: loop exit
PB: predicated region body
PF: predicated region fallthrough
CT: control target
= control target key end

     0   :  { %8 = vsyncpa [#allocation4], 0  ;;  %s28525_s0 = inlined_call_operand.vmem [shape: bf16[2,8192], index: 0, kind: input, shape index: {}]   ;;  %s28526_s1 = inlined_call_operand.hbm [shape: bf16[8192,4672], index: 1, kind: input, shape index: {}]   ;;  %s28527_s2 = inlined_call_operand.vmem [shape: f32[1,4672], index: 2, kind: input, shape index: {}]   ;;  %s28528_s3 = inlined_call_operand.hbm [shape: f32[2,4672], index: 3, kind: output, shape index: {}]  }
   0x1   :  { %10 = vsyncpa [#allocation4 + $0x1], 0 }
   0x2   :  { %11 = vsyncpa [#allocation5], 0  ;;  %s25419_s12 = smov 0   ;;  %s25421_s13 = smov 0  }
   0x3   :  { %s25423_s14 = smov 0   ;;  %s25425_s15 = smov 0  }
   0x4 LB: > { %s25438_s16 = sadd.s32 4294967295, %s25389_s15   ;;  %s25441_s17 = sadd.s32 1, %s25389_s15   ;;  %s25389_s15 = sphi %s25425_s15, %s28535_s15   ;;  %s25385_s14 = sphi %s25423_s14, %s28534_s14   ;;  %s25381_s13 = sphi %s25421_s13, %s28533_s13   ;;  %s25377_s12 = sphi %s25419_s12, %s28532_s12  }
   0x5   : > { %s47_s18 = ssub.s32 %s25389_s15, %s25441_s17  ;;  %s50_s19 = sadd.s32 1, %s25385_s14 }
   0x6   : > { %p48_p0 = scmp.eq.s32.totalorder %s47_s18, 0  ;;  %p57_p1 = scmp.ne.s32.totalorder %s25385_s14, %s25381_s13 }
   0x7   : > { %p58_p2 = scmp.eq.s32.totalorder %s25389_s15, 0  ;;  %p63_p3 = scmp.ne.s32.totalorder %s25381_s13, %s25377_s12 }
   0x8   : > { %s25451_s20 = scalar_select %p48_p0, %s25385_s14, %s50_s19  }
   0x9   : > { %p59_p4 = por %p58_p2, %p57_p1  ;;  %p64_p5 = scmp.eq.s32.totalorder %s25438_s16, 0 }
   0xa   : > { %p21710_p6 = scmp.lt.s32.totalorder %s25389_s15, 8  ;;  %s140_s22 = sand.u32 1, %s25385_s14  }
   0xb   : > { %p25455_p7 = por %p64_p5, %p63_p3  ;;  %s21697_s23 = smul.u32 18944, %s140_s22 }
   0xc   : > { %s21698_s24 = smul.u32 303104, %s25389_s15  ;;  %p25461_p8 = pnand %p21710_p6, %p59_p4 }
   0xd   : > { %s144_s29 = scalar_lea.vmem [#allocation3], %s21697_s23  ;;  %s25473_s4 = scalar_lea.sflag [#allocation4], %s140_s22 }
   0xe   : > { %s25468_s28 = scalar_lea.hbm %s28526_s1, %s21698_s24  ;;  %s152_s30 = sshll.u32 %s144_s29, 4  ;;  %s25470_s30 = int_to_ptr.vmem [resolvable:$true] %s152_s30 }
   0xf   : > { %s25295_s5 = scalar_lea.hbm %s25468_s28, 303104  ;;  %p25297_p11 = pneg %p25461_p8 }
  0x10   : > { %p25296_p10 = scmp.ne.s32.totalorder %s25468_s28, %s25295_s5  ;;  %s25300_s8 = scalar_lea.hbm %s28526_s1, 2424832 }
  0x11   : > { %p25301_p0 = scmp.lt.u32.totalorder %s25468_s28, %s28526_s1  ;;  %p25302_p1 = scmp.lt.u32.totalorder %s25300_s8, %s25295_s5 }
  0x12   : > { %p25298_p12 = pnand %p25297_p11, %p25296_p10  ;;  %p25304_p3 = scmp.lt.u32.totalorder %s25295_s5, %s25468_s28 }
  0x13   : > { %p25303_p2 = por %p25302_p1, %p25301_p0 }
  0x14   : > { %p25299_p13 = pneg %p25298_p12 }
  0x15   : > { %p25305_p4 = por %p25304_p3, %p25303_p2 }
  0x17   : > { %p25306_p5 = pnand %p25305_p4, %p25299_p13 }
  0x19   : > { %25309 = shalt.err (!%p25306_p5)
}
  0x1a   : > { %s25310_s11 = scalar_lea.vmem %s25470_s30, 303104  ;;  %s25391_s12 = smov [#allocation3]  }
  0x1b   : > { %p25311_p6 = scmp.ne.s32.totalorder %s25470_s30, %s25310_s11  ;;  %s25315_s18 = sshll.u32 %s25391_s12, 4  ;;  %s25316_s18 = int_to_ptr.vmem [resolvable:$false] %s25315_s18 }
  0x1c   : > { %s25317_s19 = scalar_lea.vmem %s25316_s18, 606208  ;;  %p25318_p9 = scmp.lt.s32.totalorder %s25470_s30, %s25316_s18 }
  0x1d   : > { %p25313_p10 = pnand %p25311_p6, %p25297_p11  ;;  %p25319_p0 = scmp.lt.s32.totalorder %s25317_s19, %s25310_s11 }
  0x1f   : > { %p25314_p12 = pneg %p25313_p10  ;;  %p25320_p1 = por %p25319_p0, %p25318_p9 }
  0x21   : > { %p25321_p2 = pnand %p25320_p1, %p25314_p12 }
  0x23   : > { %25324 = shalt.err (!%p25321_p2)
}
  0x24   : > { %s25392_s22 = smov 2368   ;;  %s25393_s23 = smov 148  }
  0x25   : > { %21709 = dma.hbm_to_vmem [thread:$0]  (!%p25461_p8), %s25468_s28, 303104, %s25470_s30, %s25473_s4, %s25392_s22, %s25392_s22, %s25393_s23  }
  0x26   : > { %p160_p11 = scmp.lt.s32.totalorder %s25389_s15, 9  ;;  %p28531_p13 = scmp.ge.s32.totalorder %s25389_s15, 1 }
  0x28   : > { %p161_p3 = pnand %p28531_p13, %p160_p11 }
  0x29   : > { %s166_s24 = sand.u32 (!%p161_p3), 1, %s25381_s13  }
  0x2a   : > { %164 = sbr.rel (%p161_p3) target bundleno = 3114 (0xc2a), region = 32  ;;  %s167_s27 = scalar_lea.sflag (!%p161_p3), [#allocation4], %s166_s24 }
  0x2b   : > { %s21699_s26 = smul.u32 (!%p161_p3), 18944, %s166_s24 }
  0x2d   : > { %s25505_s29 = scalar_lea.vmem (!%p161_p3), [#allocation3], %s21699_s26 }
  0x31   : > { %25368 = dma.done.wait (%p25455_p7), %s167_s27, 303104  }
  0x32   : > { %25370 = vsyncadd (%p25455_p7), %s167_s27, 4294664192  ;;  %s19018_s5 = sshll.u32 %s25438_s16, 3  ;;  %p19019_p8 = scmp.ne.s32.totalorder %s25438_s16, 0 }
  0x33   : > { %p193_p9 = scmp.lt.s32.totalorder %s19018_s5, 63  ;;  %vm212_vm0 = vcmask (!%p19019_p8), 517120   ;;  %v25394_v0 = vmov (!%p19019_p8), 0.0  }
  0x34   : > { %202 = sbr.rel (%p19019_p8) target bundleno = 59 (0x3b), region = 40  ;;  %203 = vst [vmem:[#allocation2] sm:$0xff] (!%p19019_p8), %v25394_v0  ;;  %204 = vst [vmem:[#allocation2 + $0x8] sm:$0xff] (!%p19019_p8), %v25394_v0 }
  0x35   : > { %s28537_s5 = smov (!%p193_p9, %s19018_s5), 63  ;;  %205 = vst [vmem:[#allocation2 + $0x10] sm:$0xff] (!%p19019_p8), %v25394_v0  ;;  %206 = vst [vmem:[#allocation2 + $0x18] sm:$0xff] (!%p19019_p8), %v25394_v0 }
  0x36   : > { %s195_s28 = scalar_lea.vmem %s28525_s0, %s28537_s5  ;;  %207 = vst [vmem:[#allocation2 + $0x20] sm:$0xff] (!%p19019_p8), %v25394_v0  ;;  %208 = vst [vmem:[#allocation2 + $0x28] sm:$0xff] (!%p19019_p8), %v25394_v0 }
  0x37   : > { %209 = vst [vmem:[#allocation2 + $0x30] sm:$0xff] (!%p19019_p8), %v25394_v0  ;;  %210 = vst [vmem:[#allocation2 + $0x38] sm:$0xff] (!%p19019_p8), %v25394_v0 }
  0x38   : > { %211 = vst [vmem:[#allocation2 + $0x40] sm:$0xff] (!%p19019_p8), %v25394_v0  ;;  %213 = vst.msk [vmem:[#allocation2 + $0x48] sm:$0x3] (!%p19019_p8), %vm212_vm0, %v25394_v0 }
  0x3b PF: > { %v21752_v1 = vld [vmem:[%s25505_s29 + $0x4] ss:$148 sps:$4 sm:$0xff]   ;;  %v21754_v2 = vld [vmem:[%s25505_s29 + $0xc] ss:$148 sps:$4 sm:$0xff]   ;;  %v21757_v4 = vld [vmem:[%s25505_s29 + $0x8] ss:$148 sps:$4 sm:$0xff]   ;;  %v2662_v39 = vlaneseq }
  0x3c   : > { %14619 = vmatprep.subr.bf16.mxu0 %v21752_v1  ;;  %v21756_v3 = vld [vmem:[%s25505_s29] ss:$148 sps:$4 sm:$0xff]   ;;  %14783 = vmatprep.subr.bf16.mxu1 %v21754_v2  ;;  %v21762_v7 = vld [vmem:[%s25505_s29 + $0x128] ss:$148 sps:$4 sm:$0xff]   ;;  %v21763_v8 = vld [vmem:[%s25505_s29 + $0x130] ss:$148 sps:$4 sm:$0xff]  }
  0x3d   : > { %v21758_v5 = vld [vmem:[%s25505_s29 + $0x12c] ss:$148 sps:$4 sm:$0xff]   ;;  %14620 = vmatpush1.bf16.msra.mxu0 %v21756_v3  ;;  %14784 = vmatpush1.bf16.msra.mxu1 %v21757_v4  ;;  %v21760_v6 = vld [vmem:[%s25505_s29 + $0x134] ss:$148 sps:$4 sm:$0xff]   ;;  %v21766_v10 = vld [vmem:[%s25505_s29 + $0x25c] ss:$148 sps:$4 sm:$0xff]  }
  0x3e   : > { %14621 = vmatprep.subr.bf16.mxu0 %v21758_v5  ;;  %14785 = vmatprep.subr.bf16.mxu1 %v21760_v6  ;;  %v21764_v9 = vld [vmem:[%s25505_s29 + $0x254] ss:$148 sps:$4 sm:$0xff]   ;;  %v21768_v11 = vld [vmem:[%s25505_s29 + $0x250] ss:$148 sps:$4 sm:$0xff]   ;;  %v21769_v12 = vld [vmem:[%s25505_s29 + $0x258] ss:$148 sps:$4 sm:$0xff]  }
  0x3f   : > { %v21770_v13 = vld [vmem:[%s25505_s29 + $0x37c] ss:$148 sps:$4 sm:$0xff]   ;;  %v21772_v14 = vld [vmem:[%s25505_s29 + $0x384] ss:$148 sps:$4 sm:$0xff]   ;;  %v21775_v16 = vld [vmem:[%s25505_s29 + $0x380] ss:$148 sps:$4 sm:$0xff]  }
  0x40   : > { %v21774_v15 = vld [vmem:[%s25505_s29 + $0x378] ss:$148 sps:$4 sm:$0xff]   ;;  %v21780_v19 = vld [vmem:[%s25505_s29 + $0x4a0] ss:$148 sps:$4 sm:$0xff]   ;;  %v21781_v20 = vld [vmem:[%s25505_s29 + $0x4a8] ss:$148 sps:$4 sm:$0xff]  }
  0x41   : > { %14622 = vmatpush1.bf16.msra.mxu0 %v21762_v7  ;;  %14786 = vmatpush1.bf16.msra.mxu1 %v21763_v8  ;;  %v21776_v17 = vld [vmem:[%s25505_s29 + $0x4a4] ss:$148 sps:$4 sm:$0xff]   ;;  %v21778_v18 = vld [vmem:[%s25505_s29 + $0x4ac] ss:$148 sps:$4 sm:$0xff]   ;;  %v21784_v22 = vld [vmem:[%s25505_s29 + $0x5d4] ss:$148 sps:$4 sm:$0xff]  }
  0x42   : > { %14623 = vmatprep.subr.bf16.mxu0 %v21764_v9  ;;  %14787 = vmatprep.subr.bf16.mxu1 %v21766_v10  ;;  %v21782_v21 = vld [vmem:[%s25505_s29 + $0x5cc] ss:$148 sps:$4 sm:$0xff]   ;;  %v21786_v23 = vld [vmem:[%s25505_s29 + $0x5c8] ss:$148 sps:$4 sm:$0xff]   ;;  %v21787_v24 = vld [vmem:[%s25505_s29 + $0x5d0] ss:$148 sps:$4 sm:$0xff]  }
  0x43   : > { %v21788_v25 = vld [vmem:[%s25505_s29 + $0x6f4] ss:$148 sps:$4 sm:$0xff]   ;;  %v21790_v26 = vld [vmem:[%s25505_s29 + $0x6fc] ss:$148 sps:$4 sm:$0xff]   ;;  %v21793_v28 = vld [vmem:[%s25505_s29 + $0x6f8] ss:$148 sps:$4 sm:$0xff]  }
  0x44   : > { %v21792_v27 = vld [vmem:[%s25505_s29 + $0x6f0] ss:$148 sps:$4 sm:$0xff]   ;;  %v21798_v31 = vld [vmem:[%s25505_s29 + $0x818] ss:$148 sps:$4 sm:$0xff]   ;;  %v21799_v32 = vld [vmem:[%s25505_s29 + $0x820] ss:$148 sps:$4 sm:$0xff]  }
  0x45   : > { %14624 = vmatpush1.bf16.msra.mxu0 %v21768_v11  ;;  %14788 = vmatpush1.bf16.msra.mxu1 %v21769_v12  ;;  %v21794_v29 = vld [vmem:[%s25505_s29 + $0x81c] ss:$148 sps:$4 sm:$0xff]   ;;  %v21796_v30 = vld [vmem:[%s25505_s29 + $0x824] ss:$148 sps:$4 sm:$0xff]   ;;  %v21802_v34 = vld [vmem:[%s25505_s29 + $0x94c] ss:$148 sps:$4 sm:$0xff]  }
  0x46   : > { %14625 = vmatprep.subr.bf16.mxu0 %v21770_v13  ;;  %14789 = vmatprep.subr.bf16.mxu1 %v21772_v14  ;;  %v21800_v33 = vld [vmem:[%s25505_s29 + $0x944] ss:$148 sps:$4 sm:$0xff]   ;;  %v21804_v35 = vld [vmem:[%s25505_s29 + $0x940] ss:$148 sps:$4 sm:$0xff]   ;;  %v21805_v36 = vld [vmem:[%s25505_s29 + $0x948] ss:$148 sps:$4 sm:$0xff]  }
  0x47   : > { %v25395_v37 = vmov 1966171168   ;;  %v21806_v40 = vld [vmem:[%s25505_s29 + $0xa6c] ss:$148 sps:$4 sm:$0xff]   ;;  %v21808_v41 = vld [vmem:[%s25505_s29 + $0xa74] ss:$148 sps:$4 sm:$0xff]  }
  0x48   : > { %v2660_v38 = vunpack.c.l.s4 %v25395_v37  ;;  %v21810_v42 = vld [vmem:[%s25505_s29 + $0xa68] ss:$148 sps:$4 sm:$0xff]   ;;  %v25558_v44 = vshrl.u32 %v2662_v39, 7  ;;  %v21811_v45 = vld [vmem:[%s25505_s29 + $0xa70] ss:$148 sps:$4 sm:$0xff]   ;;  %vm17957_vm1 = vcmask 517120  }
  0x49   : > { %14626 = vmatpush1.bf16.msra.mxu0 %v21774_v15  ;;  %14790 = vmatpush1.bf16.msra.mxu1 %v21775_v16  ;;  %v21812_v46 = vld [vmem:[%s25505_s29 + $0xb94] ss:$148 sps:$4 sm:$0xff]   ;;  %v21814_v47 = vld [vmem:[%s25505_s29 + $0xb9c] ss:$148 sps:$4 sm:$0xff]   ;;  %v21817_v49 = vld [vmem:[%s25505_s29 + $0xb98] ss:$148 sps:$4 sm:$0xff]  }
  0x4a   : > { %14627 = vmatprep.subr.bf16.mxu0 %v21776_v17  ;;  %14791 = vmatprep.subr.bf16.mxu1 %v21778_v18  ;;  %v2661_v43 = vunpack.c.0.s8 %v2660_v38  ;;  %v21816_v48 = vld [vmem:[%s25505_s29 + $0xb90] ss:$148 sps:$4 sm:$0xff]   ;;  %v224_v53 = vld [vmem:[%s195_s28] sm:$0xff]  ;;  %v21826_v58 = vld [vmem:[%s25505_s29 + $0xdec] ss:$148 sps:$4 sm:$0xff]   ;;  %p21388_p7 = scmp.ne.s32.totalorder %s25438_s16, 7 }
  0x4b   : > { %v21818_v51 = vld [vmem:[%s25505_s29 + $0xcbc] ss:$148 sps:$4 sm:$0xff]   ;;  %v21820_v52 = vld [vmem:[%s25505_s29 + $0xcc4] ss:$148 sps:$4 sm:$0xff]   ;;  %v21823_v56 = vld [vmem:[%s25505_s29 + $0xcc0] ss:$148 sps:$4 sm:$0xff]   ;;  %v2658_v10 = vcombine.high %v224_v53, %v224_v53 }
  0x4c   : > { %v25566_v50 = vsub.s32 %v2661_v43, %v25558_v44  ;;  %v21822_v54 = vld [vmem:[%s25505_s29 + $0xcb8] ss:$148 sps:$4 sm:$0xff]   ;;  %v21828_v60 = vld [vmem:[%s25505_s29 + $0xde0] ss:$148 sps:$4 sm:$0xff]   ;;  %v21829_v62 = vld [vmem:[%s25505_s29 + $0xde8] ss:$148 sps:$4 sm:$0xff]  }
  0x4d   : > { %14628 = vmatpush1.bf16.msra.mxu0 %v21780_v19  ;;  %14792 = vmatpush1.bf16.msra.mxu1 %v21781_v20  ;;  %v21824_v57 = vld [vmem:[%s25505_s29 + $0xde4] ss:$148 sps:$4 sm:$0xff]   ;;  %v21830_v63 = vld [vmem:[%s25505_s29 + $0xf0c] ss:$148 sps:$4 sm:$0xff]   ;;  %v21832_v0 = vld [vmem:[%s25505_s29 + $0xf14] ss:$148 sps:$4 sm:$0xff]  }
  0x4e   : > { %14629 = vmatprep.subr.bf16.mxu0 %v21782_v21  ;;  %14793 = vmatprep.subr.bf16.mxu1 %v21784_v22  ;;  %v2665_v55 = vrot.slane %v224_v53, %v25566_v50  ;;  %v21834_v1 = vld [vmem:[%s25505_s29 + $0xf08] ss:$148 sps:$4 sm:$0xff]   ;;  %v21835_v2 = vld [vmem:[%s25505_s29 + $0xf10] ss:$148 sps:$4 sm:$0xff]   ;;  %v21841_v6 = vld [vmem:[%s25505_s29 + $0x1038] ss:$148 sps:$4 sm:$0xff]   ;;  %v2672_v14 = vrot.slane %v2658_v10, %v25566_v50 }
  0x4f   : > { %v21836_v3 = vld [vmem:[%s25505_s29 + $0x1034] ss:$148 sps:$4 sm:$0xff]   ;;  %v21838_v4 = vld [vmem:[%s25505_s29 + $0x103c] ss:$148 sps:$4 sm:$0xff]   ;;  %v21844_v8 = vld [vmem:[%s25505_s29 + $0x1164] ss:$148 sps:$4 sm:$0xff]  }
  0x50   : > { %v2673_v59 = vcombine.high %v2665_v55, %v2665_v55  ;;  %v21840_v5 = vld [vmem:[%s25505_s29 + $0x1030] ss:$148 sps:$4 sm:$0xff]   ;;  %v21846_v9 = vld [vmem:[%s25505_s29 + $0x1158] ss:$148 sps:$4 sm:$0xff]   ;;  %v21847_v11 = vld [vmem:[%s25505_s29 + $0x1160] ss:$148 sps:$4 sm:$0xff]   ;;  %v25604_v16 = vrot.slane %v2665_v55, %v25566_v50  ;;  %v2674_v17 = vcombine.high %v2672_v14, %v2672_v14  ;;  %v25613_v22 = vrot.slane %v2672_v14, %v25566_v50 }
  0x51   : > { %14630 = vmatpush1.bf16.msra.mxu0 %v21786_v23  ;;  %14794 = vmatpush1.bf16.msra.mxu1 %v21787_v24  ;;  %v21842_v7 = vld [vmem:[%s25505_s29 + $0x115c] ss:$148 sps:$4 sm:$0xff]   ;;  %v21850_v12 = vld [vmem:[%s25505_s29 + $0x1284] ss:$148 sps:$4 sm:$0xff]   ;;  %v21853_v13 = vld [vmem:[%s25505_s29 + $0x128c] ss:$148 sps:$4 sm:$0xff]  }
  0x52   : > { %14631 = vmatprep.subr.bf16.mxu0 %v21788_v25  ;;  %14795 = vmatprep.subr.bf16.mxu1 %v21790_v26  ;;  %v25582_v61 = vrot.slane %v2673_v59, %v25566_v50  ;;  %v21848_v15 = vld [vmem:[%s25505_s29 + $0x1280] ss:$148 sps:$4 sm:$0xff]   ;;  %v21851_v18 = vld [vmem:[%s25505_s29 + $0x1288] ss:$148 sps:$4 sm:$0xff]   ;;  %v25610_v21 = vrot.slane %v2674_v17, %v25566_v50  ;;  %v21857_v25 = vld [vmem:[%s25505_s29 + $0x13b0] ss:$148 sps:$4 sm:$0xff]  }
  0x53   : > { %v21856_v19 = vld [vmem:[%s25505_s29 + $0x13ac] ss:$148 sps:$4 sm:$0xff]   ;;  %v21859_v20 = vld [vmem:[%s25505_s29 + $0x13b4] ss:$148 sps:$4 sm:$0xff]   ;;  %v21889_v43 = vld [vmem:[%s25505_s29 + $0x197c] ss:$148 sps:$4 sm:$0xff]  }
  0x54   : > { %14651 = vmatprep.mubr.bf16.mxu0 %v25582_v61  ;;  %14815 = vmatprep.mubr.bf16.mxu1 %v25582_v61  ;;  %v25617_v23 = vcombine.high %v25582_v61, %v25582_v61  ;;  %v21854_v24 = vld [vmem:[%s25505_s29 + $0x13a8] ss:$148 sps:$4 sm:$0xff]   ;;  %v21880_v38 = vld [vmem:[%s25505_s29 + $0x184c] ss:$148 sps:$4 sm:$0xff]   ;;  %v21932_v14 = vld [vmem:[%s25505_s29 + $0x22b0] ss:$148 sps:$4 sm:$0xff]  }
  0x55   : > { %14632 = vmatpush1.bf16.msra.mxu0 %v21792_v27  ;;  %14796 = vmatpush1.bf16.msra.mxu1 %v21793_v28  ;;  %v21862_v26 = vld [vmem:[%s25505_s29 + $0x14d4] ss:$148 sps:$4 sm:$0xff]   ;;  %v21865_v27 = vld [vmem:[%s25505_s29 + $0x14dc] ss:$148 sps:$4 sm:$0xff]   ;;  %v21904_v55 = vld [vmem:[%s25505_s29 + $0x1cec] ss:$148 sps:$4 sm:$0xff]  }
  0x56   : > { %14633 = vmatprep.subr.bf16.mxu0 %v21794_v29  ;;  %14797 = vmatprep.subr.bf16.mxu1 %v21796_v30  ;;  %v21860_v28 = vld [vmem:[%s25505_s29 + $0x14d0] ss:$148 sps:$4 sm:$0xff]   ;;  %v21863_v29 = vld [vmem:[%s25505_s29 + $0x14d8] ss:$148 sps:$4 sm:$0xff]   ;;  %v21875_v37 = vld [vmem:[%s25505_s29 + $0x1728] ss:$148 sps:$4 sm:$0xff]  }
  0x57   : > { %v21868_v30 = vld [vmem:[%s25505_s29 + $0x15fc] ss:$148 sps:$4 sm:$0xff]   ;;  %v21883_v39 = vld [vmem:[%s25505_s29 + $0x1854] ss:$148 sps:$4 sm:$0xff]   ;;  %vm18518_vm2 = vcmask (!%p21388_p7), 1041408  }
  0x58   : > { %v21893_v50 = vld [vmem:[%s25505_s29 + $0x1aa0] ss:$148 sps:$4 sm:$0xff]   ;;  %v21926_v10 = vld [vmem:[%s25505_s29 + $0x2188] ss:$148 sps:$4 sm:$0xff]  }
  0x59   : > { %14634 = vmatpush1.bf16.msra.mxu0 %v21798_v31  ;;  %14798 = vmatpush1.bf16.msra.mxu1 %v21799_v32  ;;  %v21871_v31 = vld [vmem:[%s25505_s29 + $0x1604] ss:$148 sps:$4 sm:$0xff]   ;;  %v21896_v53 = vld [vmem:[%s25505_s29 + $0x1bc0] ss:$148 sps:$4 sm:$0xff]   ;;  %v21940_v17 = vld [vmem:[%s25505_s29 + $0x23dc] ss:$148 sps:$4 sm:$0xff]  }
  0x5a   : > { %14635 = vmatprep.subr.bf16.mxu0 %v21800_v33  ;;  %14799 = vmatprep.subr.bf16.mxu1 %v21802_v34  ;;  %v21866_v32 = vld [vmem:[%s25505_s29 + $0x15f8] ss:$148 sps:$4 sm:$0xff]   ;;  %v21869_v33 = vld [vmem:[%s25505_s29 + $0x1600] ss:$148 sps:$4 sm:$0xff]  }
  0x5b   : > { %v21874_v34 = vld [vmem:[%s25505_s29 + $0x1724] ss:$148 sps:$4 sm:$0xff]   ;;  %v21910_v59 = vld [vmem:[%s25505_s29 + $0x1e14] ss:$148 sps:$4 sm:$0xff]  }
  0x5d   : > { %14636 = vmatpush1.bf16.msra.mxu0 %v21804_v35  ;;  %14800 = vmatpush1.bf16.msra.mxu1 %v21805_v36  ;;  %v21877_v35 = vld [vmem:[%s25505_s29 + $0x172c] ss:$148 sps:$4 sm:$0xff]  }
  0x5e   : > { %14637 = vmatprep.subr.bf16.mxu0 %v21806_v40  ;;  %14801 = vmatprep.subr.bf16.mxu1 %v21808_v41  ;;  %v21872_v36 = vld [vmem:[%s25505_s29 + $0x1720] ss:$148 sps:$4 sm:$0xff]   ;;  %v21878_v40 = vld [vmem:[%s25505_s29 + $0x1848] ss:$148 sps:$4 sm:$0xff]   ;;  %v21881_v41 = vld [vmem:[%s25505_s29 + $0x1850] ss:$148 sps:$4 sm:$0xff]  }
  0x61   : > { %14638 = vmatpush1.bf16.msra.mxu0 %v21810_v42  ;;  %14802 = vmatpush1.bf16.msra.mxu1 %v21811_v45  ;;  %v21886_v42 = vld [vmem:[%s25505_s29 + $0x1974] ss:$148 sps:$4 sm:$0xff]   ;;  %v21884_v45 = vld [vmem:[%s25505_s29 + $0x1970] ss:$148 sps:$4 sm:$0xff]  }
  0x62   : > { %14639 = vmatprep.subr.bf16.mxu0 %v21812_v46  ;;  %14803 = vmatprep.subr.bf16.mxu1 %v21814_v47  ;;  %v21887_v46 = vld [vmem:[%s25505_s29 + $0x1978] ss:$148 sps:$4 sm:$0xff]   ;;  %v21892_v47 = vld [vmem:[%s25505_s29 + $0x1a9c] ss:$148 sps:$4 sm:$0xff]  }
  0x65   : > { %14640 = vmatpush1.bf16.msra.mxu0 %v21816_v48  ;;  %14804 = vmatpush1.bf16.msra.mxu1 %v21817_v49  ;;  %v21895_v48 = vld [vmem:[%s25505_s29 + $0x1aa4] ss:$148 sps:$4 sm:$0xff]  }
  0x66   : > { %14641 = vmatprep.subr.bf16.mxu0 %v21818_v51  ;;  %14805 = vmatprep.subr.bf16.mxu1 %v21820_v52  ;;  %v21890_v49 = vld [vmem:[%s25505_s29 + $0x1a98] ss:$148 sps:$4 sm:$0xff]  }
  0x67   : > { %v21898_v51 = vld [vmem:[%s25505_s29 + $0x1bc4] ss:$148 sps:$4 sm:$0xff]   ;;  %v21901_v52 = vld [vmem:[%s25505_s29 + $0x1bcc] ss:$148 sps:$4 sm:$0xff]  }
  0x69   : > { %14642 = vmatpush1.bf16.msra.mxu0 %v21822_v54  ;;  %14806 = vmatpush1.bf16.msra.mxu1 %v21823_v56  ;;  %v21899_v54 = vld [vmem:[%s25505_s29 + $0x1bc8] ss:$148 sps:$4 sm:$0xff]  }
  0x6a   : > { %14643 = vmatprep.subr.bf16.mxu0 %v21824_v57  ;;  %14807 = vmatprep.subr.bf16.mxu1 %v21826_v58  ;;  %v21907_v56 = vld [vmem:[%s25505_s29 + $0x1cf4] ss:$148 sps:$4 sm:$0xff]   ;;  %v21905_v58 = vld [vmem:[%s25505_s29 + $0x1cf0] ss:$148 sps:$4 sm:$0xff]  }
  0x6b   : > { %v21902_v57 = vld [vmem:[%s25505_s29 + $0x1ce8] ss:$148 sps:$4 sm:$0xff]  }
  0x6d   : > { %14644 = vmatpush1.bf16.msra.mxu0 %v21828_v60  ;;  %14808 = vmatpush1.bf16.msra.mxu1 %v21829_v62  ;;  %v21913_v60 = vld [vmem:[%s25505_s29 + $0x1e1c] ss:$148 sps:$4 sm:$0xff]  }
  0x6e   : > { %14645 = vmatprep.subr.bf16.mxu0 %v21830_v63  ;;  %14809 = vmatprep.subr.bf16.mxu1 %v21832_v0  ;;  %v21908_v62 = vld [vmem:[%s25505_s29 + $0x1e10] ss:$148 sps:$4 sm:$0xff]   ;;  %v21911_v63 = vld [vmem:[%s25505_s29 + $0x1e18] ss:$148 sps:$4 sm:$0xff]  }
  0x6f   : > { %v21916_v0 = vld [vmem:[%s25505_s29 + $0x1f3c] ss:$148 sps:$4 sm:$0xff]  }
  0x71   : > { %14646 = vmatpush1.bf16.msra.mxu0 %v21834_v1  ;;  %14810 = vmatpush1.bf16.msra.mxu1 %v21835_v2  ;;  %v21919_v1 = vld [vmem:[%s25505_s29 + $0x1f44] ss:$148 sps:$4 sm:$0xff]  }
  0x72   : > { %14647 = vmatprep.subr.bf16.mxu0 %v21836_v3  ;;  %14811 = vmatprep.subr.bf16.mxu1 %v21838_v4  ;;  %v21914_v2 = vld [vmem:[%s25505_s29 + $0x1f38] ss:$148 sps:$4 sm:$0xff]   ;;  %v21917_v3 = vld [vmem:[%s25505_s29 + $0x1f40] ss:$148 sps:$4 sm:$0xff]  }
  0x73   : > { %v21922_v4 = vld [vmem:[%s25505_s29 + $0x2064] ss:$148 sps:$4 sm:$0xff]  }
  0x75   : > { %14648 = vmatpush1.bf16.msra.mxu0 %v21840_v5  ;;  %14812 = vmatpush1.bf16.msra.mxu1 %v21841_v6  ;;  %v21925_v5 = vld [vmem:[%s25505_s29 + $0x206c] ss:$148 sps:$4 sm:$0xff]  }
  0x76   : > { %14649 = vmatprep.subr.bf16.mxu0 %v21842_v7  ;;  %14813 = vmatprep.subr.bf16.mxu1 %v21844_v8  ;;  %v21920_v6 = vld [vmem:[%s25505_s29 + $0x2060] ss:$148 sps:$4 sm:$0xff]   ;;  %v21923_v7 = vld [vmem:[%s25505_s29 + $0x2068] ss:$148 sps:$4 sm:$0xff]  }
  0x77   : > { %v21928_v8 = vld [vmem:[%s25505_s29 + $0x218c] ss:$148 sps:$4 sm:$0xff]  }
  0x79   : > { %14650 = vmatpush1.bf16.msra.mxu0 %v21846_v9  ;;  %14814 = vmatpush1.bf16.msra.mxu1 %v21847_v11  ;;  %v21931_v9 = vld [vmem:[%s25505_s29 + $0x2194] ss:$148 sps:$4 sm:$0xff]   ;;  %v21929_v11 = vld [vmem:[%s25505_s29 + $0x2190] ss:$148 sps:$4 sm:$0xff]  }
  0x7a   : > { %14660 = vmatprep.subr.bf16.mxu0 %v21850_v12  ;;  %14824 = vmatprep.subr.bf16.mxu1 %v21853_v13  ;;  %v21934_v12 = vld [vmem:[%s25505_s29 + $0x22b4] ss:$148 sps:$4 sm:$0xff]   ;;  %v21937_v13 = vld [vmem:[%s25505_s29 + $0x22bc] ss:$148 sps:$4 sm:$0xff]  }
  0x7c   : > { %14652 = vmatmul.mubr.bf16.vlgmr.msra.gmra.mrb[0].mxu0 %v25604_v16  ;;  %14816 = vmatmul.mubr.bf16.vlgmr.msra.gmra.mrb[0].mxu1 %v25604_v16 }
  0x7d   : > { %14661 = vmatpush1.bf16.msra.mxu0 %v21848_v15  ;;  %14825 = vmatpush1.bf16.msra.mxu1 %v21851_v18  ;;  %v21935_v15 = vld [vmem:[%s25505_s29 + $0x22b8] ss:$148 sps:$4 sm:$0xff]  }
  0x7e   : > { %14662 = vmatprep.subr.bf16.mxu0 %v21856_v19  ;;  %14826 = vmatprep.subr.bf16.mxu1 %v21859_v20  ;;  %v21943_v18 = vld [vmem:[%s25505_s29 + $0x23e4] ss:$148 sps:$4 sm:$0xff]   ;;  %v21941_v20 = vld [vmem:[%s25505_s29 + $0x23e0] ss:$148 sps:$4 sm:$0xff]  }
  0x7f   : > { %14692 = vmatprep.mubr.bf16.mxu0 %v25617_v23  ;;  %14856 = vmatprep.mubr.bf16.mxu1 %v25617_v23  ;;  %v21938_v19 = vld [vmem:[%s25505_s29 + $0x23d8] ss:$148 sps:$4 sm:$0xff]  }
  0x81   : > { %14663 = vmatpush1.bf16.msra.mxu0 %v21854_v24  ;;  %14827 = vmatpush1.bf16.msra.mxu1 %v21857_v25  ;;  %v21946_v24 = vld [vmem:[%s25505_s29 + $0x2504] ss:$148 sps:$4 sm:$0xff]   ;;  %v21949_v25 = vld [vmem:[%s25505_s29 + $0x250c] ss:$148 sps:$4 sm:$0xff]  }
  0x82   : > { %14664 = vmatprep.subr.bf16.mxu0 %v21862_v26  ;;  %14828 = vmatprep.subr.bf16.mxu1 %v21865_v27  ;;  %v21944_v26 = vld [vmem:[%s25505_s29 + $0x2500] ss:$148 sps:$4 sm:$0xff]   ;;  %v25686_v27 = vcombine.high %v25604_v16, %v25604_v16 }
  0x85   : > { %14665 = vmatpush1.bf16.msra.mxu0 %v21860_v28  ;;  %14829 = vmatpush1.bf16.msra.mxu1 %v21863_v29  ;;  %v21947_v28 = vld [vmem:[%s25505_s29 + $0x2508] ss:$148 sps:$4 sm:$0xff]   ;;  %v21952_v29 = vld [vmem:[%s25505_s29 + $0x262c] ss:$148 sps:$4 sm:$0xff]  }
  0x86   : > { %14666 = vmatprep.subr.bf16.mxu0 %v21868_v30  ;;  %14830 = vmatprep.subr.bf16.mxu1 %v21871_v31  ;;  %v21955_v30 = vld [vmem:[%s25505_s29 + $0x2634] ss:$148 sps:$4 sm:$0xff]  }
  0x87   : > { %v21950_v31 = vld [vmem:[%s25505_s29 + $0x2628] ss:$148 sps:$4 sm:$0xff]  }
  0x89   : > { %14667 = vmatpush1.bf16.msra.mxu0 %v21866_v32  ;;  %14831 = vmatpush1.bf16.msra.mxu1 %v21869_v33  ;;  %v21953_v32 = vld [vmem:[%s25505_s29 + $0x2630] ss:$148 sps:$4 sm:$0xff]   ;;  %v21958_v33 = vld [vmem:[%s25505_s29 + $0x2754] ss:$148 sps:$4 sm:$0xff]  }
  0x8a   : > { %14668 = vmatprep.subr.bf16.mxu0 %v21874_v34  ;;  %14832 = vmatprep.subr.bf16.mxu1 %v21877_v35  ;;  %v21961_v34 = vld [vmem:[%s25505_s29 + $0x275c] ss:$148 sps:$4 sm:$0xff]  }
  0x8b   : > { %v21956_v35 = vld [vmem:[%s25505_s29 + $0x2750] ss:$148 sps:$4 sm:$0xff]  }
  0x8d   : > { %14669 = vmatpush1.bf16.msra.mxu0 %v21872_v36  ;;  %14833 = vmatpush1.bf16.msra.mxu1 %v21875_v37  ;;  %v21959_v36 = vld [vmem:[%s25505_s29 + $0x2758] ss:$148 sps:$4 sm:$0xff]   ;;  %v21964_v37 = vld [vmem:[%s25505_s29 + $0x287c] ss:$148 sps:$4 sm:$0xff]  }
  0x8e   : > { %14670 = vmatprep.subr.bf16.mxu0 %v21880_v38  ;;  %14834 = vmatprep.subr.bf16.mxu1 %v21883_v39  ;;  %v21967_v38 = vld [vmem:[%s25505_s29 + $0x2884] ss:$148 sps:$4 sm:$0xff]  }
  0x8f   : > { %v21962_v39 = vld [vmem:[%s25505_s29 + $0x2878] ss:$148 sps:$4 sm:$0xff]  }
  0x91   : > { %14671 = vmatpush1.bf16.msra.mxu0 %v21878_v40  ;;  %14835 = vmatpush1.bf16.msra.mxu1 %v21881_v41  ;;  %v21965_v40 = vld [vmem:[%s25505_s29 + $0x2880] ss:$148 sps:$4 sm:$0xff]   ;;  %v21970_v41 = vld [vmem:[%s25505_s29 + $0x29a4] ss:$148 sps:$4 sm:$0xff]  }
  0x92   : > { %14672 = vmatprep.subr.bf16.mxu0 %v21886_v42  ;;  %14836 = vmatprep.subr.bf16.mxu1 %v21889_v43  ;;  %v21973_v42 = vld [vmem:[%s25505_s29 + $0x29ac] ss:$148 sps:$4 sm:$0xff]  }
  0x93   : > { %v21968_v43 = vld [vmem:[%s25505_s29 + $0x29a0] ss:$148 sps:$4 sm:$0xff]  }
  0x95   : > { %14673 = vmatpush1.bf16.msra.mxu0 %v21884_v45  ;;  %14837 = vmatpush1.bf16.msra.mxu1 %v21887_v46  ;;  %v21971_v45 = vld [vmem:[%s25505_s29 + $0x29a8] ss:$148 sps:$4 sm:$0xff]   ;;  %v21976_v46 = vld [vmem:[%s25505_s29 + $0x2acc] ss:$148 sps:$4 sm:$0xff]  }
  0x96   : > { %14674 = vmatprep.subr.bf16.mxu0 %v21892_v47  ;;  %14838 = vmatprep.subr.bf16.mxu1 %v21895_v48  ;;  %v21979_v47 = vld [vmem:[%s25505_s29 + $0x2ad4] ss:$148 sps:$4 sm:$0xff]  }
  0x97   : > { %v21974_v48 = vld [vmem:[%s25505_s29 + $0x2ac8] ss:$148 sps:$4 sm:$0xff]  }
  0x99   : > { %14675 = vmatpush1.bf16.msra.mxu0 %v21890_v49  ;;  %14839 = vmatpush1.bf16.msra.mxu1 %v21893_v50  ;;  %v21977_v49 = vld [vmem:[%s25505_s29 + $0x2ad0] ss:$148 sps:$4 sm:$0xff]   ;;  %v21982_v50 = vld [vmem:[%s25505_s29 + $0x2bf4] ss:$148 sps:$4 sm:$0xff]  }
  0x9a   : > { %14676 = vmatprep.subr.bf16.mxu0 %v21898_v51  ;;  %14840 = vmatprep.subr.bf16.mxu1 %v21901_v52  ;;  %v21985_v51 = vld [vmem:[%s25505_s29 + $0x2bfc] ss:$148 sps:$4 sm:$0xff]  }
  0x9b   : > { %v21980_v52 = vld [vmem:[%s25505_s29 + $0x2bf0] ss:$148 sps:$4 sm:$0xff]  }
  0x9d   : > { %14677 = vmatpush1.bf16.msra.mxu0 %v21896_v53  ;;  %14841 = vmatpush1.bf16.msra.mxu1 %v21899_v54  ;;  %v21983_v53 = vld [vmem:[%s25505_s29 + $0x2bf8] ss:$148 sps:$4 sm:$0xff]   ;;  %v21988_v54 = vld [vmem:[%s25505_s29 + $0x2d1c] ss:$148 sps:$4 sm:$0xff]  }
  0x9e   : > { %14678 = vmatprep.subr.bf16.mxu0 %v21904_v55  ;;  %14842 = vmatprep.subr.bf16.mxu1 %v21907_v56  ;;  %v21991_v55 = vld [vmem:[%s25505_s29 + $0x2d24] ss:$148 sps:$4 sm:$0xff]  }
  0x9f   : > { %v21986_v56 = vld [vmem:[%s25505_s29 + $0x2d18] ss:$148 sps:$4 sm:$0xff]  }
  0xa1   : > { %14679 = vmatpush1.bf16.msra.mxu0 %v21902_v57  ;;  %14843 = vmatpush1.bf16.msra.mxu1 %v21905_v58  ;;  %v21989_v57 = vld [vmem:[%s25505_s29 + $0x2d20] ss:$148 sps:$4 sm:$0xff]   ;;  %v21994_v58 = vld [vmem:[%s25505_s29 + $0x2e44] ss:$148 sps:$4 sm:$0xff]  }
  0xa2   : > { %14680 = vmatprep.subr.bf16.mxu0 %v21910_v59  ;;  %14844 = vmatprep.subr.bf16.mxu1 %v21913_v60  ;;  %v21997_v59 = vld [vmem:[%s25505_s29 + $0x2e4c] ss:$148 sps:$4 sm:$0xff]  }
  0xa3   : > { %v21992_v60 = vld [vmem:[%s25505_s29 + $0x2e40] ss:$148 sps:$4 sm:$0xff]  }
  0xa5   : > { %14681 = vmatpush1.bf16.msra.mxu0 %v21908_v62  ;;  %14845 = vmatpush1.bf16.msra.mxu1 %v21911_v63  ;;  %v21995_v62 = vld [vmem:[%s25505_s29 + $0x2e48] ss:$148 sps:$4 sm:$0xff]   ;;  %v22000_v63 = vld [vmem:[%s25505_s29 + $0x2f6c] ss:$148 sps:$4 sm:$0xff]  }
  0xa6   : > { %14682 = vmatprep.subr.bf16.mxu0 %v21916_v0  ;;  %14846 = vmatprep.subr.bf16.mxu1 %v21919_v1  ;;  %v22003_v0 = vld [vmem:[%s25505_s29 + $0x2f74] ss:$148 sps:$4 sm:$0xff]  }
  0xa7   : > { %v21998_v1 = vld [vmem:[%s25505_s29 + $0x2f68] ss:$148 sps:$4 sm:$0xff]  }
  0xa9   : > { %14683 = vmatpush1.bf16.msra.mxu0 %v21914_v2  ;;  %14847 = vmatpush1.bf16.msra.mxu1 %v21917_v3  ;;  %v22001_v2 = vld [vmem:[%s25505_s29 + $0x2f70] ss:$148 sps:$4 sm:$0xff]   ;;  %v22006_v3 = vld [vmem:[%s25505_s29 + $0x3094] ss:$148 sps:$4 sm:$0xff]  }
  0xaa   : > { %14684 = vmatprep.subr.bf16.mxu0 %v21922_v4  ;;  %14848 = vmatprep.subr.bf16.mxu1 %v21925_v5  ;;  %v22009_v4 = vld [vmem:[%s25505_s29 + $0x309c] ss:$148 sps:$4 sm:$0xff]  }
  0xab   : > { %v22004_v5 = vld [vmem:[%s25505_s29 + $0x3090] ss:$148 sps:$4 sm:$0xff]  }
  0xad   : > { %14685 = vmatpush1.bf16.msra.mxu0 %v21920_v6  ;;  %14849 = vmatpush1.bf16.msra.mxu1 %v21923_v7  ;;  %v22007_v6 = vld [vmem:[%s25505_s29 + $0x3098] ss:$148 sps:$4 sm:$0xff]   ;;  %v22012_v7 = vld [vmem:[%s25505_s29 + $0x31bc] ss:$148 sps:$4 sm:$0xff]  }
  0xae   : > { %14686 = vmatprep.subr.bf16.mxu0 %v21928_v8  ;;  %14850 = vmatprep.subr.bf16.mxu1 %v21931_v9  ;;  %v22015_v8 = vld [vmem:[%s25505_s29 + $0x31c4] ss:$148 sps:$4 sm:$0xff]  }
  0xaf   : > { %v22010_v9 = vld [vmem:[%s25505_s29 + $0x31b8] ss:$148 sps:$4 sm:$0xff]  }
  0xb1   : > { %14687 = vmatpush1.bf16.msra.mxu0 %v21926_v10  ;;  %14851 = vmatpush1.bf16.msra.mxu1 %v21929_v11  ;;  %v22013_v10 = vld [vmem:[%s25505_s29 + $0x31c0] ss:$148 sps:$4 sm:$0xff]   ;;  %v22018_v11 = vld [vmem:[%s25505_s29 + $0x32e4] ss:$148 sps:$4 sm:$0xff]  }
  0xb2   : > { %14688 = vmatprep.subr.bf16.mxu0 %v21934_v12  ;;  %14852 = vmatprep.subr.bf16.mxu1 %v21937_v13  ;;  %v22021_v12 = vld [vmem:[%s25505_s29 + $0x32ec] ss:$148 sps:$4 sm:$0xff]  }
  0xb3   : > { %v22016_v13 = vld [vmem:[%s25505_s29 + $0x32e0] ss:$148 sps:$4 sm:$0xff]  }
  0xb5   : > { %14689 = vmatpush1.bf16.msra.mxu0 %v21932_v14  ;;  %14853 = vmatpush1.bf16.msra.mxu1 %v21935_v15  ;;  %v22019_v14 = vld [vmem:[%s25505_s29 + $0x32e8] ss:$148 sps:$4 sm:$0xff]   ;;  %v22024_v15 = vld [vmem:[%s25505_s29 + $0x340c] ss:$148 sps:$4 sm:$0xff]  }
  0xb6   : > { %14690 = vmatprep.subr.bf16.mxu0 %v21940_v17  ;;  %14854 = vmatprep.subr.bf16.mxu1 %v21943_v18  ;;  %v22027_v17 = vld [vmem:[%s25505_s29 + $0x3414] ss:$148 sps:$4 sm:$0xff]  }
  0xb7   : > { %v22022_v18 = vld [vmem:[%s25505_s29 + $0x3408] ss:$148 sps:$4 sm:$0xff]  }
  0xb9   : > { %14691 = vmatpush1.bf16.msra.mxu0 %v21938_v19  ;;  %14855 = vmatpush1.bf16.msra.mxu1 %v21941_v20  ;;  %v22025_v19 = vld [vmem:[%s25505_s29 + $0x3410] ss:$148 sps:$4 sm:$0xff]   ;;  %v22030_v20 = vld [vmem:[%s25505_s29 + $0x3534] ss:$148 sps:$4 sm:$0xff]  }
  0xba   : > { %14701 = vmatprep.subr.bf16.mxu0 %v21946_v24  ;;  %14865 = vmatprep.subr.bf16.mxu1 %v21949_v25  ;;  %v22033_v24 = vld [vmem:[%s25505_s29 + $0x353c] ss:$148 sps:$4 sm:$0xff]  }
  0xbb   : > { %v22028_v25 = vld [vmem:[%s25505_s29 + $0x3530] ss:$148 sps:$4 sm:$0xff]  }
  0xbc   : > { %14693 = vmatmul.mubr.bf16.vlgmr.msra.gmra.mrb[0].mxu0 %v25686_v27  ;;  %14857 = vmatmul.mubr.bf16.vlgmr.msra.gmra.mrb[0].mxu1 %v25686_v27 }
  0xbd   : > { %14702 = vmatpush1.bf16.msra.mxu0 %v21944_v26  ;;  %14866 = vmatpush1.bf16.msra.mxu1 %v21947_v28  ;;  %v22031_v26 = vld [vmem:[%s25505_s29 + $0x3538] ss:$148 sps:$4 sm:$0xff]   ;;  %v22036_v28 = vld [vmem:[%s25505_s29 + $0x365c] ss:$148 sps:$4 sm:$0xff]  }
  0xbe   : > { %14703 = vmatprep.subr.bf16.mxu0 %v21952_v29  ;;  %14867 = vmatprep.subr.bf16.mxu1 %v21955_v30  ;;  %v22039_v29 = vld [vmem:[%s25505_s29 + $0x3664] ss:$148 sps:$4 sm:$0xff]  }
  0xbf   : > { %14733 = vmatprep.mubr.bf16.mxu0 %v25610_v21  ;;  %14897 = vmatprep.mubr.bf16.mxu1 %v25610_v21  ;;  %v22034_v30 = vld [vmem:[%s25505_s29 + $0x3658] ss:$148 sps:$4 sm:$0xff]  }
  0xc1   : > { %14704 = vmatpush1.bf16.msra.mxu0 %v21950_v31  ;;  %14868 = vmatpush1.bf16.msra.mxu1 %v21953_v32  ;;  %v22037_v31 = vld [vmem:[%s25505_s29 + $0x3660] ss:$148 sps:$4 sm:$0xff]   ;;  %v22043_v32 = vld [vmem:[%s25505_s29 + $0x3784] ss:$148 sps:$4 sm:$0xff]  }
  0xc2   : > { %14705 = vmatprep.subr.bf16.mxu0 %v21958_v33  ;;  %14869 = vmatprep.subr.bf16.mxu1 %v21961_v34  ;;  %v22046_v33 = vld [vmem:[%s25505_s29 + $0x378c] ss:$148 sps:$4 sm:$0xff]  }
  0xc3   : > { %v22041_v34 = vld [vmem:[%s25505_s29 + $0x3780] ss:$148 sps:$4 sm:$0xff]  }
  0xc5   : > { %14706 = vmatpush1.bf16.msra.mxu0 %v21956_v35  ;;  %14870 = vmatpush1.bf16.msra.mxu1 %v21959_v36  ;;  %v22044_v35 = vld [vmem:[%s25505_s29 + $0x3788] ss:$148 sps:$4 sm:$0xff]   ;;  %v22049_v36 = vld [vmem:[%s25505_s29 + $0x38ac] ss:$148 sps:$4 sm:$0xff]  }
  0xc6   : > { %14707 = vmatprep.subr.bf16.mxu0 %v21964_v37  ;;  %14871 = vmatprep.subr.bf16.mxu1 %v21967_v38  ;;  %v22052_v37 = vld [vmem:[%s25505_s29 + $0x38b4] ss:$148 sps:$4 sm:$0xff]   ;;  %v25761_v38 = vcombine.high %v25610_v21, %v25610_v21 }
  0xc9   : > { %14708 = vmatpush1.bf16.msra.mxu0 %v21962_v39  ;;  %14872 = vmatpush1.bf16.msra.mxu1 %v21965_v40  ;;  %v22047_v39 = vld [vmem:[%s25505_s29 + $0x38a8] ss:$148 sps:$4 sm:$0xff]   ;;  %v22050_v40 = vld [vmem:[%s25505_s29 + $0x38b0] ss:$148 sps:$4 sm:$0xff]  }
  0xca   : > { %14709 = vmatprep.subr.bf16.mxu0 %v21970_v41  ;;  %14873 = vmatprep.subr.bf16.mxu1 %v21973_v42  ;;  %v22055_v41 = vld [vmem:[%s25505_s29 + $0x39d4] ss:$148 sps:$4 sm:$0xff]   ;;  %v22058_v42 = vld [vmem:[%s25505_s29 + $0x39dc] ss:$148 sps:$4 sm:$0xff]  }
  0xcd   : > { %14710 = vmatpush1.bf16.msra.mxu0 %v21968_v43  ;;  %14874 = vmatpush1.bf16.msra.mxu1 %v21971_v45  ;;  %v22053_v43 = vld [vmem:[%s25505_s29 + $0x39d0] ss:$148 sps:$4 sm:$0xff]   ;;  %v22056_v45 = vld [vmem:[%s25505_s29 + $0x39d8] ss:$148 sps:$4 sm:$0xff]  }
  0xce   : > { %14711 = vmatprep.subr.bf16.mxu0 %v21976_v46  ;;  %14875 = vmatprep.subr.bf16.mxu1 %v21979_v47  ;;  %v22061_v46 = vld [vmem:[%s25505_s29 + $0x3afc] ss:$148 sps:$4 sm:$0xff]   ;;  %v22064_v47 = vld [vmem:[%s25505_s29 + $0x3b04] ss:$148 sps:$4 sm:$0xff]  }
  0xd1   : > { %14712 = vmatpush1.bf16.msra.mxu0 %v21974_v48  ;;  %14876 = vmatpush1.bf16.msra.mxu1 %v21977_v49  ;;  %v22059_v48 = vld [vmem:[%s25505_s29 + $0x3af8] ss:$148 sps:$4 sm:$0xff]   ;;  %v22062_v49 = vld [vmem:[%s25505_s29 + $0x3b00] ss:$148 sps:$4 sm:$0xff]  }
  0xd2   : > { %14713 = vmatprep.subr.bf16.mxu0 %v21982_v50  ;;  %14877 = vmatprep.subr.bf16.mxu1 %v21985_v51  ;;  %v22067_v50 = vld [vmem:[%s25505_s29 + $0x3c24] ss:$148 sps:$4 sm:$0xff]   ;;  %v22070_v51 = vld [vmem:[%s25505_s29 + $0x3c2c] ss:$148 sps:$4 sm:$0xff]  }
  0xd5   : > { %14714 = vmatpush1.bf16.msra.mxu0 %v21980_v52  ;;  %14878 = vmatpush1.bf16.msra.mxu1 %v21983_v53  ;;  %v22065_v52 = vld [vmem:[%s25505_s29 + $0x3c20] ss:$148 sps:$4 sm:$0xff]   ;;  %v22068_v53 = vld [vmem:[%s25505_s29 + $0x3c28] ss:$148 sps:$4 sm:$0xff]  }
  0xd6   : > { %14715 = vmatprep.subr.bf16.mxu0 %v21988_v54  ;;  %14879 = vmatprep.subr.bf16.mxu1 %v21991_v55  ;;  %v22073_v54 = vld [vmem:[%s25505_s29 + $0x3d4c] ss:$148 sps:$4 sm:$0xff]   ;;  %v22076_v55 = vld [vmem:[%s25505_s29 + $0x3d54] ss:$148 sps:$4 sm:$0xff]  }
  0xd9   : > { %14716 = vmatpush1.bf16.msra.mxu0 %v21986_v56  ;;  %14880 = vmatpush1.bf16.msra.mxu1 %v21989_v57  ;;  %v22071_v56 = vld [vmem:[%s25505_s29 + $0x3d48] ss:$148 sps:$4 sm:$0xff]   ;;  %v22074_v57 = vld [vmem:[%s25505_s29 + $0x3d50] ss:$148 sps:$4 sm:$0xff]  }
  0xda   : > { %14717 = vmatprep.subr.bf16.mxu0 %v21994_v58  ;;  %14881 = vmatprep.subr.bf16.mxu1 %v21997_v59  ;;  %v22079_v58 = vld [vmem:[%s25505_s29 + $0x3e74] ss:$148 sps:$4 sm:$0xff]   ;;  %v22082_v59 = vld [vmem:[%s25505_s29 + $0x3e7c] ss:$148 sps:$4 sm:$0xff]  }
  0xdd   : > { %14718 = vmatpush1.bf16.msra.mxu0 %v21992_v60  ;;  %14882 = vmatpush1.bf16.msra.mxu1 %v21995_v62  ;;  %v22077_v60 = vld [vmem:[%s25505_s29 + $0x3e70] ss:$148 sps:$4 sm:$0xff]   ;;  %v22080_v62 = vld [vmem:[%s25505_s29 + $0x3e78] ss:$148 sps:$4 sm:$0xff]  }
  0xde   : > { %14719 = vmatprep.subr.bf16.mxu0 %v22000_v63  ;;  %14883 = vmatprep.subr.bf16.mxu1 %v22003_v0  ;;  %v22085_v63 = vld [vmem:[%s25505_s29 + $0x3f9c] ss:$148 sps:$4 sm:$0xff]   ;;  %v22088_v0 = vld [vmem:[%s25505_s29 + $0x3fa4] ss:$148 sps:$4 sm:$0xff]  }
  0xe1   : > { %14720 = vmatpush1.bf16.msra.mxu0 %v21998_v1  ;;  %14884 = vmatpush1.bf16.msra.mxu1 %v22001_v2  ;;  %v22083_v1 = vld [vmem:[%s25505_s29 + $0x3f98] ss:$148 sps:$4 sm:$0xff]   ;;  %v22086_v2 = vld [vmem:[%s25505_s29 + $0x3fa0] ss:$148 sps:$4 sm:$0xff]  }
  0xe2   : > { %14721 = vmatprep.subr.bf16.mxu0 %v22006_v3  ;;  %14885 = vmatprep.subr.bf16.mxu1 %v22009_v4  ;;  %v22091_v3 = vld [vmem:[%s25505_s29 + $0x40c4] ss:$148 sps:$4 sm:$0xff]   ;;  %v22094_v4 = vld [vmem:[%s25505_s29 + $0x40cc] ss:$148 sps:$4 sm:$0xff]  }
  0xe5   : > { %14722 = vmatpush1.bf16.msra.mxu0 %v22004_v5  ;;  %14886 = vmatpush1.bf16.msra.mxu1 %v22007_v6  ;;  %v22089_v5 = vld [vmem:[%s25505_s29 + $0x40c0] ss:$148 sps:$4 sm:$0xff]   ;;  %v22092_v6 = vld [vmem:[%s25505_s29 + $0x40c8] ss:$148 sps:$4 sm:$0xff]  }
  0xe6   : > { %14723 = vmatprep.subr.bf16.mxu0 %v22012_v7  ;;  %14887 = vmatprep.subr.bf16.mxu1 %v22015_v8  ;;  %v22097_v7 = vld [vmem:[%s25505_s29 + $0x41ec] ss:$148 sps:$4 sm:$0xff]   ;;  %v22100_v8 = vld [vmem:[%s25505_s29 + $0x41f4] ss:$148 sps:$4 sm:$0xff]  }
  0xe9   : > { %14724 = vmatpush1.bf16.msra.mxu0 %v22010_v9  ;;  %14888 = vmatpush1.bf16.msra.mxu1 %v22013_v10  ;;  %v22095_v9 = vld [vmem:[%s25505_s29 + $0x41e8] ss:$148 sps:$4 sm:$0xff]   ;;  %v22098_v10 = vld [vmem:[%s25505_s29 + $0x41f0] ss:$148 sps:$4 sm:$0xff]  }
  0xea   : > { %14725 = vmatprep.subr.bf16.mxu0 %v22018_v11  ;;  %14889 = vmatprep.subr.bf16.mxu1 %v22021_v12  ;;  %v22103_v11 = vld [vmem:[%s25505_s29 + $0x4314] ss:$148 sps:$4 sm:$0xff]   ;;  %v22106_v12 = vld [vmem:[%s25505_s29 + $0x431c] ss:$148 sps:$4 sm:$0xff]  }
  0xed   : > { %14726 = vmatpush1.bf16.msra.mxu0 %v22016_v13  ;;  %14890 = vmatpush1.bf16.msra.mxu1 %v22019_v14  ;;  %v22101_v13 = vld [vmem:[%s25505_s29 + $0x4310] ss:$148 sps:$4 sm:$0xff]   ;;  %v22104_v14 = vld [vmem:[%s25505_s29 + $0x4318] ss:$148 sps:$4 sm:$0xff]  }
  0xee   : > { %14727 = vmatprep.subr.bf16.mxu0 %v22024_v15  ;;  %14891 = vmatprep.subr.bf16.mxu1 %v22027_v17  ;;  %v22109_v15 = vld [vmem:[%s25505_s29 + $0x443c] ss:$148 sps:$4 sm:$0xff]   ;;  %v22112_v17 = vld [vmem:[%s25505_s29 + $0x4444] ss:$148 sps:$4 sm:$0xff]  }
  0xf1   : > { %14728 = vmatpush1.bf16.msra.mxu0 %v22022_v18  ;;  %14892 = vmatpush1.bf16.msra.mxu1 %v22025_v19  ;;  %v22107_v18 = vld [vmem:[%s25505_s29 + $0x4438] ss:$148 sps:$4 sm:$0xff]   ;;  %v22110_v19 = vld [vmem:[%s25505_s29 + $0x4440] ss:$148 sps:$4 sm:$0xff]  }
  0xf2   : > { %14729 = vmatprep.subr.bf16.mxu0 %v22030_v20  ;;  %14893 = vmatprep.subr.bf16.mxu1 %v22033_v24  ;;  %v22115_v20 = vld [vmem:[%s25505_s29 + $0x4564] ss:$148 sps:$4 sm:$0xff]   ;;  %v22118_v24 = vld [vmem:[%s25505_s29 + $0x456c] ss:$148 sps:$4 sm:$0xff]  }
  0xf5   : > { %14730 = vmatpush1.bf16.msra.mxu0 %v22028_v25  ;;  %14894 = vmatpush1.bf16.msra.mxu1 %v22031_v26  ;;  %v22113_v25 = vld [vmem:[%s25505_s29 + $0x4560] ss:$148 sps:$4 sm:$0xff]   ;;  %v22116_v26 = vld [vmem:[%s25505_s29 + $0x4568] ss:$148 sps:$4 sm:$0xff]  }
  0xf6   : > { %14731 = vmatprep.subr.bf16.mxu0 %v22036_v28  ;;  %14895 = vmatprep.subr.bf16.mxu1 %v22039_v29  ;;  %v22121_v28 = vld [vmem:[%s25505_s29 + $0x468c] ss:$148 sps:$4 sm:$0xff]   ;;  %v22124_v29 = vld [vmem:[%s25505_s29 + $0x4694] ss:$148 sps:$4 sm:$0xff]  }
  0xf9   : > { %14732 = vmatpush1.bf16.msra.mxu0 %v22034_v30  ;;  %14896 = vmatpush1.bf16.msra.mxu1 %v22037_v31  ;;  %v22119_v30 = vld [vmem:[%s25505_s29 + $0x4688] ss:$148 sps:$4 sm:$0xff]   ;;  %v22122_v31 = vld [vmem:[%s25505_s29 + $0x4690] ss:$148 sps:$4 sm:$0xff]  }
  0xfa   : > { %14742 = vmatprep.subr.bf16.mxu0 %v22043_v32  ;;  %14906 = vmatprep.subr.bf16.mxu1 %v22046_v33  ;;  %v22127_v32 = vld [vmem:[%s25505_s29 + $0x47b4] ss:$148 sps:$4 sm:$0xff]   ;;  %v22130_v33 = vld [vmem:[%s25505_s29 + $0x47bc] ss:$148 sps:$4 sm:$0xff]  }
  0xfc   : > { %14734 = vmatmul.mubr.bf16.vlgmr.msra.gmra.mrb[0].mxu0 %v25613_v22  ;;  %14898 = vmatmul.mubr.bf16.vlgmr.msra.gmra.mrb[0].mxu1 %v25613_v22 }
  0xfd   : > { %14743 = vmatpush1.bf16.msra.mxu0 %v22041_v34  ;;  %14907 = vmatpush1.bf16.msra.mxu1 %v22044_v35  ;;  %v22125_v34 = vld [vmem:[%s25505_s29 + $0x47b0] ss:$148 sps:$4 sm:$0xff]   ;;  %v22128_v35 = vld [vmem:[%s25505_s29 + $0x47b8] ss:$148 sps:$4 sm:$0xff]  }
  0xfe   : > { %14744 = vmatprep.subr.bf16.mxu0 %v22049_v36  ;;  %14908 = vmatprep.subr.bf16.mxu1 %v22052_v37  ;;  %v22133_v36 = vld [vmem:[%s25505_s29 + $0x48dc] ss:$148 sps:$4 sm:$0xff]   ;;  %v22136_v37 = vld [vmem:[%s25505_s29 + $0x48e4] ss:$148 sps:$4 sm:$0xff]  }
  0xff   : > { %14774 = vmatprep.mubr.bf16.mxu0 %v25761_v38  ;;  %14938 = vmatprep.mubr.bf16.mxu1 %v25761_v38 }
 0x101   : > { %14745 = vmatpush1.bf16.msra.mxu0 %v22047_v39  ;;  %14909 = vmatpush1.bf16.msra.mxu1 %v22050_v40  ;;  %v22131_v39 = vld [vmem:[%s25505_s29 + $0x48d8] ss:$148 sps:$4 sm:$0xff]   ;;  %v22134_v40 = vld [vmem:[%s25505_s29 + $0x48e0] ss:$148 sps:$4 sm:$0xff]  }
 0x102   : > { %14746 = vmatprep.subr.bf16.mxu0 %v22055_v41  ;;  %14910 = vmatprep.subr.bf16.mxu1 %v22058_v42  ;;  %v22139_v41 = vld [vmem:[%s25505_s29 + $0x14] ss:$148 sps:$4 sm:$0xff]   ;;  %v22142_v42 = vld [vmem:[%s25505_s29 + $0x1c] ss:$148 sps:$4 sm:$0xff]  }
 0x105   : > { %14747 = vmatpush1.bf16.msra.mxu0 %v22053_v43  ;;  %14911 = vmatpush1.bf16.msra.mxu1 %v22056_v45  ;;  %v25829_v43 = vcombine.high %v25613_v22, %v25613_v22  ;;  %v22137_v45 = vld [vmem:[%s25505_s29 + $0x10] ss:$148 sps:$4 sm:$0xff]  }
 0x106   : > { %14748 = vmatprep.subr.bf16.mxu0 %v22061_v46  ;;  %14912 = vmatprep.subr.bf16.mxu1 %v22064_v47  ;;  %v22140_v46 = vld [vmem:[%s25505_s29 + $0x18] ss:$148 sps:$4 sm:$0xff]   ;;  %v22145_v47 = vld [vmem:[%s25505_s29 + $0x13c] ss:$148 sps:$4 sm:$0xff]  }
 0x109   : > { %14749 = vmatpush1.bf16.msra.mxu0 %v22059_v48  ;;  %14913 = vmatpush1.bf16.msra.mxu1 %v22062_v49  ;;  %v22148_v48 = vld [vmem:[%s25505_s29 + $0x144] ss:$148 sps:$4 sm:$0xff]  }
 0x10a   : > { %14750 = vmatprep.subr.bf16.mxu0 %v22067_v50  ;;  %14914 = vmatprep.subr.bf16.mxu1 %v22070_v51  ;;  %v22143_v49 = vld [vmem:[%s25505_s29 + $0x138] ss:$148 sps:$4 sm:$0xff]   ;;  %v22146_v50 = vld [vmem:[%s25505_s29 + $0x140] ss:$148 sps:$4 sm:$0xff]  }
 0x10b   : > { %v22151_v51 = vld [vmem:[%s25505_s29 + $0x264] ss:$148 sps:$4 sm:$0xff]  }
 0x10d   : > { %14751 = vmatpush1.bf16.msra.mxu0 %v22065_v52  ;;  %14915 = vmatpush1.bf16.msra.mxu1 %v22068_v53  ;;  %v22154_v52 = vld [vmem:[%s25505_s29 + $0x26c] ss:$148 sps:$4 sm:$0xff]  }
 0x10e   : > { %14752 = vmatprep.subr.bf16.mxu0 %v22073_v54  ;;  %14916 = vmatprep.subr.bf16.mxu1 %v22076_v55  ;;  %v22149_v53 = vld [vmem:[%s25505_s29 + $0x260] ss:$148 sps:$4 sm:$0xff]   ;;  %v22152_v54 = vld [vmem:[%s25505_s29 + $0x268] ss:$148 sps:$4 sm:$0xff]  }
 0x10f   : > { %v22157_v55 = vld [vmem:[%s25505_s29 + $0x38c] ss:$148 sps:$4 sm:$0xff]  }
 0x111   : > { %14753 = vmatpush1.bf16.msra.mxu0 %v22071_v56  ;;  %14917 = vmatpush1.bf16.msra.mxu1 %v22074_v57  ;;  %v22160_v56 = vld [vmem:[%s25505_s29 + $0x394] ss:$148 sps:$4 sm:$0xff]  }
 0x112   : > { %14754 = vmatprep.subr.bf16.mxu0 %v22079_v58  ;;  %14918 = vmatprep.subr.bf16.mxu1 %v22082_v59  ;;  %v22155_v57 = vld [vmem:[%s25505_s29 + $0x388] ss:$148 sps:$4 sm:$0xff]   ;;  %v22158_v58 = vld [vmem:[%s25505_s29 + $0x390] ss:$148 sps:$4 sm:$0xff]  }
 0x113   : > { %v22163_v59 = vld [vmem:[%s25505_s29 + $0x4b4] ss:$148 sps:$4 sm:$0xff]  }
 0x115   : > { %14755 = vmatpush1.bf16.msra.mxu0 %v22077_v60  ;;  %14919 = vmatpush1.bf16.msra.mxu1 %v22080_v62  ;;  %v22166_v60 = vld [vmem:[%s25505_s29 + $0x4bc] ss:$148 sps:$4 sm:$0xff]  }
 0x116   : > { %14756 = vmatprep.subr.bf16.mxu0 %v22085_v63  ;;  %14920 = vmatprep.subr.bf16.mxu1 %v22088_v0  ;;  %v22161_v62 = vld [vmem:[%s25505_s29 + $0x4b0] ss:$148 sps:$4 sm:$0xff]   ;;  %v22164_v63 = vld [vmem:[%s25505_s29 + $0x4b8] ss:$148 sps:$4 sm:$0xff]  }
 0x117   : > { %v22169_v0 = vld [vmem:[%s25505_s29 + $0x5dc] ss:$148 sps:$4 sm:$0xff]  }
 0x119   : > { %14757 = vmatpush1.bf16.msra.mxu0 %v22083_v1  ;;  %14921 = vmatpush1.bf16.msra.mxu1 %v22086_v2  ;;  %v22172_v1 = vld [vmem:[%s25505_s29 + $0x5e4] ss:$148 sps:$4 sm:$0xff]  }
 0x11a   : > { %14758 = vmatprep.subr.bf16.mxu0 %v22091_v3  ;;  %14922 = vmatprep.subr.bf16.mxu1 %v22094_v4  ;;  %v22167_v2 = vld [vmem:[%s25505_s29 + $0x5d8] ss:$148 sps:$4 sm:$0xff]   ;;  %v22170_v3 = vld [vmem:[%s25505_s29 + $0x5e0] ss:$148 sps:$4 sm:$0xff]  }
 0x11b   : > { %v22175_v4 = vld [vmem:[%s25505_s29 + $0x704] ss:$148 sps:$4 sm:$0xff]  }
 0x11d   : > { %14759 = vmatpush1.bf16.msra.mxu0 %v22089_v5  ;;  %14923 = vmatpush1.bf16.msra.mxu1 %v22092_v6  ;;  %v22178_v5 = vld [vmem:[%s25505_s29 + $0x70c] ss:$148 sps:$4 sm:$0xff]  }
 0x11e   : > { %14760 = vmatprep.subr.bf16.mxu0 %v22097_v7  ;;  %14924 = vmatprep.subr.bf16.mxu1 %v22100_v8  ;;  %v22173_v6 = vld [vmem:[%s25505_s29 + $0x700] ss:$148 sps:$4 sm:$0xff]   ;;  %v22176_v7 = vld [vmem:[%s25505_s29 + $0x708] ss:$148 sps:$4 sm:$0xff]  }
 0x11f   : > { %v22181_v8 = vld [vmem:[%s25505_s29 + $0x82c] ss:$148 sps:$4 sm:$0xff]  }
 0x121   : > { %14761 = vmatpush1.bf16.msra.mxu0 %v22095_v9  ;;  %14925 = vmatpush1.bf16.msra.mxu1 %v22098_v10  ;;  %v22184_v9 = vld [vmem:[%s25505_s29 + $0x834] ss:$148 sps:$4 sm:$0xff]  }
 0x122   : > { %14762 = vmatprep.subr.bf16.mxu0 %v22103_v11  ;;  %14926 = vmatprep.subr.bf16.mxu1 %v22106_v12  ;;  %v22179_v10 = vld [vmem:[%s25505_s29 + $0x828] ss:$148 sps:$4 sm:$0xff]   ;;  %v22182_v11 = vld [vmem:[%s25505_s29 + $0x830] ss:$148 sps:$4 sm:$0xff]  }
 0x123   : > { %v22187_v12 = vld [vmem:[%s25505_s29 + $0x954] ss:$148 sps:$4 sm:$0xff]  }
 0x125   : > { %14763 = vmatpush1.bf16.msra.mxu0 %v22101_v13  ;;  %14927 = vmatpush1.bf16.msra.mxu1 %v22104_v14  ;;  %v22190_v13 = vld [vmem:[%s25505_s29 + $0x95c] ss:$148 sps:$4 sm:$0xff]  }
 0x126   : > { %14764 = vmatprep.subr.bf16.mxu0 %v22109_v15  ;;  %14928 = vmatprep.subr.bf16.mxu1 %v22112_v17  ;;  %v22185_v14 = vld [vmem:[%s25505_s29 + $0x950] ss:$148 sps:$4 sm:$0xff]   ;;  %v22188_v15 = vld [vmem:[%s25505_s29 + $0x958] ss:$148 sps:$4 sm:$0xff]  }
 0x127   : > { %v22193_v17 = vld [vmem:[%s25505_s29 + $0xa7c] ss:$148 sps:$4 sm:$0xff]  }
 0x129   : > { %14765 = vmatpush1.bf16.msra.mxu0 %v22107_v18  ;;  %14929 = vmatpush1.bf16.msra.mxu1 %v22110_v19  ;;  %v22196_v18 = vld [vmem:[%s25505_s29 + $0xa84] ss:$148 sps:$4 sm:$0xff]  }
 0x12a   : > { %14766 = vmatprep.subr.bf16.mxu0 %v22115_v20  ;;  %14930 = vmatprep.subr.bf16.mxu1 %v22118_v24  ;;  %v22191_v19 = vld [vmem:[%s25505_s29 + $0xa78] ss:$148 sps:$4 sm:$0xff]   ;;  %v22194_v20 = vld [vmem:[%s25505_s29 + $0xa80] ss:$148 sps:$4 sm:$0xff]  }
 0x12b   : > { %v22199_v24 = vld [vmem:[%s25505_s29 + $0xba4] ss:$148 sps:$4 sm:$0xff]  }
 0x12d   : > { %14767 = vmatpush1.bf16.msra.mxu0 %v22113_v25  ;;  %14931 = vmatpush1.bf16.msra.mxu1 %v22116_v26  ;;  %v22202_v25 = vld [vmem:[%s25505_s29 + $0xbac] ss:$148 sps:$4 sm:$0xff]  }
 0x12e   : > { %14768 = vmatprep.subr.bf16.mxu0 %v22121_v28  ;;  %14932 = vmatprep.subr.bf16.mxu1 %v22124_v29  ;;  %v22197_v26 = vld [vmem:[%s25505_s29 + $0xba0] ss:$148 sps:$4 sm:$0xff]   ;;  %v22200_v28 = vld [vmem:[%s25505_s29 + $0xba8] ss:$148 sps:$4 sm:$0xff]  }
 0x12f   : > { %v22205_v29 = vld [vmem:[%s25505_s29 + $0xccc] ss:$148 sps:$4 sm:$0xff]  }
 0x131   : > { %14769 = vmatpush1.bf16.msra.mxu0 %v22119_v30  ;;  %14933 = vmatpush1.bf16.msra.mxu1 %v22122_v31  ;;  %v22208_v30 = vld [vmem:[%s25505_s29 + $0xcd4] ss:$148 sps:$4 sm:$0xff]  }
 0x132   : > { %14770 = vmatprep.subr.bf16.mxu0 %v22127_v32  ;;  %14934 = vmatprep.subr.bf16.mxu1 %v22130_v33  ;;  %v22203_v31 = vld [vmem:[%s25505_s29 + $0xcc8] ss:$148 sps:$4 sm:$0xff]   ;;  %v22206_v32 = vld [vmem:[%s25505_s29 + $0xcd0] ss:$148 sps:$4 sm:$0xff]  }
 0x133   : > { %v22211_v33 = vld [vmem:[%s25505_s29 + $0xdf4] ss:$148 sps:$4 sm:$0xff]  }
 0x135   : > { %14771 = vmatpush1.bf16.msra.mxu0 %v22125_v34  ;;  %14935 = vmatpush1.bf16.msra.mxu1 %v22128_v35  ;;  %v22214_v34 = vld [vmem:[%s25505_s29 + $0xdfc] ss:$148 sps:$4 sm:$0xff]  }
 0x136   : > { %14772 = vmatprep.subr.bf16.mxu0 %v22133_v36  ;;  %14936 = vmatprep.subr.bf16.mxu1 %v22136_v37  ;;  %v22209_v35 = vld [vmem:[%s25505_s29 + $0xdf0] ss:$148 sps:$4 sm:$0xff]   ;;  %v22212_v36 = vld [vmem:[%s25505_s29 + $0xdf8] ss:$148 sps:$4 sm:$0xff]  }
 0x137   : > { %v22217_v37 = vld [vmem:[%s25505_s29 + $0xf1c] ss:$148 sps:$4 sm:$0xff]  }
 0x139   : > { %14773 = vmatpush1.bf16.msra.mxu0 %v22131_v39  ;;  %14937 = vmatpush1.bf16.msra.mxu1 %v22134_v40  ;;  %v22220_v39 = vld [vmem:[%s25505_s29 + $0xf24] ss:$148 sps:$4 sm:$0xff]  }
 0x13a   : > { %14947 = vmatprep.subr.bf16.mxu0 %v22139_v41  ;;  %15111 = vmatprep.subr.bf16.mxu1 %v22142_v42  ;;  %v22215_v40 = vld [vmem:[%s25505_s29 + $0xf18] ss:$148 sps:$4 sm:$0xff]   ;;  %v22218_v41 = vld [vmem:[%s25505_s29 + $0xf20] ss:$148 sps:$4 sm:$0xff]  }
 0x13b   : > { %v22223_v42 = vld [vmem:[%s25505_s29 + $0x1044] ss:$148 sps:$4 sm:$0xff]  }
 0x13c   : > { %14775 = vmatmul.mubr.bf16.vlgmr.msra.gmra.mrb[0].mxu0 %v25829_v43  ;;  %14939 = vmatmul.mubr.bf16.vlgmr.msra.gmra.mrb[0].mxu1 %v25829_v43 }
 0x13d   : > { %14948 = vmatpush1.bf16.msra.mxu0 %v22137_v45  ;;  %15112 = vmatpush1.bf16.msra.mxu1 %v22140_v46  ;;  %v22226_v45 = vld [vmem:[%s25505_s29 + $0x104c] ss:$148 sps:$4 sm:$0xff]  }
 0x13e   : > { %14949 = vmatprep.subr.bf16.mxu0 %v22145_v47  ;;  %15113 = vmatprep.subr.bf16.mxu1 %v22148_v48  ;;  %v22221_v46 = vld [vmem:[%s25505_s29 + $0x1040] ss:$148 sps:$4 sm:$0xff]   ;;  %v22224_v47 = vld [vmem:[%s25505_s29 + $0x1048] ss:$148 sps:$4 sm:$0xff]  }
 0x13f   : > { %14979 = vmatprep.mubr.bf16.mxu0 %v25582_v61  ;;  %15143 = vmatprep.mubr.bf16.mxu1 %v25582_v61  ;;  %v22229_v48 = vld [vmem:[%s25505_s29 + $0x116c] ss:$148 sps:$4 sm:$0xff]  }
 0x141   : > { %14950 = vmatpush1.bf16.msra.mxu0 %v22143_v49  ;;  %15114 = vmatpush1.bf16.msra.mxu1 %v22146_v50  ;;  %v22232_v49 = vld [vmem:[%s25505_s29 + $0x1174] ss:$148 sps:$4 sm:$0xff]  }
 0x142   : > { %14951 = vmatprep.subr.bf16.mxu0 %v22151_v51  ;;  %15115 = vmatprep.subr.bf16.mxu1 %v22154_v52  ;;  %v22227_v50 = vld [vmem:[%s25505_s29 + $0x1168] ss:$148 sps:$4 sm:$0xff]   ;;  %v22230_v51 = vld [vmem:[%s25505_s29 + $0x1170] ss:$148 sps:$4 sm:$0xff]  }
 0x143   : > { %v22235_v52 = vld [vmem:[%s25505_s29 + $0x1294] ss:$148 sps:$4 sm:$0xff]  }
 0x145   : > { %14952 = vmatpush1.bf16.msra.mxu0 %v22149_v53  ;;  %15116 = vmatpush1.bf16.msra.mxu1 %v22152_v54  ;;  %v22238_v53 = vld [vmem:[%s25505_s29 + $0x129c] ss:$148 sps:$4 sm:$0xff]  }
 0x146   : > { %14953 = vmatprep.subr.bf16.mxu0 %v22157_v55  ;;  %15117 = vmatprep.subr.bf16.mxu1 %v22160_v56  ;;  %v22233_v54 = vld [vmem:[%s25505_s29 + $0x1290] ss:$148 sps:$4 sm:$0xff]   ;;  %v22236_v55 = vld [vmem:[%s25505_s29 + $0x1298] ss:$148 sps:$4 sm:$0xff]  }
 0x147   : > { %v22241_v56 = vld [vmem:[%s25505_s29 + $0x13bc] ss:$148 sps:$4 sm:$0xff]  }
 0x149   : > { %14954 = vmatpush1.bf16.msra.mxu0 %v22155_v57  ;;  %15118 = vmatpush1.bf16.msra.mxu1 %v22158_v58  ;;  %v22244_v57 = vld [vmem:[%s25505_s29 + $0x13c4] ss:$148 sps:$4 sm:$0xff]  }
 0x14a   : > { %14955 = vmatprep.subr.bf16.mxu0 %v22163_v59  ;;  %15119 = vmatprep.subr.bf16.mxu1 %v22166_v60  ;;  %v22239_v58 = vld [vmem:[%s25505_s29 + $0x13b8] ss:$148 sps:$4 sm:$0xff]   ;;  %v22242_v59 = vld [vmem:[%s25505_s29 + $0x13c0] ss:$148 sps:$4 sm:$0xff]  }
 0x14b   : > { %v22247_v60 = vld [vmem:[%s25505_s29 + $0x14e4] ss:$148 sps:$4 sm:$0xff]  }
 0x14d   : > { %14956 = vmatpush1.bf16.msra.mxu0 %v22161_v62  ;;  %15120 = vmatpush1.bf16.msra.mxu1 %v22164_v63  ;;  %v22250_v62 = vld [vmem:[%s25505_s29 + $0x14ec] ss:$148 sps:$4 sm:$0xff]  }
 0x14e   : > { %14957 = vmatprep.subr.bf16.mxu0 %v22169_v0  ;;  %15121 = vmatprep.subr.bf16.mxu1 %v22172_v1  ;;  %v22245_v63 = vld [vmem:[%s25505_s29 + $0x14e0] ss:$148 sps:$4 sm:$0xff]   ;;  %v22248_v0 = vld [vmem:[%s25505_s29 + $0x14e8] ss:$148 sps:$4 sm:$0xff]  }
 0x14f   : > { %v22253_v1 = vld [vmem:[%s25505_s29 + $0x160c] ss:$148 sps:$4 sm:$0xff]  }
 0x151   : > { %14958 = vmatpush1.bf16.msra.mxu0 %v22167_v2  ;;  %15122 = vmatpush1.bf16.msra.mxu1 %v22170_v3  ;;  %v22256_v2 = vld [vmem:[%s25505_s29 + $0x1614] ss:$148 sps:$4 sm:$0xff]  }
 0x152   : > { %14959 = vmatprep.subr.bf16.mxu0 %v22175_v4  ;;  %15123 = vmatprep.subr.bf16.mxu1 %v22178_v5  ;;  %v22251_v3 = vld [vmem:[%s25505_s29 + $0x1608] ss:$148 sps:$4 sm:$0xff]   ;;  %v22254_v4 = vld [vmem:[%s25505_s29 + $0x1610] ss:$148 sps:$4 sm:$0xff]  }
 0x153   : > { %v22259_v5 = vld [vmem:[%s25505_s29 + $0x1734] ss:$148 sps:$4 sm:$0xff]  }
 0x155   : > { %14960 = vmatpush1.bf16.msra.mxu0 %v22173_v6  ;;  %15124 = vmatpush1.bf16.msra.mxu1 %v22176_v7  ;;  %v22262_v6 = vld [vmem:[%s25505_s29 + $0x173c] ss:$148 sps:$4 sm:$0xff]  }
 0x156   : > { %14961 = vmatprep.subr.bf16.mxu0 %v22181_v8  ;;  %15125 = vmatprep.subr.bf16.mxu1 %v22184_v9  ;;  %v22257_v7 = vld [vmem:[%s25505_s29 + $0x1730] ss:$148 sps:$4 sm:$0xff]   ;;  %v22260_v8 = vld [vmem:[%s25505_s29 + $0x1738] ss:$148 sps:$4 sm:$0xff]  }
 0x157   : > { %v22265_v9 = vld [vmem:[%s25505_s29 + $0x185c] ss:$148 sps:$4 sm:$0xff]  }
 0x159   : > { %14962 = vmatpush1.bf16.msra.mxu0 %v22179_v10  ;;  %15126 = vmatpush1.bf16.msra.mxu1 %v22182_v11  ;;  %v22268_v10 = vld [vmem:[%s25505_s29 + $0x1864] ss:$148 sps:$4 sm:$0xff]  }
 0x15a   : > { %14963 = vmatprep.subr.bf16.mxu0 %v22187_v12  ;;  %15127 = vmatprep.subr.bf16.mxu1 %v22190_v13  ;;  %v22263_v11 = vld [vmem:[%s25505_s29 + $0x1858] ss:$148 sps:$4 sm:$0xff]   ;;  %v22266_v12 = vld [vmem:[%s25505_s29 + $0x1860] ss:$148 sps:$4 sm:$0xff]  }
 0x15b   : > { %v22271_v13 = vld [vmem:[%s25505_s29 + $0x1984] ss:$148 sps:$4 sm:$0xff]  }
 0x15d   : > { %14964 = vmatpush1.bf16.msra.mxu0 %v22185_v14  ;;  %15128 = vmatpush1.bf16.msra.mxu1 %v22188_v15  ;;  %v22274_v14 = vld [vmem:[%s25505_s29 + $0x198c] ss:$148 sps:$4 sm:$0xff]  }
 0x15e   : > { %14965 = vmatprep.subr.bf16.mxu0 %v22193_v17  ;;  %15129 = vmatprep.subr.bf16.mxu1 %v22196_v18  ;;  %v22269_v15 = vld [vmem:[%s25505_s29 + $0x1980] ss:$148 sps:$4 sm:$0xff]   ;;  %v22272_v17 = vld [vmem:[%s25505_s29 + $0x1988] ss:$148 sps:$4 sm:$0xff]  }
 0x15f   : > { %v22277_v18 = vld [vmem:[%s25505_s29 + $0x1aac] ss:$148 sps:$4 sm:$0xff]  }
 0x161   : > { %14966 = vmatpush1.bf16.msra.mxu0 %v22191_v19  ;;  %15130 = vmatpush1.bf16.msra.mxu1 %v22194_v20  ;;  %v22280_v19 = vld [vmem:[%s25505_s29 + $0x1ab4] ss:$148 sps:$4 sm:$0xff]  }
 0x162   : > { %14967 = vmatprep.subr.bf16.mxu0 %v22199_v24  ;;  %15131 = vmatprep.subr.bf16.mxu1 %v22202_v25  ;;  %v22275_v20 = vld [vmem:[%s25505_s29 + $0x1aa8] ss:$148 sps:$4 sm:$0xff]   ;;  %v22278_v24 = vld [vmem:[%s25505_s29 + $0x1ab0] ss:$148 sps:$4 sm:$0xff]  }
 0x163   : > { %v22283_v25 = vld [vmem:[%s25505_s29 + $0x1bd4] ss:$148 sps:$4 sm:$0xff]  }
 0x165   : > { %14968 = vmatpush1.bf16.msra.mxu0 %v22197_v26  ;;  %15132 = vmatpush1.bf16.msra.mxu1 %v22200_v28  ;;  %v22286_v26 = vld [vmem:[%s25505_s29 + $0x1bdc] ss:$148 sps:$4 sm:$0xff]  }
 0x166   : > { %14969 = vmatprep.subr.bf16.mxu0 %v22205_v29  ;;  %15133 = vmatprep.subr.bf16.mxu1 %v22208_v30  ;;  %v22281_v28 = vld [vmem:[%s25505_s29 + $0x1bd0] ss:$148 sps:$4 sm:$0xff]   ;;  %v22284_v29 = vld [vmem:[%s25505_s29 + $0x1bd8] ss:$148 sps:$4 sm:$0xff]  }
 0x167   : > { %v22289_v30 = vld [vmem:[%s25505_s29 + $0x1cfc] ss:$148 sps:$4 sm:$0xff]  }
 0x169   : > { %14970 = vmatpush1.bf16.msra.mxu0 %v22203_v31  ;;  %15134 = vmatpush1.bf16.msra.mxu1 %v22206_v32  ;;  %v22292_v31 = vld [vmem:[%s25505_s29 + $0x1d04] ss:$148 sps:$4 sm:$0xff]  }
 0x16a   : > { %14971 = vmatprep.subr.bf16.mxu0 %v22211_v33  ;;  %15135 = vmatprep.subr.bf16.mxu1 %v22214_v34  ;;  %v22287_v32 = vld [vmem:[%s25505_s29 + $0x1cf8] ss:$148 sps:$4 sm:$0xff]   ;;  %v22290_v33 = vld [vmem:[%s25505_s29 + $0x1d00] ss:$148 sps:$4 sm:$0xff]  }
 0x16b   : > { %v22295_v34 = vld [vmem:[%s25505_s29 + $0x1e24] ss:$148 sps:$4 sm:$0xff]  }
 0x16d   : > { %14972 = vmatpush1.bf16.msra.mxu0 %v22209_v35  ;;  %15136 = vmatpush1.bf16.msra.mxu1 %v22212_v36  ;;  %v22298_v35 = vld [vmem:[%s25505_s29 + $0x1e2c] ss:$148 sps:$4 sm:$0xff]  }
 0x16e   : > { %14973 = vmatprep.subr.bf16.mxu0 %v22217_v37  ;;  %15137 = vmatprep.subr.bf16.mxu1 %v22220_v39  ;;  %v22293_v36 = vld [vmem:[%s25505_s29 + $0x1e20] ss:$148 sps:$4 sm:$0xff]   ;;  %v22296_v37 = vld [vmem:[%s25505_s29 + $0x1e28] ss:$148 sps:$4 sm:$0xff]  }
 0x16f   : > { %v22301_v39 = vld [vmem:[%s25505_s29 + $0x1f4c] ss:$148 sps:$4 sm:$0xff]  }
 0x171   : > { %14974 = vmatpush1.bf16.msra.mxu0 %v22215_v40  ;;  %15138 = vmatpush1.bf16.msra.mxu1 %v22218_v41  ;;  %v22304_v40 = vld [vmem:[%s25505_s29 + $0x1f54] ss:$148 sps:$4 sm:$0xff]  }
 0x172   : > { %14975 = vmatprep.subr.bf16.mxu0 %v22223_v42  ;;  %15139 = vmatprep.subr.bf16.mxu1 %v22226_v45  ;;  %v22299_v41 = vld [vmem:[%s25505_s29 + $0x1f48] ss:$148 sps:$4 sm:$0xff]   ;;  %v22302_v42 = vld [vmem:[%s25505_s29 + $0x1f50] ss:$148 sps:$4 sm:$0xff]  }
 0x173   : > { %v22307_v45 = vld [vmem:[%s25505_s29 + $0x2074] ss:$148 sps:$4 sm:$0xff]  }
 0x175   : > { %14976 = vmatpush1.bf16.msra.mxu0 %v22221_v46  ;;  %15140 = vmatpush1.bf16.msra.mxu1 %v22224_v47  ;;  %v22310_v46 = vld [vmem:[%s25505_s29 + $0x207c] ss:$148 sps:$4 sm:$0xff]  }
 0x176   : > { %14977 = vmatprep.subr.bf16.mxu0 %v22229_v48  ;;  %15141 = vmatprep.subr.bf16.mxu1 %v22232_v49  ;;  %v22305_v47 = vld [vmem:[%s25505_s29 + $0x2070] ss:$148 sps:$4 sm:$0xff]   ;;  %v22308_v48 = vld [vmem:[%s25505_s29 + $0x2078] ss:$148 sps:$4 sm:$0xff]  }
 0x177   : > { %v22313_v49 = vld [vmem:[%s25505_s29 + $0x219c] ss:$148 sps:$4 sm:$0xff]  }
 0x179   : > { %14978 = vmatpush1.bf16.msra.mxu0 %v22227_v50  ;;  %15142 = vmatpush1.bf16.msra.mxu1 %v22230_v51  ;;  %v22316_v50 = vld [vmem:[%s25505_s29 + $0x21a4] ss:$148 sps:$4 sm:$0xff]  }
 0x17a   : > { %14988 = vmatprep.subr.bf16.mxu0 %v22235_v52  ;;  %15152 = vmatprep.subr.bf16.mxu1 %v22238_v53  ;;  %v22311_v51 = vld [vmem:[%s25505_s29 + $0x2198] ss:$148 sps:$4 sm:$0xff]   ;;  %v22314_v52 = vld [vmem:[%s25505_s29 + $0x21a0] ss:$148 sps:$4 sm:$0xff]  }
 0x17b   : > { %v22319_v53 = vld [vmem:[%s25505_s29 + $0x22c4] ss:$148 sps:$4 sm:$0xff]  }
 0x17c   : > { %14980 = vmatmul.mubr.bf16.vlgmr.msra.gmra.mrb[4].mxu0 %v25604_v16  ;;  %15144 = vmatmul.mubr.bf16.vlgmr.msra.gmra.mrb[4].mxu1 %v25604_v16 }
 0x17d   : > { %14989 = vmatpush1.bf16.msra.mxu0 %v22233_v54  ;;  %15153 = vmatpush1.bf16.msra.mxu1 %v22236_v55  ;;  %v22322_v54 = vld [vmem:[%s25505_s29 + $0x22cc] ss:$148 sps:$4 sm:$0xff]  }
 0x17e   : > { %14990 = vmatprep.subr.bf16.mxu0 %v22241_v56  ;;  %15154 = vmatprep.subr.bf16.mxu1 %v22244_v57  ;;  %v22317_v55 = vld [vmem:[%s25505_s29 + $0x22c0] ss:$148 sps:$4 sm:$0xff]   ;;  %v22320_v56 = vld [vmem:[%s25505_s29 + $0x22c8] ss:$148 sps:$4 sm:$0xff]  }
 0x17f   : > { %15020 = vmatprep.mubr.bf16.mxu0 %v25617_v23  ;;  %15184 = vmatprep.mubr.bf16.mxu1 %v25617_v23  ;;  %v22325_v57 = vld [vmem:[%s25505_s29 + $0x23ec] ss:$148 sps:$4 sm:$0xff]  }
 0x181   : > { %14991 = vmatpush1.bf16.msra.mxu0 %v22239_v58  ;;  %15155 = vmatpush1.bf16.msra.mxu1 %v22242_v59  ;;  %v22328_v58 = vld [vmem:[%s25505_s29 + $0x23f4] ss:$148 sps:$4 sm:$0xff]  }
 0x182   : > { %14992 = vmatprep.subr.bf16.mxu0 %v22247_v60  ;;  %15156 = vmatprep.subr.bf16.mxu1 %v22250_v62  ;;  %v22323_v59 = vld [vmem:[%s25505_s29 + $0x23e8] ss:$148 sps:$4 sm:$0xff]   ;;  %v22326_v60 = vld [vmem:[%s25505_s29 + $0x23f0] ss:$148 sps:$4 sm:$0xff]  }
 0x183   : > { %v22331_v62 = vld [vmem:[%s25505_s29 + $0x2514] ss:$148 sps:$4 sm:$0xff]  }
 0x185   : > { %14993 = vmatpush1.bf16.msra.mxu0 %v22245_v63  ;;  %15157 = vmatpush1.bf16.msra.mxu1 %v22248_v0  ;;  %v22334_v63 = vld [vmem:[%s25505_s29 + $0x251c] ss:$148 sps:$4 sm:$0xff]  }
 0x186   : > { %14994 = vmatprep.subr.bf16.mxu0 %v22253_v1  ;;  %15158 = vmatprep.subr.bf16.mxu1 %v22256_v2  ;;  %v22329_v0 = vld [vmem:[%s25505_s29 + $0x2510] ss:$148 sps:$4 sm:$0xff]   ;;  %v22332_v1 = vld [vmem:[%s25505_s29 + $0x2518] ss:$148 sps:$4 sm:$0xff]  }
 0x187   : > { %v22337_v2 = vld [vmem:[%s25505_s29 + $0x263c] ss:$148 sps:$4 sm:$0xff]  }
 0x189   : > { %14995 = vmatpush1.bf16.msra.mxu0 %v22251_v3  ;;  %15159 = vmatpush1.bf16.msra.mxu1 %v22254_v4  ;;  %v22340_v3 = vld [vmem:[%s25505_s29 + $0x2644] ss:$148 sps:$4 sm:$0xff]  }
 0x18a   : > { %14996 = vmatprep.subr.bf16.mxu0 %v22259_v5  ;;  %15160 = vmatprep.subr.bf16.mxu1 %v22262_v6  ;;  %v22335_v4 = vld [vmem:[%s25505_s29 + $0x2638] ss:$148 sps:$4 sm:$0xff]   ;;  %v22338_v5 = vld [vmem:[%s25505_s29 + $0x2640] ss:$148 sps:$4 sm:$0xff]  }
 0x18b   : > { %v22343_v6 = vld [vmem:[%s25505_s29 + $0x2764] ss:$148 sps:$4 sm:$0xff]  }
 0x18d   : > { %14997 = vmatpush1.bf16.msra.mxu0 %v22257_v7  ;;  %15161 = vmatpush1.bf16.msra.mxu1 %v22260_v8  ;;  %v22346_v7 = vld [vmem:[%s25505_s29 + $0x276c] ss:$148 sps:$4 sm:$0xff]  }
 0x18e   : > { %14998 = vmatprep.subr.bf16.mxu0 %v22265_v9  ;;  %15162 = vmatprep.subr.bf16.mxu1 %v22268_v10  ;;  %v22341_v8 = vld [vmem:[%s25505_s29 + $0x2760] ss:$148 sps:$4 sm:$0xff]   ;;  %v22344_v9 = vld [vmem:[%s25505_s29 + $0x2768] ss:$148 sps:$4 sm:$0xff]  }
 0x18f   : > { %v22349_v10 = vld [vmem:[%s25505_s29 + $0x288c] ss:$148 sps:$4 sm:$0xff]  }
 0x191   : > { %14999 = vmatpush1.bf16.msra.mxu0 %v22263_v11  ;;  %15163 = vmatpush1.bf16.msra.mxu1 %v22266_v12  ;;  %v22352_v11 = vld [vmem:[%s25505_s29 + $0x2894] ss:$148 sps:$4 sm:$0xff]  }
 0x192   : > { %15000 = vmatprep.subr.bf16.mxu0 %v22271_v13  ;;  %15164 = vmatprep.subr.bf16.mxu1 %v22274_v14  ;;  %v22347_v12 = vld [vmem:[%s25505_s29 + $0x2888] ss:$148 sps:$4 sm:$0xff]   ;;  %v22350_v13 = vld [vmem:[%s25505_s29 + $0x2890] ss:$148 sps:$4 sm:$0xff]  }
 0x193   : > { %v22355_v14 = vld [vmem:[%s25505_s29 + $0x29b4] ss:$148 sps:$4 sm:$0xff]  }
 0x195   : > { %15001 = vmatpush1.bf16.msra.mxu0 %v22269_v15  ;;  %15165 = vmatpush1.bf16.msra.mxu1 %v22272_v17  ;;  %v22358_v15 = vld [vmem:[%s25505_s29 + $0x29bc] ss:$148 sps:$4 sm:$0xff]  }
 0x196   : > { %15002 = vmatprep.subr.bf16.mxu0 %v22277_v18  ;;  %15166 = vmatprep.subr.bf16.mxu1 %v22280_v19  ;;  %v22353_v17 = vld [vmem:[%s25505_s29 + $0x29b0] ss:$148 sps:$4 sm:$0xff]   ;;  %v22356_v18 = vld [vmem:[%s25505_s29 + $0x29b8] ss:$148 sps:$4 sm:$0xff]  }
 0x197   : > { %v22361_v19 = vld [vmem:[%s25505_s29 + $0x2adc] ss:$148 sps:$4 sm:$0xff]  }
 0x199   : > { %15003 = vmatpush1.bf16.msra.mxu0 %v22275_v20  ;;  %15167 = vmatpush1.bf16.msra.mxu1 %v22278_v24  ;;  %v22364_v20 = vld [vmem:[%s25505_s29 + $0x2ae4] ss:$148 sps:$4 sm:$0xff]  }
 0x19a   : > { %15004 = vmatprep.subr.bf16.mxu0 %v22283_v25  ;;  %15168 = vmatprep.subr.bf16.mxu1 %v22286_v26  ;;  %v22359_v24 = vld [vmem:[%s25505_s29 + $0x2ad8] ss:$148 sps:$4 sm:$0xff]   ;;  %v22362_v25 = vld [vmem:[%s25505_s29 + $0x2ae0] ss:$148 sps:$4 sm:$0xff]  }
 0x19b   : > { %v22367_v26 = vld [vmem:[%s25505_s29 + $0x2c04] ss:$148 sps:$4 sm:$0xff]  }
 0x19d   : > { %15005 = vmatpush1.bf16.msra.mxu0 %v22281_v28  ;;  %15169 = vmatpush1.bf16.msra.mxu1 %v22284_v29  ;;  %v22370_v28 = vld [vmem:[%s25505_s29 + $0x2c0c] ss:$148 sps:$4 sm:$0xff]  }
 0x19e   : > { %15006 = vmatprep.subr.bf16.mxu0 %v22289_v30  ;;  %15170 = vmatprep.subr.bf16.mxu1 %v22292_v31  ;;  %v22365_v29 = vld [vmem:[%s25505_s29 + $0x2c00] ss:$148 sps:$4 sm:$0xff]   ;;  %v22368_v30 = vld [vmem:[%s25505_s29 + $0x2c08] ss:$148 sps:$4 sm:$0xff]  }
 0x19f   : > { %v22373_v31 = vld [vmem:[%s25505_s29 + $0x2d2c] ss:$148 sps:$4 sm:$0xff]  }
 0x1a1   : > { %15007 = vmatpush1.bf16.msra.mxu0 %v22287_v32  ;;  %15171 = vmatpush1.bf16.msra.mxu1 %v22290_v33  ;;  %v22376_v32 = vld [vmem:[%s25505_s29 + $0x2d34] ss:$148 sps:$4 sm:$0xff]  }
 0x1a2   : > { %15008 = vmatprep.subr.bf16.mxu0 %v22295_v34  ;;  %15172 = vmatprep.subr.bf16.mxu1 %v22298_v35  ;;  %v22371_v33 = vld [vmem:[%s25505_s29 + $0x2d28] ss:$148 sps:$4 sm:$0xff]   ;;  %v22374_v34 = vld [vmem:[%s25505_s29 + $0x2d30] ss:$148 sps:$4 sm:$0xff]  }
 0x1a3   : > { %v22379_v35 = vld [vmem:[%s25505_s29 + $0x2e54] ss:$148 sps:$4 sm:$0xff]  }
 0x1a5   : > { %15009 = vmatpush1.bf16.msra.mxu0 %v22293_v36  ;;  %15173 = vmatpush1.bf16.msra.mxu1 %v22296_v37  ;;  %v22382_v36 = vld [vmem:[%s25505_s29 + $0x2e5c] ss:$148 sps:$4 sm:$0xff]  }
 0x1a6   : > { %15010 = vmatprep.subr.bf16.mxu0 %v22301_v39  ;;  %15174 = vmatprep.subr.bf16.mxu1 %v22304_v40  ;;  %v22377_v37 = vld [vmem:[%s25505_s29 + $0x2e50] ss:$148 sps:$4 sm:$0xff]   ;;  %v22380_v39 = vld [vmem:[%s25505_s29 + $0x2e58] ss:$148 sps:$4 sm:$0xff]  }
 0x1a7   : > { %v22385_v40 = vld [vmem:[%s25505_s29 + $0x2f7c] ss:$148 sps:$4 sm:$0xff]  }
 0x1a9   : > { %15011 = vmatpush1.bf16.msra.mxu0 %v22299_v41  ;;  %15175 = vmatpush1.bf16.msra.mxu1 %v22302_v42  ;;  %v22388_v41 = vld [vmem:[%s25505_s29 + $0x2f84] ss:$148 sps:$4 sm:$0xff]  }
 0x1aa   : > { %15012 = vmatprep.subr.bf16.mxu0 %v22307_v45  ;;  %15176 = vmatprep.subr.bf16.mxu1 %v22310_v46  ;;  %v22383_v42 = vld [vmem:[%s25505_s29 + $0x2f78] ss:$148 sps:$4 sm:$0xff]   ;;  %v22386_v45 = vld [vmem:[%s25505_s29 + $0x2f80] ss:$148 sps:$4 sm:$0xff]  }
 0x1ab   : > { %v22391_v46 = vld [vmem:[%s25505_s29 + $0x30a4] ss:$148 sps:$4 sm:$0xff]  }
 0x1ad   : > { %15013 = vmatpush1.bf16.msra.mxu0 %v22305_v47  ;;  %15177 = vmatpush1.bf16.msra.mxu1 %v22308_v48  ;;  %v22394_v47 = vld [vmem:[%s25505_s29 + $0x30ac] ss:$148 sps:$4 sm:$0xff]  }
 0x1ae   : > { %15014 = vmatprep.subr.bf16.mxu0 %v22313_v49  ;;  %15178 = vmatprep.subr.bf16.mxu1 %v22316_v50  ;;  %v22389_v48 = vld [vmem:[%s25505_s29 + $0x30a0] ss:$148 sps:$4 sm:$0xff]   ;;  %v22392_v49 = vld [vmem:[%s25505_s29 + $0x30a8] ss:$148 sps:$4 sm:$0xff]  }
 0x1af   : > { %v22397_v50 = vld [vmem:[%s25505_s29 + $0x31cc] ss:$148 sps:$4 sm:$0xff]  }
 0x1b1   : > { %15015 = vmatpush1.bf16.msra.mxu0 %v22311_v51  ;;  %15179 = vmatpush1.bf16.msra.mxu1 %v22314_v52  ;;  %v22400_v51 = vld [vmem:[%s25505_s29 + $0x31d4] ss:$148 sps:$4 sm:$0xff]  }
 0x1b2   : > { %15016 = vmatprep.subr.bf16.mxu0 %v22319_v53  ;;  %15180 = vmatprep.subr.bf16.mxu1 %v22322_v54  ;;  %v22395_v52 = vld [vmem:[%s25505_s29 + $0x31c8] ss:$148 sps:$4 sm:$0xff]   ;;  %v22398_v53 = vld [vmem:[%s25505_s29 + $0x31d0] ss:$148 sps:$4 sm:$0xff]  }
 0x1b3   : > { %v22403_v54 = vld [vmem:[%s25505_s29 + $0x32f4] ss:$148 sps:$4 sm:$0xff]  }
 0x1b5   : > { %15017 = vmatpush1.bf16.msra.mxu0 %v22317_v55  ;;  %15181 = vmatpush1.bf16.msra.mxu1 %v22320_v56  ;;  %v22406_v55 = vld [vmem:[%s25505_s29 + $0x32fc] ss:$148 sps:$4 sm:$0xff]  }
 0x1b6   : > { %15018 = vmatprep.subr.bf16.mxu0 %v22325_v57  ;;  %15182 = vmatprep.subr.bf16.mxu1 %v22328_v58  ;;  %v22401_v56 = vld [vmem:[%s25505_s29 + $0x32f0] ss:$148 sps:$4 sm:$0xff]   ;;  %v22404_v57 = vld [vmem:[%s25505_s29 + $0x32f8] ss:$148 sps:$4 sm:$0xff]  }
 0x1b7   : > { %v22409_v58 = vld [vmem:[%s25505_s29 + $0x341c] ss:$148 sps:$4 sm:$0xff]  }
 0x1b9   : > { %15019 = vmatpush1.bf16.msra.mxu0 %v22323_v59  ;;  %15183 = vmatpush1.bf16.msra.mxu1 %v22326_v60  ;;  %v22412_v59 = vld [vmem:[%s25505_s29 + $0x3424] ss:$148 sps:$4 sm:$0xff]  }
 0x1ba   : > { %15029 = vmatprep.subr.bf16.mxu0 %v22331_v62  ;;  %15193 = vmatprep.subr.bf16.mxu1 %v22334_v63  ;;  %v22407_v60 = vld [vmem:[%s25505_s29 + $0x3418] ss:$148 sps:$4 sm:$0xff]   ;;  %v22410_v62 = vld [vmem:[%s25505_s29 + $0x3420] ss:$148 sps:$4 sm:$0xff]  }
 0x1bb   : > { %v22415_v63 = vld [vmem:[%s25505_s29 + $0x3544] ss:$148 sps:$4 sm:$0xff]  }
 0x1bc   : > { %15021 = vmatmul.mubr.bf16.vlgmr.msra.gmra.mrb[4].mxu0 %v25686_v27  ;;  %15185 = vmatmul.mubr.bf16.vlgmr.msra.gmra.mrb[4].mxu1 %v25686_v27 }
 0x1bd   : > { %15030 = vmatpush1.bf16.msra.mxu0 %v22329_v0  ;;  %15194 = vmatpush1.bf16.msra.mxu1 %v22332_v1  ;;  %v22418_v0 = vld [vmem:[%s25505_s29 + $0x354c] ss:$148 sps:$4 sm:$0xff]  }
 0x1be   : > { %15031 = vmatprep.subr.bf16.mxu0 %v22337_v2  ;;  %15195 = vmatprep.subr.bf16.mxu1 %v22340_v3  ;;  %v22413_v1 = vld [vmem:[%s25505_s29 + $0x3540] ss:$148 sps:$4 sm:$0xff]   ;;  %v22416_v2 = vld [vmem:[%s25505_s29 + $0x3548] ss:$148 sps:$4 sm:$0xff]  }
 0x1bf   : > { %15061 = vmatprep.mubr.bf16.mxu0 %v25610_v21  ;;  %15225 = vmatprep.mubr.bf16.mxu1 %v25610_v21  ;;  %v22421_v3 = vld [vmem:[%s25505_s29 + $0x366c] ss:$148 sps:$4 sm:$0xff]  }
 0x1c1   : > { %15032 = vmatpush1.bf16.msra.mxu0 %v22335_v4  ;;  %15196 = vmatpush1.bf16.msra.mxu1 %v22338_v5  ;;  %v22424_v4 = vld [vmem:[%s25505_s29 + $0x3674] ss:$148 sps:$4 sm:$0xff]  }
 0x1c2   : > { %15033 = vmatprep.subr.bf16.mxu0 %v22343_v6  ;;  %15197 = vmatprep.subr.bf16.mxu1 %v22346_v7  ;;  %v22419_v5 = vld [vmem:[%s25505_s29 + $0x3668] ss:$148 sps:$4 sm:$0xff]   ;;  %v22422_v6 = vld [vmem:[%s25505_s29 + $0x3670] ss:$148 sps:$4 sm:$0xff]  }
 0x1c3   : > { %v22427_v7 = vld [vmem:[%s25505_s29 + $0x3794] ss:$148 sps:$4 sm:$0xff]  }
 0x1c5   : > { %15034 = vmatpush1.bf16.msra.mxu0 %v22341_v8  ;;  %15198 = vmatpush1.bf16.msra.mxu1 %v22344_v9  ;;  %v22430_v8 = vld [vmem:[%s25505_s29 + $0x379c] ss:$148 sps:$4 sm:$0xff]  }
 0x1c6   : > { %15035 = vmatprep.subr.bf16.mxu0 %v22349_v10  ;;  %15199 = vmatprep.subr.bf16.mxu1 %v22352_v11  ;;  %v22425_v9 = vld [vmem:[%s25505_s29 + $0x3790] ss:$148 sps:$4 sm:$0xff]   ;;  %v22428_v10 = vld [vmem:[%s25505_s29 + $0x3798] ss:$148 sps:$4 sm:$0xff]  }
 0x1c7   : > { %v22433_v11 = vld [vmem:[%s25505_s29 + $0x38bc] ss:$148 sps:$4 sm:$0xff]  }
 0x1c9   : > { %15036 = vmatpush1.bf16.msra.mxu0 %v22347_v12  ;;  %15200 = vmatpush1.bf16.msra.mxu1 %v22350_v13  ;;  %v22436_v12 = vld [vmem:[%s25505_s29 + $0x38c4] ss:$148 sps:$4 sm:$0xff]  }
 0x1ca   : > { %15037 = vmatprep.subr.bf16.mxu0 %v22355_v14  ;;  %15201 = vmatprep.subr.bf16.mxu1 %v22358_v15  ;;  %v22431_v13 = vld [vmem:[%s25505_s29 + $0x38b8] ss:$148 sps:$4 sm:$0xff]   ;;  %v22434_v14 = vld [vmem:[%s25505_s29 + $0x38c0] ss:$148 sps:$4 sm:$0xff]  }
 0x1cb   : > { %v22439_v15 = vld [vmem:[%s25505_s29 + $0x39e4] ss:$148 sps:$4 sm:$0xff]  }
 0x1cd   : > { %15038 = vmatpush1.bf16.msra.mxu0 %v22353_v17  ;;  %15202 = vmatpush1.bf16.msra.mxu1 %v22356_v18  ;;  %v22442_v17 = vld [vmem:[%s25505_s29 + $0x39ec] ss:$148 sps:$4 sm:$0xff]  }
 0x1ce   : > { %15039 = vmatprep.subr.bf16.mxu0 %v22361_v19  ;;  %15203 = vmatprep.subr.bf16.mxu1 %v22364_v20  ;;  %v22437_v18 = vld [vmem:[%s25505_s29 + $0x39e0] ss:$148 sps:$4 sm:$0xff]   ;;  %v22440_v19 = vld [vmem:[%s25505_s29 + $0x39e8] ss:$148 sps:$4 sm:$0xff]  }
 0x1cf   : > { %v22445_v20 = vld [vmem:[%s25505_s29 + $0x3b0c] ss:$148 sps:$4 sm:$0xff]  }
 0x1d1   : > { %15040 = vmatpush1.bf16.msra.mxu0 %v22359_v24  ;;  %15204 = vmatpush1.bf16.msra.mxu1 %v22362_v25  ;;  %v22448_v24 = vld [vmem:[%s25505_s29 + $0x3b14] ss:$148 sps:$4 sm:$0xff]  }
 0x1d2   : > { %15041 = vmatprep.subr.bf16.mxu0 %v22367_v26  ;;  %15205 = vmatprep.subr.bf16.mxu1 %v22370_v28  ;;  %v22443_v25 = vld [vmem:[%s25505_s29 + $0x3b08] ss:$148 sps:$4 sm:$0xff]   ;;  %v22446_v26 = vld [vmem:[%s25505_s29 + $0x3b10] ss:$148 sps:$4 sm:$0xff]  }
 0x1d3   : > { %v22451_v28 = vld [vmem:[%s25505_s29 + $0x3c34] ss:$148 sps:$4 sm:$0xff]  }
 0x1d5   : > { %15042 = vmatpush1.bf16.msra.mxu0 %v22365_v29  ;;  %15206 = vmatpush1.bf16.msra.mxu1 %v22368_v30  ;;  %v22454_v29 = vld [vmem:[%s25505_s29 + $0x3c3c] ss:$148 sps:$4 sm:$0xff]   ;;  %v25396_v30 = vmov 1983009808  }
 0x1d6   : > { %15043 = vmatprep.subr.bf16.mxu0 %v22373_v31  ;;  %15207 = vmatprep.subr.bf16.mxu1 %v22376_v32  ;;  %v17771_v31 = vunpack.c.l.s4 %v25396_v30  ;;  %v22449_v32 = vld [vmem:[%s25505_s29 + $0x3c30] ss:$148 sps:$4 sm:$0xff]   ;;  %v22503_v30 = vld [vmem:[%s25505_s29 + $0x4698] ss:$148 sps:$4 sm:$0xff]  }
 0x1d9   : > { %15044 = vmatpush1.bf16.msra.mxu0 %v22371_v33  ;;  %15208 = vmatpush1.bf16.msra.mxu1 %v22374_v34  ;;  %v22452_v33 = vld [vmem:[%s25505_s29 + $0x3c38] ss:$148 sps:$4 sm:$0xff]   ;;  %v22457_v34 = vld [vmem:[%s25505_s29 + $0x3d5c] ss:$148 sps:$4 sm:$0xff]  }
 0x1da   : > { %15045 = vmatprep.subr.bf16.mxu0 %v22379_v35  ;;  %15209 = vmatprep.subr.bf16.mxu1 %v22382_v36  ;;  %v22460_v35 = vld [vmem:[%s25505_s29 + $0x3d64] ss:$148 sps:$4 sm:$0xff]   ;;  %v17772_v36 = vunpack.c.0.s8 %v17771_v31  ;;  %v22506_v31 = vld [vmem:[%s25505_s29 + $0x46a0] ss:$148 sps:$4 sm:$0xff]  }
 0x1dd   : > { %15046 = vmatpush1.bf16.msra.mxu0 %v22377_v37  ;;  %15210 = vmatpush1.bf16.msra.mxu1 %v22380_v39  ;;  %v22455_v37 = vld [vmem:[%s25505_s29 + $0x3d58] ss:$148 sps:$4 sm:$0xff]   ;;  %v22458_v39 = vld [vmem:[%s25505_s29 + $0x3d60] ss:$148 sps:$4 sm:$0xff]  }
 0x1de   : > { %15047 = vmatprep.subr.bf16.mxu0 %v22385_v40  ;;  %15211 = vmatprep.subr.bf16.mxu1 %v22388_v41  ;;  %v22463_v40 = vld [vmem:[%s25505_s29 + $0x3e84] ss:$148 sps:$4 sm:$0xff]   ;;  %v22466_v41 = vld [vmem:[%s25505_s29 + $0x3e8c] ss:$148 sps:$4 sm:$0xff]  }
 0x1e1   : > { %15048 = vmatpush1.bf16.msra.mxu0 %v22383_v42  ;;  %15212 = vmatpush1.bf16.msra.mxu1 %v22386_v45 }
 0x1e2   : > { %15049 = vmatprep.subr.bf16.mxu0 %v22391_v46  ;;  %15213 = vmatprep.subr.bf16.mxu1 %v22394_v47  ;;  %v26064_v46 = vsub.s32 %v17772_v36, %v25558_v44  ;;  %v22517_v36 = vld [vmem:[%s25505_s29 + $0x48ec] ss:$148 sps:$4 sm:$0xff]  }
 0x1e5   : > { %15050 = vmatpush1.bf16.msra.mxu0 %v22389_v48  ;;  %15214 = vmatpush1.bf16.msra.mxu1 %v22392_v49 }
 0x1e6   : > { %15051 = vmatprep.subr.bf16.mxu0 %v22397_v50  ;;  %15215 = vmatprep.subr.bf16.mxu1 %v22400_v51 }
 0x1e9   : > { %15052 = vmatpush1.bf16.msra.mxu0 %v22395_v52  ;;  %15216 = vmatpush1.bf16.msra.mxu1 %v22398_v53  ;;  %v22461_v53 = vld [vmem:[%s25505_s29 + $0x3e80] ss:$148 sps:$4 sm:$0xff]  }
 0x1ea   : > { %15053 = vmatprep.subr.bf16.mxu0 %v22403_v54  ;;  %15217 = vmatprep.subr.bf16.mxu1 %v22406_v55  ;;  %v22464_v54 = vld [vmem:[%s25505_s29 + $0x3e88] ss:$148 sps:$4 sm:$0xff]  }
 0x1eb   : > { %v214_v55 = vld [vmem:[#allocation2] sm:$0xff] }
 0x1ed   : > { %15054 = vmatpush1.bf16.msra.mxu0 %v22401_v56  ;;  %15218 = vmatpush1.bf16.msra.mxu1 %v22404_v57 }
 0x1ee   : > { %15055 = vmatprep.subr.bf16.mxu0 %v22409_v58  ;;  %15219 = vmatprep.subr.bf16.mxu1 %v22412_v59  ;;  %v22469_v58 = vld [vmem:[%s25505_s29 + $0x3fac] ss:$148 sps:$4 sm:$0xff]   ;;  %v22472_v59 = vld [vmem:[%s25505_s29 + $0x3fb4] ss:$148 sps:$4 sm:$0xff]  }
 0x1f1   : > { %15056 = vmatpush1.bf16.msra.mxu0 %v22407_v60  ;;  %15220 = vmatpush1.bf16.msra.mxu1 %v22410_v62 }
 0x1f2   : > { %15057 = vmatprep.subr.bf16.mxu0 %v22415_v63  ;;  %15221 = vmatprep.subr.bf16.mxu1 %v22418_v0  ;;  %v22467_v0 = vld [vmem:[%s25505_s29 + $0x3fa8] ss:$148 sps:$4 sm:$0xff]  }
 0x1f5   : > { %15058 = vmatpush1.bf16.msra.mxu0 %v22413_v1  ;;  %15222 = vmatpush1.bf16.msra.mxu1 %v22416_v2  ;;  %v22470_v1 = vld [vmem:[%s25505_s29 + $0x3fb0] ss:$148 sps:$4 sm:$0xff]   ;;  %v22475_v2 = vld [vmem:[%s25505_s29 + $0x40d4] ss:$148 sps:$4 sm:$0xff]  }
 0x1f6   : > { %15059 = vmatprep.subr.bf16.mxu0 %v22421_v3  ;;  %15223 = vmatprep.subr.bf16.mxu1 %v22424_v4  ;;  %v22478_v3 = vld [vmem:[%s25505_s29 + $0x40dc] ss:$148 sps:$4 sm:$0xff]  }
 0x1f9   : > { %15060 = vmatpush1.bf16.msra.mxu0 %v22419_v5  ;;  %15224 = vmatpush1.bf16.msra.mxu1 %v22422_v6  ;;  %v22473_v5 = vld [vmem:[%s25505_s29 + $0x40d0] ss:$148 sps:$4 sm:$0xff]   ;;  %v22476_v6 = vld [vmem:[%s25505_s29 + $0x40d8] ss:$148 sps:$4 sm:$0xff]  }
 0x1fa   : > { %15070 = vmatprep.subr.bf16.mxu0 %v22427_v7  ;;  %15234 = vmatprep.subr.bf16.mxu1 %v22430_v8  ;;  %v22481_v7 = vld [vmem:[%s25505_s29 + $0x41fc] ss:$148 sps:$4 sm:$0xff]   ;;  %v22484_v8 = vld [vmem:[%s25505_s29 + $0x4204] ss:$148 sps:$4 sm:$0xff]  }
 0x1fc   : > { %15062 = vmatmul.mubr.bf16.vlgmr.msra.gmra.mrb[4].mxu0 %v25613_v22  ;;  %15226 = vmatmul.mubr.bf16.vlgmr.msra.gmra.mrb[4].mxu1 %v25613_v22 }
 0x1fd   : > { %15071 = vmatpush1.bf16.msra.mxu0 %v22425_v9  ;;  %15235 = vmatpush1.bf16.msra.mxu1 %v22428_v10  ;;  %v22479_v9 = vld [vmem:[%s25505_s29 + $0x41f8] ss:$148 sps:$4 sm:$0xff]   ;;  %v22482_v10 = vld [vmem:[%s25505_s29 + $0x4200] ss:$148 sps:$4 sm:$0xff]  }
 0x1fe   : > { %15072 = vmatprep.subr.bf16.mxu0 %v22433_v11  ;;  %15236 = vmatprep.subr.bf16.mxu1 %v22436_v12  ;;  %v22487_v11 = vld [vmem:[%s25505_s29 + $0x4324] ss:$148 sps:$4 sm:$0xff]   ;;  %v22490_v12 = vld [vmem:[%s25505_s29 + $0x432c] ss:$148 sps:$4 sm:$0xff]  }
 0x1ff   : > { %15102 = vmatprep.mubr.bf16.mxu0 %v25761_v38  ;;  %15266 = vmatprep.mubr.bf16.mxu1 %v25761_v38 }
 0x201   : > { %15073 = vmatpush1.bf16.msra.mxu0 %v22431_v13  ;;  %15237 = vmatpush1.bf16.msra.mxu1 %v22434_v14  ;;  %v22485_v13 = vld [vmem:[%s25505_s29 + $0x4320] ss:$148 sps:$4 sm:$0xff]   ;;  %v22488_v14 = vld [vmem:[%s25505_s29 + $0x4328] ss:$148 sps:$4 sm:$0xff]  }
 0x202   : > { %15074 = vmatprep.subr.bf16.mxu0 %v22439_v15  ;;  %15238 = vmatprep.subr.bf16.mxu1 %v22442_v17  ;;  %v22493_v15 = vld [vmem:[%s25505_s29 + $0x444c] ss:$148 sps:$4 sm:$0xff]   ;;  %v22496_v17 = vld [vmem:[%s25505_s29 + $0x4454] ss:$148 sps:$4 sm:$0xff]  }
 0x205   : > { %15075 = vmatpush1.bf16.msra.mxu0 %v22437_v18  ;;  %15239 = vmatpush1.bf16.msra.mxu1 %v22440_v19  ;;  %v22491_v18 = vld [vmem:[%s25505_s29 + $0x4448] ss:$148 sps:$4 sm:$0xff]   ;;  %v22494_v19 = vld [vmem:[%s25505_s29 + $0x4450] ss:$148 sps:$4 sm:$0xff]  }
 0x206   : > { %15076 = vmatprep.subr.bf16.mxu0 %v22445_v20  ;;  %15240 = vmatprep.subr.bf16.mxu1 %v22448_v24  ;;  %v22499_v20 = vld [vmem:[%s25505_s29 + $0x4574] ss:$148 sps:$4 sm:$0xff]   ;;  %v22502_v24 = vld [vmem:[%s25505_s29 + $0x457c] ss:$148 sps:$4 sm:$0xff]  }
 0x209   : > { %15077 = vmatpush1.bf16.msra.mxu0 %v22443_v25  ;;  %15241 = vmatpush1.bf16.msra.mxu1 %v22446_v26  ;;  %v22497_v25 = vld [vmem:[%s25505_s29 + $0x4570] ss:$148 sps:$4 sm:$0xff]   ;;  %v22500_v26 = vld [vmem:[%s25505_s29 + $0x4578] ss:$148 sps:$4 sm:$0xff]  }
 0x20a   : > { %15078 = vmatprep.subr.bf16.mxu0 %v22451_v28  ;;  %15242 = vmatprep.subr.bf16.mxu1 %v22454_v29  ;;  %v22505_v28 = vld [vmem:[%s25505_s29 + $0x469c] ss:$148 sps:$4 sm:$0xff]   ;;  %v22508_v29 = vld [vmem:[%s25505_s29 + $0x46a4] ss:$148 sps:$4 sm:$0xff]  }
 0x20d   : > { %15079 = vmatpush1.bf16.msra.mxu0 %v22449_v32  ;;  %15243 = vmatpush1.bf16.msra.mxu1 %v22452_v33  ;;  %v22511_v32 = vld [vmem:[%s25505_s29 + $0x47c4] ss:$148 sps:$4 sm:$0xff]   ;;  %v22514_v33 = vld [vmem:[%s25505_s29 + $0x47cc] ss:$148 sps:$4 sm:$0xff]  }
 0x20e   : > { %15080 = vmatprep.subr.bf16.mxu0 %v22457_v34  ;;  %15244 = vmatprep.subr.bf16.mxu1 %v22460_v35  ;;  %v22509_v34 = vld [vmem:[%s25505_s29 + $0x47c0] ss:$148 sps:$4 sm:$0xff]   ;;  %v22512_v35 = vld [vmem:[%s25505_s29 + $0x47c8] ss:$148 sps:$4 sm:$0xff]  }
 0x20f   : > { %v14776_v42 = vpop.f32.mrb[0].mxu0  ;;  %v14940_v45 = vpop.f32.mrb[0].mxu1 }
 0x210   : > { %v14778_v47 = vpop.f32.mrb[1].mxu0  ;;  %v14942_v48 = vpop.f32.mrb[1].mxu1 }
 0x211   : > { %v17768_v49 = vcombine.low %v14776_v42, %v14778_v47  ;;  %v17769_v50 = vcombine.low %v14940_v45, %v14942_v48  ;;  %v14780_v51 = vpop.f32.mrb[2].mxu0  ;;  %v14944_v52 = vpop.f32.mrb[2].mxu1  ;;  %15081 = vmatpush1.bf16.msra.mxu0 %v22455_v37  ;;  %15245 = vmatpush1.bf16.msra.mxu1 %v22458_v39  ;;  %v22520_v37 = vld [vmem:[%s25505_s29 + $0x48f4] ss:$148 sps:$4 sm:$0xff]   ;;  %v22526_v42 = vld [vmem:[%s25505_s29 + $0x2c] ss:$148 sps:$4 sm:$0xff]  }
 0x212   : > { %v14781_v56 = vpop.f32.mrb[3].mxu0  ;;  %v14945_v57 = vpop.f32.mrb[3].mxu1  ;;  %15082 = vmatprep.subr.bf16.mxu0 %v22463_v40  ;;  %15246 = vmatprep.subr.bf16.mxu1 %v22466_v41  ;;  %v22515_v39 = vld [vmem:[%s25505_s29 + $0x48e8] ss:$148 sps:$4 sm:$0xff]   ;;  %v22518_v40 = vld [vmem:[%s25505_s29 + $0x48f0] ss:$148 sps:$4 sm:$0xff]  }
 0x213   : > { %v17776_v60 = vrot.slane %v17768_v49, %v26064_v46  ;;  %v17783_v62 = vrot.slane %v17769_v50, %v26064_v46  ;;  %v22523_v41 = vld [vmem:[%s25505_s29 + $0x24] ss:$148 sps:$4 sm:$0xff]   ;;  %v22521_v45 = vld [vmem:[%s25505_s29 + $0x20] ss:$148 sps:$4 sm:$0xff]   ;;  %v22524_v47 = vld [vmem:[%s25505_s29 + $0x28] ss:$148 sps:$4 sm:$0xff]  }
 0x214   : > { %v22529_v48 = vld [vmem:[%s25505_s29 + $0x14c] ss:$148 sps:$4 sm:$0xff]   ;;  %v22532_v49 = vld [vmem:[%s25505_s29 + $0x154] ss:$148 sps:$4 sm:$0xff]   ;;  %v22530_v51 = vld [vmem:[%s25505_s29 + $0x150] ss:$148 sps:$4 sm:$0xff]  }
 0x215   : > { %v17784_v63 = vcombine.low %v17776_v60, %v17783_v62  ;;  %15083 = vmatpush1.bf16.msra.mxu0 %v22461_v53  ;;  %15247 = vmatpush1.bf16.msra.mxu1 %v22464_v54  ;;  %v22527_v50 = vld [vmem:[%s25505_s29 + $0x148] ss:$148 sps:$4 sm:$0xff]   ;;  %v22533_v54 = vld [vmem:[%s25505_s29 + $0x270] ss:$148 sps:$4 sm:$0xff]   ;;  %v22550_v62 = vld [vmem:[%s25505_s29 + $0x4cc] ss:$148 sps:$4 sm:$0xff]  }
 0x216   : > { %15084 = vmatprep.subr.bf16.mxu0 %v22469_v58  ;;  %15248 = vmatprep.subr.bf16.mxu1 %v22472_v59  ;;  %v22535_v52 = vld [vmem:[%s25505_s29 + $0x274] ss:$148 sps:$4 sm:$0xff]   ;;  %v22538_v53 = vld [vmem:[%s25505_s29 + $0x27c] ss:$148 sps:$4 sm:$0xff]   ;;  %v22544_v57 = vld [vmem:[%s25505_s29 + $0x3a4] ss:$148 sps:$4 sm:$0xff]  }
 0x217   : > { %v17938_v4 = vadd.f32 %v17784_v63, %v214_v55  ;;  %v22536_v55 = vld [vmem:[%s25505_s29 + $0x278] ss:$148 sps:$4 sm:$0xff]   ;;  %v22541_v56 = vld [vmem:[%s25505_s29 + $0x39c] ss:$148 sps:$4 sm:$0xff]   ;;  %v22542_v59 = vld [vmem:[%s25505_s29 + $0x3a0] ss:$148 sps:$4 sm:$0xff]  }
 0x218   : > { %v22539_v58 = vld [vmem:[%s25505_s29 + $0x398] ss:$148 sps:$4 sm:$0xff]   ;;  %v22545_v63 = vld [vmem:[%s25505_s29 + $0x4c0] ss:$148 sps:$4 sm:$0xff]  }
 0x219   : > { %17948 = vst [vmem:[#allocation2] sm:$0xff] %v17938_v4  ;;  %15085 = vmatpush1.bf16.msra.mxu0 %v22467_v0  ;;  %15249 = vmatpush1.bf16.msra.mxu1 %v22470_v1  ;;  %v22547_v60 = vld [vmem:[%s25505_s29 + $0x4c4] ss:$148 sps:$4 sm:$0xff]   ;;  %v22548_v0 = vld [vmem:[%s25505_s29 + $0x4c8] ss:$148 sps:$4 sm:$0xff]  }
 0x21a   : > { %15086 = vmatprep.subr.bf16.mxu0 %v22475_v2  ;;  %15250 = vmatprep.subr.bf16.mxu1 %v22478_v3  ;;  %v22553_v1 = vld [vmem:[%s25505_s29 + $0x5ec] ss:$148 sps:$4 sm:$0xff]   ;;  %v22556_v2 = vld [vmem:[%s25505_s29 + $0x5f4] ss:$148 sps:$4 sm:$0xff]   ;;  %v22554_v4 = vld [vmem:[%s25505_s29 + $0x5f0] ss:$148 sps:$4 sm:$0xff]  }
 0x21b   : > { %v22551_v3 = vld [vmem:[%s25505_s29 + $0x5e8] ss:$148 sps:$4 sm:$0xff]  }
 0x21d   : > { %15087 = vmatpush1.bf16.msra.mxu0 %v22473_v5  ;;  %15251 = vmatpush1.bf16.msra.mxu1 %v22476_v6  ;;  %v22559_v5 = vld [vmem:[%s25505_s29 + $0x714] ss:$148 sps:$4 sm:$0xff]   ;;  %v22562_v6 = vld [vmem:[%s25505_s29 + $0x71c] ss:$148 sps:$4 sm:$0xff]  }
 0x21e   : > { %15088 = vmatprep.subr.bf16.mxu0 %v22481_v7  ;;  %15252 = vmatprep.subr.bf16.mxu1 %v22484_v8  ;;  %v22557_v7 = vld [vmem:[%s25505_s29 + $0x710] ss:$148 sps:$4 sm:$0xff]   ;;  %v22560_v8 = vld [vmem:[%s25505_s29 + $0x718] ss:$148 sps:$4 sm:$0xff]  }
 0x221   : > { %15089 = vmatpush1.bf16.msra.mxu0 %v22479_v9  ;;  %15253 = vmatpush1.bf16.msra.mxu1 %v22482_v10  ;;  %v22565_v9 = vld [vmem:[%s25505_s29 + $0x83c] ss:$148 sps:$4 sm:$0xff]   ;;  %v22568_v10 = vld [vmem:[%s25505_s29 + $0x844] ss:$148 sps:$4 sm:$0xff]  }
 0x222   : > { %15090 = vmatprep.subr.bf16.mxu0 %v22487_v11  ;;  %15254 = vmatprep.subr.bf16.mxu1 %v22490_v12  ;;  %v22563_v11 = vld [vmem:[%s25505_s29 + $0x838] ss:$148 sps:$4 sm:$0xff]   ;;  %v22566_v12 = vld [vmem:[%s25505_s29 + $0x840] ss:$148 sps:$4 sm:$0xff]  }
 0x225   : > { %15091 = vmatpush1.bf16.msra.mxu0 %v22485_v13  ;;  %15255 = vmatpush1.bf16.msra.mxu1 %v22488_v14  ;;  %v22571_v13 = vld [vmem:[%s25505_s29 + $0x964] ss:$148 sps:$4 sm:$0xff]   ;;  %v22574_v14 = vld [vmem:[%s25505_s29 + $0x96c] ss:$148 sps:$4 sm:$0xff]  }
 0x226   : > { %15092 = vmatprep.subr.bf16.mxu0 %v22493_v15  ;;  %15256 = vmatprep.subr.bf16.mxu1 %v22496_v17  ;;  %v22569_v15 = vld [vmem:[%s25505_s29 + $0x960] ss:$148 sps:$4 sm:$0xff]   ;;  %v22572_v17 = vld [vmem:[%s25505_s29 + $0x968] ss:$148 sps:$4 sm:$0xff]  }
 0x229   : > { %15093 = vmatpush1.bf16.msra.mxu0 %v22491_v18  ;;  %15257 = vmatpush1.bf16.msra.mxu1 %v22494_v19  ;;  %v22577_v18 = vld [vmem:[%s25505_s29 + $0xa8c] ss:$148 sps:$4 sm:$0xff]   ;;  %v22580_v19 = vld [vmem:[%s25505_s29 + $0xa94] ss:$148 sps:$4 sm:$0xff]  }
 0x22a   : > { %15094 = vmatprep.subr.bf16.mxu0 %v22499_v20  ;;  %15258 = vmatprep.subr.bf16.mxu1 %v22502_v24  ;;  %v22575_v20 = vld [vmem:[%s25505_s29 + $0xa88] ss:$148 sps:$4 sm:$0xff]   ;;  %v22578_v24 = vld [vmem:[%s25505_s29 + $0xa90] ss:$148 sps:$4 sm:$0xff]  }
 0x22d   : > { %15095 = vmatpush1.bf16.msra.mxu0 %v22497_v25  ;;  %15259 = vmatpush1.bf16.msra.mxu1 %v22500_v26  ;;  %v22583_v25 = vld [vmem:[%s25505_s29 + $0xbb4] ss:$148 sps:$4 sm:$0xff]   ;;  %v22586_v26 = vld [vmem:[%s25505_s29 + $0xbbc] ss:$148 sps:$4 sm:$0xff]  }
 0x22e   : > { %15096 = vmatprep.subr.bf16.mxu0 %v22505_v28  ;;  %15260 = vmatprep.subr.bf16.mxu1 %v22508_v29  ;;  %v22581_v28 = vld [vmem:[%s25505_s29 + $0xbb0] ss:$148 sps:$4 sm:$0xff]   ;;  %v22584_v29 = vld [vmem:[%s25505_s29 + $0xbb8] ss:$148 sps:$4 sm:$0xff]  }
 0x231   : > { %15097 = vmatpush1.bf16.msra.mxu0 %v22503_v30  ;;  %15261 = vmatpush1.bf16.msra.mxu1 %v22506_v31  ;;  %v22589_v30 = vld [vmem:[%s25505_s29 + $0xcdc] ss:$148 sps:$4 sm:$0xff]   ;;  %v22592_v31 = vld [vmem:[%s25505_s29 + $0xce4] ss:$148 sps:$4 sm:$0xff]  }
 0x232   : > { %15098 = vmatprep.subr.bf16.mxu0 %v22511_v32  ;;  %15262 = vmatprep.subr.bf16.mxu1 %v22514_v33  ;;  %v22587_v32 = vld [vmem:[%s25505_s29 + $0xcd8] ss:$148 sps:$4 sm:$0xff]   ;;  %v22590_v33 = vld [vmem:[%s25505_s29 + $0xce0] ss:$148 sps:$4 sm:$0xff]  }
 0x235   : > { %15099 = vmatpush1.bf16.msra.mxu0 %v22509_v34  ;;  %15263 = vmatpush1.bf16.msra.mxu1 %v22512_v35  ;;  %v22595_v34 = vld [vmem:[%s25505_s29 + $0xe04] ss:$148 sps:$4 sm:$0xff]   ;;  %v22598_v35 = vld [vmem:[%s25505_s29 + $0xe0c] ss:$148 sps:$4 sm:$0xff]  }
 0x236   : > { %15100 = vmatprep.subr.bf16.mxu0 %v22517_v36  ;;  %15264 = vmatprep.subr.bf16.mxu1 %v22520_v37  ;;  %v22593_v36 = vld [vmem:[%s25505_s29 + $0xe00] ss:$148 sps:$4 sm:$0xff]   ;;  %v22596_v37 = vld [vmem:[%s25505_s29 + $0xe08] ss:$148 sps:$4 sm:$0xff]  }
 0x239   : > { %15101 = vmatpush1.bf16.msra.mxu0 %v22515_v39  ;;  %15265 = vmatpush1.bf16.msra.mxu1 %v22518_v40  ;;  %v22601_v39 = vld [vmem:[%s25505_s29 + $0xf2c] ss:$148 sps:$4 sm:$0xff]   ;;  %v22604_v40 = vld [vmem:[%s25505_s29 + $0xf34] ss:$148 sps:$4 sm:$0xff]  }
 0x23a   : > { %15275 = vmatprep.subr.bf16.mxu0 %v22523_v41  ;;  %15439 = vmatprep.subr.bf16.mxu1 %v22526_v42  ;;  %v22599_v41 = vld [vmem:[%s25505_s29 + $0xf28] ss:$148 sps:$4 sm:$0xff]   ;;  %v22602_v42 = vld [vmem:[%s25505_s29 + $0xf30] ss:$148 sps:$4 sm:$0xff]  }
 0x23c   : > { %15103 = vmatmul.mubr.bf16.vlgmr.msra.gmra.mrb[4].mxu0 %v25829_v43  ;;  %15267 = vmatmul.mubr.bf16.vlgmr.msra.gmra.mrb[4].mxu1 %v25829_v43 }
 0x23d   : > { %15276 = vmatpush1.bf16.msra.mxu0 %v22521_v45  ;;  %15440 = vmatpush1.bf16.msra.mxu1 %v22524_v47  ;;  %v22607_v45 = vld [vmem:[%s25505_s29 + $0x1054] ss:$148 sps:$4 sm:$0xff]   ;;  %v22610_v47 = vld [vmem:[%s25505_s29 + $0x105c] ss:$148 sps:$4 sm:$0xff]  }
 0x23e   : > { %15277 = vmatprep.subr.bf16.mxu0 %v22529_v48  ;;  %15441 = vmatprep.subr.bf16.mxu1 %v22532_v49  ;;  %v22605_v48 = vld [vmem:[%s25505_s29 + $0x1050] ss:$148 sps:$4 sm:$0xff]   ;;  %v22608_v49 = vld [vmem:[%s25505_s29 + $0x1058] ss:$148 sps:$4 sm:$0xff]  }
 0x23f   : > { %15307 = vmatprep.mubr.bf16.mxu0 %v25582_v61  ;;  %15471 = vmatprep.mubr.bf16.mxu1 %v25582_v61 }
 0x241   : > { %15278 = vmatpush1.bf16.msra.mxu0 %v22527_v50  ;;  %15442 = vmatpush1.bf16.msra.mxu1 %v22530_v51  ;;  %v22613_v50 = vld [vmem:[%s25505_s29 + $0x117c] ss:$148 sps:$4 sm:$0xff]   ;;  %v22616_v51 = vld [vmem:[%s25505_s29 + $0x1184] ss:$148 sps:$4 sm:$0xff]  }
 0x242   : > { %15279 = vmatprep.subr.bf16.mxu0 %v22535_v52  ;;  %15443 = vmatprep.subr.bf16.mxu1 %v22538_v53  ;;  %v22611_v52 = vld [vmem:[%s25505_s29 + $0x1178] ss:$148 sps:$4 sm:$0xff]   ;;  %v22614_v53 = vld [vmem:[%s25505_s29 + $0x1180] ss:$148 sps:$4 sm:$0xff]  }
 0x245   : > { %15280 = vmatpush1.bf16.msra.mxu0 %v22533_v54  ;;  %15444 = vmatpush1.bf16.msra.mxu1 %v22536_v55  ;;  %v22619_v54 = vld [vmem:[%s25505_s29 + $0x12a4] ss:$148 sps:$4 sm:$0xff]   ;;  %v22622_v55 = vld [vmem:[%s25505_s29 + $0x12ac] ss:$148 sps:$4 sm:$0xff]  }
 0x246   : > { %15281 = vmatprep.subr.bf16.mxu0 %v22541_v56  ;;  %15445 = vmatprep.subr.bf16.mxu1 %v22544_v57  ;;  %v22617_v56 = vld [vmem:[%s25505_s29 + $0x12a0] ss:$148 sps:$4 sm:$0xff]   ;;  %v22620_v57 = vld [vmem:[%s25505_s29 + $0x12a8] ss:$148 sps:$4 sm:$0xff]  }
 0x249   : > { %15282 = vmatpush1.bf16.msra.mxu0 %v22539_v58  ;;  %15446 = vmatpush1.bf16.msra.mxu1 %v22542_v59  ;;  %v22625_v58 = vld [vmem:[%s25505_s29 + $0x13cc] ss:$148 sps:$4 sm:$0xff]   ;;  %v22628_v59 = vld [vmem:[%s25505_s29 + $0x13d4] ss:$148 sps:$4 sm:$0xff]  }
 0x24a   : > { %15283 = vmatprep.subr.bf16.mxu0 %v22547_v60  ;;  %15447 = vmatprep.subr.bf16.mxu1 %v22550_v62  ;;  %v22623_v60 = vld [vmem:[%s25505_s29 + $0x13c8] ss:$148 sps:$4 sm:$0xff]   ;;  %v22626_v62 = vld [vmem:[%s25505_s29 + $0x13d0] ss:$148 sps:$4 sm:$0xff]  }
 0x24d   : > { %15284 = vmatpush1.bf16.msra.mxu0 %v22545_v63  ;;  %15448 = vmatpush1.bf16.msra.mxu1 %v22548_v0  ;;  %v22631_v63 = vld [vmem:[%s25505_s29 + $0x14f4] ss:$148 sps:$4 sm:$0xff]   ;;  %v22634_v0 = vld [vmem:[%s25505_s29 + $0x14fc] ss:$148 sps:$4 sm:$0xff]  }
 0x24e   : > { %15285 = vmatprep.subr.bf16.mxu0 %v22553_v1  ;;  %15449 = vmatprep.subr.bf16.mxu1 %v22556_v2  ;;  %v22629_v1 = vld [vmem:[%s25505_s29 + $0x14f0] ss:$148 sps:$4 sm:$0xff]   ;;  %v22632_v2 = vld [vmem:[%s25505_s29 + $0x14f8] ss:$148 sps:$4 sm:$0xff]  }
 0x251   : > { %15286 = vmatpush1.bf16.msra.mxu0 %v22551_v3  ;;  %15450 = vmatpush1.bf16.msra.mxu1 %v22554_v4  ;;  %v22637_v3 = vld [vmem:[%s25505_s29 + $0x161c] ss:$148 sps:$4 sm:$0xff]   ;;  %v22640_v4 = vld [vmem:[%s25505_s29 + $0x1624] ss:$148 sps:$4 sm:$0xff]  }
 0x252   : > { %15287 = vmatprep.subr.bf16.mxu0 %v22559_v5  ;;  %15451 = vmatprep.subr.bf16.mxu1 %v22562_v6  ;;  %v22635_v5 = vld [vmem:[%s25505_s29 + $0x1618] ss:$148 sps:$4 sm:$0xff]   ;;  %v22638_v6 = vld [vmem:[%s25505_s29 + $0x1620] ss:$148 sps:$4 sm:$0xff]  }
 0x255   : > { %15288 = vmatpush1.bf16.msra.mxu0 %v22557_v7  ;;  %15452 = vmatpush1.bf16.msra.mxu1 %v22560_v8  ;;  %v22643_v7 = vld [vmem:[%s25505_s29 + $0x1744] ss:$148 sps:$4 sm:$0xff]   ;;  %v22646_v8 = vld [vmem:[%s25505_s29 + $0x174c] ss:$148 sps:$4 sm:$0xff]  }
 0x256   : > { %15289 = vmatprep.subr.bf16.mxu0 %v22565_v9  ;;  %15453 = vmatprep.subr.bf16.mxu1 %v22568_v10  ;;  %v22641_v9 = vld [vmem:[%s25505_s29 + $0x1740] ss:$148 sps:$4 sm:$0xff]   ;;  %v22644_v10 = vld [vmem:[%s25505_s29 + $0x1748] ss:$148 sps:$4 sm:$0xff]  }
 0x259   : > { %15290 = vmatpush1.bf16.msra.mxu0 %v22563_v11  ;;  %15454 = vmatpush1.bf16.msra.mxu1 %v22566_v12  ;;  %v22649_v11 = vld [vmem:[%s25505_s29 + $0x186c] ss:$148 sps:$4 sm:$0xff]   ;;  %v22652_v12 = vld [vmem:[%s25505_s29 + $0x1874] ss:$148 sps:$4 sm:$0xff]  }
 0x25a   : > { %15291 = vmatprep.subr.bf16.mxu0 %v22571_v13  ;;  %15455 = vmatprep.subr.bf16.mxu1 %v22574_v14  ;;  %v22647_v13 = vld [vmem:[%s25505_s29 + $0x1868] ss:$148 sps:$4 sm:$0xff]   ;;  %v22650_v14 = vld [vmem:[%s25505_s29 + $0x1870] ss:$148 sps:$4 sm:$0xff]  }
 0x25d   : > { %15292 = vmatpush1.bf16.msra.mxu0 %v22569_v15  ;;  %15456 = vmatpush1.bf16.msra.mxu1 %v22572_v17  ;;  %v22655_v15 = vld [vmem:[%s25505_s29 + $0x1994] ss:$148 sps:$4 sm:$0xff]   ;;  %v22658_v17 = vld [vmem:[%s25505_s29 + $0x199c] ss:$148 sps:$4 sm:$0xff]  }
 0x25e   : > { %15293 = vmatprep.subr.bf16.mxu0 %v22577_v18  ;;  %15457 = vmatprep.subr.bf16.mxu1 %v22580_v19  ;;  %v22653_v18 = vld [vmem:[%s25505_s29 + $0x1990] ss:$148 sps:$4 sm:$0xff]   ;;  %v22656_v19 = vld [vmem:[%s25505_s29 + $0x1998] ss:$148 sps:$4 sm:$0xff]  }
 0x261   : > { %15294 = vmatpush1.bf16.msra.mxu0 %v22575_v20  ;;  %15458 = vmatpush1.bf16.msra.mxu1 %v22578_v24  ;;  %v22661_v20 = vld [vmem:[%s25505_s29 + $0x1abc] ss:$148 sps:$4 sm:$0xff]   ;;  %v22664_v24 = vld [vmem:[%s25505_s29 + $0x1ac4] ss:$148 sps:$4 sm:$0xff]  }
 0x262   : > { %15295 = vmatprep.subr.bf16.mxu0 %v22583_v25  ;;  %15459 = vmatprep.subr.bf16.mxu1 %v22586_v26  ;;  %v22659_v25 = vld [vmem:[%s25505_s29 + $0x1ab8] ss:$148 sps:$4 sm:$0xff]   ;;  %v22662_v26 = vld [vmem:[%s25505_s29 + $0x1ac0] ss:$148 sps:$4 sm:$0xff]  }
 0x265   : > { %15296 = vmatpush1.bf16.msra.mxu0 %v22581_v28  ;;  %15460 = vmatpush1.bf16.msra.mxu1 %v22584_v29  ;;  %v22667_v28 = vld [vmem:[%s25505_s29 + $0x1be4] ss:$148 sps:$4 sm:$0xff]   ;;  %v22670_v29 = vld [vmem:[%s25505_s29 + $0x1bec] ss:$148 sps:$4 sm:$0xff]  }
 0x266   : > { %15297 = vmatprep.subr.bf16.mxu0 %v22589_v30  ;;  %15461 = vmatprep.subr.bf16.mxu1 %v22592_v31  ;;  %v22665_v30 = vld [vmem:[%s25505_s29 + $0x1be0] ss:$148 sps:$4 sm:$0xff]   ;;  %v22668_v31 = vld [vmem:[%s25505_s29 + $0x1be8] ss:$148 sps:$4 sm:$0xff]  }
 0x269   : > { %15298 = vmatpush1.bf16.msra.mxu0 %v22587_v32  ;;  %15462 = vmatpush1.bf16.msra.mxu1 %v22590_v33  ;;  %v22673_v32 = vld [vmem:[%s25505_s29 + $0x1d0c] ss:$148 sps:$4 sm:$0xff]   ;;  %v22676_v33 = vld [vmem:[%s25505_s29 + $0x1d14] ss:$148 sps:$4 sm:$0xff]  }
 0x26a   : > { %15299 = vmatprep.subr.bf16.mxu0 %v22595_v34  ;;  %15463 = vmatprep.subr.bf16.mxu1 %v22598_v35  ;;  %v22671_v34 = vld [vmem:[%s25505_s29 + $0x1d08] ss:$148 sps:$4 sm:$0xff]   ;;  %v22674_v35 = vld [vmem:[%s25505_s29 + $0x1d10] ss:$148 sps:$4 sm:$0xff]  }
 0x26d   : > { %15300 = vmatpush1.bf16.msra.mxu0 %v22593_v36  ;;  %15464 = vmatpush1.bf16.msra.mxu1 %v22596_v37  ;;  %v22679_v36 = vld [vmem:[%s25505_s29 + $0x1e34] ss:$148 sps:$4 sm:$0xff]   ;;  %v22682_v37 = vld [vmem:[%s25505_s29 + $0x1e3c] ss:$148 sps:$4 sm:$0xff]  }
 0x26e   : > { %15301 = vmatprep.subr.bf16.mxu0 %v22601_v39  ;;  %15465 = vmatprep.subr.bf16.mxu1 %v22604_v40  ;;  %v22677_v39 = vld [vmem:[%s25505_s29 + $0x1e30] ss:$148 sps:$4 sm:$0xff]   ;;  %v22680_v40 = vld [vmem:[%s25505_s29 + $0x1e38] ss:$148 sps:$4 sm:$0xff]  }
 0x271   : > { %15302 = vmatpush1.bf16.msra.mxu0 %v22599_v41  ;;  %15466 = vmatpush1.bf16.msra.mxu1 %v22602_v42  ;;  %v22685_v41 = vld [vmem:[%s25505_s29 + $0x1f5c] ss:$148 sps:$4 sm:$0xff]   ;;  %v22688_v42 = vld [vmem:[%s25505_s29 + $0x1f64] ss:$148 sps:$4 sm:$0xff]  }
 0x272   : > { %15303 = vmatprep.subr.bf16.mxu0 %v22607_v45  ;;  %15467 = vmatprep.subr.bf16.mxu1 %v22610_v47  ;;  %v22683_v45 = vld [vmem:[%s25505_s29 + $0x1f58] ss:$148 sps:$4 sm:$0xff]   ;;  %v22686_v47 = vld [vmem:[%s25505_s29 + $0x1f60] ss:$148 sps:$4 sm:$0xff]  }
 0x275   : > { %15304 = vmatpush1.bf16.msra.mxu0 %v22605_v48  ;;  %15468 = vmatpush1.bf16.msra.mxu1 %v22608_v49  ;;  %v22691_v48 = vld [vmem:[%s25505_s29 + $0x2084] ss:$148 sps:$4 sm:$0xff]   ;;  %v22694_v49 = vld [vmem:[%s25505_s29 + $0x208c] ss:$148 sps:$4 sm:$0xff]  }
 0x276   : > { %15305 = vmatprep.subr.bf16.mxu0 %v22613_v50  ;;  %15469 = vmatprep.subr.bf16.mxu1 %v22616_v51  ;;  %v22689_v50 = vld [vmem:[%s25505_s29 + $0x2080] ss:$148 sps:$4 sm:$0xff]   ;;  %v22692_v51 = vld [vmem:[%s25505_s29 + $0x2088] ss:$148 sps:$4 sm:$0xff]  }
 0x279   : > { %15306 = vmatpush1.bf16.msra.mxu0 %v22611_v52  ;;  %15470 = vmatpush1.bf16.msra.mxu1 %v22614_v53  ;;  %v22697_v52 = vld [vmem:[%s25505_s29 + $0x21ac] ss:$148 sps:$4 sm:$0xff]   ;;  %v22700_v53 = vld [vmem:[%s25505_s29 + $0x21b4] ss:$148 sps:$4 sm:$0xff]  }
 0x27a   : > { %15316 = vmatprep.subr.bf16.mxu0 %v22619_v54  ;;  %15480 = vmatprep.subr.bf16.mxu1 %v22622_v55  ;;  %v22695_v54 = vld [vmem:[%s25505_s29 + $0x21a8] ss:$148 sps:$4 sm:$0xff]   ;;  %v22698_v55 = vld [vmem:[%s25505_s29 + $0x21b0] ss:$148 sps:$4 sm:$0xff]  }
 0x27c   : > { %15308 = vmatmul.mubr.bf16.vlgmr.msra.gmra.mrb[8].mxu0 %v25604_v16  ;;  %15472 = vmatmul.mubr.bf16.vlgmr.msra.gmra.mrb[8].mxu1 %v25604_v16 }
 0x27d   : > { %15317 = vmatpush1.bf16.msra.mxu0 %v22617_v56  ;;  %15481 = vmatpush1.bf16.msra.mxu1 %v22620_v57  ;;  %v22703_v56 = vld [vmem:[%s25505_s29 + $0x22d4] ss:$148 sps:$4 sm:$0xff]   ;;  %v22706_v57 = vld [vmem:[%s25505_s29 + $0x22dc] ss:$148 sps:$4 sm:$0xff]  }
 0x27e   : > { %15318 = vmatprep.subr.bf16.mxu0 %v22625_v58  ;;  %15482 = vmatprep.subr.bf16.mxu1 %v22628_v59  ;;  %v22701_v58 = vld [vmem:[%s25505_s29 + $0x22d0] ss:$148 sps:$4 sm:$0xff]   ;;  %v22704_v59 = vld [vmem:[%s25505_s29 + $0x22d8] ss:$148 sps:$4 sm:$0xff]  }
 0x27f   : > { %15348 = vmatprep.mubr.bf16.mxu0 %v25617_v23  ;;  %15512 = vmatprep.mubr.bf16.mxu1 %v25617_v23 }
 0x281   : > { %15319 = vmatpush1.bf16.msra.mxu0 %v22623_v60  ;;  %15483 = vmatpush1.bf16.msra.mxu1 %v22626_v62  ;;  %v22709_v60 = vld [vmem:[%s25505_s29 + $0x23fc] ss:$148 sps:$4 sm:$0xff]   ;;  %v22712_v62 = vld [vmem:[%s25505_s29 + $0x2404] ss:$148 sps:$4 sm:$0xff]  }
 0x282   : > { %15320 = vmatprep.subr.bf16.mxu0 %v22631_v63  ;;  %15484 = vmatprep.subr.bf16.mxu1 %v22634_v0  ;;  %v22707_v63 = vld [vmem:[%s25505_s29 + $0x23f8] ss:$148 sps:$4 sm:$0xff]   ;;  %v22710_v0 = vld [vmem:[%s25505_s29 + $0x2400] ss:$148 sps:$4 sm:$0xff]  }
 0x285   : > { %15321 = vmatpush1.bf16.msra.mxu0 %v22629_v1  ;;  %15485 = vmatpush1.bf16.msra.mxu1 %v22632_v2  ;;  %v22715_v1 = vld [vmem:[%s25505_s29 + $0x2524] ss:$148 sps:$4 sm:$0xff]   ;;  %v22718_v2 = vld [vmem:[%s25505_s29 + $0x252c] ss:$148 sps:$4 sm:$0xff]  }
 0x286   : > { %15322 = vmatprep.subr.bf16.mxu0 %v22637_v3  ;;  %15486 = vmatprep.subr.bf16.mxu1 %v22640_v4  ;;  %v22713_v3 = vld [vmem:[%s25505_s29 + $0x2520] ss:$148 sps:$4 sm:$0xff]   ;;  %v22716_v4 = vld [vmem:[%s25505_s29 + $0x2528] ss:$148 sps:$4 sm:$0xff]  }
 0x289   : > { %15323 = vmatpush1.bf16.msra.mxu0 %v22635_v5  ;;  %15487 = vmatpush1.bf16.msra.mxu1 %v22638_v6  ;;  %v22721_v5 = vld [vmem:[%s25505_s29 + $0x264c] ss:$148 sps:$4 sm:$0xff]   ;;  %v22724_v6 = vld [vmem:[%s25505_s29 + $0x2654] ss:$148 sps:$4 sm:$0xff]  }
 0x28a   : > { %15324 = vmatprep.subr.bf16.mxu0 %v22643_v7  ;;  %15488 = vmatprep.subr.bf16.mxu1 %v22646_v8  ;;  %v22719_v7 = vld [vmem:[%s25505_s29 + $0x2648] ss:$148 sps:$4 sm:$0xff]   ;;  %v22722_v8 = vld [vmem:[%s25505_s29 + $0x2650] ss:$148 sps:$4 sm:$0xff]  }
 0x28d   : > { %15325 = vmatpush1.bf16.msra.mxu0 %v22641_v9  ;;  %15489 = vmatpush1.bf16.msra.mxu1 %v22644_v10  ;;  %v22727_v9 = vld [vmem:[%s25505_s29 + $0x2774] ss:$148 sps:$4 sm:$0xff]   ;;  %v22730_v10 = vld [vmem:[%s25505_s29 + $0x277c] ss:$148 sps:$4 sm:$0xff]  }
 0x28e   : > { %15326 = vmatprep.subr.bf16.mxu0 %v22649_v11  ;;  %15490 = vmatprep.subr.bf16.mxu1 %v22652_v12  ;;  %v22725_v11 = vld [vmem:[%s25505_s29 + $0x2770] ss:$148 sps:$4 sm:$0xff]   ;;  %v22728_v12 = vld [vmem:[%s25505_s29 + $0x2778] ss:$148 sps:$4 sm:$0xff]  }
 0x291   : > { %15327 = vmatpush1.bf16.msra.mxu0 %v22647_v13  ;;  %15491 = vmatpush1.bf16.msra.mxu1 %v22650_v14  ;;  %v22733_v13 = vld [vmem:[%s25505_s29 + $0x289c] ss:$148 sps:$4 sm:$0xff]   ;;  %v22736_v14 = vld [vmem:[%s25505_s29 + $0x28a4] ss:$148 sps:$4 sm:$0xff]  }
 0x292   : > { %15328 = vmatprep.subr.bf16.mxu0 %v22655_v15  ;;  %15492 = vmatprep.subr.bf16.mxu1 %v22658_v17  ;;  %v22731_v15 = vld [vmem:[%s25505_s29 + $0x2898] ss:$148 sps:$4 sm:$0xff]   ;;  %v22734_v17 = vld [vmem:[%s25505_s29 + $0x28a0] ss:$148 sps:$4 sm:$0xff]  }
 0x295   : > { %15329 = vmatpush1.bf16.msra.mxu0 %v22653_v18  ;;  %15493 = vmatpush1.bf16.msra.mxu1 %v22656_v19  ;;  %v22739_v18 = vld [vmem:[%s25505_s29 + $0x29c4] ss:$148 sps:$4 sm:$0xff]   ;;  %v22742_v19 = vld [vmem:[%s25505_s29 + $0x29cc] ss:$148 sps:$4 sm:$0xff]  }
 0x296   : > { %15330 = vmatprep.subr.bf16.mxu0 %v22661_v20  ;;  %15494 = vmatprep.subr.bf16.mxu1 %v22664_v24  ;;  %v22737_v20 = vld [vmem:[%s25505_s29 + $0x29c0] ss:$148 sps:$4 sm:$0xff]   ;;  %v22740_v24 = vld [vmem:[%s25505_s29 + $0x29c8] ss:$148 sps:$4 sm:$0xff]  }
 0x299   : > { %15331 = vmatpush1.bf16.msra.mxu0 %v22659_v25  ;;  %15495 = vmatpush1.bf16.msra.mxu1 %v22662_v26  ;;  %v22745_v25 = vld [vmem:[%s25505_s29 + $0x2aec] ss:$148 sps:$4 sm:$0xff]   ;;  %v22748_v26 = vld [vmem:[%s25505_s29 + $0x2af4] ss:$148 sps:$4 sm:$0xff]  }
 0x29a   : > { %15332 = vmatprep.subr.bf16.mxu0 %v22667_v28  ;;  %15496 = vmatprep.subr.bf16.mxu1 %v22670_v29  ;;  %v22743_v28 = vld [vmem:[%s25505_s29 + $0x2ae8] ss:$148 sps:$4 sm:$0xff]   ;;  %v22746_v29 = vld [vmem:[%s25505_s29 + $0x2af0] ss:$148 sps:$4 sm:$0xff]  }
 0x29d   : > { %15333 = vmatpush1.bf16.msra.mxu0 %v22665_v30  ;;  %15497 = vmatpush1.bf16.msra.mxu1 %v22668_v31  ;;  %v22751_v30 = vld [vmem:[%s25505_s29 + $0x2c14] ss:$148 sps:$4 sm:$0xff]   ;;  %v22754_v31 = vld [vmem:[%s25505_s29 + $0x2c1c] ss:$148 sps:$4 sm:$0xff]  }
 0x29e   : > { %15334 = vmatprep.subr.bf16.mxu0 %v22673_v32  ;;  %15498 = vmatprep.subr.bf16.mxu1 %v22676_v33  ;;  %v22749_v32 = vld [vmem:[%s25505_s29 + $0x2c10] ss:$148 sps:$4 sm:$0xff]   ;;  %v22752_v33 = vld [vmem:[%s25505_s29 + $0x2c18] ss:$148 sps:$4 sm:$0xff]  }
 0x2a1   : > { %15335 = vmatpush1.bf16.msra.mxu0 %v22671_v34  ;;  %15499 = vmatpush1.bf16.msra.mxu1 %v22674_v35  ;;  %v22757_v34 = vld [vmem:[%s25505_s29 + $0x2d3c] ss:$148 sps:$4 sm:$0xff]   ;;  %v22760_v35 = vld [vmem:[%s25505_s29 + $0x2d44] ss:$148 sps:$4 sm:$0xff]  }
 0x2a2   : > { %15336 = vmatprep.subr.bf16.mxu0 %v22679_v36  ;;  %15500 = vmatprep.subr.bf16.mxu1 %v22682_v37  ;;  %v22755_v36 = vld [vmem:[%s25505_s29 + $0x2d38] ss:$148 sps:$4 sm:$0xff]   ;;  %v22758_v37 = vld [vmem:[%s25505_s29 + $0x2d40] ss:$148 sps:$4 sm:$0xff]  }
 0x2a5   : > { %15337 = vmatpush1.bf16.msra.mxu0 %v22677_v39  ;;  %15501 = vmatpush1.bf16.msra.mxu1 %v22680_v40  ;;  %v22763_v39 = vld [vmem:[%s25505_s29 + $0x2e64] ss:$148 sps:$4 sm:$0xff]   ;;  %v22766_v40 = vld [vmem:[%s25505_s29 + $0x2e6c] ss:$148 sps:$4 sm:$0xff]  }
 0x2a6   : > { %15338 = vmatprep.subr.bf16.mxu0 %v22685_v41  ;;  %15502 = vmatprep.subr.bf16.mxu1 %v22688_v42  ;;  %v22761_v41 = vld [vmem:[%s25505_s29 + $0x2e60] ss:$148 sps:$4 sm:$0xff]   ;;  %v22764_v42 = vld [vmem:[%s25505_s29 + $0x2e68] ss:$148 sps:$4 sm:$0xff]  }
 0x2a9   : > { %15339 = vmatpush1.bf16.msra.mxu0 %v22683_v45  ;;  %15503 = vmatpush1.bf16.msra.mxu1 %v22686_v47  ;;  %v22769_v45 = vld [vmem:[%s25505_s29 + $0x2f8c] ss:$148 sps:$4 sm:$0xff]   ;;  %v22772_v47 = vld [vmem:[%s25505_s29 + $0x2f94] ss:$148 sps:$4 sm:$0xff]  }
 0x2aa   : > { %15340 = vmatprep.subr.bf16.mxu0 %v22691_v48  ;;  %15504 = vmatprep.subr.bf16.mxu1 %v22694_v49  ;;  %v22767_v48 = vld [vmem:[%s25505_s29 + $0x2f88] ss:$148 sps:$4 sm:$0xff]   ;;  %v22770_v49 = vld [vmem:[%s25505_s29 + $0x2f90] ss:$148 sps:$4 sm:$0xff]  }
 0x2ad   : > { %15341 = vmatpush1.bf16.msra.mxu0 %v22689_v50  ;;  %15505 = vmatpush1.bf16.msra.mxu1 %v22692_v51  ;;  %v22775_v50 = vld [vmem:[%s25505_s29 + $0x30b4] ss:$148 sps:$4 sm:$0xff]   ;;  %v22778_v51 = vld [vmem:[%s25505_s29 + $0x30bc] ss:$148 sps:$4 sm:$0xff]  }
 0x2ae   : > { %15342 = vmatprep.subr.bf16.mxu0 %v22697_v52  ;;  %15506 = vmatprep.subr.bf16.mxu1 %v22700_v53  ;;  %v22773_v52 = vld [vmem:[%s25505_s29 + $0x30b0] ss:$148 sps:$4 sm:$0xff]   ;;  %v22776_v53 = vld [vmem:[%s25505_s29 + $0x30b8] ss:$148 sps:$4 sm:$0xff]  }
 0x2b1   : > { %15343 = vmatpush1.bf16.msra.mxu0 %v22695_v54  ;;  %15507 = vmatpush1.bf16.msra.mxu1 %v22698_v55  ;;  %v22781_v54 = vld [vmem:[%s25505_s29 + $0x31dc] ss:$148 sps:$4 sm:$0xff]   ;;  %v22784_v55 = vld [vmem:[%s25505_s29 + $0x31e4] ss:$148 sps:$4 sm:$0xff]  }
 0x2b2   : > { %15344 = vmatprep.subr.bf16.mxu0 %v22703_v56  ;;  %15508 = vmatprep.subr.bf16.mxu1 %v22706_v57  ;;  %v22779_v56 = vld [vmem:[%s25505_s29 + $0x31d8] ss:$148 sps:$4 sm:$0xff]   ;;  %v22782_v57 = vld [vmem:[%s25505_s29 + $0x31e0] ss:$148 sps:$4 sm:$0xff]  }
 0x2b5   : > { %15345 = vmatpush1.bf16.msra.mxu0 %v22701_v58  ;;  %15509 = vmatpush1.bf16.msra.mxu1 %v22704_v59  ;;  %v22787_v58 = vld [vmem:[%s25505_s29 + $0x3304] ss:$148 sps:$4 sm:$0xff]   ;;  %v22790_v59 = vld [vmem:[%s25505_s29 + $0x330c] ss:$148 sps:$4 sm:$0xff]  }
 0x2b6   : > { %15346 = vmatprep.subr.bf16.mxu0 %v22709_v60  ;;  %15510 = vmatprep.subr.bf16.mxu1 %v22712_v62  ;;  %v22785_v60 = vld [vmem:[%s25505_s29 + $0x3300] ss:$148 sps:$4 sm:$0xff]   ;;  %v22788_v62 = vld [vmem:[%s25505_s29 + $0x3308] ss:$148 sps:$4 sm:$0xff]  }
 0x2b9   : > { %15347 = vmatpush1.bf16.msra.mxu0 %v22707_v63  ;;  %15511 = vmatpush1.bf16.msra.mxu1 %v22710_v0  ;;  %v22793_v63 = vld [vmem:[%s25505_s29 + $0x342c] ss:$148 sps:$4 sm:$0xff]   ;;  %v22796_v0 = vld [vmem:[%s25505_s29 + $0x3434] ss:$148 sps:$4 sm:$0xff]  }
 0x2ba   : > { %15357 = vmatprep.subr.bf16.mxu0 %v22715_v1  ;;  %15521 = vmatprep.subr.bf16.mxu1 %v22718_v2  ;;  %v22791_v1 = vld [vmem:[%s25505_s29 + $0x3428] ss:$148 sps:$4 sm:$0xff]   ;;  %v22794_v2 = vld [vmem:[%s25505_s29 + $0x3430] ss:$148 sps:$4 sm:$0xff]  }
 0x2bc   : > { %15349 = vmatmul.mubr.bf16.vlgmr.msra.gmra.mrb[8].mxu0 %v25686_v27  ;;  %15513 = vmatmul.mubr.bf16.vlgmr.msra.gmra.mrb[8].mxu1 %v25686_v27 }
 0x2bd   : > { %15358 = vmatpush1.bf16.msra.mxu0 %v22713_v3  ;;  %15522 = vmatpush1.bf16.msra.mxu1 %v22716_v4  ;;  %v22799_v3 = vld [vmem:[%s25505_s29 + $0x3554] ss:$148 sps:$4 sm:$0xff]   ;;  %v22802_v4 = vld [vmem:[%s25505_s29 + $0x355c] ss:$148 sps:$4 sm:$0xff]  }
 0x2be   : > { %15359 = vmatprep.subr.bf16.mxu0 %v22721_v5  ;;  %15523 = vmatprep.subr.bf16.mxu1 %v22724_v6  ;;  %v22797_v5 = vld [vmem:[%s25505_s29 + $0x3550] ss:$148 sps:$4 sm:$0xff]   ;;  %v22800_v6 = vld [vmem:[%s25505_s29 + $0x3558] ss:$148 sps:$4 sm:$0xff]  }
 0x2bf   : > { %15389 = vmatprep.mubr.bf16.mxu0 %v25610_v21  ;;  %15553 = vmatprep.mubr.bf16.mxu1 %v25610_v21 }
 0x2c1   : > { %15360 = vmatpush1.bf16.msra.mxu0 %v22719_v7  ;;  %15524 = vmatpush1.bf16.msra.mxu1 %v22722_v8  ;;  %v22805_v7 = vld [vmem:[%s25505_s29 + $0x367c] ss:$148 sps:$4 sm:$0xff]   ;;  %v22808_v8 = vld [vmem:[%s25505_s29 + $0x3684] ss:$148 sps:$4 sm:$0xff]  }
 0x2c2   : > { %15361 = vmatprep.subr.bf16.mxu0 %v22727_v9  ;;  %15525 = vmatprep.subr.bf16.mxu1 %v22730_v10  ;;  %v22803_v9 = vld [vmem:[%s25505_s29 + $0x3678] ss:$148 sps:$4 sm:$0xff]   ;;  %v22806_v10 = vld [vmem:[%s25505_s29 + $0x3680] ss:$148 sps:$4 sm:$0xff]  }
 0x2c5   : > { %15362 = vmatpush1.bf16.msra.mxu0 %v22725_v11  ;;  %15526 = vmatpush1.bf16.msra.mxu1 %v22728_v12  ;;  %v22811_v11 = vld [vmem:[%s25505_s29 + $0x37a4] ss:$148 sps:$4 sm:$0xff]   ;;  %v22814_v12 = vld [vmem:[%s25505_s29 + $0x37ac] ss:$148 sps:$4 sm:$0xff]  }
 0x2c6   : > { %15363 = vmatprep.subr.bf16.mxu0 %v22733_v13  ;;  %15527 = vmatprep.subr.bf16.mxu1 %v22736_v14  ;;  %v22809_v13 = vld [vmem:[%s25505_s29 + $0x37a0] ss:$148 sps:$4 sm:$0xff]   ;;  %v22812_v14 = vld [vmem:[%s25505_s29 + $0x37a8] ss:$148 sps:$4 sm:$0xff]  }
 0x2c9   : > { %15364 = vmatpush1.bf16.msra.mxu0 %v22731_v15  ;;  %15528 = vmatpush1.bf16.msra.mxu1 %v22734_v17  ;;  %v22817_v15 = vld [vmem:[%s25505_s29 + $0x38cc] ss:$148 sps:$4 sm:$0xff]   ;;  %v22820_v17 = vld [vmem:[%s25505_s29 + $0x38d4] ss:$148 sps:$4 sm:$0xff]  }
 0x2ca   : > { %15365 = vmatprep.subr.bf16.mxu0 %v22739_v18  ;;  %15529 = vmatprep.subr.bf16.mxu1 %v22742_v19  ;;  %v22815_v18 = vld [vmem:[%s25505_s29 + $0x38c8] ss:$148 sps:$4 sm:$0xff]   ;;  %v22818_v19 = vld [vmem:[%s25505_s29 + $0x38d0] ss:$148 sps:$4 sm:$0xff]  }
 0x2cd   : > { %15366 = vmatpush1.bf16.msra.mxu0 %v22737_v20  ;;  %15530 = vmatpush1.bf16.msra.mxu1 %v22740_v24  ;;  %v22823_v20 = vld [vmem:[%s25505_s29 + $0x39f4] ss:$148 sps:$4 sm:$0xff]   ;;  %v22826_v24 = vld [vmem:[%s25505_s29 + $0x39fc] ss:$148 sps:$4 sm:$0xff]  }
 0x2ce   : > { %15367 = vmatprep.subr.bf16.mxu0 %v22745_v25  ;;  %15531 = vmatprep.subr.bf16.mxu1 %v22748_v26  ;;  %v22821_v25 = vld [vmem:[%s25505_s29 + $0x39f0] ss:$148 sps:$4 sm:$0xff]   ;;  %v22824_v26 = vld [vmem:[%s25505_s29 + $0x39f8] ss:$148 sps:$4 sm:$0xff]  }
 0x2d1   : > { %15368 = vmatpush1.bf16.msra.mxu0 %v22743_v28  ;;  %15532 = vmatpush1.bf16.msra.mxu1 %v22746_v29  ;;  %v22829_v28 = vld [vmem:[%s25505_s29 + $0x3b1c] ss:$148 sps:$4 sm:$0xff]   ;;  %v22832_v29 = vld [vmem:[%s25505_s29 + $0x3b24] ss:$148 sps:$4 sm:$0xff]  }
 0x2d2   : > { %15369 = vmatprep.subr.bf16.mxu0 %v22751_v30  ;;  %15533 = vmatprep.subr.bf16.mxu1 %v22754_v31  ;;  %v22827_v30 = vld [vmem:[%s25505_s29 + $0x3b18] ss:$148 sps:$4 sm:$0xff]   ;;  %v22830_v31 = vld [vmem:[%s25505_s29 + $0x3b20] ss:$148 sps:$4 sm:$0xff]  }
 0x2d5   : > { %15370 = vmatpush1.bf16.msra.mxu0 %v22749_v32  ;;  %15534 = vmatpush1.bf16.msra.mxu1 %v22752_v33  ;;  %v22835_v32 = vld [vmem:[%s25505_s29 + $0x3c44] ss:$148 sps:$4 sm:$0xff]   ;;  %v22838_v33 = vld [vmem:[%s25505_s29 + $0x3c4c] ss:$148 sps:$4 sm:$0xff]  }
 0x2d6   : > { %15371 = vmatprep.subr.bf16.mxu0 %v22757_v34  ;;  %15535 = vmatprep.subr.bf16.mxu1 %v22760_v35  ;;  %v22833_v34 = vld [vmem:[%s25505_s29 + $0x3c40] ss:$148 sps:$4 sm:$0xff]   ;;  %v22836_v35 = vld [vmem:[%s25505_s29 + $0x3c48] ss:$148 sps:$4 sm:$0xff]  }
 0x2d9   : > { %15372 = vmatpush1.bf16.msra.mxu0 %v22755_v36  ;;  %15536 = vmatpush1.bf16.msra.mxu1 %v22758_v37  ;;  %v22841_v36 = vld [vmem:[%s25505_s29 + $0x3d6c] ss:$148 sps:$4 sm:$0xff]   ;;  %v22844_v37 = vld [vmem:[%s25505_s29 + $0x3d74] ss:$148 sps:$4 sm:$0xff]  }
 0x2da   : > { %15373 = vmatprep.subr.bf16.mxu0 %v22763_v39  ;;  %15537 = vmatprep.subr.bf16.mxu1 %v22766_v40  ;;  %v22839_v39 = vld [vmem:[%s25505_s29 + $0x3d68] ss:$148 sps:$4 sm:$0xff]   ;;  %v22842_v40 = vld [vmem:[%s25505_s29 + $0x3d70] ss:$148 sps:$4 sm:$0xff]  }
 0x2dd   : > { %15374 = vmatpush1.bf16.msra.mxu0 %v22761_v41  ;;  %15538 = vmatpush1.bf16.msra.mxu1 %v22764_v42  ;;  %v22847_v41 = vld [vmem:[%s25505_s29 + $0x3e94] ss:$148 sps:$4 sm:$0xff]   ;;  %v22850_v42 = vld [vmem:[%s25505_s29 + $0x3e9c] ss:$148 sps:$4 sm:$0xff]  }
 0x2de   : > { %15375 = vmatprep.subr.bf16.mxu0 %v22769_v45  ;;  %15539 = vmatprep.subr.bf16.mxu1 %v22772_v47 }
 0x2e1   : > { %15376 = vmatpush1.bf16.msra.mxu0 %v22767_v48  ;;  %15540 = vmatpush1.bf16.msra.mxu1 %v22770_v49 }
 0x2e2   : > { %15377 = vmatprep.subr.bf16.mxu0 %v22775_v50  ;;  %15541 = vmatprep.subr.bf16.mxu1 %v22778_v51 }
 0x2e5   : > { %15378 = vmatpush1.bf16.msra.mxu0 %v22773_v52  ;;  %15542 = vmatpush1.bf16.msra.mxu1 %v22776_v53 }
 0x2e6   : > { %15379 = vmatprep.subr.bf16.mxu0 %v22781_v54  ;;  %15543 = vmatprep.subr.bf16.mxu1 %v22784_v55  ;;  %v22845_v54 = vld [vmem:[%s25505_s29 + $0x3e90] ss:$148 sps:$4 sm:$0xff]   ;;  %v22848_v55 = vld [vmem:[%s25505_s29 + $0x3e98] ss:$148 sps:$4 sm:$0xff]  }
 0x2e9   : > { %15380 = vmatpush1.bf16.msra.mxu0 %v22779_v56  ;;  %15544 = vmatpush1.bf16.msra.mxu1 %v22782_v57  ;;  %v215_v56 = vld [vmem:[#allocation2 + $0x8] sm:$0xff] }
 0x2ea   : > { %15381 = vmatprep.subr.bf16.mxu0 %v22787_v58  ;;  %15545 = vmatprep.subr.bf16.mxu1 %v22790_v59  ;;  %v22853_v59 = vld [vmem:[%s25505_s29 + $0x3fbc] ss:$148 sps:$4 sm:$0xff]  }
 0x2ed   : > { %15382 = vmatpush1.bf16.msra.mxu0 %v22785_v60  ;;  %15546 = vmatpush1.bf16.msra.mxu1 %v22788_v62  ;;  %v22856_v60 = vld [vmem:[%s25505_s29 + $0x3fc4] ss:$148 sps:$4 sm:$0xff]  }
 0x2ee   : > { %15383 = vmatprep.subr.bf16.mxu0 %v22793_v63  ;;  %15547 = vmatprep.subr.bf16.mxu1 %v22796_v0 }
 0x2f1   : > { %15384 = vmatpush1.bf16.msra.mxu0 %v22791_v1  ;;  %15548 = vmatpush1.bf16.msra.mxu1 %v22794_v2  ;;  %v22851_v1 = vld [vmem:[%s25505_s29 + $0x3fb8] ss:$148 sps:$4 sm:$0xff]   ;;  %v22854_v2 = vld [vmem:[%s25505_s29 + $0x3fc0] ss:$148 sps:$4 sm:$0xff]  }
 0x2f2   : > { %15385 = vmatprep.subr.bf16.mxu0 %v22799_v3  ;;  %15549 = vmatprep.subr.bf16.mxu1 %v22802_v4  ;;  %v22859_v3 = vld [vmem:[%s25505_s29 + $0x40e4] ss:$148 sps:$4 sm:$0xff]   ;;  %v22862_v4 = vld [vmem:[%s25505_s29 + $0x40ec] ss:$148 sps:$4 sm:$0xff]  }
 0x2f5   : > { %15386 = vmatpush1.bf16.msra.mxu0 %v22797_v5  ;;  %15550 = vmatpush1.bf16.msra.mxu1 %v22800_v6  ;;  %v22857_v6 = vld [vmem:[%s25505_s29 + $0x40e0] ss:$148 sps:$4 sm:$0xff]  }
 0x2f6   : > { %15387 = vmatprep.subr.bf16.mxu0 %v22805_v7  ;;  %15551 = vmatprep.subr.bf16.mxu1 %v22808_v8  ;;  %v22860_v7 = vld [vmem:[%s25505_s29 + $0x40e8] ss:$148 sps:$4 sm:$0xff]   ;;  %v22865_v8 = vld [vmem:[%s25505_s29 + $0x420c] ss:$148 sps:$4 sm:$0xff]  }
 0x2f9   : > { %15388 = vmatpush1.bf16.msra.mxu0 %v22803_v9  ;;  %15552 = vmatpush1.bf16.msra.mxu1 %v22806_v10  ;;  %v22868_v9 = vld [vmem:[%s25505_s29 + $0x4214] ss:$148 sps:$4 sm:$0xff]  }
 0x2fa   : > { %15398 = vmatprep.subr.bf16.mxu0 %v22811_v11  ;;  %15562 = vmatprep.subr.bf16.mxu1 %v22814_v12  ;;  %v22863_v10 = vld [vmem:[%s25505_s29 + $0x4208] ss:$148 sps:$4 sm:$0xff]   ;;  %v22866_v11 = vld [vmem:[%s25505_s29 + $0x4210] ss:$148 sps:$4 sm:$0xff]  }
 0x2fb   : > { %v22871_v12 = vld [vmem:[%s25505_s29 + $0x4334] ss:$148 sps:$4 sm:$0xff]  }
 0x2fc   : > { %15390 = vmatmul.mubr.bf16.vlgmr.msra.gmra.mrb[8].mxu0 %v25613_v22  ;;  %15554 = vmatmul.mubr.bf16.vlgmr.msra.gmra.mrb[8].mxu1 %v25613_v22 }
 0x2fd   : > { %15399 = vmatpush1.bf16.msra.mxu0 %v22809_v13  ;;  %15563 = vmatpush1.bf16.msra.mxu1 %v22812_v14  ;;  %v22874_v13 = vld [vmem:[%s25505_s29 + $0x433c] ss:$148 sps:$4 sm:$0xff]  }
 0x2fe   : > { %15400 = vmatprep.subr.bf16.mxu0 %v22817_v15  ;;  %15564 = vmatprep.subr.bf16.mxu1 %v22820_v17  ;;  %v22869_v14 = vld [vmem:[%s25505_s29 + $0x4330] ss:$148 sps:$4 sm:$0xff]   ;;  %v22872_v15 = vld [vmem:[%s25505_s29 + $0x4338] ss:$148 sps:$4 sm:$0xff]  }
 0x2ff   : > { %15430 = vmatprep.mubr.bf16.mxu0 %v25761_v38  ;;  %15594 = vmatprep.mubr.bf16.mxu1 %v25761_v38  ;;  %v22877_v17 = vld [vmem:[%s25505_s29 + $0x445c] ss:$148 sps:$4 sm:$0xff]  }
 0x301   : > { %15401 = vmatpush1.bf16.msra.mxu0 %v22815_v18  ;;  %15565 = vmatpush1.bf16.msra.mxu1 %v22818_v19  ;;  %v22880_v18 = vld [vmem:[%s25505_s29 + $0x4464] ss:$148 sps:$4 sm:$0xff]  }
 0x302   : > { %15402 = vmatprep.subr.bf16.mxu0 %v22823_v20  ;;  %15566 = vmatprep.subr.bf16.mxu1 %v22826_v24  ;;  %v22875_v19 = vld [vmem:[%s25505_s29 + $0x4458] ss:$148 sps:$4 sm:$0xff]   ;;  %v22878_v20 = vld [vmem:[%s25505_s29 + $0x4460] ss:$148 sps:$4 sm:$0xff]  }
 0x303   : > { %v22883_v24 = vld [vmem:[%s25505_s29 + $0x4584] ss:$148 sps:$4 sm:$0xff]  }
 0x305   : > { %15403 = vmatpush1.bf16.msra.mxu0 %v22821_v25  ;;  %15567 = vmatpush1.bf16.msra.mxu1 %v22824_v26  ;;  %v22886_v25 = vld [vmem:[%s25505_s29 + $0x458c] ss:$148 sps:$4 sm:$0xff]  }
 0x306   : > { %15404 = vmatprep.subr.bf16.mxu0 %v22829_v28  ;;  %15568 = vmatprep.subr.bf16.mxu1 %v22832_v29  ;;  %v22881_v26 = vld [vmem:[%s25505_s29 + $0x4580] ss:$148 sps:$4 sm:$0xff]   ;;  %v22884_v28 = vld [vmem:[%s25505_s29 + $0x4588] ss:$148 sps:$4 sm:$0xff]  }
 0x307   : > { %v22889_v29 = vld [vmem:[%s25505_s29 + $0x46ac] ss:$148 sps:$4 sm:$0xff]  }
 0x309   : > { %15405 = vmatpush1.bf16.msra.mxu0 %v22827_v30  ;;  %15569 = vmatpush1.bf16.msra.mxu1 %v22830_v31  ;;  %v22892_v30 = vld [vmem:[%s25505_s29 + $0x46b4] ss:$148 sps:$4 sm:$0xff]  }
 0x30a   : > { %15406 = vmatprep.subr.bf16.mxu0 %v22835_v32  ;;  %15570 = vmatprep.subr.bf16.mxu1 %v22838_v33  ;;  %v22887_v31 = vld [vmem:[%s25505_s29 + $0x46a8] ss:$148 sps:$4 sm:$0xff]   ;;  %v22890_v32 = vld [vmem:[%s25505_s29 + $0x46b0] ss:$148 sps:$4 sm:$0xff]  }
 0x30b   : > { %v22895_v33 = vld [vmem:[%s25505_s29 + $0x47d4] ss:$148 sps:$4 sm:$0xff]  }
 0x30d   : > { %15407 = vmatpush1.bf16.msra.mxu0 %v22833_v34  ;;  %15571 = vmatpush1.bf16.msra.mxu1 %v22836_v35  ;;  %v22898_v34 = vld [vmem:[%s25505_s29 + $0x47dc] ss:$148 sps:$4 sm:$0xff]  }
 0x30e   : > { %15408 = vmatprep.subr.bf16.mxu0 %v22841_v36  ;;  %15572 = vmatprep.subr.bf16.mxu1 %v22844_v37  ;;  %v22893_v35 = vld [vmem:[%s25505_s29 + $0x47d0] ss:$148 sps:$4 sm:$0xff]   ;;  %v22896_v36 = vld [vmem:[%s25505_s29 + $0x47d8] ss:$148 sps:$4 sm:$0xff]  }
 0x30f   : > { %v15104_v45 = vpop.f32.mrb[4].mxu0  ;;  %v15268_v47 = vpop.f32.mrb[4].mxu1  ;;  %v22901_v37 = vld [vmem:[%s25505_s29 + $0x48fc] ss:$148 sps:$4 sm:$0xff]  }
 0x310   : > { %v15106_v48 = vpop.f32.mrb[5].mxu0  ;;  %v15270_v49 = vpop.f32.mrb[5].mxu1 }
 0x311   : > { %v17785_v50 = vcombine.low %v15104_v45, %v15106_v48  ;;  %v17786_v51 = vcombine.low %v15268_v47, %v15270_v49  ;;  %v15108_v52 = vpop.f32.mrb[6].mxu0  ;;  %v15272_v53 = vpop.f32.mrb[6].mxu1  ;;  %15409 = vmatpush1.bf16.msra.mxu0 %v22839_v39  ;;  %15573 = vmatpush1.bf16.msra.mxu1 %v22842_v40  ;;  %v22904_v39 = vld [vmem:[%s25505_s29 + $0x4904] ss:$148 sps:$4 sm:$0xff]   ;;  %v22910_v45 = vld [vmem:[%s25505_s29 + $0x3c] ss:$148 sps:$4 sm:$0xff]  }
 0x312   : > { %v15109_v57 = vpop.f32.mrb[7].mxu0  ;;  %v15273_v58 = vpop.f32.mrb[7].mxu1  ;;  %15410 = vmatprep.subr.bf16.mxu0 %v22847_v41  ;;  %15574 = vmatprep.subr.bf16.mxu1 %v22850_v42  ;;  %v22899_v40 = vld [vmem:[%s25505_s29 + $0x48f8] ss:$148 sps:$4 sm:$0xff]   ;;  %v22902_v41 = vld [vmem:[%s25505_s29 + $0x4900] ss:$148 sps:$4 sm:$0xff]  }
 0x313   : > { %v17793_v62 = vrot.slane %v17785_v50, %v26064_v46  ;;  %v17800_v63 = vrot.slane %v17786_v51, %v26064_v46  ;;  %v22907_v42 = vld [vmem:[%s25505_s29 + $0x34] ss:$148 sps:$4 sm:$0xff]   ;;  %v22905_v47 = vld [vmem:[%s25505_s29 + $0x30] ss:$148 sps:$4 sm:$0xff]   ;;  %v22908_v48 = vld [vmem:[%s25505_s29 + $0x38] ss:$148 sps:$4 sm:$0xff]  }
 0x314   : > { %v22913_v49 = vld [vmem:[%s25505_s29 + $0x15c] ss:$148 sps:$4 sm:$0xff]   ;;  %v22916_v50 = vld [vmem:[%s25505_s29 + $0x164] ss:$148 sps:$4 sm:$0xff]   ;;  %v22914_v52 = vld [vmem:[%s25505_s29 + $0x160] ss:$148 sps:$4 sm:$0xff]  }
 0x315   : > { %v17801_v0 = vcombine.low %v17793_v62, %v17800_v63  ;;  %15411 = vmatpush1.bf16.msra.mxu0 %v22845_v54  ;;  %15575 = vmatpush1.bf16.msra.mxu1 %v22848_v55  ;;  %v22911_v51 = vld [vmem:[%s25505_s29 + $0x158] ss:$148 sps:$4 sm:$0xff]   ;;  %v22917_v55 = vld [vmem:[%s25505_s29 + $0x280] ss:$148 sps:$4 sm:$0xff]   ;;  %v22934_v63 = vld [vmem:[%s25505_s29 + $0x4dc] ss:$148 sps:$4 sm:$0xff]  }
 0x316   : > { %15412 = vmatprep.subr.bf16.mxu0 %v22853_v59  ;;  %15576 = vmatprep.subr.bf16.mxu1 %v22856_v60  ;;  %v22919_v53 = vld [vmem:[%s25505_s29 + $0x284] ss:$148 sps:$4 sm:$0xff]   ;;  %v22922_v54 = vld [vmem:[%s25505_s29 + $0x28c] ss:$148 sps:$4 sm:$0xff]   ;;  %v22928_v58 = vld [vmem:[%s25505_s29 + $0x3b4] ss:$148 sps:$4 sm:$0xff]  }
 0x317   : > { %v17939_v5 = vadd.f32 %v17801_v0, %v215_v56  ;;  %v22920_v56 = vld [vmem:[%s25505_s29 + $0x288] ss:$148 sps:$4 sm:$0xff]   ;;  %v22925_v57 = vld [vmem:[%s25505_s29 + $0x3ac] ss:$148 sps:$4 sm:$0xff]   ;;  %v22926_v60 = vld [vmem:[%s25505_s29 + $0x3b0] ss:$148 sps:$4 sm:$0xff]  }
 0x318   : > { %v22923_v59 = vld [vmem:[%s25505_s29 + $0x3a8] ss:$148 sps:$4 sm:$0xff]   ;;  %v22929_v0 = vld [vmem:[%s25505_s29 + $0x4d0] ss:$148 sps:$4 sm:$0xff]  }
 0x319   : > { %17949 = vst [vmem:[#allocation2 + $0x8] sm:$0xff] %v17939_v5  ;;  %15413 = vmatpush1.bf16.msra.mxu0 %v22851_v1  ;;  %15577 = vmatpush1.bf16.msra.mxu1 %v22854_v2  ;;  %v22931_v62 = vld [vmem:[%s25505_s29 + $0x4d4] ss:$148 sps:$4 sm:$0xff]   ;;  %v22932_v1 = vld [vmem:[%s25505_s29 + $0x4d8] ss:$148 sps:$4 sm:$0xff]  }
 0x31a   : > { %15414 = vmatprep.subr.bf16.mxu0 %v22859_v3  ;;  %15578 = vmatprep.subr.bf16.mxu1 %v22862_v4  ;;  %v22937_v2 = vld [vmem:[%s25505_s29 + $0x5fc] ss:$148 sps:$4 sm:$0xff]   ;;  %v22940_v3 = vld [vmem:[%s25505_s29 + $0x604] ss:$148 sps:$4 sm:$0xff]   ;;  %v22938_v5 = vld [vmem:[%s25505_s29 + $0x600] ss:$148 sps:$4 sm:$0xff]  }
 0x31b   : > { %v22935_v4 = vld [vmem:[%s25505_s29 + $0x5f8] ss:$148 sps:$4 sm:$0xff]  }
 0x31d   : > { %15415 = vmatpush1.bf16.msra.mxu0 %v22857_v6  ;;  %15579 = vmatpush1.bf16.msra.mxu1 %v22860_v7  ;;  %v22943_v6 = vld [vmem:[%s25505_s29 + $0x724] ss:$148 sps:$4 sm:$0xff]   ;;  %v22946_v7 = vld [vmem:[%s25505_s29 + $0x72c] ss:$148 sps:$4 sm:$0xff]  }
 0x31e   : > { %15416 = vmatprep.subr.bf16.mxu0 %v22865_v8  ;;  %15580 = vmatprep.subr.bf16.mxu1 %v22868_v9  ;;  %v22941_v8 = vld [vmem:[%s25505_s29 + $0x720] ss:$148 sps:$4 sm:$0xff]   ;;  %v22944_v9 = vld [vmem:[%s25505_s29 + $0x728] ss:$148 sps:$4 sm:$0xff]  }
 0x321   : > { %15417 = vmatpush1.bf16.msra.mxu0 %v22863_v10  ;;  %15581 = vmatpush1.bf16.msra.mxu1 %v22866_v11  ;;  %v22949_v10 = vld [vmem:[%s25505_s29 + $0x84c] ss:$148 sps:$4 sm:$0xff]   ;;  %v22952_v11 = vld [vmem:[%s25505_s29 + $0x854] ss:$148 sps:$4 sm:$0xff]  }
 0x322   : > { %15418 = vmatprep.subr.bf16.mxu0 %v22871_v12  ;;  %15582 = vmatprep.subr.bf16.mxu1 %v22874_v13  ;;  %v22947_v12 = vld [vmem:[%s25505_s29 + $0x848] ss:$148 sps:$4 sm:$0xff]   ;;  %v22950_v13 = vld [vmem:[%s25505_s29 + $0x850] ss:$148 sps:$4 sm:$0xff]  }
 0x325   : > { %15419 = vmatpush1.bf16.msra.mxu0 %v22869_v14  ;;  %15583 = vmatpush1.bf16.msra.mxu1 %v22872_v15  ;;  %v22955_v14 = vld [vmem:[%s25505_s29 + $0x974] ss:$148 sps:$4 sm:$0xff]   ;;  %v22958_v15 = vld [vmem:[%s25505_s29 + $0x97c] ss:$148 sps:$4 sm:$0xff]  }
 0x326   : > { %15420 = vmatprep.subr.bf16.mxu0 %v22877_v17  ;;  %15584 = vmatprep.subr.bf16.mxu1 %v22880_v18  ;;  %v22953_v17 = vld [vmem:[%s25505_s29 + $0x970] ss:$148 sps:$4 sm:$0xff]   ;;  %v22956_v18 = vld [vmem:[%s25505_s29 + $0x978] ss:$148 sps:$4 sm:$0xff]  }
 0x329   : > { %15421 = vmatpush1.bf16.msra.mxu0 %v22875_v19  ;;  %15585 = vmatpush1.bf16.msra.mxu1 %v22878_v20  ;;  %v22961_v19 = vld [vmem:[%s25505_s29 + $0xa9c] ss:$148 sps:$4 sm:$0xff]   ;;  %v22964_v20 = vld [vmem:[%s25505_s29 + $0xaa4] ss:$148 sps:$4 sm:$0xff]  }
 0x32a   : > { %15422 = vmatprep.subr.bf16.mxu0 %v22883_v24  ;;  %15586 = vmatprep.subr.bf16.mxu1 %v22886_v25  ;;  %v22959_v24 = vld [vmem:[%s25505_s29 + $0xa98] ss:$148 sps:$4 sm:$0xff]   ;;  %v22962_v25 = vld [vmem:[%s25505_s29 + $0xaa0] ss:$148 sps:$4 sm:$0xff]  }
 0x32d   : > { %15423 = vmatpush1.bf16.msra.mxu0 %v22881_v26  ;;  %15587 = vmatpush1.bf16.msra.mxu1 %v22884_v28  ;;  %v22967_v26 = vld [vmem:[%s25505_s29 + $0xbc4] ss:$148 sps:$4 sm:$0xff]   ;;  %v22970_v28 = vld [vmem:[%s25505_s29 + $0xbcc] ss:$148 sps:$4 sm:$0xff]  }
 0x32e   : > { %15424 = vmatprep.subr.bf16.mxu0 %v22889_v29  ;;  %15588 = vmatprep.subr.bf16.mxu1 %v22892_v30  ;;  %v22965_v29 = vld [vmem:[%s25505_s29 + $0xbc0] ss:$148 sps:$4 sm:$0xff]   ;;  %v22968_v30 = vld [vmem:[%s25505_s29 + $0xbc8] ss:$148 sps:$4 sm:$0xff]  }
 0x331   : > { %15425 = vmatpush1.bf16.msra.mxu0 %v22887_v31  ;;  %15589 = vmatpush1.bf16.msra.mxu1 %v22890_v32  ;;  %v22973_v31 = vld [vmem:[%s25505_s29 + $0xcec] ss:$148 sps:$4 sm:$0xff]   ;;  %v22976_v32 = vld [vmem:[%s25505_s29 + $0xcf4] ss:$148 sps:$4 sm:$0xff]  }
 0x332   : > { %15426 = vmatprep.subr.bf16.mxu0 %v22895_v33  ;;  %15590 = vmatprep.subr.bf16.mxu1 %v22898_v34  ;;  %v22971_v33 = vld [vmem:[%s25505_s29 + $0xce8] ss:$148 sps:$4 sm:$0xff]   ;;  %v22974_v34 = vld [vmem:[%s25505_s29 + $0xcf0] ss:$148 sps:$4 sm:$0xff]  }
 0x335   : > { %15427 = vmatpush1.bf16.msra.mxu0 %v22893_v35  ;;  %15591 = vmatpush1.bf16.msra.mxu1 %v22896_v36  ;;  %v22979_v35 = vld [vmem:[%s25505_s29 + $0xe14] ss:$148 sps:$4 sm:$0xff]   ;;  %v22982_v36 = vld [vmem:[%s25505_s29 + $0xe1c] ss:$148 sps:$4 sm:$0xff]  }
 0x336   : > { %15428 = vmatprep.subr.bf16.mxu0 %v22901_v37  ;;  %15592 = vmatprep.subr.bf16.mxu1 %v22904_v39  ;;  %v22977_v37 = vld [vmem:[%s25505_s29 + $0xe10] ss:$148 sps:$4 sm:$0xff]   ;;  %v22980_v39 = vld [vmem:[%s25505_s29 + $0xe18] ss:$148 sps:$4 sm:$0xff]  }
 0x339   : > { %15429 = vmatpush1.bf16.msra.mxu0 %v22899_v40  ;;  %15593 = vmatpush1.bf16.msra.mxu1 %v22902_v41  ;;  %v22985_v40 = vld [vmem:[%s25505_s29 + $0xf3c] ss:$148 sps:$4 sm:$0xff]   ;;  %v22988_v41 = vld [vmem:[%s25505_s29 + $0xf44] ss:$148 sps:$4 sm:$0xff]  }
 0x33a   : > { %15603 = vmatprep.subr.bf16.mxu0 %v22907_v42  ;;  %15767 = vmatprep.subr.bf16.mxu1 %v22910_v45  ;;  %v22983_v42 = vld [vmem:[%s25505_s29 + $0xf38] ss:$148 sps:$4 sm:$0xff]   ;;  %v22986_v45 = vld [vmem:[%s25505_s29 + $0xf40] ss:$148 sps:$4 sm:$0xff]  }
 0x33c   : > { %15431 = vmatmul.mubr.bf16.vlgmr.msra.gmra.mrb[8].mxu0 %v25829_v43  ;;  %15595 = vmatmul.mubr.bf16.vlgmr.msra.gmra.mrb[8].mxu1 %v25829_v43 }
 0x33d   : > { %15604 = vmatpush1.bf16.msra.mxu0 %v22905_v47  ;;  %15768 = vmatpush1.bf16.msra.mxu1 %v22908_v48  ;;  %v22991_v47 = vld [vmem:[%s25505_s29 + $0x1064] ss:$148 sps:$4 sm:$0xff]   ;;  %v22994_v48 = vld [vmem:[%s25505_s29 + $0x106c] ss:$148 sps:$4 sm:$0xff]  }
 0x33e   : > { %15605 = vmatprep.subr.bf16.mxu0 %v22913_v49  ;;  %15769 = vmatprep.subr.bf16.mxu1 %v22916_v50  ;;  %v22989_v49 = vld [vmem:[%s25505_s29 + $0x1060] ss:$148 sps:$4 sm:$0xff]   ;;  %v22992_v50 = vld [vmem:[%s25505_s29 + $0x1068] ss:$148 sps:$4 sm:$0xff]  }
 0x33f   : > { %15635 = vmatprep.mubr.bf16.mxu0 %v25582_v61  ;;  %15799 = vmatprep.mubr.bf16.mxu1 %v25582_v61 }
 0x341   : > { %15606 = vmatpush1.bf16.msra.mxu0 %v22911_v51  ;;  %15770 = vmatpush1.bf16.msra.mxu1 %v22914_v52  ;;  %v22997_v51 = vld [vmem:[%s25505_s29 + $0x118c] ss:$148 sps:$4 sm:$0xff]   ;;  %v23000_v52 = vld [vmem:[%s25505_s29 + $0x1194] ss:$148 sps:$4 sm:$0xff]  }
 0x342   : > { %15607 = vmatprep.subr.bf16.mxu0 %v22919_v53  ;;  %15771 = vmatprep.subr.bf16.mxu1 %v22922_v54  ;;  %v22995_v53 = vld [vmem:[%s25505_s29 + $0x1188] ss:$148 sps:$4 sm:$0xff]   ;;  %v22998_v54 = vld [vmem:[%s25505_s29 + $0x1190] ss:$148 sps:$4 sm:$0xff]  }
 0x345   : > { %15608 = vmatpush1.bf16.msra.mxu0 %v22917_v55  ;;  %15772 = vmatpush1.bf16.msra.mxu1 %v22920_v56  ;;  %v23003_v55 = vld [vmem:[%s25505_s29 + $0x12b4] ss:$148 sps:$4 sm:$0xff]   ;;  %v23006_v56 = vld [vmem:[%s25505_s29 + $0x12bc] ss:$148 sps:$4 sm:$0xff]  }
 0x346   : > { %15609 = vmatprep.subr.bf16.mxu0 %v22925_v57  ;;  %15773 = vmatprep.subr.bf16.mxu1 %v22928_v58  ;;  %v23001_v57 = vld [vmem:[%s25505_s29 + $0x12b0] ss:$148 sps:$4 sm:$0xff]   ;;  %v23004_v58 = vld [vmem:[%s25505_s29 + $0x12b8] ss:$148 sps:$4 sm:$0xff]  }
 0x349   : > { %15610 = vmatpush1.bf16.msra.mxu0 %v22923_v59  ;;  %15774 = vmatpush1.bf16.msra.mxu1 %v22926_v60  ;;  %v23009_v59 = vld [vmem:[%s25505_s29 + $0x13dc] ss:$148 sps:$4 sm:$0xff]   ;;  %v23012_v60 = vld [vmem:[%s25505_s29 + $0x13e4] ss:$148 sps:$4 sm:$0xff]  }
 0x34a   : > { %15611 = vmatprep.subr.bf16.mxu0 %v22931_v62  ;;  %15775 = vmatprep.subr.bf16.mxu1 %v22934_v63  ;;  %v23007_v62 = vld [vmem:[%s25505_s29 + $0x13d8] ss:$148 sps:$4 sm:$0xff]   ;;  %v23010_v63 = vld [vmem:[%s25505_s29 + $0x13e0] ss:$148 sps:$4 sm:$0xff]  }
 0x34d   : > { %15612 = vmatpush1.bf16.msra.mxu0 %v22929_v0  ;;  %15776 = vmatpush1.bf16.msra.mxu1 %v22932_v1  ;;  %v23015_v0 = vld [vmem:[%s25505_s29 + $0x1504] ss:$148 sps:$4 sm:$0xff]   ;;  %v23018_v1 = vld [vmem:[%s25505_s29 + $0x150c] ss:$148 sps:$4 sm:$0xff]  }
 0x34e   : > { %15613 = vmatprep.subr.bf16.mxu0 %v22937_v2  ;;  %15777 = vmatprep.subr.bf16.mxu1 %v22940_v3  ;;  %v23013_v2 = vld [vmem:[%s25505_s29 + $0x1500] ss:$148 sps:$4 sm:$0xff]   ;;  %v23016_v3 = vld [vmem:[%s25505_s29 + $0x1508] ss:$148 sps:$4 sm:$0xff]  }
 0x351   : > { %15614 = vmatpush1.bf16.msra.mxu0 %v22935_v4  ;;  %15778 = vmatpush1.bf16.msra.mxu1 %v22938_v5  ;;  %v23021_v4 = vld [vmem:[%s25505_s29 + $0x162c] ss:$148 sps:$4 sm:$0xff]   ;;  %v23024_v5 = vld [vmem:[%s25505_s29 + $0x1634] ss:$148 sps:$4 sm:$0xff]  }
 0x352   : > { %15615 = vmatprep.subr.bf16.mxu0 %v22943_v6  ;;  %15779 = vmatprep.subr.bf16.mxu1 %v22946_v7  ;;  %v23019_v6 = vld [vmem:[%s25505_s29 + $0x1628] ss:$148 sps:$4 sm:$0xff]   ;;  %v23022_v7 = vld [vmem:[%s25505_s29 + $0x1630] ss:$148 sps:$4 sm:$0xff]  }
 0x355   : > { %15616 = vmatpush1.bf16.msra.mxu0 %v22941_v8  ;;  %15780 = vmatpush1.bf16.msra.mxu1 %v22944_v9  ;;  %v23027_v8 = vld [vmem:[%s25505_s29 + $0x1754] ss:$148 sps:$4 sm:$0xff]   ;;  %v23030_v9 = vld [vmem:[%s25505_s29 + $0x175c] ss:$148 sps:$4 sm:$0xff]  }
 0x356   : > { %15617 = vmatprep.subr.bf16.mxu0 %v22949_v10  ;;  %15781 = vmatprep.subr.bf16.mxu1 %v22952_v11  ;;  %v23025_v10 = vld [vmem:[%s25505_s29 + $0x1750] ss:$148 sps:$4 sm:$0xff]   ;;  %v23028_v11 = vld [vmem:[%s25505_s29 + $0x1758] ss:$148 sps:$4 sm:$0xff]  }
 0x359   : > { %15618 = vmatpush1.bf16.msra.mxu0 %v22947_v12  ;;  %15782 = vmatpush1.bf16.msra.mxu1 %v22950_v13  ;;  %v23033_v12 = vld [vmem:[%s25505_s29 + $0x187c] ss:$148 sps:$4 sm:$0xff]   ;;  %v23036_v13 = vld [vmem:[%s25505_s29 + $0x1884] ss:$148 sps:$4 sm:$0xff]  }
 0x35a   : > { %15619 = vmatprep.subr.bf16.mxu0 %v22955_v14  ;;  %15783 = vmatprep.subr.bf16.mxu1 %v22958_v15  ;;  %v23031_v14 = vld [vmem:[%s25505_s29 + $0x1878] ss:$148 sps:$4 sm:$0xff]   ;;  %v23034_v15 = vld [vmem:[%s25505_s29 + $0x1880] ss:$148 sps:$4 sm:$0xff]  }
 0x35d   : > { %15620 = vmatpush1.bf16.msra.mxu0 %v22953_v17  ;;  %15784 = vmatpush1.bf16.msra.mxu1 %v22956_v18  ;;  %v23039_v17 = vld [vmem:[%s25505_s29 + $0x19a4] ss:$148 sps:$4 sm:$0xff]   ;;  %v23042_v18 = vld [vmem:[%s25505_s29 + $0x19ac] ss:$148 sps:$4 sm:$0xff]  }
 0x35e   : > { %15621 = vmatprep.subr.bf16.mxu0 %v22961_v19  ;;  %15785 = vmatprep.subr.bf16.mxu1 %v22964_v20  ;;  %v23037_v19 = vld [vmem:[%s25505_s29 + $0x19a0] ss:$148 sps:$4 sm:$0xff]   ;;  %v23040_v20 = vld [vmem:[%s25505_s29 + $0x19a8] ss:$148 sps:$4 sm:$0xff]  }
 0x361   : > { %15622 = vmatpush1.bf16.msra.mxu0 %v22959_v24  ;;  %15786 = vmatpush1.bf16.msra.mxu1 %v22962_v25  ;;  %v23045_v24 = vld [vmem:[%s25505_s29 + $0x1acc] ss:$148 sps:$4 sm:$0xff]   ;;  %v23048_v25 = vld [vmem:[%s25505_s29 + $0x1ad4] ss:$148 sps:$4 sm:$0xff]  }
 0x362   : > { %15623 = vmatprep.subr.bf16.mxu0 %v22967_v26  ;;  %15787 = vmatprep.subr.bf16.mxu1 %v22970_v28  ;;  %v23043_v26 = vld [vmem:[%s25505_s29 + $0x1ac8] ss:$148 sps:$4 sm:$0xff]   ;;  %v23046_v28 = vld [vmem:[%s25505_s29 + $0x1ad0] ss:$148 sps:$4 sm:$0xff]  }
 0x365   : > { %15624 = vmatpush1.bf16.msra.mxu0 %v22965_v29  ;;  %15788 = vmatpush1.bf16.msra.mxu1 %v22968_v30  ;;  %v23051_v29 = vld [vmem:[%s25505_s29 + $0x1bf4] ss:$148 sps:$4 sm:$0xff]   ;;  %v23054_v30 = vld [vmem:[%s25505_s29 + $0x1bfc] ss:$148 sps:$4 sm:$0xff]  }
 0x366   : > { %15625 = vmatprep.subr.bf16.mxu0 %v22973_v31  ;;  %15789 = vmatprep.subr.bf16.mxu1 %v22976_v32  ;;  %v23049_v31 = vld [vmem:[%s25505_s29 + $0x1bf0] ss:$148 sps:$4 sm:$0xff]   ;;  %v23052_v32 = vld [vmem:[%s25505_s29 + $0x1bf8] ss:$148 sps:$4 sm:$0xff]  }
 0x369   : > { %15626 = vmatpush1.bf16.msra.mxu0 %v22971_v33  ;;  %15790 = vmatpush1.bf16.msra.mxu1 %v22974_v34  ;;  %v23057_v33 = vld [vmem:[%s25505_s29 + $0x1d1c] ss:$148 sps:$4 sm:$0xff]   ;;  %v23060_v34 = vld [vmem:[%s25505_s29 + $0x1d24] ss:$148 sps:$4 sm:$0xff]  }
 0x36a   : > { %15627 = vmatprep.subr.bf16.mxu0 %v22979_v35  ;;  %15791 = vmatprep.subr.bf16.mxu1 %v22982_v36  ;;  %v23055_v35 = vld [vmem:[%s25505_s29 + $0x1d18] ss:$148 sps:$4 sm:$0xff]   ;;  %v23058_v36 = vld [vmem:[%s25505_s29 + $0x1d20] ss:$148 sps:$4 sm:$0xff]  }
 0x36d   : > { %15628 = vmatpush1.bf16.msra.mxu0 %v22977_v37  ;;  %15792 = vmatpush1.bf16.msra.mxu1 %v22980_v39  ;;  %v23063_v37 = vld [vmem:[%s25505_s29 + $0x1e44] ss:$148 sps:$4 sm:$0xff]   ;;  %v23066_v39 = vld [vmem:[%s25505_s29 + $0x1e4c] ss:$148 sps:$4 sm:$0xff]  }
 0x36e   : > { %15629 = vmatprep.subr.bf16.mxu0 %v22985_v40  ;;  %15793 = vmatprep.subr.bf16.mxu1 %v22988_v41  ;;  %v23061_v40 = vld [vmem:[%s25505_s29 + $0x1e40] ss:$148 sps:$4 sm:$0xff]   ;;  %v23064_v41 = vld [vmem:[%s25505_s29 + $0x1e48] ss:$148 sps:$4 sm:$0xff]  }
 0x371   : > { %15630 = vmatpush1.bf16.msra.mxu0 %v22983_v42  ;;  %15794 = vmatpush1.bf16.msra.mxu1 %v22986_v45  ;;  %v23069_v42 = vld [vmem:[%s25505_s29 + $0x1f6c] ss:$148 sps:$4 sm:$0xff]   ;;  %v23072_v45 = vld [vmem:[%s25505_s29 + $0x1f74] ss:$148 sps:$4 sm:$0xff]  }
 0x372   : > { %15631 = vmatprep.subr.bf16.mxu0 %v22991_v47  ;;  %15795 = vmatprep.subr.bf16.mxu1 %v22994_v48  ;;  %v23067_v47 = vld [vmem:[%s25505_s29 + $0x1f68] ss:$148 sps:$4 sm:$0xff]   ;;  %v23070_v48 = vld [vmem:[%s25505_s29 + $0x1f70] ss:$148 sps:$4 sm:$0xff]  }
 0x375   : > { %15632 = vmatpush1.bf16.msra.mxu0 %v22989_v49  ;;  %15796 = vmatpush1.bf16.msra.mxu1 %v22992_v50  ;;  %v23075_v49 = vld [vmem:[%s25505_s29 + $0x2094] ss:$148 sps:$4 sm:$0xff]   ;;  %v23078_v50 = vld [vmem:[%s25505_s29 + $0x209c] ss:$148 sps:$4 sm:$0xff]  }
 0x376   : > { %15633 = vmatprep.subr.bf16.mxu0 %v22997_v51  ;;  %15797 = vmatprep.subr.bf16.mxu1 %v23000_v52  ;;  %v23073_v51 = vld [vmem:[%s25505_s29 + $0x2090] ss:$148 sps:$4 sm:$0xff]   ;;  %v23076_v52 = vld [vmem:[%s25505_s29 + $0x2098] ss:$148 sps:$4 sm:$0xff]  }
 0x379   : > { %15634 = vmatpush1.bf16.msra.mxu0 %v22995_v53  ;;  %15798 = vmatpush1.bf16.msra.mxu1 %v22998_v54  ;;  %v23081_v53 = vld [vmem:[%s25505_s29 + $0x21bc] ss:$148 sps:$4 sm:$0xff]   ;;  %v23084_v54 = vld [vmem:[%s25505_s29 + $0x21c4] ss:$148 sps:$4 sm:$0xff]  }
 0x37a   : > { %15644 = vmatprep.subr.bf16.mxu0 %v23003_v55  ;;  %15808 = vmatprep.subr.bf16.mxu1 %v23006_v56  ;;  %v23079_v55 = vld [vmem:[%s25505_s29 + $0x21b8] ss:$148 sps:$4 sm:$0xff]   ;;  %v23082_v56 = vld [vmem:[%s25505_s29 + $0x21c0] ss:$148 sps:$4 sm:$0xff]  }
 0x37c   : > { %15636 = vmatmul.mubr.bf16.vlgmr.msra.gmra.mrb[12].mxu0 %v25604_v16  ;;  %15800 = vmatmul.mubr.bf16.vlgmr.msra.gmra.mrb[12].mxu1 %v25604_v16 }
 0x37d   : > { %15645 = vmatpush1.bf16.msra.mxu0 %v23001_v57  ;;  %15809 = vmatpush1.bf16.msra.mxu1 %v23004_v58  ;;  %v23087_v57 = vld [vmem:[%s25505_s29 + $0x22e4] ss:$148 sps:$4 sm:$0xff]   ;;  %v23090_v58 = vld [vmem:[%s25505_s29 + $0x22ec] ss:$148 sps:$4 sm:$0xff]  }
 0x37e   : > { %15646 = vmatprep.subr.bf16.mxu0 %v23009_v59  ;;  %15810 = vmatprep.subr.bf16.mxu1 %v23012_v60  ;;  %v23085_v59 = vld [vmem:[%s25505_s29 + $0x22e0] ss:$148 sps:$4 sm:$0xff]   ;;  %v23088_v60 = vld [vmem:[%s25505_s29 + $0x22e8] ss:$148 sps:$4 sm:$0xff]  }
 0x37f   : > { %15676 = vmatprep.mubr.bf16.mxu0 %v25617_v23  ;;  %15840 = vmatprep.mubr.bf16.mxu1 %v25617_v23 }
 0x381   : > { %15647 = vmatpush1.bf16.msra.mxu0 %v23007_v62  ;;  %15811 = vmatpush1.bf16.msra.mxu1 %v23010_v63  ;;  %v23093_v62 = vld [vmem:[%s25505_s29 + $0x240c] ss:$148 sps:$4 sm:$0xff]   ;;  %v23096_v63 = vld [vmem:[%s25505_s29 + $0x2414] ss:$148 sps:$4 sm:$0xff]  }
 0x382   : > { %15648 = vmatprep.subr.bf16.mxu0 %v23015_v0  ;;  %15812 = vmatprep.subr.bf16.mxu1 %v23018_v1  ;;  %v23091_v0 = vld [vmem:[%s25505_s29 + $0x2408] ss:$148 sps:$4 sm:$0xff]   ;;  %v23094_v1 = vld [vmem:[%s25505_s29 + $0x2410] ss:$148 sps:$4 sm:$0xff]  }
 0x385   : > { %15649 = vmatpush1.bf16.msra.mxu0 %v23013_v2  ;;  %15813 = vmatpush1.bf16.msra.mxu1 %v23016_v3  ;;  %v23099_v2 = vld [vmem:[%s25505_s29 + $0x2534] ss:$148 sps:$4 sm:$0xff]   ;;  %v23102_v3 = vld [vmem:[%s25505_s29 + $0x253c] ss:$148 sps:$4 sm:$0xff]  }
 0x386   : > { %15650 = vmatprep.subr.bf16.mxu0 %v23021_v4  ;;  %15814 = vmatprep.subr.bf16.mxu1 %v23024_v5  ;;  %v23097_v4 = vld [vmem:[%s25505_s29 + $0x2530] ss:$148 sps:$4 sm:$0xff]   ;;  %v23100_v5 = vld [vmem:[%s25505_s29 + $0x2538] ss:$148 sps:$4 sm:$0xff]  }
 0x389   : > { %15651 = vmatpush1.bf16.msra.mxu0 %v23019_v6  ;;  %15815 = vmatpush1.bf16.msra.mxu1 %v23022_v7  ;;  %v23105_v6 = vld [vmem:[%s25505_s29 + $0x265c] ss:$148 sps:$4 sm:$0xff]   ;;  %v23108_v7 = vld [vmem:[%s25505_s29 + $0x2664] ss:$148 sps:$4 sm:$0xff]  }
 0x38a   : > { %15652 = vmatprep.subr.bf16.mxu0 %v23027_v8  ;;  %15816 = vmatprep.subr.bf16.mxu1 %v23030_v9  ;;  %v23103_v8 = vld [vmem:[%s25505_s29 + $0x2658] ss:$148 sps:$4 sm:$0xff]   ;;  %v23106_v9 = vld [vmem:[%s25505_s29 + $0x2660] ss:$148 sps:$4 sm:$0xff]  }
 0x38d   : > { %15653 = vmatpush1.bf16.msra.mxu0 %v23025_v10  ;;  %15817 = vmatpush1.bf16.msra.mxu1 %v23028_v11  ;;  %v23111_v10 = vld [vmem:[%s25505_s29 + $0x2784] ss:$148 sps:$4 sm:$0xff]   ;;  %v23114_v11 = vld [vmem:[%s25505_s29 + $0x278c] ss:$148 sps:$4 sm:$0xff]  }
 0x38e   : > { %15654 = vmatprep.subr.bf16.mxu0 %v23033_v12  ;;  %15818 = vmatprep.subr.bf16.mxu1 %v23036_v13  ;;  %v23109_v12 = vld [vmem:[%s25505_s29 + $0x2780] ss:$148 sps:$4 sm:$0xff]   ;;  %v23112_v13 = vld [vmem:[%s25505_s29 + $0x2788] ss:$148 sps:$4 sm:$0xff]  }
 0x391   : > { %15655 = vmatpush1.bf16.msra.mxu0 %v23031_v14  ;;  %15819 = vmatpush1.bf16.msra.mxu1 %v23034_v15  ;;  %v23117_v14 = vld [vmem:[%s25505_s29 + $0x28ac] ss:$148 sps:$4 sm:$0xff]   ;;  %v23120_v15 = vld [vmem:[%s25505_s29 + $0x28b4] ss:$148 sps:$4 sm:$0xff]  }
 0x392   : > { %15656 = vmatprep.subr.bf16.mxu0 %v23039_v17  ;;  %15820 = vmatprep.subr.bf16.mxu1 %v23042_v18  ;;  %v23115_v17 = vld [vmem:[%s25505_s29 + $0x28a8] ss:$148 sps:$4 sm:$0xff]   ;;  %v23118_v18 = vld [vmem:[%s25505_s29 + $0x28b0] ss:$148 sps:$4 sm:$0xff]  }
 0x395   : > { %15657 = vmatpush1.bf16.msra.mxu0 %v23037_v19  ;;  %15821 = vmatpush1.bf16.msra.mxu1 %v23040_v20  ;;  %v23123_v19 = vld [vmem:[%s25505_s29 + $0x29d4] ss:$148 sps:$4 sm:$0xff]   ;;  %v23126_v20 = vld [vmem:[%s25505_s29 + $0x29dc] ss:$148 sps:$4 sm:$0xff]  }
 0x396   : > { %15658 = vmatprep.subr.bf16.mxu0 %v23045_v24  ;;  %15822 = vmatprep.subr.bf16.mxu1 %v23048_v25  ;;  %v23121_v24 = vld [vmem:[%s25505_s29 + $0x29d0] ss:$148 sps:$4 sm:$0xff]   ;;  %v23124_v25 = vld [vmem:[%s25505_s29 + $0x29d8] ss:$148 sps:$4 sm:$0xff]  }
 0x399   : > { %15659 = vmatpush1.bf16.msra.mxu0 %v23043_v26  ;;  %15823 = vmatpush1.bf16.msra.mxu1 %v23046_v28  ;;  %v23129_v26 = vld [vmem:[%s25505_s29 + $0x2afc] ss:$148 sps:$4 sm:$0xff]   ;;  %v23132_v28 = vld [vmem:[%s25505_s29 + $0x2b04] ss:$148 sps:$4 sm:$0xff]  }
 0x39a   : > { %15660 = vmatprep.subr.bf16.mxu0 %v23051_v29  ;;  %15824 = vmatprep.subr.bf16.mxu1 %v23054_v30  ;;  %v23127_v29 = vld [vmem:[%s25505_s29 + $0x2af8] ss:$148 sps:$4 sm:$0xff]   ;;  %v23130_v30 = vld [vmem:[%s25505_s29 + $0x2b00] ss:$148 sps:$4 sm:$0xff]  }
 0x39d   : > { %15661 = vmatpush1.bf16.msra.mxu0 %v23049_v31  ;;  %15825 = vmatpush1.bf16.msra.mxu1 %v23052_v32  ;;  %v23135_v31 = vld [vmem:[%s25505_s29 + $0x2c24] ss:$148 sps:$4 sm:$0xff]   ;;  %v23138_v32 = vld [vmem:[%s25505_s29 + $0x2c2c] ss:$148 sps:$4 sm:$0xff]  }
 0x39e   : > { %15662 = vmatprep.subr.bf16.mxu0 %v23057_v33  ;;  %15826 = vmatprep.subr.bf16.mxu1 %v23060_v34  ;;  %v23133_v33 = vld [vmem:[%s25505_s29 + $0x2c20] ss:$148 sps:$4 sm:$0xff]   ;;  %v23136_v34 = vld [vmem:[%s25505_s29 + $0x2c28] ss:$148 sps:$4 sm:$0xff]  }
 0x3a1   : > { %15663 = vmatpush1.bf16.msra.mxu0 %v23055_v35  ;;  %15827 = vmatpush1.bf16.msra.mxu1 %v23058_v36  ;;  %v23141_v35 = vld [vmem:[%s25505_s29 + $0x2d4c] ss:$148 sps:$4 sm:$0xff]   ;;  %v23144_v36 = vld [vmem:[%s25505_s29 + $0x2d54] ss:$148 sps:$4 sm:$0xff]  }
 0x3a2   : > { %15664 = vmatprep.subr.bf16.mxu0 %v23063_v37  ;;  %15828 = vmatprep.subr.bf16.mxu1 %v23066_v39  ;;  %v23139_v37 = vld [vmem:[%s25505_s29 + $0x2d48] ss:$148 sps:$4 sm:$0xff]   ;;  %v23142_v39 = vld [vmem:[%s25505_s29 + $0x2d50] ss:$148 sps:$4 sm:$0xff]  }
 0x3a5   : > { %15665 = vmatpush1.bf16.msra.mxu0 %v23061_v40  ;;  %15829 = vmatpush1.bf16.msra.mxu1 %v23064_v41  ;;  %v23147_v40 = vld [vmem:[%s25505_s29 + $0x2e74] ss:$148 sps:$4 sm:$0xff]   ;;  %v23150_v41 = vld [vmem:[%s25505_s29 + $0x2e7c] ss:$148 sps:$4 sm:$0xff]  }
 0x3a6   : > { %15666 = vmatprep.subr.bf16.mxu0 %v23069_v42  ;;  %15830 = vmatprep.subr.bf16.mxu1 %v23072_v45  ;;  %v23145_v42 = vld [vmem:[%s25505_s29 + $0x2e70] ss:$148 sps:$4 sm:$0xff]   ;;  %v23148_v45 = vld [vmem:[%s25505_s29 + $0x2e78] ss:$148 sps:$4 sm:$0xff]  }
 0x3a9   : > { %15667 = vmatpush1.bf16.msra.mxu0 %v23067_v47  ;;  %15831 = vmatpush1.bf16.msra.mxu1 %v23070_v48  ;;  %v23153_v47 = vld [vmem:[%s25505_s29 + $0x2f9c] ss:$148 sps:$4 sm:$0xff]   ;;  %v23156_v48 = vld [vmem:[%s25505_s29 + $0x2fa4] ss:$148 sps:$4 sm:$0xff]  }
 0x3aa   : > { %15668 = vmatprep.subr.bf16.mxu0 %v23075_v49  ;;  %15832 = vmatprep.subr.bf16.mxu1 %v23078_v50  ;;  %v23151_v49 = vld [vmem:[%s25505_s29 + $0x2f98] ss:$148 sps:$4 sm:$0xff]   ;;  %v23154_v50 = vld [vmem:[%s25505_s29 + $0x2fa0] ss:$148 sps:$4 sm:$0xff]  }
 0x3ad   : > { %15669 = vmatpush1.bf16.msra.mxu0 %v23073_v51  ;;  %15833 = vmatpush1.bf16.msra.mxu1 %v23076_v52  ;;  %v23159_v51 = vld [vmem:[%s25505_s29 + $0x30c4] ss:$148 sps:$4 sm:$0xff]   ;;  %v23162_v52 = vld [vmem:[%s25505_s29 + $0x30cc] ss:$148 sps:$4 sm:$0xff]  }
 0x3ae   : > { %15670 = vmatprep.subr.bf16.mxu0 %v23081_v53  ;;  %15834 = vmatprep.subr.bf16.mxu1 %v23084_v54  ;;  %v23157_v53 = vld [vmem:[%s25505_s29 + $0x30c0] ss:$148 sps:$4 sm:$0xff]   ;;  %v23160_v54 = vld [vmem:[%s25505_s29 + $0x30c8] ss:$148 sps:$4 sm:$0xff]  }
 0x3b1   : > { %15671 = vmatpush1.bf16.msra.mxu0 %v23079_v55  ;;  %15835 = vmatpush1.bf16.msra.mxu1 %v23082_v56  ;;  %v23165_v55 = vld [vmem:[%s25505_s29 + $0x31ec] ss:$148 sps:$4 sm:$0xff]   ;;  %v23168_v56 = vld [vmem:[%s25505_s29 + $0x31f4] ss:$148 sps:$4 sm:$0xff]  }
 0x3b2   : > { %15672 = vmatprep.subr.bf16.mxu0 %v23087_v57  ;;  %15836 = vmatprep.subr.bf16.mxu1 %v23090_v58  ;;  %v23163_v57 = vld [vmem:[%s25505_s29 + $0x31e8] ss:$148 sps:$4 sm:$0xff]   ;;  %v23166_v58 = vld [vmem:[%s25505_s29 + $0x31f0] ss:$148 sps:$4 sm:$0xff]  }
 0x3b5   : > { %15673 = vmatpush1.bf16.msra.mxu0 %v23085_v59  ;;  %15837 = vmatpush1.bf16.msra.mxu1 %v23088_v60  ;;  %v23171_v59 = vld [vmem:[%s25505_s29 + $0x3314] ss:$148 sps:$4 sm:$0xff]   ;;  %v23174_v60 = vld [vmem:[%s25505_s29 + $0x331c] ss:$148 sps:$4 sm:$0xff]  }
 0x3b6   : > { %15674 = vmatprep.subr.bf16.mxu0 %v23093_v62  ;;  %15838 = vmatprep.subr.bf16.mxu1 %v23096_v63  ;;  %v23169_v62 = vld [vmem:[%s25505_s29 + $0x3310] ss:$148 sps:$4 sm:$0xff]   ;;  %v23172_v63 = vld [vmem:[%s25505_s29 + $0x3318] ss:$148 sps:$4 sm:$0xff]  }
 0x3b9   : > { %15675 = vmatpush1.bf16.msra.mxu0 %v23091_v0  ;;  %15839 = vmatpush1.bf16.msra.mxu1 %v23094_v1  ;;  %v23177_v0 = vld [vmem:[%s25505_s29 + $0x343c] ss:$148 sps:$4 sm:$0xff]   ;;  %v23180_v1 = vld [vmem:[%s25505_s29 + $0x3444] ss:$148 sps:$4 sm:$0xff]  }
 0x3ba   : > { %15685 = vmatprep.subr.bf16.mxu0 %v23099_v2  ;;  %15849 = vmatprep.subr.bf16.mxu1 %v23102_v3  ;;  %v23175_v2 = vld [vmem:[%s25505_s29 + $0x3438] ss:$148 sps:$4 sm:$0xff]   ;;  %v23178_v3 = vld [vmem:[%s25505_s29 + $0x3440] ss:$148 sps:$4 sm:$0xff]  }
 0x3bc   : > { %15677 = vmatmul.mubr.bf16.vlgmr.msra.gmra.mrb[12].mxu0 %v25686_v27  ;;  %15841 = vmatmul.mubr.bf16.vlgmr.msra.gmra.mrb[12].mxu1 %v25686_v27 }
 0x3bd   : > { %15686 = vmatpush1.bf16.msra.mxu0 %v23097_v4  ;;  %15850 = vmatpush1.bf16.msra.mxu1 %v23100_v5  ;;  %v23183_v4 = vld [vmem:[%s25505_s29 + $0x3564] ss:$148 sps:$4 sm:$0xff]   ;;  %v23186_v5 = vld [vmem:[%s25505_s29 + $0x356c] ss:$148 sps:$4 sm:$0xff]  }
 0x3be   : > { %15687 = vmatprep.subr.bf16.mxu0 %v23105_v6  ;;  %15851 = vmatprep.subr.bf16.mxu1 %v23108_v7  ;;  %v23181_v6 = vld [vmem:[%s25505_s29 + $0x3560] ss:$148 sps:$4 sm:$0xff]   ;;  %v23184_v7 = vld [vmem:[%s25505_s29 + $0x3568] ss:$148 sps:$4 sm:$0xff]  }
 0x3bf   : > { %15717 = vmatprep.mubr.bf16.mxu0 %v25610_v21  ;;  %15881 = vmatprep.mubr.bf16.mxu1 %v25610_v21 }
 0x3c1   : > { %15688 = vmatpush1.bf16.msra.mxu0 %v23103_v8  ;;  %15852 = vmatpush1.bf16.msra.mxu1 %v23106_v9  ;;  %v23189_v8 = vld [vmem:[%s25505_s29 + $0x368c] ss:$148 sps:$4 sm:$0xff]   ;;  %v23192_v9 = vld [vmem:[%s25505_s29 + $0x3694] ss:$148 sps:$4 sm:$0xff]  }
 0x3c2   : > { %15689 = vmatprep.subr.bf16.mxu0 %v23111_v10  ;;  %15853 = vmatprep.subr.bf16.mxu1 %v23114_v11  ;;  %v23187_v10 = vld [vmem:[%s25505_s29 + $0x3688] ss:$148 sps:$4 sm:$0xff]   ;;  %v23190_v11 = vld [vmem:[%s25505_s29 + $0x3690] ss:$148 sps:$4 sm:$0xff]  }
 0x3c5   : > { %15690 = vmatpush1.bf16.msra.mxu0 %v23109_v12  ;;  %15854 = vmatpush1.bf16.msra.mxu1 %v23112_v13  ;;  %v23195_v12 = vld [vmem:[%s25505_s29 + $0x37b4] ss:$148 sps:$4 sm:$0xff]   ;;  %v23198_v13 = vld [vmem:[%s25505_s29 + $0x37bc] ss:$148 sps:$4 sm:$0xff]  }
 0x3c6   : > { %15691 = vmatprep.subr.bf16.mxu0 %v23117_v14  ;;  %15855 = vmatprep.subr.bf16.mxu1 %v23120_v15  ;;  %v23193_v14 = vld [vmem:[%s25505_s29 + $0x37b0] ss:$148 sps:$4 sm:$0xff]   ;;  %v23196_v15 = vld [vmem:[%s25505_s29 + $0x37b8] ss:$148 sps:$4 sm:$0xff]  }
 0x3c9   : > { %15692 = vmatpush1.bf16.msra.mxu0 %v23115_v17  ;;  %15856 = vmatpush1.bf16.msra.mxu1 %v23118_v18  ;;  %v23201_v17 = vld [vmem:[%s25505_s29 + $0x38dc] ss:$148 sps:$4 sm:$0xff]   ;;  %v23204_v18 = vld [vmem:[%s25505_s29 + $0x38e4] ss:$148 sps:$4 sm:$0xff]  }
 0x3ca   : > { %15693 = vmatprep.subr.bf16.mxu0 %v23123_v19  ;;  %15857 = vmatprep.subr.bf16.mxu1 %v23126_v20  ;;  %v23199_v19 = vld [vmem:[%s25505_s29 + $0x38d8] ss:$148 sps:$4 sm:$0xff]   ;;  %v23202_v20 = vld [vmem:[%s25505_s29 + $0x38e0] ss:$148 sps:$4 sm:$0xff]  }
 0x3cd   : > { %15694 = vmatpush1.bf16.msra.mxu0 %v23121_v24  ;;  %15858 = vmatpush1.bf16.msra.mxu1 %v23124_v25  ;;  %v23207_v24 = vld [vmem:[%s25505_s29 + $0x3a04] ss:$148 sps:$4 sm:$0xff]   ;;  %v23210_v25 = vld [vmem:[%s25505_s29 + $0x3a0c] ss:$148 sps:$4 sm:$0xff]  }
 0x3ce   : > { %15695 = vmatprep.subr.bf16.mxu0 %v23129_v26  ;;  %15859 = vmatprep.subr.bf16.mxu1 %v23132_v28  ;;  %v23205_v26 = vld [vmem:[%s25505_s29 + $0x3a00] ss:$148 sps:$4 sm:$0xff]   ;;  %v23208_v28 = vld [vmem:[%s25505_s29 + $0x3a08] ss:$148 sps:$4 sm:$0xff]  }
 0x3d1   : > { %15696 = vmatpush1.bf16.msra.mxu0 %v23127_v29  ;;  %15860 = vmatpush1.bf16.msra.mxu1 %v23130_v30  ;;  %v23213_v29 = vld [vmem:[%s25505_s29 + $0x3b2c] ss:$148 sps:$4 sm:$0xff]   ;;  %v23216_v30 = vld [vmem:[%s25505_s29 + $0x3b34] ss:$148 sps:$4 sm:$0xff]  }
 0x3d2   : > { %15697 = vmatprep.subr.bf16.mxu0 %v23135_v31  ;;  %15861 = vmatprep.subr.bf16.mxu1 %v23138_v32  ;;  %v23211_v31 = vld [vmem:[%s25505_s29 + $0x3b28] ss:$148 sps:$4 sm:$0xff]   ;;  %v23214_v32 = vld [vmem:[%s25505_s29 + $0x3b30] ss:$148 sps:$4 sm:$0xff]  }
 0x3d5   : > { %15698 = vmatpush1.bf16.msra.mxu0 %v23133_v33  ;;  %15862 = vmatpush1.bf16.msra.mxu1 %v23136_v34  ;;  %v23219_v33 = vld [vmem:[%s25505_s29 + $0x3c54] ss:$148 sps:$4 sm:$0xff]   ;;  %v23222_v34 = vld [vmem:[%s25505_s29 + $0x3c5c] ss:$148 sps:$4 sm:$0xff]  }
 0x3d6   : > { %15699 = vmatprep.subr.bf16.mxu0 %v23141_v35  ;;  %15863 = vmatprep.subr.bf16.mxu1 %v23144_v36  ;;  %v23217_v35 = vld [vmem:[%s25505_s29 + $0x3c50] ss:$148 sps:$4 sm:$0xff]   ;;  %v23220_v36 = vld [vmem:[%s25505_s29 + $0x3c58] ss:$148 sps:$4 sm:$0xff]  }
 0x3d9   : > { %15700 = vmatpush1.bf16.msra.mxu0 %v23139_v37  ;;  %15864 = vmatpush1.bf16.msra.mxu1 %v23142_v39  ;;  %v23225_v37 = vld [vmem:[%s25505_s29 + $0x3d7c] ss:$148 sps:$4 sm:$0xff]   ;;  %v23228_v39 = vld [vmem:[%s25505_s29 + $0x3d84] ss:$148 sps:$4 sm:$0xff]  }
 0x3da   : > { %15701 = vmatprep.subr.bf16.mxu0 %v23147_v40  ;;  %15865 = vmatprep.subr.bf16.mxu1 %v23150_v41  ;;  %v23223_v40 = vld [vmem:[%s25505_s29 + $0x3d78] ss:$148 sps:$4 sm:$0xff]   ;;  %v23226_v41 = vld [vmem:[%s25505_s29 + $0x3d80] ss:$148 sps:$4 sm:$0xff]  }
 0x3dd   : > { %15702 = vmatpush1.bf16.msra.mxu0 %v23145_v42  ;;  %15866 = vmatpush1.bf16.msra.mxu1 %v23148_v45  ;;  %v23231_v42 = vld [vmem:[%s25505_s29 + $0x3ea4] ss:$148 sps:$4 sm:$0xff]   ;;  %v23234_v45 = vld [vmem:[%s25505_s29 + $0x3eac] ss:$148 sps:$4 sm:$0xff]  }
 0x3de   : > { %15703 = vmatprep.subr.bf16.mxu0 %v23153_v47  ;;  %15867 = vmatprep.subr.bf16.mxu1 %v23156_v48 }
 0x3e1   : > { %15704 = vmatpush1.bf16.msra.mxu0 %v23151_v49  ;;  %15868 = vmatpush1.bf16.msra.mxu1 %v23154_v50 }
 0x3e2   : > { %15705 = vmatprep.subr.bf16.mxu0 %v23159_v51  ;;  %15869 = vmatprep.subr.bf16.mxu1 %v23162_v52 }
 0x3e5   : > { %15706 = vmatpush1.bf16.msra.mxu0 %v23157_v53  ;;  %15870 = vmatpush1.bf16.msra.mxu1 %v23160_v54 }
 0x3e6   : > { %15707 = vmatprep.subr.bf16.mxu0 %v23165_v55  ;;  %15871 = vmatprep.subr.bf16.mxu1 %v23168_v56  ;;  %v23229_v55 = vld [vmem:[%s25505_s29 + $0x3ea0] ss:$148 sps:$4 sm:$0xff]   ;;  %v23232_v56 = vld [vmem:[%s25505_s29 + $0x3ea8] ss:$148 sps:$4 sm:$0xff]  }
 0x3e9   : > { %15708 = vmatpush1.bf16.msra.mxu0 %v23163_v57  ;;  %15872 = vmatpush1.bf16.msra.mxu1 %v23166_v58  ;;  %v216_v57 = vld [vmem:[#allocation2 + $0x10] sm:$0xff] }
 0x3ea   : > { %15709 = vmatprep.subr.bf16.mxu0 %v23171_v59  ;;  %15873 = vmatprep.subr.bf16.mxu1 %v23174_v60  ;;  %v23237_v60 = vld [vmem:[%s25505_s29 + $0x3fcc] ss:$148 sps:$4 sm:$0xff]  }
 0x3ed   : > { %15710 = vmatpush1.bf16.msra.mxu0 %v23169_v62  ;;  %15874 = vmatpush1.bf16.msra.mxu1 %v23172_v63  ;;  %v23240_v62 = vld [vmem:[%s25505_s29 + $0x3fd4] ss:$148 sps:$4 sm:$0xff]  }
 0x3ee   : > { %15711 = vmatprep.subr.bf16.mxu0 %v23177_v0  ;;  %15875 = vmatprep.subr.bf16.mxu1 %v23180_v1 }
 0x3f1   : > { %15712 = vmatpush1.bf16.msra.mxu0 %v23175_v2  ;;  %15876 = vmatpush1.bf16.msra.mxu1 %v23178_v3  ;;  %v23235_v2 = vld [vmem:[%s25505_s29 + $0x3fc8] ss:$148 sps:$4 sm:$0xff]   ;;  %v23238_v3 = vld [vmem:[%s25505_s29 + $0x3fd0] ss:$148 sps:$4 sm:$0xff]  }
 0x3f2   : > { %15713 = vmatprep.subr.bf16.mxu0 %v23183_v4  ;;  %15877 = vmatprep.subr.bf16.mxu1 %v23186_v5  ;;  %v23243_v4 = vld [vmem:[%s25505_s29 + $0x40f4] ss:$148 sps:$4 sm:$0xff]   ;;  %v23246_v5 = vld [vmem:[%s25505_s29 + $0x40fc] ss:$148 sps:$4 sm:$0xff]  }
 0x3f5   : > { %15714 = vmatpush1.bf16.msra.mxu0 %v23181_v6  ;;  %15878 = vmatpush1.bf16.msra.mxu1 %v23184_v7  ;;  %v23241_v7 = vld [vmem:[%s25505_s29 + $0x40f0] ss:$148 sps:$4 sm:$0xff]  }
 0x3f6   : > { %15715 = vmatprep.subr.bf16.mxu0 %v23189_v8  ;;  %15879 = vmatprep.subr.bf16.mxu1 %v23192_v9  ;;  %v23244_v8 = vld [vmem:[%s25505_s29 + $0x40f8] ss:$148 sps:$4 sm:$0xff]   ;;  %v23249_v9 = vld [vmem:[%s25505_s29 + $0x421c] ss:$148 sps:$4 sm:$0xff]  }
 0x3f9   : > { %15716 = vmatpush1.bf16.msra.mxu0 %v23187_v10  ;;  %15880 = vmatpush1.bf16.msra.mxu1 %v23190_v11  ;;  %v23252_v10 = vld [vmem:[%s25505_s29 + $0x4224] ss:$148 sps:$4 sm:$0xff]  }
 0x3fa   : > { %15726 = vmatprep.subr.bf16.mxu0 %v23195_v12  ;;  %15890 = vmatprep.subr.bf16.mxu1 %v23198_v13  ;;  %v23247_v11 = vld [vmem:[%s25505_s29 + $0x4218] ss:$148 sps:$4 sm:$0xff]   ;;  %v23250_v12 = vld [vmem:[%s25505_s29 + $0x4220] ss:$148 sps:$4 sm:$0xff]  }
 0x3fb   : > { %v23255_v13 = vld [vmem:[%s25505_s29 + $0x4344] ss:$148 sps:$4 sm:$0xff]  }
 0x3fc   : > { %15718 = vmatmul.mubr.bf16.vlgmr.msra.gmra.mrb[12].mxu0 %v25613_v22  ;;  %15882 = vmatmul.mubr.bf16.vlgmr.msra.gmra.mrb[12].mxu1 %v25613_v22 }
 0x3fd   : > { %15727 = vmatpush1.bf16.msra.mxu0 %v23193_v14  ;;  %15891 = vmatpush1.bf16.msra.mxu1 %v23196_v15  ;;  %v23258_v14 = vld [vmem:[%s25505_s29 + $0x434c] ss:$148 sps:$4 sm:$0xff]  }
 0x3fe   : > { %15728 = vmatprep.subr.bf16.mxu0 %v23201_v17  ;;  %15892 = vmatprep.subr.bf16.mxu1 %v23204_v18  ;;  %v23253_v15 = vld [vmem:[%s25505_s29 + $0x4340] ss:$148 sps:$4 sm:$0xff]   ;;  %v23256_v17 = vld [vmem:[%s25505_s29 + $0x4348] ss:$148 sps:$4 sm:$0xff]  }
 0x3ff   : > { %15758 = vmatprep.mubr.bf16.mxu0 %v25761_v38  ;;  %15922 = vmatprep.mubr.bf16.mxu1 %v25761_v38  ;;  %v23261_v18 = vld [vmem:[%s25505_s29 + $0x446c] ss:$148 sps:$4 sm:$0xff]  }
 0x401   : > { %15729 = vmatpush1.bf16.msra.mxu0 %v23199_v19  ;;  %15893 = vmatpush1.bf16.msra.mxu1 %v23202_v20  ;;  %v23264_v19 = vld [vmem:[%s25505_s29 + $0x4474] ss:$148 sps:$4 sm:$0xff]  }
 0x402   : > { %15730 = vmatprep.subr.bf16.mxu0 %v23207_v24  ;;  %15894 = vmatprep.subr.bf16.mxu1 %v23210_v25  ;;  %v23259_v20 = vld [vmem:[%s25505_s29 + $0x4468] ss:$148 sps:$4 sm:$0xff]   ;;  %v23262_v24 = vld [vmem:[%s25505_s29 + $0x4470] ss:$148 sps:$4 sm:$0xff]  }
 0x403   : > { %v23267_v25 = vld [vmem:[%s25505_s29 + $0x4594] ss:$148 sps:$4 sm:$0xff]  }
 0x405   : > { %15731 = vmatpush1.bf16.msra.mxu0 %v23205_v26  ;;  %15895 = vmatpush1.bf16.msra.mxu1 %v23208_v28  ;;  %v23270_v26 = vld [vmem:[%s25505_s29 + $0x459c] ss:$148 sps:$4 sm:$0xff]  }
 0x406   : > { %15732 = vmatprep.subr.bf16.mxu0 %v23213_v29  ;;  %15896 = vmatprep.subr.bf16.mxu1 %v23216_v30  ;;  %v23265_v28 = vld [vmem:[%s25505_s29 + $0x4590] ss:$148 sps:$4 sm:$0xff]   ;;  %v23268_v29 = vld [vmem:[%s25505_s29 + $0x4598] ss:$148 sps:$4 sm:$0xff]  }
 0x407   : > { %v23273_v30 = vld [vmem:[%s25505_s29 + $0x46bc] ss:$148 sps:$4 sm:$0xff]  }
 0x409   : > { %15733 = vmatpush1.bf16.msra.mxu0 %v23211_v31  ;;  %15897 = vmatpush1.bf16.msra.mxu1 %v23214_v32  ;;  %v23276_v31 = vld [vmem:[%s25505_s29 + $0x46c4] ss:$148 sps:$4 sm:$0xff]  }
 0x40a   : > { %15734 = vmatprep.subr.bf16.mxu0 %v23219_v33  ;;  %15898 = vmatprep.subr.bf16.mxu1 %v23222_v34  ;;  %v23271_v32 = vld [vmem:[%s25505_s29 + $0x46b8] ss:$148 sps:$4 sm:$0xff]   ;;  %v23274_v33 = vld [vmem:[%s25505_s29 + $0x46c0] ss:$148 sps:$4 sm:$0xff]  }
 0x40b   : > { %v23279_v34 = vld [vmem:[%s25505_s29 + $0x47e4] ss:$148 sps:$4 sm:$0xff]  }
 0x40d   : > { %15735 = vmatpush1.bf16.msra.mxu0 %v23217_v35  ;;  %15899 = vmatpush1.bf16.msra.mxu1 %v23220_v36  ;;  %v23282_v35 = vld [vmem:[%s25505_s29 + $0x47ec] ss:$148 sps:$4 sm:$0xff]  }
 0x40e   : > { %15736 = vmatprep.subr.bf16.mxu0 %v23225_v37  ;;  %15900 = vmatprep.subr.bf16.mxu1 %v23228_v39  ;;  %v23277_v36 = vld [vmem:[%s25505_s29 + $0x47e0] ss:$148 sps:$4 sm:$0xff]   ;;  %v23280_v37 = vld [vmem:[%s25505_s29 + $0x47e8] ss:$148 sps:$4 sm:$0xff]  }
 0x40f   : > { %v15432_v47 = vpop.f32.mrb[8].mxu0  ;;  %v15596_v48 = vpop.f32.mrb[8].mxu1  ;;  %v23285_v39 = vld [vmem:[%s25505_s29 + $0x490c] ss:$148 sps:$4 sm:$0xff]  }
 0x410   : > { %v15434_v49 = vpop.f32.mrb[9].mxu0  ;;  %v15598_v50 = vpop.f32.mrb[9].mxu1 }
 0x411   : > { %v17802_v51 = vcombine.low %v15432_v47, %v15434_v49  ;;  %v17803_v52 = vcombine.low %v15596_v48, %v15598_v50  ;;  %v15436_v53 = vpop.f32.mrb[10].mxu0  ;;  %v15600_v54 = vpop.f32.mrb[10].mxu1  ;;  %15737 = vmatpush1.bf16.msra.mxu0 %v23223_v40  ;;  %15901 = vmatpush1.bf16.msra.mxu1 %v23226_v41  ;;  %v23288_v40 = vld [vmem:[%s25505_s29 + $0x4914] ss:$148 sps:$4 sm:$0xff]   ;;  %v23294_v47 = vld [vmem:[%s25505_s29 + $0x4c] ss:$148 sps:$4 sm:$0xff]  }
 0x412   : > { %v15437_v58 = vpop.f32.mrb[11].mxu0  ;;  %v15601_v59 = vpop.f32.mrb[11].mxu1  ;;  %15738 = vmatprep.subr.bf16.mxu0 %v23231_v42  ;;  %15902 = vmatprep.subr.bf16.mxu1 %v23234_v45  ;;  %v23283_v41 = vld [vmem:[%s25505_s29 + $0x4908] ss:$148 sps:$4 sm:$0xff]   ;;  %v23286_v42 = vld [vmem:[%s25505_s29 + $0x4910] ss:$148 sps:$4 sm:$0xff]  }
 0x413   : > { %v17810_v63 = vrot.slane %v17802_v51, %v26064_v46  ;;  %v17817_v0 = vrot.slane %v17803_v52, %v26064_v46  ;;  %v23291_v45 = vld [vmem:[%s25505_s29 + $0x44] ss:$148 sps:$4 sm:$0xff]   ;;  %v23289_v48 = vld [vmem:[%s25505_s29 + $0x40] ss:$148 sps:$4 sm:$0xff]   ;;  %v23292_v49 = vld [vmem:[%s25505_s29 + $0x48] ss:$148 sps:$4 sm:$0xff]  }
 0x414   : > { %v23297_v50 = vld [vmem:[%s25505_s29 + $0x16c] ss:$148 sps:$4 sm:$0xff]   ;;  %v23300_v51 = vld [vmem:[%s25505_s29 + $0x174] ss:$148 sps:$4 sm:$0xff]   ;;  %v23298_v53 = vld [vmem:[%s25505_s29 + $0x170] ss:$148 sps:$4 sm:$0xff]  }
 0x415   : > { %v17818_v1 = vcombine.low %v17810_v63, %v17817_v0  ;;  %15739 = vmatpush1.bf16.msra.mxu0 %v23229_v55  ;;  %15903 = vmatpush1.bf16.msra.mxu1 %v23232_v56  ;;  %v23295_v52 = vld [vmem:[%s25505_s29 + $0x168] ss:$148 sps:$4 sm:$0xff]   ;;  %v23301_v56 = vld [vmem:[%s25505_s29 + $0x290] ss:$148 sps:$4 sm:$0xff]   ;;  %v23318_v0 = vld [vmem:[%s25505_s29 + $0x4ec] ss:$148 sps:$4 sm:$0xff]  }
 0x416   : > { %15740 = vmatprep.subr.bf16.mxu0 %v23237_v60  ;;  %15904 = vmatprep.subr.bf16.mxu1 %v23240_v62  ;;  %v23303_v54 = vld [vmem:[%s25505_s29 + $0x294] ss:$148 sps:$4 sm:$0xff]   ;;  %v23306_v55 = vld [vmem:[%s25505_s29 + $0x29c] ss:$148 sps:$4 sm:$0xff]   ;;  %v23312_v59 = vld [vmem:[%s25505_s29 + $0x3c4] ss:$148 sps:$4 sm:$0xff]  }
 0x417   : > { %v17940_v6 = vadd.f32 %v17818_v1, %v216_v57  ;;  %v23304_v57 = vld [vmem:[%s25505_s29 + $0x298] ss:$148 sps:$4 sm:$0xff]   ;;  %v23309_v58 = vld [vmem:[%s25505_s29 + $0x3bc] ss:$148 sps:$4 sm:$0xff]   ;;  %v23310_v62 = vld [vmem:[%s25505_s29 + $0x3c0] ss:$148 sps:$4 sm:$0xff]  }
 0x418   : > { %v23307_v60 = vld [vmem:[%s25505_s29 + $0x3b8] ss:$148 sps:$4 sm:$0xff]   ;;  %v23313_v1 = vld [vmem:[%s25505_s29 + $0x4e0] ss:$148 sps:$4 sm:$0xff]  }
 0x419   : > { %17950 = vst [vmem:[#allocation2 + $0x10] sm:$0xff] %v17940_v6  ;;  %15741 = vmatpush1.bf16.msra.mxu0 %v23235_v2  ;;  %15905 = vmatpush1.bf16.msra.mxu1 %v23238_v3  ;;  %v23315_v63 = vld [vmem:[%s25505_s29 + $0x4e4] ss:$148 sps:$4 sm:$0xff]   ;;  %v23316_v2 = vld [vmem:[%s25505_s29 + $0x4e8] ss:$148 sps:$4 sm:$0xff]  }
 0x41a   : > { %15742 = vmatprep.subr.bf16.mxu0 %v23243_v4  ;;  %15906 = vmatprep.subr.bf16.mxu1 %v23246_v5  ;;  %v23321_v3 = vld [vmem:[%s25505_s29 + $0x60c] ss:$148 sps:$4 sm:$0xff]   ;;  %v23324_v4 = vld [vmem:[%s25505_s29 + $0x614] ss:$148 sps:$4 sm:$0xff]   ;;  %v23322_v6 = vld [vmem:[%s25505_s29 + $0x610] ss:$148 sps:$4 sm:$0xff]  }
 0x41b   : > { %v23319_v5 = vld [vmem:[%s25505_s29 + $0x608] ss:$148 sps:$4 sm:$0xff]  }
 0x41d   : > { %15743 = vmatpush1.bf16.msra.mxu0 %v23241_v7  ;;  %15907 = vmatpush1.bf16.msra.mxu1 %v23244_v8  ;;  %v23327_v7 = vld [vmem:[%s25505_s29 + $0x734] ss:$148 sps:$4 sm:$0xff]   ;;  %v23330_v8 = vld [vmem:[%s25505_s29 + $0x73c] ss:$148 sps:$4 sm:$0xff]  }
 0x41e   : > { %15744 = vmatprep.subr.bf16.mxu0 %v23249_v9  ;;  %15908 = vmatprep.subr.bf16.mxu1 %v23252_v10  ;;  %v23325_v9 = vld [vmem:[%s25505_s29 + $0x730] ss:$148 sps:$4 sm:$0xff]   ;;  %v23328_v10 = vld [vmem:[%s25505_s29 + $0x738] ss:$148 sps:$4 sm:$0xff]  }
 0x421   : > { %15745 = vmatpush1.bf16.msra.mxu0 %v23247_v11  ;;  %15909 = vmatpush1.bf16.msra.mxu1 %v23250_v12  ;;  %v23333_v11 = vld [vmem:[%s25505_s29 + $0x85c] ss:$148 sps:$4 sm:$0xff]   ;;  %v23336_v12 = vld [vmem:[%s25505_s29 + $0x864] ss:$148 sps:$4 sm:$0xff]  }
 0x422   : > { %15746 = vmatprep.subr.bf16.mxu0 %v23255_v13  ;;  %15910 = vmatprep.subr.bf16.mxu1 %v23258_v14  ;;  %v23331_v13 = vld [vmem:[%s25505_s29 + $0x858] ss:$148 sps:$4 sm:$0xff]   ;;  %v23334_v14 = vld [vmem:[%s25505_s29 + $0x860] ss:$148 sps:$4 sm:$0xff]  }
 0x425   : > { %15747 = vmatpush1.bf16.msra.mxu0 %v23253_v15  ;;  %15911 = vmatpush1.bf16.msra.mxu1 %v23256_v17  ;;  %v23339_v15 = vld [vmem:[%s25505_s29 + $0x984] ss:$148 sps:$4 sm:$0xff]   ;;  %v23342_v17 = vld [vmem:[%s25505_s29 + $0x98c] ss:$148 sps:$4 sm:$0xff]  }
 0x426   : > { %15748 = vmatprep.subr.bf16.mxu0 %v23261_v18  ;;  %15912 = vmatprep.subr.bf16.mxu1 %v23264_v19  ;;  %v23337_v18 = vld [vmem:[%s25505_s29 + $0x980] ss:$148 sps:$4 sm:$0xff]   ;;  %v23340_v19 = vld [vmem:[%s25505_s29 + $0x988] ss:$148 sps:$4 sm:$0xff]  }
 0x429   : > { %15749 = vmatpush1.bf16.msra.mxu0 %v23259_v20  ;;  %15913 = vmatpush1.bf16.msra.mxu1 %v23262_v24  ;;  %v23345_v20 = vld [vmem:[%s25505_s29 + $0xaac] ss:$148 sps:$4 sm:$0xff]   ;;  %v23348_v24 = vld [vmem:[%s25505_s29 + $0xab4] ss:$148 sps:$4 sm:$0xff]  }
 0x42a   : > { %15750 = vmatprep.subr.bf16.mxu0 %v23267_v25  ;;  %15914 = vmatprep.subr.bf16.mxu1 %v23270_v26  ;;  %v23343_v25 = vld [vmem:[%s25505_s29 + $0xaa8] ss:$148 sps:$4 sm:$0xff]   ;;  %v23346_v26 = vld [vmem:[%s25505_s29 + $0xab0] ss:$148 sps:$4 sm:$0xff]  }
 0x42d   : > { %15751 = vmatpush1.bf16.msra.mxu0 %v23265_v28  ;;  %15915 = vmatpush1.bf16.msra.mxu1 %v23268_v29  ;;  %v23351_v28 = vld [vmem:[%s25505_s29 + $0xbd4] ss:$148 sps:$4 sm:$0xff]   ;;  %v23354_v29 = vld [vmem:[%s25505_s29 + $0xbdc] ss:$148 sps:$4 sm:$0xff]  }
 0x42e   : > { %15752 = vmatprep.subr.bf16.mxu0 %v23273_v30  ;;  %15916 = vmatprep.subr.bf16.mxu1 %v23276_v31  ;;  %v23349_v30 = vld [vmem:[%s25505_s29 + $0xbd0] ss:$148 sps:$4 sm:$0xff]   ;;  %v23352_v31 = vld [vmem:[%s25505_s29 + $0xbd8] ss:$148 sps:$4 sm:$0xff]  }
 0x431   : > { %15753 = vmatpush1.bf16.msra.mxu0 %v23271_v32  ;;  %15917 = vmatpush1.bf16.msra.mxu1 %v23274_v33  ;;  %v23357_v32 = vld [vmem:[%s25505_s29 + $0xcfc] ss:$148 sps:$4 sm:$0xff]   ;;  %v23360_v33 = vld [vmem:[%s25505_s29 + $0xd04] ss:$148 sps:$4 sm:$0xff]  }
 0x432   : > { %15754 = vmatprep.subr.bf16.mxu0 %v23279_v34  ;;  %15918 = vmatprep.subr.bf16.mxu1 %v23282_v35  ;;  %v23355_v34 = vld [vmem:[%s25505_s29 + $0xcf8] ss:$148 sps:$4 sm:$0xff]   ;;  %v23358_v35 = vld [vmem:[%s25505_s29 + $0xd00] ss:$148 sps:$4 sm:$0xff]  }
 0x435   : > { %15755 = vmatpush1.bf16.msra.mxu0 %v23277_v36  ;;  %15919 = vmatpush1.bf16.msra.mxu1 %v23280_v37  ;;  %v23363_v36 = vld [vmem:[%s25505_s29 + $0xe24] ss:$148 sps:$4 sm:$0xff]   ;;  %v23366_v37 = vld [vmem:[%s25505_s29 + $0xe2c] ss:$148 sps:$4 sm:$0xff]  }
 0x436   : > { %15756 = vmatprep.subr.bf16.mxu0 %v23285_v39  ;;  %15920 = vmatprep.subr.bf16.mxu1 %v23288_v40  ;;  %v23361_v39 = vld [vmem:[%s25505_s29 + $0xe20] ss:$148 sps:$4 sm:$0xff]   ;;  %v23364_v40 = vld [vmem:[%s25505_s29 + $0xe28] ss:$148 sps:$4 sm:$0xff]  }
 0x439   : > { %15757 = vmatpush1.bf16.msra.mxu0 %v23283_v41  ;;  %15921 = vmatpush1.bf16.msra.mxu1 %v23286_v42  ;;  %v23369_v41 = vld [vmem:[%s25505_s29 + $0xf4c] ss:$148 sps:$4 sm:$0xff]   ;;  %v23372_v42 = vld [vmem:[%s25505_s29 + $0xf54] ss:$148 sps:$4 sm:$0xff]  }
 0x43a   : > { %15931 = vmatprep.subr.bf16.mxu0 %v23291_v45  ;;  %16095 = vmatprep.subr.bf16.mxu1 %v23294_v47  ;;  %v23367_v45 = vld [vmem:[%s25505_s29 + $0xf48] ss:$148 sps:$4 sm:$0xff]   ;;  %v23370_v47 = vld [vmem:[%s25505_s29 + $0xf50] ss:$148 sps:$4 sm:$0xff]  }
 0x43c   : > { %15759 = vmatmul.mubr.bf16.vlgmr.msra.gmra.mrb[12].mxu0 %v25829_v43  ;;  %15923 = vmatmul.mubr.bf16.vlgmr.msra.gmra.mrb[12].mxu1 %v25829_v43 }
 0x43d   : > { %15932 = vmatpush1.bf16.msra.mxu0 %v23289_v48  ;;  %16096 = vmatpush1.bf16.msra.mxu1 %v23292_v49  ;;  %v23375_v48 = vld [vmem:[%s25505_s29 + $0x1074] ss:$148 sps:$4 sm:$0xff]   ;;  %v23378_v49 = vld [vmem:[%s25505_s29 + $0x107c] ss:$148 sps:$4 sm:$0xff]  }
 0x43e   : > { %15933 = vmatprep.subr.bf16.mxu0 %v23297_v50  ;;  %16097 = vmatprep.subr.bf16.mxu1 %v23300_v51  ;;  %v23373_v50 = vld [vmem:[%s25505_s29 + $0x1070] ss:$148 sps:$4 sm:$0xff]   ;;  %v23376_v51 = vld [vmem:[%s25505_s29 + $0x1078] ss:$148 sps:$4 sm:$0xff]  }
 0x43f   : > { %15963 = vmatprep.mubr.bf16.mxu0 %v25582_v61  ;;  %16127 = vmatprep.mubr.bf16.mxu1 %v25582_v61 }
 0x441   : > { %15934 = vmatpush1.bf16.msra.mxu0 %v23295_v52  ;;  %16098 = vmatpush1.bf16.msra.mxu1 %v23298_v53  ;;  %v23381_v52 = vld [vmem:[%s25505_s29 + $0x119c] ss:$148 sps:$4 sm:$0xff]   ;;  %v23384_v53 = vld [vmem:[%s25505_s29 + $0x11a4] ss:$148 sps:$4 sm:$0xff]  }
 0x442   : > { %15935 = vmatprep.subr.bf16.mxu0 %v23303_v54  ;;  %16099 = vmatprep.subr.bf16.mxu1 %v23306_v55  ;;  %v23379_v54 = vld [vmem:[%s25505_s29 + $0x1198] ss:$148 sps:$4 sm:$0xff]   ;;  %v23382_v55 = vld [vmem:[%s25505_s29 + $0x11a0] ss:$148 sps:$4 sm:$0xff]  }
 0x445   : > { %15936 = vmatpush1.bf16.msra.mxu0 %v23301_v56  ;;  %16100 = vmatpush1.bf16.msra.mxu1 %v23304_v57  ;;  %v23387_v56 = vld [vmem:[%s25505_s29 + $0x12c4] ss:$148 sps:$4 sm:$0xff]   ;;  %v23390_v57 = vld [vmem:[%s25505_s29 + $0x12cc] ss:$148 sps:$4 sm:$0xff]  }
 0x446   : > { %15937 = vmatprep.subr.bf16.mxu0 %v23309_v58  ;;  %16101 = vmatprep.subr.bf16.mxu1 %v23312_v59  ;;  %v23385_v58 = vld [vmem:[%s25505_s29 + $0x12c0] ss:$148 sps:$4 sm:$0xff]   ;;  %v23388_v59 = vld [vmem:[%s25505_s29 + $0x12c8] ss:$148 sps:$4 sm:$0xff]  }
 0x449   : > { %15938 = vmatpush1.bf16.msra.mxu0 %v23307_v60  ;;  %16102 = vmatpush1.bf16.msra.mxu1 %v23310_v62  ;;  %v23393_v60 = vld [vmem:[%s25505_s29 + $0x13ec] ss:$148 sps:$4 sm:$0xff]   ;;  %v23396_v62 = vld [vmem:[%s25505_s29 + $0x13f4] ss:$148 sps:$4 sm:$0xff]  }
 0x44a   : > { %15939 = vmatprep.subr.bf16.mxu0 %v23315_v63  ;;  %16103 = vmatprep.subr.bf16.mxu1 %v23318_v0  ;;  %v23391_v63 = vld [vmem:[%s25505_s29 + $0x13e8] ss:$148 sps:$4 sm:$0xff]   ;;  %v23394_v0 = vld [vmem:[%s25505_s29 + $0x13f0] ss:$148 sps:$4 sm:$0xff]  }
 0x44d   : > { %15940 = vmatpush1.bf16.msra.mxu0 %v23313_v1  ;;  %16104 = vmatpush1.bf16.msra.mxu1 %v23316_v2  ;;  %v23399_v1 = vld [vmem:[%s25505_s29 + $0x1514] ss:$148 sps:$4 sm:$0xff]   ;;  %v23402_v2 = vld [vmem:[%s25505_s29 + $0x151c] ss:$148 sps:$4 sm:$0xff]  }
 0x44e   : > { %15941 = vmatprep.subr.bf16.mxu0 %v23321_v3  ;;  %16105 = vmatprep.subr.bf16.mxu1 %v23324_v4  ;;  %v23397_v3 = vld [vmem:[%s25505_s29 + $0x1510] ss:$148 sps:$4 sm:$0xff]   ;;  %v23400_v4 = vld [vmem:[%s25505_s29 + $0x1518] ss:$148 sps:$4 sm:$0xff]  }
 0x451   : > { %15942 = vmatpush1.bf16.msra.mxu0 %v23319_v5  ;;  %16106 = vmatpush1.bf16.msra.mxu1 %v23322_v6  ;;  %v23405_v5 = vld [vmem:[%s25505_s29 + $0x163c] ss:$148 sps:$4 sm:$0xff]   ;;  %v23408_v6 = vld [vmem:[%s25505_s29 + $0x1644] ss:$148 sps:$4 sm:$0xff]  }
 0x452   : > { %15943 = vmatprep.subr.bf16.mxu0 %v23327_v7  ;;  %16107 = vmatprep.subr.bf16.mxu1 %v23330_v8  ;;  %v23403_v7 = vld [vmem:[%s25505_s29 + $0x1638] ss:$148 sps:$4 sm:$0xff]   ;;  %v23406_v8 = vld [vmem:[%s25505_s29 + $0x1640] ss:$148 sps:$4 sm:$0xff]  }
 0x455   : > { %15944 = vmatpush1.bf16.msra.mxu0 %v23325_v9  ;;  %16108 = vmatpush1.bf16.msra.mxu1 %v23328_v10  ;;  %v23411_v9 = vld [vmem:[%s25505_s29 + $0x1764] ss:$148 sps:$4 sm:$0xff]   ;;  %v23414_v10 = vld [vmem:[%s25505_s29 + $0x176c] ss:$148 sps:$4 sm:$0xff]  }
 0x456   : > { %15945 = vmatprep.subr.bf16.mxu0 %v23333_v11  ;;  %16109 = vmatprep.subr.bf16.mxu1 %v23336_v12  ;;  %v23409_v11 = vld [vmem:[%s25505_s29 + $0x1760] ss:$148 sps:$4 sm:$0xff]   ;;  %v23412_v12 = vld [vmem:[%s25505_s29 + $0x1768] ss:$148 sps:$4 sm:$0xff]  }
 0x459   : > { %15946 = vmatpush1.bf16.msra.mxu0 %v23331_v13  ;;  %16110 = vmatpush1.bf16.msra.mxu1 %v23334_v14  ;;  %v23417_v13 = vld [vmem:[%s25505_s29 + $0x188c] ss:$148 sps:$4 sm:$0xff]   ;;  %v23420_v14 = vld [vmem:[%s25505_s29 + $0x1894] ss:$148 sps:$4 sm:$0xff]  }
 0x45a   : > { %15947 = vmatprep.subr.bf16.mxu0 %v23339_v15  ;;  %16111 = vmatprep.subr.bf16.mxu1 %v23342_v17  ;;  %v23415_v15 = vld [vmem:[%s25505_s29 + $0x1888] ss:$148 sps:$4 sm:$0xff]   ;;  %v23418_v17 = vld [vmem:[%s25505_s29 + $0x1890] ss:$148 sps:$4 sm:$0xff]  }
 0x45d   : > { %15948 = vmatpush1.bf16.msra.mxu0 %v23337_v18  ;;  %16112 = vmatpush1.bf16.msra.mxu1 %v23340_v19  ;;  %v23423_v18 = vld [vmem:[%s25505_s29 + $0x19b4] ss:$148 sps:$4 sm:$0xff]   ;;  %v23426_v19 = vld [vmem:[%s25505_s29 + $0x19bc] ss:$148 sps:$4 sm:$0xff]  }
 0x45e   : > { %15949 = vmatprep.subr.bf16.mxu0 %v23345_v20  ;;  %16113 = vmatprep.subr.bf16.mxu1 %v23348_v24  ;;  %v23421_v20 = vld [vmem:[%s25505_s29 + $0x19b0] ss:$148 sps:$4 sm:$0xff]   ;;  %v23424_v24 = vld [vmem:[%s25505_s29 + $0x19b8] ss:$148 sps:$4 sm:$0xff]  }
 0x461   : > { %15950 = vmatpush1.bf16.msra.mxu0 %v23343_v25  ;;  %16114 = vmatpush1.bf16.msra.mxu1 %v23346_v26  ;;  %v23429_v25 = vld [vmem:[%s25505_s29 + $0x1adc] ss:$148 sps:$4 sm:$0xff]   ;;  %v23432_v26 = vld [vmem:[%s25505_s29 + $0x1ae4] ss:$148 sps:$4 sm:$0xff]  }
 0x462   : > { %15951 = vmatprep.subr.bf16.mxu0 %v23351_v28  ;;  %16115 = vmatprep.subr.bf16.mxu1 %v23354_v29  ;;  %v23427_v28 = vld [vmem:[%s25505_s29 + $0x1ad8] ss:$148 sps:$4 sm:$0xff]   ;;  %v23430_v29 = vld [vmem:[%s25505_s29 + $0x1ae0] ss:$148 sps:$4 sm:$0xff]  }
 0x465   : > { %15952 = vmatpush1.bf16.msra.mxu0 %v23349_v30  ;;  %16116 = vmatpush1.bf16.msra.mxu1 %v23352_v31  ;;  %v23435_v30 = vld [vmem:[%s25505_s29 + $0x1c04] ss:$148 sps:$4 sm:$0xff]   ;;  %v23438_v31 = vld [vmem:[%s25505_s29 + $0x1c0c] ss:$148 sps:$4 sm:$0xff]  }
 0x466   : > { %15953 = vmatprep.subr.bf16.mxu0 %v23357_v32  ;;  %16117 = vmatprep.subr.bf16.mxu1 %v23360_v33  ;;  %v23433_v32 = vld [vmem:[%s25505_s29 + $0x1c00] ss:$148 sps:$4 sm:$0xff]   ;;  %v23436_v33 = vld [vmem:[%s25505_s29 + $0x1c08] ss:$148 sps:$4 sm:$0xff]  }
 0x469   : > { %15954 = vmatpush1.bf16.msra.mxu0 %v23355_v34  ;;  %16118 = vmatpush1.bf16.msra.mxu1 %v23358_v35  ;;  %v23441_v34 = vld [vmem:[%s25505_s29 + $0x1d2c] ss:$148 sps:$4 sm:$0xff]   ;;  %v23444_v35 = vld [vmem:[%s25505_s29 + $0x1d34] ss:$148 sps:$4 sm:$0xff]  }
 0x46a   : > { %15955 = vmatprep.subr.bf16.mxu0 %v23363_v36  ;;  %16119 = vmatprep.subr.bf16.mxu1 %v23366_v37  ;;  %v23439_v36 = vld [vmem:[%s25505_s29 + $0x1d28] ss:$148 sps:$4 sm:$0xff]   ;;  %v23442_v37 = vld [vmem:[%s25505_s29 + $0x1d30] ss:$148 sps:$4 sm:$0xff]  }
 0x46d   : > { %15956 = vmatpush1.bf16.msra.mxu0 %v23361_v39  ;;  %16120 = vmatpush1.bf16.msra.mxu1 %v23364_v40  ;;  %v23447_v39 = vld [vmem:[%s25505_s29 + $0x1e54] ss:$148 sps:$4 sm:$0xff]   ;;  %v23450_v40 = vld [vmem:[%s25505_s29 + $0x1e5c] ss:$148 sps:$4 sm:$0xff]  }
 0x46e   : > { %15957 = vmatprep.subr.bf16.mxu0 %v23369_v41  ;;  %16121 = vmatprep.subr.bf16.mxu1 %v23372_v42  ;;  %v23445_v41 = vld [vmem:[%s25505_s29 + $0x1e50] ss:$148 sps:$4 sm:$0xff]   ;;  %v23448_v42 = vld [vmem:[%s25505_s29 + $0x1e58] ss:$148 sps:$4 sm:$0xff]  }
 0x471   : > { %15958 = vmatpush1.bf16.msra.mxu0 %v23367_v45  ;;  %16122 = vmatpush1.bf16.msra.mxu1 %v23370_v47  ;;  %v23453_v45 = vld [vmem:[%s25505_s29 + $0x1f7c] ss:$148 sps:$4 sm:$0xff]   ;;  %v23456_v47 = vld [vmem:[%s25505_s29 + $0x1f84] ss:$148 sps:$4 sm:$0xff]  }
 0x472   : > { %15959 = vmatprep.subr.bf16.mxu0 %v23375_v48  ;;  %16123 = vmatprep.subr.bf16.mxu1 %v23378_v49  ;;  %v23451_v48 = vld [vmem:[%s25505_s29 + $0x1f78] ss:$148 sps:$4 sm:$0xff]   ;;  %v23454_v49 = vld [vmem:[%s25505_s29 + $0x1f80] ss:$148 sps:$4 sm:$0xff]  }
 0x475   : > { %15960 = vmatpush1.bf16.msra.mxu0 %v23373_v50  ;;  %16124 = vmatpush1.bf16.msra.mxu1 %v23376_v51  ;;  %v23459_v50 = vld [vmem:[%s25505_s29 + $0x20a4] ss:$148 sps:$4 sm:$0xff]   ;;  %v23462_v51 = vld [vmem:[%s25505_s29 + $0x20ac] ss:$148 sps:$4 sm:$0xff]  }
 0x476   : > { %15961 = vmatprep.subr.bf16.mxu0 %v23381_v52  ;;  %16125 = vmatprep.subr.bf16.mxu1 %v23384_v53  ;;  %v23457_v52 = vld [vmem:[%s25505_s29 + $0x20a0] ss:$148 sps:$4 sm:$0xff]   ;;  %v23460_v53 = vld [vmem:[%s25505_s29 + $0x20a8] ss:$148 sps:$4 sm:$0xff]  }
 0x479   : > { %15962 = vmatpush1.bf16.msra.mxu0 %v23379_v54  ;;  %16126 = vmatpush1.bf16.msra.mxu1 %v23382_v55  ;;  %v23465_v54 = vld [vmem:[%s25505_s29 + $0x21cc] ss:$148 sps:$4 sm:$0xff]   ;;  %v23468_v55 = vld [vmem:[%s25505_s29 + $0x21d4] ss:$148 sps:$4 sm:$0xff]  }
 0x47a   : > { %15972 = vmatprep.subr.bf16.mxu0 %v23387_v56  ;;  %16136 = vmatprep.subr.bf16.mxu1 %v23390_v57  ;;  %v23463_v56 = vld [vmem:[%s25505_s29 + $0x21c8] ss:$148 sps:$4 sm:$0xff]   ;;  %v23466_v57 = vld [vmem:[%s25505_s29 + $0x21d0] ss:$148 sps:$4 sm:$0xff]  }
 0x47c   : > { %15964 = vmatmul.mubr.bf16.vlgmr.msra.gmra.mrb[16].mxu0 %v25604_v16  ;;  %16128 = vmatmul.mubr.bf16.vlgmr.msra.gmra.mrb[16].mxu1 %v25604_v16 }
 0x47d   : > { %15973 = vmatpush1.bf16.msra.mxu0 %v23385_v58  ;;  %16137 = vmatpush1.bf16.msra.mxu1 %v23388_v59  ;;  %v23471_v58 = vld [vmem:[%s25505_s29 + $0x22f4] ss:$148 sps:$4 sm:$0xff]   ;;  %v23474_v59 = vld [vmem:[%s25505_s29 + $0x22fc] ss:$148 sps:$4 sm:$0xff]  }
 0x47e   : > { %15974 = vmatprep.subr.bf16.mxu0 %v23393_v60  ;;  %16138 = vmatprep.subr.bf16.mxu1 %v23396_v62  ;;  %v23469_v60 = vld [vmem:[%s25505_s29 + $0x22f0] ss:$148 sps:$4 sm:$0xff]   ;;  %v23472_v62 = vld [vmem:[%s25505_s29 + $0x22f8] ss:$148 sps:$4 sm:$0xff]  }
 0x47f   : > { %16004 = vmatprep.mubr.bf16.mxu0 %v25617_v23  ;;  %16168 = vmatprep.mubr.bf16.mxu1 %v25617_v23 }
 0x481   : > { %15975 = vmatpush1.bf16.msra.mxu0 %v23391_v63  ;;  %16139 = vmatpush1.bf16.msra.mxu1 %v23394_v0  ;;  %v23477_v63 = vld [vmem:[%s25505_s29 + $0x241c] ss:$148 sps:$4 sm:$0xff]   ;;  %v23480_v0 = vld [vmem:[%s25505_s29 + $0x2424] ss:$148 sps:$4 sm:$0xff]  }
 0x482   : > { %15976 = vmatprep.subr.bf16.mxu0 %v23399_v1  ;;  %16140 = vmatprep.subr.bf16.mxu1 %v23402_v2  ;;  %v23475_v1 = vld [vmem:[%s25505_s29 + $0x2418] ss:$148 sps:$4 sm:$0xff]   ;;  %v23478_v2 = vld [vmem:[%s25505_s29 + $0x2420] ss:$148 sps:$4 sm:$0xff]  }
 0x485   : > { %15977 = vmatpush1.bf16.msra.mxu0 %v23397_v3  ;;  %16141 = vmatpush1.bf16.msra.mxu1 %v23400_v4  ;;  %v23483_v3 = vld [vmem:[%s25505_s29 + $0x2544] ss:$148 sps:$4 sm:$0xff]   ;;  %v23486_v4 = vld [vmem:[%s25505_s29 + $0x254c] ss:$148 sps:$4 sm:$0xff]  }
 0x486   : > { %15978 = vmatprep.subr.bf16.mxu0 %v23405_v5  ;;  %16142 = vmatprep.subr.bf16.mxu1 %v23408_v6  ;;  %v23481_v5 = vld [vmem:[%s25505_s29 + $0x2540] ss:$148 sps:$4 sm:$0xff]   ;;  %v23484_v6 = vld [vmem:[%s25505_s29 + $0x2548] ss:$148 sps:$4 sm:$0xff]  }
 0x489   : > { %15979 = vmatpush1.bf16.msra.mxu0 %v23403_v7  ;;  %16143 = vmatpush1.bf16.msra.mxu1 %v23406_v8  ;;  %v23489_v7 = vld [vmem:[%s25505_s29 + $0x266c] ss:$148 sps:$4 sm:$0xff]   ;;  %v23492_v8 = vld [vmem:[%s25505_s29 + $0x2674] ss:$148 sps:$4 sm:$0xff]  }
 0x48a   : > { %15980 = vmatprep.subr.bf16.mxu0 %v23411_v9  ;;  %16144 = vmatprep.subr.bf16.mxu1 %v23414_v10  ;;  %v23487_v9 = vld [vmem:[%s25505_s29 + $0x2668] ss:$148 sps:$4 sm:$0xff]   ;;  %v23490_v10 = vld [vmem:[%s25505_s29 + $0x2670] ss:$148 sps:$4 sm:$0xff]  }
 0x48d   : > { %15981 = vmatpush1.bf16.msra.mxu0 %v23409_v11  ;;  %16145 = vmatpush1.bf16.msra.mxu1 %v23412_v12  ;;  %v23495_v11 = vld [vmem:[%s25505_s29 + $0x2794] ss:$148 sps:$4 sm:$0xff]   ;;  %v23498_v12 = vld [vmem:[%s25505_s29 + $0x279c] ss:$148 sps:$4 sm:$0xff]  }
 0x48e   : > { %15982 = vmatprep.subr.bf16.mxu0 %v23417_v13  ;;  %16146 = vmatprep.subr.bf16.mxu1 %v23420_v14  ;;  %v23493_v13 = vld [vmem:[%s25505_s29 + $0x2790] ss:$148 sps:$4 sm:$0xff]   ;;  %v23496_v14 = vld [vmem:[%s25505_s29 + $0x2798] ss:$148 sps:$4 sm:$0xff]  }
 0x491   : > { %15983 = vmatpush1.bf16.msra.mxu0 %v23415_v15  ;;  %16147 = vmatpush1.bf16.msra.mxu1 %v23418_v17  ;;  %v23501_v15 = vld [vmem:[%s25505_s29 + $0x28bc] ss:$148 sps:$4 sm:$0xff]   ;;  %v23504_v17 = vld [vmem:[%s25505_s29 + $0x28c4] ss:$148 sps:$4 sm:$0xff]  }
 0x492   : > { %15984 = vmatprep.subr.bf16.mxu0 %v23423_v18  ;;  %16148 = vmatprep.subr.bf16.mxu1 %v23426_v19  ;;  %v23499_v18 = vld [vmem:[%s25505_s29 + $0x28b8] ss:$148 sps:$4 sm:$0xff]   ;;  %v23502_v19 = vld [vmem:[%s25505_s29 + $0x28c0] ss:$148 sps:$4 sm:$0xff]  }
 0x495   : > { %15985 = vmatpush1.bf16.msra.mxu0 %v23421_v20  ;;  %16149 = vmatpush1.bf16.msra.mxu1 %v23424_v24  ;;  %v23507_v20 = vld [vmem:[%s25505_s29 + $0x29e4] ss:$148 sps:$4 sm:$0xff]   ;;  %v23510_v24 = vld [vmem:[%s25505_s29 + $0x29ec] ss:$148 sps:$4 sm:$0xff]  }
 0x496   : > { %15986 = vmatprep.subr.bf16.mxu0 %v23429_v25  ;;  %16150 = vmatprep.subr.bf16.mxu1 %v23432_v26  ;;  %v23505_v25 = vld [vmem:[%s25505_s29 + $0x29e0] ss:$148 sps:$4 sm:$0xff]   ;;  %v23508_v26 = vld [vmem:[%s25505_s29 + $0x29e8] ss:$148 sps:$4 sm:$0xff]  }
 0x499   : > { %15987 = vmatpush1.bf16.msra.mxu0 %v23427_v28  ;;  %16151 = vmatpush1.bf16.msra.mxu1 %v23430_v29  ;;  %v23513_v28 = vld [vmem:[%s25505_s29 + $0x2b0c] ss:$148 sps:$4 sm:$0xff]   ;;  %v23516_v29 = vld [vmem:[%s25505_s29 + $0x2b14] ss:$148 sps:$4 sm:$0xff]  }
 0x49a   : > { %15988 = vmatprep.subr.bf16.mxu0 %v23435_v30  ;;  %16152 = vmatprep.subr.bf16.mxu1 %v23438_v31  ;;  %v23511_v30 = vld [vmem:[%s25505_s29 + $0x2b08] ss:$148 sps:$4 sm:$0xff]   ;;  %v23514_v31 = vld [vmem:[%s25505_s29 + $0x2b10] ss:$148 sps:$4 sm:$0xff]  }
 0x49d   : > { %15989 = vmatpush1.bf16.msra.mxu0 %v23433_v32  ;;  %16153 = vmatpush1.bf16.msra.mxu1 %v23436_v33  ;;  %v23519_v32 = vld [vmem:[%s25505_s29 + $0x2c34] ss:$148 sps:$4 sm:$0xff]   ;;  %v23522_v33 = vld [vmem:[%s25505_s29 + $0x2c3c] ss:$148 sps:$4 sm:$0xff]  }
 0x49e   : > { %15990 = vmatprep.subr.bf16.mxu0 %v23441_v34  ;;  %16154 = vmatprep.subr.bf16.mxu1 %v23444_v35  ;;  %v23517_v34 = vld [vmem:[%s25505_s29 + $0x2c30] ss:$148 sps:$4 sm:$0xff]   ;;  %v23520_v35 = vld [vmem:[%s25505_s29 + $0x2c38] ss:$148 sps:$4 sm:$0xff]  }
 0x4a1   : > { %15991 = vmatpush1.bf16.msra.mxu0 %v23439_v36  ;;  %16155 = vmatpush1.bf16.msra.mxu1 %v23442_v37  ;;  %v23525_v36 = vld [vmem:[%s25505_s29 + $0x2d5c] ss:$148 sps:$4 sm:$0xff]   ;;  %v23528_v37 = vld [vmem:[%s25505_s29 + $0x2d64] ss:$148 sps:$4 sm:$0xff]  }
 0x4a2   : > { %15992 = vmatprep.subr.bf16.mxu0 %v23447_v39  ;;  %16156 = vmatprep.subr.bf16.mxu1 %v23450_v40  ;;  %v23523_v39 = vld [vmem:[%s25505_s29 + $0x2d58] ss:$148 sps:$4 sm:$0xff]   ;;  %v23526_v40 = vld [vmem:[%s25505_s29 + $0x2d60] ss:$148 sps:$4 sm:$0xff]  }
 0x4a5   : > { %15993 = vmatpush1.bf16.msra.mxu0 %v23445_v41  ;;  %16157 = vmatpush1.bf16.msra.mxu1 %v23448_v42  ;;  %v23531_v41 = vld [vmem:[%s25505_s29 + $0x2e84] ss:$148 sps:$4 sm:$0xff]   ;;  %v23534_v42 = vld [vmem:[%s25505_s29 + $0x2e8c] ss:$148 sps:$4 sm:$0xff]  }
 0x4a6   : > { %15994 = vmatprep.subr.bf16.mxu0 %v23453_v45  ;;  %16158 = vmatprep.subr.bf16.mxu1 %v23456_v47  ;;  %v23529_v45 = vld [vmem:[%s25505_s29 + $0x2e80] ss:$148 sps:$4 sm:$0xff]   ;;  %v23532_v47 = vld [vmem:[%s25505_s29 + $0x2e88] ss:$148 sps:$4 sm:$0xff]  }
 0x4a9   : > { %15995 = vmatpush1.bf16.msra.mxu0 %v23451_v48  ;;  %16159 = vmatpush1.bf16.msra.mxu1 %v23454_v49  ;;  %v23537_v48 = vld [vmem:[%s25505_s29 + $0x2fac] ss:$148 sps:$4 sm:$0xff]   ;;  %v23540_v49 = vld [vmem:[%s25505_s29 + $0x2fb4] ss:$148 sps:$4 sm:$0xff]  }
 0x4aa   : > { %15996 = vmatprep.subr.bf16.mxu0 %v23459_v50  ;;  %16160 = vmatprep.subr.bf16.mxu1 %v23462_v51  ;;  %v23535_v50 = vld [vmem:[%s25505_s29 + $0x2fa8] ss:$148 sps:$4 sm:$0xff]   ;;  %v23538_v51 = vld [vmem:[%s25505_s29 + $0x2fb0] ss:$148 sps:$4 sm:$0xff]  }
 0x4ad   : > { %15997 = vmatpush1.bf16.msra.mxu0 %v23457_v52  ;;  %16161 = vmatpush1.bf16.msra.mxu1 %v23460_v53  ;;  %v23543_v52 = vld [vmem:[%s25505_s29 + $0x30d4] ss:$148 sps:$4 sm:$0xff]   ;;  %v23546_v53 = vld [vmem:[%s25505_s29 + $0x30dc] ss:$148 sps:$4 sm:$0xff]  }
 0x4ae   : > { %15998 = vmatprep.subr.bf16.mxu0 %v23465_v54  ;;  %16162 = vmatprep.subr.bf16.mxu1 %v23468_v55  ;;  %v23541_v54 = vld [vmem:[%s25505_s29 + $0x30d0] ss:$148 sps:$4 sm:$0xff]   ;;  %v23544_v55 = vld [vmem:[%s25505_s29 + $0x30d8] ss:$148 sps:$4 sm:$0xff]  }
 0x4b1   : > { %15999 = vmatpush1.bf16.msra.mxu0 %v23463_v56  ;;  %16163 = vmatpush1.bf16.msra.mxu1 %v23466_v57  ;;  %v23549_v56 = vld [vmem:[%s25505_s29 + $0x31fc] ss:$148 sps:$4 sm:$0xff]   ;;  %v23552_v57 = vld [vmem:[%s25505_s29 + $0x3204] ss:$148 sps:$4 sm:$0xff]  }
 0x4b2   : > { %16000 = vmatprep.subr.bf16.mxu0 %v23471_v58  ;;  %16164 = vmatprep.subr.bf16.mxu1 %v23474_v59  ;;  %v23547_v58 = vld [vmem:[%s25505_s29 + $0x31f8] ss:$148 sps:$4 sm:$0xff]   ;;  %v23550_v59 = vld [vmem:[%s25505_s29 + $0x3200] ss:$148 sps:$4 sm:$0xff]  }
 0x4b5   : > { %16001 = vmatpush1.bf16.msra.mxu0 %v23469_v60  ;;  %16165 = vmatpush1.bf16.msra.mxu1 %v23472_v62  ;;  %v23555_v60 = vld [vmem:[%s25505_s29 + $0x3324] ss:$148 sps:$4 sm:$0xff]   ;;  %v23558_v62 = vld [vmem:[%s25505_s29 + $0x332c] ss:$148 sps:$4 sm:$0xff]  }
 0x4b6   : > { %16002 = vmatprep.subr.bf16.mxu0 %v23477_v63  ;;  %16166 = vmatprep.subr.bf16.mxu1 %v23480_v0  ;;  %v23553_v63 = vld [vmem:[%s25505_s29 + $0x3320] ss:$148 sps:$4 sm:$0xff]   ;;  %v23556_v0 = vld [vmem:[%s25505_s29 + $0x3328] ss:$148 sps:$4 sm:$0xff]  }
 0x4b9   : > { %16003 = vmatpush1.bf16.msra.mxu0 %v23475_v1  ;;  %16167 = vmatpush1.bf16.msra.mxu1 %v23478_v2  ;;  %v23561_v1 = vld [vmem:[%s25505_s29 + $0x344c] ss:$148 sps:$4 sm:$0xff]   ;;  %v23564_v2 = vld [vmem:[%s25505_s29 + $0x3454] ss:$148 sps:$4 sm:$0xff]  }
 0x4ba   : > { %16013 = vmatprep.subr.bf16.mxu0 %v23483_v3  ;;  %16177 = vmatprep.subr.bf16.mxu1 %v23486_v4  ;;  %v23559_v3 = vld [vmem:[%s25505_s29 + $0x3448] ss:$148 sps:$4 sm:$0xff]   ;;  %v23562_v4 = vld [vmem:[%s25505_s29 + $0x3450] ss:$148 sps:$4 sm:$0xff]  }
 0x4bc   : > { %16005 = vmatmul.mubr.bf16.vlgmr.msra.gmra.mrb[16].mxu0 %v25686_v27  ;;  %16169 = vmatmul.mubr.bf16.vlgmr.msra.gmra.mrb[16].mxu1 %v25686_v27 }
 0x4bd   : > { %16014 = vmatpush1.bf16.msra.mxu0 %v23481_v5  ;;  %16178 = vmatpush1.bf16.msra.mxu1 %v23484_v6  ;;  %v23567_v5 = vld [vmem:[%s25505_s29 + $0x3574] ss:$148 sps:$4 sm:$0xff]   ;;  %v23570_v6 = vld [vmem:[%s25505_s29 + $0x357c] ss:$148 sps:$4 sm:$0xff]  }
 0x4be   : > { %16015 = vmatprep.subr.bf16.mxu0 %v23489_v7  ;;  %16179 = vmatprep.subr.bf16.mxu1 %v23492_v8  ;;  %v23565_v7 = vld [vmem:[%s25505_s29 + $0x3570] ss:$148 sps:$4 sm:$0xff]   ;;  %v23568_v8 = vld [vmem:[%s25505_s29 + $0x3578] ss:$148 sps:$4 sm:$0xff]  }
 0x4bf   : > { %16045 = vmatprep.mubr.bf16.mxu0 %v25610_v21  ;;  %16209 = vmatprep.mubr.bf16.mxu1 %v25610_v21 }
 0x4c1   : > { %16016 = vmatpush1.bf16.msra.mxu0 %v23487_v9  ;;  %16180 = vmatpush1.bf16.msra.mxu1 %v23490_v10  ;;  %v23573_v9 = vld [vmem:[%s25505_s29 + $0x369c] ss:$148 sps:$4 sm:$0xff]   ;;  %v23576_v10 = vld [vmem:[%s25505_s29 + $0x36a4] ss:$148 sps:$4 sm:$0xff]  }
 0x4c2   : > { %16017 = vmatprep.subr.bf16.mxu0 %v23495_v11  ;;  %16181 = vmatprep.subr.bf16.mxu1 %v23498_v12  ;;  %v23571_v11 = vld [vmem:[%s25505_s29 + $0x3698] ss:$148 sps:$4 sm:$0xff]   ;;  %v23574_v12 = vld [vmem:[%s25505_s29 + $0x36a0] ss:$148 sps:$4 sm:$0xff]  }
 0x4c5   : > { %16018 = vmatpush1.bf16.msra.mxu0 %v23493_v13  ;;  %16182 = vmatpush1.bf16.msra.mxu1 %v23496_v14  ;;  %v23579_v13 = vld [vmem:[%s25505_s29 + $0x37c4] ss:$148 sps:$4 sm:$0xff]   ;;  %v23582_v14 = vld [vmem:[%s25505_s29 + $0x37cc] ss:$148 sps:$4 sm:$0xff]  }
 0x4c6   : > { %16019 = vmatprep.subr.bf16.mxu0 %v23501_v15  ;;  %16183 = vmatprep.subr.bf16.mxu1 %v23504_v17  ;;  %v23577_v15 = vld [vmem:[%s25505_s29 + $0x37c0] ss:$148 sps:$4 sm:$0xff]   ;;  %v23580_v17 = vld [vmem:[%s25505_s29 + $0x37c8] ss:$148 sps:$4 sm:$0xff]  }
 0x4c9   : > { %16020 = vmatpush1.bf16.msra.mxu0 %v23499_v18  ;;  %16184 = vmatpush1.bf16.msra.mxu1 %v23502_v19  ;;  %v23585_v18 = vld [vmem:[%s25505_s29 + $0x38ec] ss:$148 sps:$4 sm:$0xff]   ;;  %v23588_v19 = vld [vmem:[%s25505_s29 + $0x38f4] ss:$148 sps:$4 sm:$0xff]  }
 0x4ca   : > { %16021 = vmatprep.subr.bf16.mxu0 %v23507_v20  ;;  %16185 = vmatprep.subr.bf16.mxu1 %v23510_v24  ;;  %v23583_v20 = vld [vmem:[%s25505_s29 + $0x38e8] ss:$148 sps:$4 sm:$0xff]   ;;  %v23586_v24 = vld [vmem:[%s25505_s29 + $0x38f0] ss:$148 sps:$4 sm:$0xff]  }
 0x4cd   : > { %16022 = vmatpush1.bf16.msra.mxu0 %v23505_v25  ;;  %16186 = vmatpush1.bf16.msra.mxu1 %v23508_v26  ;;  %v23591_v25 = vld [vmem:[%s25505_s29 + $0x3a14] ss:$148 sps:$4 sm:$0xff]   ;;  %v23594_v26 = vld [vmem:[%s25505_s29 + $0x3a1c] ss:$148 sps:$4 sm:$0xff]  }
 0x4ce   : > { %16023 = vmatprep.subr.bf16.mxu0 %v23513_v28  ;;  %16187 = vmatprep.subr.bf16.mxu1 %v23516_v29  ;;  %v23589_v28 = vld [vmem:[%s25505_s29 + $0x3a10] ss:$148 sps:$4 sm:$0xff]   ;;  %v23592_v29 = vld [vmem:[%s25505_s29 + $0x3a18] ss:$148 sps:$4 sm:$0xff]  }
 0x4d1   : > { %16024 = vmatpush1.bf16.msra.mxu0 %v23511_v30  ;;  %16188 = vmatpush1.bf16.msra.mxu1 %v23514_v31  ;;  %v23597_v30 = vld [vmem:[%s25505_s29 + $0x3b3c] ss:$148 sps:$4 sm:$0xff]   ;;  %v23600_v31 = vld [vmem:[%s25505_s29 + $0x3b44] ss:$148 sps:$4 sm:$0xff]  }
 0x4d2   : > { %16025 = vmatprep.subr.bf16.mxu0 %v23519_v32  ;;  %16189 = vmatprep.subr.bf16.mxu1 %v23522_v33  ;;  %v23595_v32 = vld [vmem:[%s25505_s29 + $0x3b38] ss:$148 sps:$4 sm:$0xff]   ;;  %v23598_v33 = vld [vmem:[%s25505_s29 + $0x3b40] ss:$148 sps:$4 sm:$0xff]  }
 0x4d5   : > { %16026 = vmatpush1.bf16.msra.mxu0 %v23517_v34  ;;  %16190 = vmatpush1.bf16.msra.mxu1 %v23520_v35  ;;  %v23603_v34 = vld [vmem:[%s25505_s29 + $0x3c64] ss:$148 sps:$4 sm:$0xff]   ;;  %v23606_v35 = vld [vmem:[%s25505_s29 + $0x3c6c] ss:$148 sps:$4 sm:$0xff]  }
 0x4d6   : > { %16027 = vmatprep.subr.bf16.mxu0 %v23525_v36  ;;  %16191 = vmatprep.subr.bf16.mxu1 %v23528_v37  ;;  %v23601_v36 = vld [vmem:[%s25505_s29 + $0x3c60] ss:$148 sps:$4 sm:$0xff]   ;;  %v23604_v37 = vld [vmem:[%s25505_s29 + $0x3c68] ss:$148 sps:$4 sm:$0xff]  }
 0x4d9   : > { %16028 = vmatpush1.bf16.msra.mxu0 %v23523_v39  ;;  %16192 = vmatpush1.bf16.msra.mxu1 %v23526_v40  ;;  %v23609_v39 = vld [vmem:[%s25505_s29 + $0x3d8c] ss:$148 sps:$4 sm:$0xff]   ;;  %v23612_v40 = vld [vmem:[%s25505_s29 + $0x3d94] ss:$148 sps:$4 sm:$0xff]  }
 0x4da   : > { %16029 = vmatprep.subr.bf16.mxu0 %v23531_v41  ;;  %16193 = vmatprep.subr.bf16.mxu1 %v23534_v42  ;;  %v23607_v41 = vld [vmem:[%s25505_s29 + $0x3d88] ss:$148 sps:$4 sm:$0xff]   ;;  %v23610_v42 = vld [vmem:[%s25505_s29 + $0x3d90] ss:$148 sps:$4 sm:$0xff]  }
 0x4dd   : > { %16030 = vmatpush1.bf16.msra.mxu0 %v23529_v45  ;;  %16194 = vmatpush1.bf16.msra.mxu1 %v23532_v47  ;;  %v23615_v45 = vld [vmem:[%s25505_s29 + $0x3eb4] ss:$148 sps:$4 sm:$0xff]   ;;  %v23618_v47 = vld [vmem:[%s25505_s29 + $0x3ebc] ss:$148 sps:$4 sm:$0xff]  }
 0x4de   : > { %16031 = vmatprep.subr.bf16.mxu0 %v23537_v48  ;;  %16195 = vmatprep.subr.bf16.mxu1 %v23540_v49 }
 0x4e1   : > { %16032 = vmatpush1.bf16.msra.mxu0 %v23535_v50  ;;  %16196 = vmatpush1.bf16.msra.mxu1 %v23538_v51 }
 0x4e2   : > { %16033 = vmatprep.subr.bf16.mxu0 %v23543_v52  ;;  %16197 = vmatprep.subr.bf16.mxu1 %v23546_v53 }
 0x4e5   : > { %16034 = vmatpush1.bf16.msra.mxu0 %v23541_v54  ;;  %16198 = vmatpush1.bf16.msra.mxu1 %v23544_v55 }
 0x4e6   : > { %16035 = vmatprep.subr.bf16.mxu0 %v23549_v56  ;;  %16199 = vmatprep.subr.bf16.mxu1 %v23552_v57  ;;  %v23613_v56 = vld [vmem:[%s25505_s29 + $0x3eb0] ss:$148 sps:$4 sm:$0xff]   ;;  %v23616_v57 = vld [vmem:[%s25505_s29 + $0x3eb8] ss:$148 sps:$4 sm:$0xff]  }
 0x4e9   : > { %16036 = vmatpush1.bf16.msra.mxu0 %v23547_v58  ;;  %16200 = vmatpush1.bf16.msra.mxu1 %v23550_v59  ;;  %v217_v58 = vld [vmem:[#allocation2 + $0x18] sm:$0xff] }
 0x4ea   : > { %16037 = vmatprep.subr.bf16.mxu0 %v23555_v60  ;;  %16201 = vmatprep.subr.bf16.mxu1 %v23558_v62  ;;  %v23621_v62 = vld [vmem:[%s25505_s29 + $0x3fdc] ss:$148 sps:$4 sm:$0xff]  }
 0x4ed   : > { %16038 = vmatpush1.bf16.msra.mxu0 %v23553_v63  ;;  %16202 = vmatpush1.bf16.msra.mxu1 %v23556_v0  ;;  %v23624_v63 = vld [vmem:[%s25505_s29 + $0x3fe4] ss:$148 sps:$4 sm:$0xff]  }
 0x4ee   : > { %16039 = vmatprep.subr.bf16.mxu0 %v23561_v1  ;;  %16203 = vmatprep.subr.bf16.mxu1 %v23564_v2 }
 0x4f1   : > { %16040 = vmatpush1.bf16.msra.mxu0 %v23559_v3  ;;  %16204 = vmatpush1.bf16.msra.mxu1 %v23562_v4  ;;  %v23619_v3 = vld [vmem:[%s25505_s29 + $0x3fd8] ss:$148 sps:$4 sm:$0xff]   ;;  %v23622_v4 = vld [vmem:[%s25505_s29 + $0x3fe0] ss:$148 sps:$4 sm:$0xff]  }
 0x4f2   : > { %16041 = vmatprep.subr.bf16.mxu0 %v23567_v5  ;;  %16205 = vmatprep.subr.bf16.mxu1 %v23570_v6  ;;  %v23627_v5 = vld [vmem:[%s25505_s29 + $0x4104] ss:$148 sps:$4 sm:$0xff]   ;;  %v23630_v6 = vld [vmem:[%s25505_s29 + $0x410c] ss:$148 sps:$4 sm:$0xff]  }
 0x4f5   : > { %16042 = vmatpush1.bf16.msra.mxu0 %v23565_v7  ;;  %16206 = vmatpush1.bf16.msra.mxu1 %v23568_v8  ;;  %v23625_v8 = vld [vmem:[%s25505_s29 + $0x4100] ss:$148 sps:$4 sm:$0xff]  }
 0x4f6   : > { %16043 = vmatprep.subr.bf16.mxu0 %v23573_v9  ;;  %16207 = vmatprep.subr.bf16.mxu1 %v23576_v10  ;;  %v23628_v9 = vld [vmem:[%s25505_s29 + $0x4108] ss:$148 sps:$4 sm:$0xff]   ;;  %v23633_v10 = vld [vmem:[%s25505_s29 + $0x422c] ss:$148 sps:$4 sm:$0xff]  }
 0x4f9   : > { %16044 = vmatpush1.bf16.msra.mxu0 %v23571_v11  ;;  %16208 = vmatpush1.bf16.msra.mxu1 %v23574_v12  ;;  %v23636_v11 = vld [vmem:[%s25505_s29 + $0x4234] ss:$148 sps:$4 sm:$0xff]  }
 0x4fa   : > { %16054 = vmatprep.subr.bf16.mxu0 %v23579_v13  ;;  %16218 = vmatprep.subr.bf16.mxu1 %v23582_v14  ;;  %v23631_v12 = vld [vmem:[%s25505_s29 + $0x4228] ss:$148 sps:$4 sm:$0xff]   ;;  %v23634_v13 = vld [vmem:[%s25505_s29 + $0x4230] ss:$148 sps:$4 sm:$0xff]  }
 0x4fb   : > { %v23639_v14 = vld [vmem:[%s25505_s29 + $0x4354] ss:$148 sps:$4 sm:$0xff]  }
 0x4fc   : > { %16046 = vmatmul.mubr.bf16.vlgmr.msra.gmra.mrb[16].mxu0 %v25613_v22  ;;  %16210 = vmatmul.mubr.bf16.vlgmr.msra.gmra.mrb[16].mxu1 %v25613_v22 }
 0x4fd   : > { %16055 = vmatpush1.bf16.msra.mxu0 %v23577_v15  ;;  %16219 = vmatpush1.bf16.msra.mxu1 %v23580_v17  ;;  %v23642_v15 = vld [vmem:[%s25505_s29 + $0x435c] ss:$148 sps:$4 sm:$0xff]  }
 0x4fe   : > { %16056 = vmatprep.subr.bf16.mxu0 %v23585_v18  ;;  %16220 = vmatprep.subr.bf16.mxu1 %v23588_v19  ;;  %v23637_v17 = vld [vmem:[%s25505_s29 + $0x4350] ss:$148 sps:$4 sm:$0xff]   ;;  %v23640_v18 = vld [vmem:[%s25505_s29 + $0x4358] ss:$148 sps:$4 sm:$0xff]  }
 0x4ff   : > { %16086 = vmatprep.mubr.bf16.mxu0 %v25761_v38  ;;  %16250 = vmatprep.mubr.bf16.mxu1 %v25761_v38  ;;  %v23645_v19 = vld [vmem:[%s25505_s29 + $0x447c] ss:$148 sps:$4 sm:$0xff]  }
 0x501   : > { %16057 = vmatpush1.bf16.msra.mxu0 %v23583_v20  ;;  %16221 = vmatpush1.bf16.msra.mxu1 %v23586_v24  ;;  %v23648_v20 = vld [vmem:[%s25505_s29 + $0x4484] ss:$148 sps:$4 sm:$0xff]  }
 0x502   : > { %16058 = vmatprep.subr.bf16.mxu0 %v23591_v25  ;;  %16222 = vmatprep.subr.bf16.mxu1 %v23594_v26  ;;  %v23643_v24 = vld [vmem:[%s25505_s29 + $0x4478] ss:$148 sps:$4 sm:$0xff]   ;;  %v23646_v25 = vld [vmem:[%s25505_s29 + $0x4480] ss:$148 sps:$4 sm:$0xff]  }
 0x503   : > { %v23651_v26 = vld [vmem:[%s25505_s29 + $0x45a4] ss:$148 sps:$4 sm:$0xff]  }
 0x505   : > { %16059 = vmatpush1.bf16.msra.mxu0 %v23589_v28  ;;  %16223 = vmatpush1.bf16.msra.mxu1 %v23592_v29  ;;  %v23654_v28 = vld [vmem:[%s25505_s29 + $0x45ac] ss:$148 sps:$4 sm:$0xff]  }
 0x506   : > { %16060 = vmatprep.subr.bf16.mxu0 %v23597_v30  ;;  %16224 = vmatprep.subr.bf16.mxu1 %v23600_v31  ;;  %v23649_v29 = vld [vmem:[%s25505_s29 + $0x45a0] ss:$148 sps:$4 sm:$0xff]   ;;  %v23652_v30 = vld [vmem:[%s25505_s29 + $0x45a8] ss:$148 sps:$4 sm:$0xff]  }
 0x507   : > { %v23657_v31 = vld [vmem:[%s25505_s29 + $0x46cc] ss:$148 sps:$4 sm:$0xff]  }
 0x509   : > { %16061 = vmatpush1.bf16.msra.mxu0 %v23595_v32  ;;  %16225 = vmatpush1.bf16.msra.mxu1 %v23598_v33  ;;  %v23660_v32 = vld [vmem:[%s25505_s29 + $0x46d4] ss:$148 sps:$4 sm:$0xff]  }
 0x50a   : > { %16062 = vmatprep.subr.bf16.mxu0 %v23603_v34  ;;  %16226 = vmatprep.subr.bf16.mxu1 %v23606_v35  ;;  %v23655_v33 = vld [vmem:[%s25505_s29 + $0x46c8] ss:$148 sps:$4 sm:$0xff]   ;;  %v23658_v34 = vld [vmem:[%s25505_s29 + $0x46d0] ss:$148 sps:$4 sm:$0xff]  }
 0x50b   : > { %v23663_v35 = vld [vmem:[%s25505_s29 + $0x47f4] ss:$148 sps:$4 sm:$0xff]  }
 0x50d   : > { %16063 = vmatpush1.bf16.msra.mxu0 %v23601_v36  ;;  %16227 = vmatpush1.bf16.msra.mxu1 %v23604_v37  ;;  %v23666_v36 = vld [vmem:[%s25505_s29 + $0x47fc] ss:$148 sps:$4 sm:$0xff]  }
 0x50e   : > { %16064 = vmatprep.subr.bf16.mxu0 %v23609_v39  ;;  %16228 = vmatprep.subr.bf16.mxu1 %v23612_v40  ;;  %v23661_v37 = vld [vmem:[%s25505_s29 + $0x47f0] ss:$148 sps:$4 sm:$0xff]   ;;  %v23664_v39 = vld [vmem:[%s25505_s29 + $0x47f8] ss:$148 sps:$4 sm:$0xff]  }
 0x50f   : > { %v15760_v48 = vpop.f32.mrb[12].mxu0  ;;  %v15924_v49 = vpop.f32.mrb[12].mxu1  ;;  %v23669_v40 = vld [vmem:[%s25505_s29 + $0x491c] ss:$148 sps:$4 sm:$0xff]  }
 0x510   : > { %v15762_v50 = vpop.f32.mrb[13].mxu0  ;;  %v15926_v51 = vpop.f32.mrb[13].mxu1 }
 0x511   : > { %v17819_v52 = vcombine.low %v15760_v48, %v15762_v50  ;;  %v17820_v53 = vcombine.low %v15924_v49, %v15926_v51  ;;  %v15764_v54 = vpop.f32.mrb[14].mxu0  ;;  %v15928_v55 = vpop.f32.mrb[14].mxu1  ;;  %16065 = vmatpush1.bf16.msra.mxu0 %v23607_v41  ;;  %16229 = vmatpush1.bf16.msra.mxu1 %v23610_v42  ;;  %v23672_v41 = vld [vmem:[%s25505_s29 + $0x4924] ss:$148 sps:$4 sm:$0xff]   ;;  %v23678_v48 = vld [vmem:[%s25505_s29 + $0x5c] ss:$148 sps:$4 sm:$0xff]  }
 0x512   : > { %v15765_v59 = vpop.f32.mrb[15].mxu0  ;;  %v15929_v60 = vpop.f32.mrb[15].mxu1  ;;  %16066 = vmatprep.subr.bf16.mxu0 %v23615_v45  ;;  %16230 = vmatprep.subr.bf16.mxu1 %v23618_v47  ;;  %v23667_v42 = vld [vmem:[%s25505_s29 + $0x4918] ss:$148 sps:$4 sm:$0xff]   ;;  %v23670_v45 = vld [vmem:[%s25505_s29 + $0x4920] ss:$148 sps:$4 sm:$0xff]  }
 0x513   : > { %v17827_v0 = vrot.slane %v17819_v52, %v26064_v46  ;;  %v17834_v1 = vrot.slane %v17820_v53, %v26064_v46  ;;  %v23675_v47 = vld [vmem:[%s25505_s29 + $0x54] ss:$148 sps:$4 sm:$0xff]   ;;  %v23673_v49 = vld [vmem:[%s25505_s29 + $0x50] ss:$148 sps:$4 sm:$0xff]   ;;  %v23676_v50 = vld [vmem:[%s25505_s29 + $0x58] ss:$148 sps:$4 sm:$0xff]  }
 0x514   : > { %v23681_v51 = vld [vmem:[%s25505_s29 + $0x17c] ss:$148 sps:$4 sm:$0xff]   ;;  %v23684_v52 = vld [vmem:[%s25505_s29 + $0x184] ss:$148 sps:$4 sm:$0xff]   ;;  %v23682_v54 = vld [vmem:[%s25505_s29 + $0x180] ss:$148 sps:$4 sm:$0xff]  }
 0x515   : > { %v17835_v2 = vcombine.low %v17827_v0, %v17834_v1  ;;  %16067 = vmatpush1.bf16.msra.mxu0 %v23613_v56  ;;  %16231 = vmatpush1.bf16.msra.mxu1 %v23616_v57  ;;  %v23679_v53 = vld [vmem:[%s25505_s29 + $0x178] ss:$148 sps:$4 sm:$0xff]   ;;  %v23685_v57 = vld [vmem:[%s25505_s29 + $0x2a0] ss:$148 sps:$4 sm:$0xff]   ;;  %v23702_v1 = vld [vmem:[%s25505_s29 + $0x4fc] ss:$148 sps:$4 sm:$0xff]  }
 0x516   : > { %16068 = vmatprep.subr.bf16.mxu0 %v23621_v62  ;;  %16232 = vmatprep.subr.bf16.mxu1 %v23624_v63  ;;  %v23687_v55 = vld [vmem:[%s25505_s29 + $0x2a4] ss:$148 sps:$4 sm:$0xff]   ;;  %v23690_v56 = vld [vmem:[%s25505_s29 + $0x2ac] ss:$148 sps:$4 sm:$0xff]   ;;  %v23696_v60 = vld [vmem:[%s25505_s29 + $0x3d4] ss:$148 sps:$4 sm:$0xff]  }
 0x517   : > { %v17941_v7 = vadd.f32 %v17835_v2, %v217_v58  ;;  %v23688_v58 = vld [vmem:[%s25505_s29 + $0x2a8] ss:$148 sps:$4 sm:$0xff]   ;;  %v23693_v59 = vld [vmem:[%s25505_s29 + $0x3cc] ss:$148 sps:$4 sm:$0xff]   ;;  %v23694_v63 = vld [vmem:[%s25505_s29 + $0x3d0] ss:$148 sps:$4 sm:$0xff]  }
 0x518   : > { %v23691_v62 = vld [vmem:[%s25505_s29 + $0x3c8] ss:$148 sps:$4 sm:$0xff]   ;;  %v23697_v2 = vld [vmem:[%s25505_s29 + $0x4f0] ss:$148 sps:$4 sm:$0xff]  }
 0x519   : > { %17951 = vst [vmem:[#allocation2 + $0x18] sm:$0xff] %v17941_v7  ;;  %16069 = vmatpush1.bf16.msra.mxu0 %v23619_v3  ;;  %16233 = vmatpush1.bf16.msra.mxu1 %v23622_v4  ;;  %v23699_v0 = vld [vmem:[%s25505_s29 + $0x4f4] ss:$148 sps:$4 sm:$0xff]   ;;  %v23700_v3 = vld [vmem:[%s25505_s29 + $0x4f8] ss:$148 sps:$4 sm:$0xff]  }
 0x51a   : > { %16070 = vmatprep.subr.bf16.mxu0 %v23627_v5  ;;  %16234 = vmatprep.subr.bf16.mxu1 %v23630_v6  ;;  %v23705_v4 = vld [vmem:[%s25505_s29 + $0x61c] ss:$148 sps:$4 sm:$0xff]   ;;  %v23708_v5 = vld [vmem:[%s25505_s29 + $0x624] ss:$148 sps:$4 sm:$0xff]   ;;  %v23706_v7 = vld [vmem:[%s25505_s29 + $0x620] ss:$148 sps:$4 sm:$0xff]  }
 0x51b   : > { %v23703_v6 = vld [vmem:[%s25505_s29 + $0x618] ss:$148 sps:$4 sm:$0xff]  }
 0x51d   : > { %16071 = vmatpush1.bf16.msra.mxu0 %v23625_v8  ;;  %16235 = vmatpush1.bf16.msra.mxu1 %v23628_v9  ;;  %v23711_v8 = vld [vmem:[%s25505_s29 + $0x744] ss:$148 sps:$4 sm:$0xff]   ;;  %v23714_v9 = vld [vmem:[%s25505_s29 + $0x74c] ss:$148 sps:$4 sm:$0xff]  }
 0x51e   : > { %16072 = vmatprep.subr.bf16.mxu0 %v23633_v10  ;;  %16236 = vmatprep.subr.bf16.mxu1 %v23636_v11  ;;  %v23709_v10 = vld [vmem:[%s25505_s29 + $0x740] ss:$148 sps:$4 sm:$0xff]   ;;  %v23712_v11 = vld [vmem:[%s25505_s29 + $0x748] ss:$148 sps:$4 sm:$0xff]  }
 0x521   : > { %16073 = vmatpush1.bf16.msra.mxu0 %v23631_v12  ;;  %16237 = vmatpush1.bf16.msra.mxu1 %v23634_v13  ;;  %v23717_v12 = vld [vmem:[%s25505_s29 + $0x86c] ss:$148 sps:$4 sm:$0xff]   ;;  %v23720_v13 = vld [vmem:[%s25505_s29 + $0x874] ss:$148 sps:$4 sm:$0xff]  }
 0x522   : > { %16074 = vmatprep.subr.bf16.mxu0 %v23639_v14  ;;  %16238 = vmatprep.subr.bf16.mxu1 %v23642_v15  ;;  %v23715_v14 = vld [vmem:[%s25505_s29 + $0x868] ss:$148 sps:$4 sm:$0xff]   ;;  %v23718_v15 = vld [vmem:[%s25505_s29 + $0x870] ss:$148 sps:$4 sm:$0xff]  }
 0x525   : > { %16075 = vmatpush1.bf16.msra.mxu0 %v23637_v17  ;;  %16239 = vmatpush1.bf16.msra.mxu1 %v23640_v18  ;;  %v23723_v17 = vld [vmem:[%s25505_s29 + $0x994] ss:$148 sps:$4 sm:$0xff]   ;;  %v23726_v18 = vld [vmem:[%s25505_s29 + $0x99c] ss:$148 sps:$4 sm:$0xff]  }
 0x526   : > { %16076 = vmatprep.subr.bf16.mxu0 %v23645_v19  ;;  %16240 = vmatprep.subr.bf16.mxu1 %v23648_v20  ;;  %v23721_v19 = vld [vmem:[%s25505_s29 + $0x990] ss:$148 sps:$4 sm:$0xff]   ;;  %v23724_v20 = vld [vmem:[%s25505_s29 + $0x998] ss:$148 sps:$4 sm:$0xff]  }
 0x529   : > { %16077 = vmatpush1.bf16.msra.mxu0 %v23643_v24  ;;  %16241 = vmatpush1.bf16.msra.mxu1 %v23646_v25  ;;  %v23729_v24 = vld [vmem:[%s25505_s29 + $0xabc] ss:$148 sps:$4 sm:$0xff]   ;;  %v23732_v25 = vld [vmem:[%s25505_s29 + $0xac4] ss:$148 sps:$4 sm:$0xff]  }
 0x52a   : > { %16078 = vmatprep.subr.bf16.mxu0 %v23651_v26  ;;  %16242 = vmatprep.subr.bf16.mxu1 %v23654_v28  ;;  %v23727_v26 = vld [vmem:[%s25505_s29 + $0xab8] ss:$148 sps:$4 sm:$0xff]   ;;  %v23730_v28 = vld [vmem:[%s25505_s29 + $0xac0] ss:$148 sps:$4 sm:$0xff]  }
 0x52d   : > { %16079 = vmatpush1.bf16.msra.mxu0 %v23649_v29  ;;  %16243 = vmatpush1.bf16.msra.mxu1 %v23652_v30  ;;  %v23735_v29 = vld [vmem:[%s25505_s29 + $0xbe4] ss:$148 sps:$4 sm:$0xff]   ;;  %v23738_v30 = vld [vmem:[%s25505_s29 + $0xbec] ss:$148 sps:$4 sm:$0xff]  }
 0x52e   : > { %16080 = vmatprep.subr.bf16.mxu0 %v23657_v31  ;;  %16244 = vmatprep.subr.bf16.mxu1 %v23660_v32  ;;  %v23733_v31 = vld [vmem:[%s25505_s29 + $0xbe0] ss:$148 sps:$4 sm:$0xff]   ;;  %v23736_v32 = vld [vmem:[%s25505_s29 + $0xbe8] ss:$148 sps:$4 sm:$0xff]  }
 0x531   : > { %16081 = vmatpush1.bf16.msra.mxu0 %v23655_v33  ;;  %16245 = vmatpush1.bf16.msra.mxu1 %v23658_v34  ;;  %v23741_v33 = vld [vmem:[%s25505_s29 + $0xd0c] ss:$148 sps:$4 sm:$0xff]   ;;  %v23744_v34 = vld [vmem:[%s25505_s29 + $0xd14] ss:$148 sps:$4 sm:$0xff]  }
 0x532   : > { %16082 = vmatprep.subr.bf16.mxu0 %v23663_v35  ;;  %16246 = vmatprep.subr.bf16.mxu1 %v23666_v36  ;;  %v23739_v35 = vld [vmem:[%s25505_s29 + $0xd08] ss:$148 sps:$4 sm:$0xff]   ;;  %v23742_v36 = vld [vmem:[%s25505_s29 + $0xd10] ss:$148 sps:$4 sm:$0xff]  }
 0x535   : > { %16083 = vmatpush1.bf16.msra.mxu0 %v23661_v37  ;;  %16247 = vmatpush1.bf16.msra.mxu1 %v23664_v39  ;;  %v23747_v37 = vld [vmem:[%s25505_s29 + $0xe34] ss:$148 sps:$4 sm:$0xff]   ;;  %v23750_v39 = vld [vmem:[%s25505_s29 + $0xe3c] ss:$148 sps:$4 sm:$0xff]  }
 0x536   : > { %16084 = vmatprep.subr.bf16.mxu0 %v23669_v40  ;;  %16248 = vmatprep.subr.bf16.mxu1 %v23672_v41  ;;  %v23745_v40 = vld [vmem:[%s25505_s29 + $0xe30] ss:$148 sps:$4 sm:$0xff]   ;;  %v23748_v41 = vld [vmem:[%s25505_s29 + $0xe38] ss:$148 sps:$4 sm:$0xff]  }
 0x539   : > { %16085 = vmatpush1.bf16.msra.mxu0 %v23667_v42  ;;  %16249 = vmatpush1.bf16.msra.mxu1 %v23670_v45  ;;  %v23753_v42 = vld [vmem:[%s25505_s29 + $0xf5c] ss:$148 sps:$4 sm:$0xff]   ;;  %v23756_v45 = vld [vmem:[%s25505_s29 + $0xf64] ss:$148 sps:$4 sm:$0xff]  }
 0x53a   : > { %16259 = vmatprep.subr.bf16.mxu0 %v23675_v47  ;;  %16423 = vmatprep.subr.bf16.mxu1 %v23678_v48  ;;  %v23751_v47 = vld [vmem:[%s25505_s29 + $0xf58] ss:$148 sps:$4 sm:$0xff]   ;;  %v23754_v48 = vld [vmem:[%s25505_s29 + $0xf60] ss:$148 sps:$4 sm:$0xff]  }
 0x53c   : > { %16087 = vmatmul.mubr.bf16.vlgmr.msra.gmra.mrb[16].mxu0 %v25829_v43  ;;  %16251 = vmatmul.mubr.bf16.vlgmr.msra.gmra.mrb[16].mxu1 %v25829_v43 }
 0x53d   : > { %16260 = vmatpush1.bf16.msra.mxu0 %v23673_v49  ;;  %16424 = vmatpush1.bf16.msra.mxu1 %v23676_v50  ;;  %v23759_v49 = vld [vmem:[%s25505_s29 + $0x1084] ss:$148 sps:$4 sm:$0xff]   ;;  %v23762_v50 = vld [vmem:[%s25505_s29 + $0x108c] ss:$148 sps:$4 sm:$0xff]  }
 0x53e   : > { %16261 = vmatprep.subr.bf16.mxu0 %v23681_v51  ;;  %16425 = vmatprep.subr.bf16.mxu1 %v23684_v52  ;;  %v23757_v51 = vld [vmem:[%s25505_s29 + $0x1080] ss:$148 sps:$4 sm:$0xff]   ;;  %v23760_v52 = vld [vmem:[%s25505_s29 + $0x1088] ss:$148 sps:$4 sm:$0xff]  }
 0x53f   : > { %16291 = vmatprep.mubr.bf16.mxu0 %v25582_v61  ;;  %16455 = vmatprep.mubr.bf16.mxu1 %v25582_v61 }
 0x541   : > { %16262 = vmatpush1.bf16.msra.mxu0 %v23679_v53  ;;  %16426 = vmatpush1.bf16.msra.mxu1 %v23682_v54  ;;  %v23765_v53 = vld [vmem:[%s25505_s29 + $0x11ac] ss:$148 sps:$4 sm:$0xff]   ;;  %v23768_v54 = vld [vmem:[%s25505_s29 + $0x11b4] ss:$148 sps:$4 sm:$0xff]  }
 0x542   : > { %16263 = vmatprep.subr.bf16.mxu0 %v23687_v55  ;;  %16427 = vmatprep.subr.bf16.mxu1 %v23690_v56  ;;  %v23763_v55 = vld [vmem:[%s25505_s29 + $0x11a8] ss:$148 sps:$4 sm:$0xff]   ;;  %v23766_v56 = vld [vmem:[%s25505_s29 + $0x11b0] ss:$148 sps:$4 sm:$0xff]  }
 0x545   : > { %16264 = vmatpush1.bf16.msra.mxu0 %v23685_v57  ;;  %16428 = vmatpush1.bf16.msra.mxu1 %v23688_v58  ;;  %v23771_v57 = vld [vmem:[%s25505_s29 + $0x12d4] ss:$148 sps:$4 sm:$0xff]   ;;  %v23774_v58 = vld [vmem:[%s25505_s29 + $0x12dc] ss:$148 sps:$4 sm:$0xff]  }
 0x546   : > { %16265 = vmatprep.subr.bf16.mxu0 %v23693_v59  ;;  %16429 = vmatprep.subr.bf16.mxu1 %v23696_v60  ;;  %v23769_v59 = vld [vmem:[%s25505_s29 + $0x12d0] ss:$148 sps:$4 sm:$0xff]   ;;  %v23772_v60 = vld [vmem:[%s25505_s29 + $0x12d8] ss:$148 sps:$4 sm:$0xff]  }
 0x549   : > { %16266 = vmatpush1.bf16.msra.mxu0 %v23691_v62  ;;  %16430 = vmatpush1.bf16.msra.mxu1 %v23694_v63  ;;  %v23777_v62 = vld [vmem:[%s25505_s29 + $0x13fc] ss:$148 sps:$4 sm:$0xff]   ;;  %v23780_v63 = vld [vmem:[%s25505_s29 + $0x1404] ss:$148 sps:$4 sm:$0xff]  }
 0x54a   : > { %16267 = vmatprep.subr.bf16.mxu0 %v23699_v0  ;;  %16431 = vmatprep.subr.bf16.mxu1 %v23702_v1  ;;  %v23775_v0 = vld [vmem:[%s25505_s29 + $0x13f8] ss:$148 sps:$4 sm:$0xff]   ;;  %v23778_v1 = vld [vmem:[%s25505_s29 + $0x1400] ss:$148 sps:$4 sm:$0xff]  }
 0x54d   : > { %16268 = vmatpush1.bf16.msra.mxu0 %v23697_v2  ;;  %16432 = vmatpush1.bf16.msra.mxu1 %v23700_v3  ;;  %v23783_v2 = vld [vmem:[%s25505_s29 + $0x1524] ss:$148 sps:$4 sm:$0xff]   ;;  %v23786_v3 = vld [vmem:[%s25505_s29 + $0x152c] ss:$148 sps:$4 sm:$0xff]  }
 0x54e   : > { %16269 = vmatprep.subr.bf16.mxu0 %v23705_v4  ;;  %16433 = vmatprep.subr.bf16.mxu1 %v23708_v5  ;;  %v23781_v4 = vld [vmem:[%s25505_s29 + $0x1520] ss:$148 sps:$4 sm:$0xff]   ;;  %v23784_v5 = vld [vmem:[%s25505_s29 + $0x1528] ss:$148 sps:$4 sm:$0xff]  }
 0x551   : > { %16270 = vmatpush1.bf16.msra.mxu0 %v23703_v6  ;;  %16434 = vmatpush1.bf16.msra.mxu1 %v23706_v7  ;;  %v23789_v6 = vld [vmem:[%s25505_s29 + $0x164c] ss:$148 sps:$4 sm:$0xff]   ;;  %v23792_v7 = vld [vmem:[%s25505_s29 + $0x1654] ss:$148 sps:$4 sm:$0xff]  }
 0x552   : > { %16271 = vmatprep.subr.bf16.mxu0 %v23711_v8  ;;  %16435 = vmatprep.subr.bf16.mxu1 %v23714_v9  ;;  %v23787_v8 = vld [vmem:[%s25505_s29 + $0x1648] ss:$148 sps:$4 sm:$0xff]   ;;  %v23790_v9 = vld [vmem:[%s25505_s29 + $0x1650] ss:$148 sps:$4 sm:$0xff]  }
 0x555   : > { %16272 = vmatpush1.bf16.msra.mxu0 %v23709_v10  ;;  %16436 = vmatpush1.bf16.msra.mxu1 %v23712_v11  ;;  %v23795_v10 = vld [vmem:[%s25505_s29 + $0x1774] ss:$148 sps:$4 sm:$0xff]   ;;  %v23798_v11 = vld [vmem:[%s25505_s29 + $0x177c] ss:$148 sps:$4 sm:$0xff]  }
 0x556   : > { %16273 = vmatprep.subr.bf16.mxu0 %v23717_v12  ;;  %16437 = vmatprep.subr.bf16.mxu1 %v23720_v13  ;;  %v23793_v12 = vld [vmem:[%s25505_s29 + $0x1770] ss:$148 sps:$4 sm:$0xff]   ;;  %v23796_v13 = vld [vmem:[%s25505_s29 + $0x1778] ss:$148 sps:$4 sm:$0xff]  }
 0x559   : > { %16274 = vmatpush1.bf16.msra.mxu0 %v23715_v14  ;;  %16438 = vmatpush1.bf16.msra.mxu1 %v23718_v15  ;;  %v23801_v14 = vld [vmem:[%s25505_s29 + $0x189c] ss:$148 sps:$4 sm:$0xff]   ;;  %v23804_v15 = vld [vmem:[%s25505_s29 + $0x18a4] ss:$148 sps:$4 sm:$0xff]  }
 0x55a   : > { %16275 = vmatprep.subr.bf16.mxu0 %v23723_v17  ;;  %16439 = vmatprep.subr.bf16.mxu1 %v23726_v18  ;;  %v23799_v17 = vld [vmem:[%s25505_s29 + $0x1898] ss:$148 sps:$4 sm:$0xff]   ;;  %v23802_v18 = vld [vmem:[%s25505_s29 + $0x18a0] ss:$148 sps:$4 sm:$0xff]  }
 0x55d   : > { %16276 = vmatpush1.bf16.msra.mxu0 %v23721_v19  ;;  %16440 = vmatpush1.bf16.msra.mxu1 %v23724_v20  ;;  %v23807_v19 = vld [vmem:[%s25505_s29 + $0x19c4] ss:$148 sps:$4 sm:$0xff]   ;;  %v23810_v20 = vld [vmem:[%s25505_s29 + $0x19cc] ss:$148 sps:$4 sm:$0xff]  }
 0x55e   : > { %16277 = vmatprep.subr.bf16.mxu0 %v23729_v24  ;;  %16441 = vmatprep.subr.bf16.mxu1 %v23732_v25  ;;  %v23805_v24 = vld [vmem:[%s25505_s29 + $0x19c0] ss:$148 sps:$4 sm:$0xff]   ;;  %v23808_v25 = vld [vmem:[%s25505_s29 + $0x19c8] ss:$148 sps:$4 sm:$0xff]  }
 0x561   : > { %16278 = vmatpush1.bf16.msra.mxu0 %v23727_v26  ;;  %16442 = vmatpush1.bf16.msra.mxu1 %v23730_v28  ;;  %v23813_v26 = vld [vmem:[%s25505_s29 + $0x1aec] ss:$148 sps:$4 sm:$0xff]   ;;  %v23816_v28 = vld [vmem:[%s25505_s29 + $0x1af4] ss:$148 sps:$4 sm:$0xff]  }
 0x562   : > { %16279 = vmatprep.subr.bf16.mxu0 %v23735_v29  ;;  %16443 = vmatprep.subr.bf16.mxu1 %v23738_v30  ;;  %v23811_v29 = vld [vmem:[%s25505_s29 + $0x1ae8] ss:$148 sps:$4 sm:$0xff]   ;;  %v23814_v30 = vld [vmem:[%s25505_s29 + $0x1af0] ss:$148 sps:$4 sm:$0xff]  }
 0x565   : > { %16280 = vmatpush1.bf16.msra.mxu0 %v23733_v31  ;;  %16444 = vmatpush1.bf16.msra.mxu1 %v23736_v32  ;;  %v23819_v31 = vld [vmem:[%s25505_s29 + $0x1c14] ss:$148 sps:$4 sm:$0xff]   ;;  %v23822_v32 = vld [vmem:[%s25505_s29 + $0x1c1c] ss:$148 sps:$4 sm:$0xff]  }
 0x566   : > { %16281 = vmatprep.subr.bf16.mxu0 %v23741_v33  ;;  %16445 = vmatprep.subr.bf16.mxu1 %v23744_v34  ;;  %v23817_v33 = vld [vmem:[%s25505_s29 + $0x1c10] ss:$148 sps:$4 sm:$0xff]   ;;  %v23820_v34 = vld [vmem:[%s25505_s29 + $0x1c18] ss:$148 sps:$4 sm:$0xff]  }
 0x569   : > { %16282 = vmatpush1.bf16.msra.mxu0 %v23739_v35  ;;  %16446 = vmatpush1.bf16.msra.mxu1 %v23742_v36  ;;  %v23825_v35 = vld [vmem:[%s25505_s29 + $0x1d3c] ss:$148 sps:$4 sm:$0xff]   ;;  %v23828_v36 = vld [vmem:[%s25505_s29 + $0x1d44] ss:$148 sps:$4 sm:$0xff]  }
 0x56a   : > { %16283 = vmatprep.subr.bf16.mxu0 %v23747_v37  ;;  %16447 = vmatprep.subr.bf16.mxu1 %v23750_v39  ;;  %v23823_v37 = vld [vmem:[%s25505_s29 + $0x1d38] ss:$148 sps:$4 sm:$0xff]   ;;  %v23826_v39 = vld [vmem:[%s25505_s29 + $0x1d40] ss:$148 sps:$4 sm:$0xff]  }
 0x56d   : > { %16284 = vmatpush1.bf16.msra.mxu0 %v23745_v40  ;;  %16448 = vmatpush1.bf16.msra.mxu1 %v23748_v41  ;;  %v23831_v40 = vld [vmem:[%s25505_s29 + $0x1e64] ss:$148 sps:$4 sm:$0xff]   ;;  %v23834_v41 = vld [vmem:[%s25505_s29 + $0x1e6c] ss:$148 sps:$4 sm:$0xff]  }
 0x56e   : > { %16285 = vmatprep.subr.bf16.mxu0 %v23753_v42  ;;  %16449 = vmatprep.subr.bf16.mxu1 %v23756_v45  ;;  %v23829_v42 = vld [vmem:[%s25505_s29 + $0x1e60] ss:$148 sps:$4 sm:$0xff]   ;;  %v23832_v45 = vld [vmem:[%s25505_s29 + $0x1e68] ss:$148 sps:$4 sm:$0xff]  }
 0x571   : > { %16286 = vmatpush1.bf16.msra.mxu0 %v23751_v47  ;;  %16450 = vmatpush1.bf16.msra.mxu1 %v23754_v48  ;;  %v23837_v47 = vld [vmem:[%s25505_s29 + $0x1f8c] ss:$148 sps:$4 sm:$0xff]   ;;  %v23840_v48 = vld [vmem:[%s25505_s29 + $0x1f94] ss:$148 sps:$4 sm:$0xff]  }
 0x572   : > { %16287 = vmatprep.subr.bf16.mxu0 %v23759_v49  ;;  %16451 = vmatprep.subr.bf16.mxu1 %v23762_v50  ;;  %v23835_v49 = vld [vmem:[%s25505_s29 + $0x1f88] ss:$148 sps:$4 sm:$0xff]   ;;  %v23838_v50 = vld [vmem:[%s25505_s29 + $0x1f90] ss:$148 sps:$4 sm:$0xff]  }
 0x575   : > { %16288 = vmatpush1.bf16.msra.mxu0 %v23757_v51  ;;  %16452 = vmatpush1.bf16.msra.mxu1 %v23760_v52  ;;  %v23843_v51 = vld [vmem:[%s25505_s29 + $0x20b4] ss:$148 sps:$4 sm:$0xff]   ;;  %v23846_v52 = vld [vmem:[%s25505_s29 + $0x20bc] ss:$148 sps:$4 sm:$0xff]  }
 0x576   : > { %16289 = vmatprep.subr.bf16.mxu0 %v23765_v53  ;;  %16453 = vmatprep.subr.bf16.mxu1 %v23768_v54  ;;  %v23841_v53 = vld [vmem:[%s25505_s29 + $0x20b0] ss:$148 sps:$4 sm:$0xff]   ;;  %v23844_v54 = vld [vmem:[%s25505_s29 + $0x20b8] ss:$148 sps:$4 sm:$0xff]  }
 0x579   : > { %16290 = vmatpush1.bf16.msra.mxu0 %v23763_v55  ;;  %16454 = vmatpush1.bf16.msra.mxu1 %v23766_v56  ;;  %v23849_v55 = vld [vmem:[%s25505_s29 + $0x21dc] ss:$148 sps:$4 sm:$0xff]   ;;  %v23852_v56 = vld [vmem:[%s25505_s29 + $0x21e4] ss:$148 sps:$4 sm:$0xff]  }
 0x57a   : > { %16300 = vmatprep.subr.bf16.mxu0 %v23771_v57  ;;  %16464 = vmatprep.subr.bf16.mxu1 %v23774_v58  ;;  %v23847_v57 = vld [vmem:[%s25505_s29 + $0x21d8] ss:$148 sps:$4 sm:$0xff]   ;;  %v23850_v58 = vld [vmem:[%s25505_s29 + $0x21e0] ss:$148 sps:$4 sm:$0xff]  }
 0x57c   : > { %16292 = vmatmul.mubr.bf16.vlgmr.msra.gmra.mrb[20].mxu0 %v25604_v16  ;;  %16456 = vmatmul.mubr.bf16.vlgmr.msra.gmra.mrb[20].mxu1 %v25604_v16 }
 0x57d   : > { %16301 = vmatpush1.bf16.msra.mxu0 %v23769_v59  ;;  %16465 = vmatpush1.bf16.msra.mxu1 %v23772_v60  ;;  %v23855_v59 = vld [vmem:[%s25505_s29 + $0x2304] ss:$148 sps:$4 sm:$0xff]   ;;  %v23858_v60 = vld [vmem:[%s25505_s29 + $0x230c] ss:$148 sps:$4 sm:$0xff]  }
 0x57e   : > { %16302 = vmatprep.subr.bf16.mxu0 %v23777_v62  ;;  %16466 = vmatprep.subr.bf16.mxu1 %v23780_v63  ;;  %v23853_v62 = vld [vmem:[%s25505_s29 + $0x2300] ss:$148 sps:$4 sm:$0xff]   ;;  %v23856_v63 = vld [vmem:[%s25505_s29 + $0x2308] ss:$148 sps:$4 sm:$0xff]  }
 0x57f   : > { %16332 = vmatprep.mubr.bf16.mxu0 %v25617_v23  ;;  %16496 = vmatprep.mubr.bf16.mxu1 %v25617_v23 }
 0x581   : > { %16303 = vmatpush1.bf16.msra.mxu0 %v23775_v0  ;;  %16467 = vmatpush1.bf16.msra.mxu1 %v23778_v1  ;;  %v23861_v0 = vld [vmem:[%s25505_s29 + $0x242c] ss:$148 sps:$4 sm:$0xff]   ;;  %v23864_v1 = vld [vmem:[%s25505_s29 + $0x2434] ss:$148 sps:$4 sm:$0xff]  }
 0x582   : > { %16304 = vmatprep.subr.bf16.mxu0 %v23783_v2  ;;  %16468 = vmatprep.subr.bf16.mxu1 %v23786_v3  ;;  %v23859_v2 = vld [vmem:[%s25505_s29 + $0x2428] ss:$148 sps:$4 sm:$0xff]   ;;  %v23862_v3 = vld [vmem:[%s25505_s29 + $0x2430] ss:$148 sps:$4 sm:$0xff]  }
 0x585   : > { %16305 = vmatpush1.bf16.msra.mxu0 %v23781_v4  ;;  %16469 = vmatpush1.bf16.msra.mxu1 %v23784_v5  ;;  %v23867_v4 = vld [vmem:[%s25505_s29 + $0x2554] ss:$148 sps:$4 sm:$0xff]   ;;  %v23870_v5 = vld [vmem:[%s25505_s29 + $0x255c] ss:$148 sps:$4 sm:$0xff]  }
 0x586   : > { %16306 = vmatprep.subr.bf16.mxu0 %v23789_v6  ;;  %16470 = vmatprep.subr.bf16.mxu1 %v23792_v7  ;;  %v23865_v6 = vld [vmem:[%s25505_s29 + $0x2550] ss:$148 sps:$4 sm:$0xff]   ;;  %v23868_v7 = vld [vmem:[%s25505_s29 + $0x2558] ss:$148 sps:$4 sm:$0xff]  }
 0x589   : > { %16307 = vmatpush1.bf16.msra.mxu0 %v23787_v8  ;;  %16471 = vmatpush1.bf16.msra.mxu1 %v23790_v9  ;;  %v23873_v8 = vld [vmem:[%s25505_s29 + $0x267c] ss:$148 sps:$4 sm:$0xff]   ;;  %v23876_v9 = vld [vmem:[%s25505_s29 + $0x2684] ss:$148 sps:$4 sm:$0xff]  }
 0x58a   : > { %16308 = vmatprep.subr.bf16.mxu0 %v23795_v10  ;;  %16472 = vmatprep.subr.bf16.mxu1 %v23798_v11  ;;  %v23871_v10 = vld [vmem:[%s25505_s29 + $0x2678] ss:$148 sps:$4 sm:$0xff]   ;;  %v23874_v11 = vld [vmem:[%s25505_s29 + $0x2680] ss:$148 sps:$4 sm:$0xff]  }
 0x58d   : > { %16309 = vmatpush1.bf16.msra.mxu0 %v23793_v12  ;;  %16473 = vmatpush1.bf16.msra.mxu1 %v23796_v13  ;;  %v23879_v12 = vld [vmem:[%s25505_s29 + $0x27a4] ss:$148 sps:$4 sm:$0xff]   ;;  %v23882_v13 = vld [vmem:[%s25505_s29 + $0x27ac] ss:$148 sps:$4 sm:$0xff]  }
 0x58e   : > { %16310 = vmatprep.subr.bf16.mxu0 %v23801_v14  ;;  %16474 = vmatprep.subr.bf16.mxu1 %v23804_v15  ;;  %v23877_v14 = vld [vmem:[%s25505_s29 + $0x27a0] ss:$148 sps:$4 sm:$0xff]   ;;  %v23880_v15 = vld [vmem:[%s25505_s29 + $0x27a8] ss:$148 sps:$4 sm:$0xff]  }
 0x591   : > { %16311 = vmatpush1.bf16.msra.mxu0 %v23799_v17  ;;  %16475 = vmatpush1.bf16.msra.mxu1 %v23802_v18  ;;  %v23885_v17 = vld [vmem:[%s25505_s29 + $0x28cc] ss:$148 sps:$4 sm:$0xff]   ;;  %v23888_v18 = vld [vmem:[%s25505_s29 + $0x28d4] ss:$148 sps:$4 sm:$0xff]  }
 0x592   : > { %16312 = vmatprep.subr.bf16.mxu0 %v23807_v19  ;;  %16476 = vmatprep.subr.bf16.mxu1 %v23810_v20  ;;  %v23883_v19 = vld [vmem:[%s25505_s29 + $0x28c8] ss:$148 sps:$4 sm:$0xff]   ;;  %v23886_v20 = vld [vmem:[%s25505_s29 + $0x28d0] ss:$148 sps:$4 sm:$0xff]  }
 0x595   : > { %16313 = vmatpush1.bf16.msra.mxu0 %v23805_v24  ;;  %16477 = vmatpush1.bf16.msra.mxu1 %v23808_v25  ;;  %v23891_v24 = vld [vmem:[%s25505_s29 + $0x29f4] ss:$148 sps:$4 sm:$0xff]   ;;  %v23894_v25 = vld [vmem:[%s25505_s29 + $0x29fc] ss:$148 sps:$4 sm:$0xff]  }
 0x596   : > { %16314 = vmatprep.subr.bf16.mxu0 %v23813_v26  ;;  %16478 = vmatprep.subr.bf16.mxu1 %v23816_v28  ;;  %v23889_v26 = vld [vmem:[%s25505_s29 + $0x29f0] ss:$148 sps:$4 sm:$0xff]   ;;  %v23892_v28 = vld [vmem:[%s25505_s29 + $0x29f8] ss:$148 sps:$4 sm:$0xff]  }
 0x599   : > { %16315 = vmatpush1.bf16.msra.mxu0 %v23811_v29  ;;  %16479 = vmatpush1.bf16.msra.mxu1 %v23814_v30  ;;  %v23897_v29 = vld [vmem:[%s25505_s29 + $0x2b1c] ss:$148 sps:$4 sm:$0xff]   ;;  %v23900_v30 = vld [vmem:[%s25505_s29 + $0x2b24] ss:$148 sps:$4 sm:$0xff]  }
 0x59a   : > { %16316 = vmatprep.subr.bf16.mxu0 %v23819_v31  ;;  %16480 = vmatprep.subr.bf16.mxu1 %v23822_v32  ;;  %v23895_v31 = vld [vmem:[%s25505_s29 + $0x2b18] ss:$148 sps:$4 sm:$0xff]   ;;  %v23898_v32 = vld [vmem:[%s25505_s29 + $0x2b20] ss:$148 sps:$4 sm:$0xff]  }
 0x59d   : > { %16317 = vmatpush1.bf16.msra.mxu0 %v23817_v33  ;;  %16481 = vmatpush1.bf16.msra.mxu1 %v23820_v34  ;;  %v23903_v33 = vld [vmem:[%s25505_s29 + $0x2c44] ss:$148 sps:$4 sm:$0xff]   ;;  %v23906_v34 = vld [vmem:[%s25505_s29 + $0x2c4c] ss:$148 sps:$4 sm:$0xff]  }
 0x59e   : > { %16318 = vmatprep.subr.bf16.mxu0 %v23825_v35  ;;  %16482 = vmatprep.subr.bf16.mxu1 %v23828_v36  ;;  %v23901_v35 = vld [vmem:[%s25505_s29 + $0x2c40] ss:$148 sps:$4 sm:$0xff]   ;;  %v23904_v36 = vld [vmem:[%s25505_s29 + $0x2c48] ss:$148 sps:$4 sm:$0xff]  }
 0x5a1   : > { %16319 = vmatpush1.bf16.msra.mxu0 %v23823_v37  ;;  %16483 = vmatpush1.bf16.msra.mxu1 %v23826_v39  ;;  %v23909_v37 = vld [vmem:[%s25505_s29 + $0x2d6c] ss:$148 sps:$4 sm:$0xff]   ;;  %v23912_v39 = vld [vmem:[%s25505_s29 + $0x2d74] ss:$148 sps:$4 sm:$0xff]  }
 0x5a2   : > { %16320 = vmatprep.subr.bf16.mxu0 %v23831_v40  ;;  %16484 = vmatprep.subr.bf16.mxu1 %v23834_v41  ;;  %v23907_v40 = vld [vmem:[%s25505_s29 + $0x2d68] ss:$148 sps:$4 sm:$0xff]   ;;  %v23910_v41 = vld [vmem:[%s25505_s29 + $0x2d70] ss:$148 sps:$4 sm:$0xff]  }
 0x5a5   : > { %16321 = vmatpush1.bf16.msra.mxu0 %v23829_v42  ;;  %16485 = vmatpush1.bf16.msra.mxu1 %v23832_v45  ;;  %v23915_v42 = vld [vmem:[%s25505_s29 + $0x2e94] ss:$148 sps:$4 sm:$0xff]   ;;  %v23918_v45 = vld [vmem:[%s25505_s29 + $0x2e9c] ss:$148 sps:$4 sm:$0xff]  }
 0x5a6   : > { %16322 = vmatprep.subr.bf16.mxu0 %v23837_v47  ;;  %16486 = vmatprep.subr.bf16.mxu1 %v23840_v48  ;;  %v23913_v47 = vld [vmem:[%s25505_s29 + $0x2e90] ss:$148 sps:$4 sm:$0xff]   ;;  %v23916_v48 = vld [vmem:[%s25505_s29 + $0x2e98] ss:$148 sps:$4 sm:$0xff]  }
 0x5a9   : > { %16323 = vmatpush1.bf16.msra.mxu0 %v23835_v49  ;;  %16487 = vmatpush1.bf16.msra.mxu1 %v23838_v50  ;;  %v23921_v49 = vld [vmem:[%s25505_s29 + $0x2fbc] ss:$148 sps:$4 sm:$0xff]   ;;  %v23924_v50 = vld [vmem:[%s25505_s29 + $0x2fc4] ss:$148 sps:$4 sm:$0xff]  }
 0x5aa   : > { %16324 = vmatprep.subr.bf16.mxu0 %v23843_v51  ;;  %16488 = vmatprep.subr.bf16.mxu1 %v23846_v52  ;;  %v23919_v51 = vld [vmem:[%s25505_s29 + $0x2fb8] ss:$148 sps:$4 sm:$0xff]   ;;  %v23922_v52 = vld [vmem:[%s25505_s29 + $0x2fc0] ss:$148 sps:$4 sm:$0xff]  }
 0x5ad   : > { %16325 = vmatpush1.bf16.msra.mxu0 %v23841_v53  ;;  %16489 = vmatpush1.bf16.msra.mxu1 %v23844_v54  ;;  %v23927_v53 = vld [vmem:[%s25505_s29 + $0x30e4] ss:$148 sps:$4 sm:$0xff]   ;;  %v23930_v54 = vld [vmem:[%s25505_s29 + $0x30ec] ss:$148 sps:$4 sm:$0xff]  }
 0x5ae   : > { %16326 = vmatprep.subr.bf16.mxu0 %v23849_v55  ;;  %16490 = vmatprep.subr.bf16.mxu1 %v23852_v56  ;;  %v23925_v55 = vld [vmem:[%s25505_s29 + $0x30e0] ss:$148 sps:$4 sm:$0xff]   ;;  %v23928_v56 = vld [vmem:[%s25505_s29 + $0x30e8] ss:$148 sps:$4 sm:$0xff]  }
 0x5b1   : > { %16327 = vmatpush1.bf16.msra.mxu0 %v23847_v57  ;;  %16491 = vmatpush1.bf16.msra.mxu1 %v23850_v58  ;;  %v23933_v57 = vld [vmem:[%s25505_s29 + $0x320c] ss:$148 sps:$4 sm:$0xff]   ;;  %v23936_v58 = vld [vmem:[%s25505_s29 + $0x3214] ss:$148 sps:$4 sm:$0xff]  }
 0x5b2   : > { %16328 = vmatprep.subr.bf16.mxu0 %v23855_v59  ;;  %16492 = vmatprep.subr.bf16.mxu1 %v23858_v60  ;;  %v23931_v59 = vld [vmem:[%s25505_s29 + $0x3208] ss:$148 sps:$4 sm:$0xff]   ;;  %v23934_v60 = vld [vmem:[%s25505_s29 + $0x3210] ss:$148 sps:$4 sm:$0xff]  }
 0x5b5   : > { %16329 = vmatpush1.bf16.msra.mxu0 %v23853_v62  ;;  %16493 = vmatpush1.bf16.msra.mxu1 %v23856_v63  ;;  %v23939_v62 = vld [vmem:[%s25505_s29 + $0x3334] ss:$148 sps:$4 sm:$0xff]   ;;  %v23942_v63 = vld [vmem:[%s25505_s29 + $0x333c] ss:$148 sps:$4 sm:$0xff]  }
 0x5b6   : > { %16330 = vmatprep.subr.bf16.mxu0 %v23861_v0  ;;  %16494 = vmatprep.subr.bf16.mxu1 %v23864_v1  ;;  %v23937_v0 = vld [vmem:[%s25505_s29 + $0x3330] ss:$148 sps:$4 sm:$0xff]   ;;  %v23940_v1 = vld [vmem:[%s25505_s29 + $0x3338] ss:$148 sps:$4 sm:$0xff]  }
 0x5b9   : > { %16331 = vmatpush1.bf16.msra.mxu0 %v23859_v2  ;;  %16495 = vmatpush1.bf16.msra.mxu1 %v23862_v3  ;;  %v23945_v2 = vld [vmem:[%s25505_s29 + $0x345c] ss:$148 sps:$4 sm:$0xff]   ;;  %v23948_v3 = vld [vmem:[%s25505_s29 + $0x3464] ss:$148 sps:$4 sm:$0xff]  }
 0x5ba   : > { %16341 = vmatprep.subr.bf16.mxu0 %v23867_v4  ;;  %16505 = vmatprep.subr.bf16.mxu1 %v23870_v5  ;;  %v23943_v4 = vld [vmem:[%s25505_s29 + $0x3458] ss:$148 sps:$4 sm:$0xff]   ;;  %v23946_v5 = vld [vmem:[%s25505_s29 + $0x3460] ss:$148 sps:$4 sm:$0xff]  }
 0x5bc   : > { %16333 = vmatmul.mubr.bf16.vlgmr.msra.gmra.mrb[20].mxu0 %v25686_v27  ;;  %16497 = vmatmul.mubr.bf16.vlgmr.msra.gmra.mrb[20].mxu1 %v25686_v27 }
 0x5bd   : > { %16342 = vmatpush1.bf16.msra.mxu0 %v23865_v6  ;;  %16506 = vmatpush1.bf16.msra.mxu1 %v23868_v7  ;;  %v23951_v6 = vld [vmem:[%s25505_s29 + $0x3584] ss:$148 sps:$4 sm:$0xff]   ;;  %v23954_v7 = vld [vmem:[%s25505_s29 + $0x358c] ss:$148 sps:$4 sm:$0xff]  }
 0x5be   : > { %16343 = vmatprep.subr.bf16.mxu0 %v23873_v8  ;;  %16507 = vmatprep.subr.bf16.mxu1 %v23876_v9  ;;  %v23949_v8 = vld [vmem:[%s25505_s29 + $0x3580] ss:$148 sps:$4 sm:$0xff]   ;;  %v23952_v9 = vld [vmem:[%s25505_s29 + $0x3588] ss:$148 sps:$4 sm:$0xff]  }
 0x5bf   : > { %16373 = vmatprep.mubr.bf16.mxu0 %v25610_v21  ;;  %16537 = vmatprep.mubr.bf16.mxu1 %v25610_v21 }
 0x5c1   : > { %16344 = vmatpush1.bf16.msra.mxu0 %v23871_v10  ;;  %16508 = vmatpush1.bf16.msra.mxu1 %v23874_v11  ;;  %v23957_v10 = vld [vmem:[%s25505_s29 + $0x36ac] ss:$148 sps:$4 sm:$0xff]   ;;  %v23960_v11 = vld [vmem:[%s25505_s29 + $0x36b4] ss:$148 sps:$4 sm:$0xff]  }
 0x5c2   : > { %16345 = vmatprep.subr.bf16.mxu0 %v23879_v12  ;;  %16509 = vmatprep.subr.bf16.mxu1 %v23882_v13  ;;  %v23955_v12 = vld [vmem:[%s25505_s29 + $0x36a8] ss:$148 sps:$4 sm:$0xff]   ;;  %v23958_v13 = vld [vmem:[%s25505_s29 + $0x36b0] ss:$148 sps:$4 sm:$0xff]  }
 0x5c5   : > { %16346 = vmatpush1.bf16.msra.mxu0 %v23877_v14  ;;  %16510 = vmatpush1.bf16.msra.mxu1 %v23880_v15  ;;  %v23963_v14 = vld [vmem:[%s25505_s29 + $0x37d4] ss:$148 sps:$4 sm:$0xff]   ;;  %v23966_v15 = vld [vmem:[%s25505_s29 + $0x37dc] ss:$148 sps:$4 sm:$0xff]  }
 0x5c6   : > { %16347 = vmatprep.subr.bf16.mxu0 %v23885_v17  ;;  %16511 = vmatprep.subr.bf16.mxu1 %v23888_v18  ;;  %v23961_v17 = vld [vmem:[%s25505_s29 + $0x37d0] ss:$148 sps:$4 sm:$0xff]   ;;  %v23964_v18 = vld [vmem:[%s25505_s29 + $0x37d8] ss:$148 sps:$4 sm:$0xff]  }
 0x5c9   : > { %16348 = vmatpush1.bf16.msra.mxu0 %v23883_v19  ;;  %16512 = vmatpush1.bf16.msra.mxu1 %v23886_v20  ;;  %v23969_v19 = vld [vmem:[%s25505_s29 + $0x38fc] ss:$148 sps:$4 sm:$0xff]   ;;  %v23972_v20 = vld [vmem:[%s25505_s29 + $0x3904] ss:$148 sps:$4 sm:$0xff]  }
 0x5ca   : > { %16349 = vmatprep.subr.bf16.mxu0 %v23891_v24  ;;  %16513 = vmatprep.subr.bf16.mxu1 %v23894_v25  ;;  %v23967_v24 = vld [vmem:[%s25505_s29 + $0x38f8] ss:$148 sps:$4 sm:$0xff]   ;;  %v23970_v25 = vld [vmem:[%s25505_s29 + $0x3900] ss:$148 sps:$4 sm:$0xff]  }
 0x5cd   : > { %16350 = vmatpush1.bf16.msra.mxu0 %v23889_v26  ;;  %16514 = vmatpush1.bf16.msra.mxu1 %v23892_v28  ;;  %v23975_v26 = vld [vmem:[%s25505_s29 + $0x3a24] ss:$148 sps:$4 sm:$0xff]   ;;  %v23978_v28 = vld [vmem:[%s25505_s29 + $0x3a2c] ss:$148 sps:$4 sm:$0xff]  }
 0x5ce   : > { %16351 = vmatprep.subr.bf16.mxu0 %v23897_v29  ;;  %16515 = vmatprep.subr.bf16.mxu1 %v23900_v30  ;;  %v23973_v29 = vld [vmem:[%s25505_s29 + $0x3a20] ss:$148 sps:$4 sm:$0xff]   ;;  %v23976_v30 = vld [vmem:[%s25505_s29 + $0x3a28] ss:$148 sps:$4 sm:$0xff]  }
 0x5d1   : > { %16352 = vmatpush1.bf16.msra.mxu0 %v23895_v31  ;;  %16516 = vmatpush1.bf16.msra.mxu1 %v23898_v32  ;;  %v23981_v31 = vld [vmem:[%s25505_s29 + $0x3b4c] ss:$148 sps:$4 sm:$0xff]   ;;  %v23984_v32 = vld [vmem:[%s25505_s29 + $0x3b54] ss:$148 sps:$4 sm:$0xff]  }
 0x5d2   : > { %16353 = vmatprep.subr.bf16.mxu0 %v23903_v33  ;;  %16517 = vmatprep.subr.bf16.mxu1 %v23906_v34  ;;  %v23979_v33 = vld [vmem:[%s25505_s29 + $0x3b48] ss:$148 sps:$4 sm:$0xff]   ;;  %v23982_v34 = vld [vmem:[%s25505_s29 + $0x3b50] ss:$148 sps:$4 sm:$0xff]  }
 0x5d5   : > { %16354 = vmatpush1.bf16.msra.mxu0 %v23901_v35  ;;  %16518 = vmatpush1.bf16.msra.mxu1 %v23904_v36  ;;  %v23987_v35 = vld [vmem:[%s25505_s29 + $0x3c74] ss:$148 sps:$4 sm:$0xff]   ;;  %v23990_v36 = vld [vmem:[%s25505_s29 + $0x3c7c] ss:$148 sps:$4 sm:$0xff]  }
 0x5d6   : > { %16355 = vmatprep.subr.bf16.mxu0 %v23909_v37  ;;  %16519 = vmatprep.subr.bf16.mxu1 %v23912_v39  ;;  %v23985_v37 = vld [vmem:[%s25505_s29 + $0x3c70] ss:$148 sps:$4 sm:$0xff]   ;;  %v23988_v39 = vld [vmem:[%s25505_s29 + $0x3c78] ss:$148 sps:$4 sm:$0xff]  }
 0x5d9   : > { %16356 = vmatpush1.bf16.msra.mxu0 %v23907_v40  ;;  %16520 = vmatpush1.bf16.msra.mxu1 %v23910_v41  ;;  %v23993_v40 = vld [vmem:[%s25505_s29 + $0x3d9c] ss:$148 sps:$4 sm:$0xff]   ;;  %v23996_v41 = vld [vmem:[%s25505_s29 + $0x3da4] ss:$148 sps:$4 sm:$0xff]  }
 0x5da   : > { %16357 = vmatprep.subr.bf16.mxu0 %v23915_v42  ;;  %16521 = vmatprep.subr.bf16.mxu1 %v23918_v45  ;;  %v23991_v42 = vld [vmem:[%s25505_s29 + $0x3d98] ss:$148 sps:$4 sm:$0xff]   ;;  %v23994_v45 = vld [vmem:[%s25505_s29 + $0x3da0] ss:$148 sps:$4 sm:$0xff]  }
 0x5dd   : > { %16358 = vmatpush1.bf16.msra.mxu0 %v23913_v47  ;;  %16522 = vmatpush1.bf16.msra.mxu1 %v23916_v48  ;;  %v23999_v47 = vld [vmem:[%s25505_s29 + $0x3ec4] ss:$148 sps:$4 sm:$0xff]   ;;  %v24002_v48 = vld [vmem:[%s25505_s29 + $0x3ecc] ss:$148 sps:$4 sm:$0xff]  }
 0x5de   : > { %16359 = vmatprep.subr.bf16.mxu0 %v23921_v49  ;;  %16523 = vmatprep.subr.bf16.mxu1 %v23924_v50 }
 0x5e1   : > { %16360 = vmatpush1.bf16.msra.mxu0 %v23919_v51  ;;  %16524 = vmatpush1.bf16.msra.mxu1 %v23922_v52 }
 0x5e2   : > { %16361 = vmatprep.subr.bf16.mxu0 %v23927_v53  ;;  %16525 = vmatprep.subr.bf16.mxu1 %v23930_v54 }
 0x5e5   : > { %16362 = vmatpush1.bf16.msra.mxu0 %v23925_v55  ;;  %16526 = vmatpush1.bf16.msra.mxu1 %v23928_v56 }
 0x5e6   : > { %16363 = vmatprep.subr.bf16.mxu0 %v23933_v57  ;;  %16527 = vmatprep.subr.bf16.mxu1 %v23936_v58  ;;  %v23997_v57 = vld [vmem:[%s25505_s29 + $0x3ec0] ss:$148 sps:$4 sm:$0xff]   ;;  %v24000_v58 = vld [vmem:[%s25505_s29 + $0x3ec8] ss:$148 sps:$4 sm:$0xff]  }
 0x5e9   : > { %16364 = vmatpush1.bf16.msra.mxu0 %v23931_v59  ;;  %16528 = vmatpush1.bf16.msra.mxu1 %v23934_v60 }
 0x5ea   : > { %16365 = vmatprep.subr.bf16.mxu0 %v23939_v62  ;;  %16529 = vmatprep.subr.bf16.mxu1 %v23942_v63  ;;  %v24005_v62 = vld [vmem:[%s25505_s29 + $0x3fec] ss:$148 sps:$4 sm:$0xff]   ;;  %v24008_v63 = vld [vmem:[%s25505_s29 + $0x3ff4] ss:$148 sps:$4 sm:$0xff]  }
 0x5ed   : > { %16366 = vmatpush1.bf16.msra.mxu0 %v23937_v0  ;;  %16530 = vmatpush1.bf16.msra.mxu1 %v23940_v1 }
 0x5ee   : > { %16367 = vmatprep.subr.bf16.mxu0 %v23945_v2  ;;  %16531 = vmatprep.subr.bf16.mxu1 %v23948_v3  ;;  %v218_v2 = vld [vmem:[#allocation2 + $0x20] sm:$0xff] }
 0x5f1   : > { %16368 = vmatpush1.bf16.msra.mxu0 %v23943_v4  ;;  %16532 = vmatpush1.bf16.msra.mxu1 %v23946_v5  ;;  %v24003_v4 = vld [vmem:[%s25505_s29 + $0x3fe8] ss:$148 sps:$4 sm:$0xff]   ;;  %v24006_v5 = vld [vmem:[%s25505_s29 + $0x3ff0] ss:$148 sps:$4 sm:$0xff]  }
 0x5f2   : > { %16369 = vmatprep.subr.bf16.mxu0 %v23951_v6  ;;  %16533 = vmatprep.subr.bf16.mxu1 %v23954_v7  ;;  %v24011_v6 = vld [vmem:[%s25505_s29 + $0x4114] ss:$148 sps:$4 sm:$0xff]   ;;  %v24014_v7 = vld [vmem:[%s25505_s29 + $0x411c] ss:$148 sps:$4 sm:$0xff]  }
 0x5f5   : > { %16370 = vmatpush1.bf16.msra.mxu0 %v23949_v8  ;;  %16534 = vmatpush1.bf16.msra.mxu1 %v23952_v9  ;;  %v24009_v9 = vld [vmem:[%s25505_s29 + $0x4110] ss:$148 sps:$4 sm:$0xff]  }
 0x5f6   : > { %16371 = vmatprep.subr.bf16.mxu0 %v23957_v10  ;;  %16535 = vmatprep.subr.bf16.mxu1 %v23960_v11  ;;  %v24012_v10 = vld [vmem:[%s25505_s29 + $0x4118] ss:$148 sps:$4 sm:$0xff]   ;;  %v24017_v11 = vld [vmem:[%s25505_s29 + $0x423c] ss:$148 sps:$4 sm:$0xff]  }
 0x5f9   : > { %16372 = vmatpush1.bf16.msra.mxu0 %v23955_v12  ;;  %16536 = vmatpush1.bf16.msra.mxu1 %v23958_v13  ;;  %v24020_v12 = vld [vmem:[%s25505_s29 + $0x4244] ss:$148 sps:$4 sm:$0xff]  }
 0x5fa   : > { %16382 = vmatprep.subr.bf16.mxu0 %v23963_v14  ;;  %16546 = vmatprep.subr.bf16.mxu1 %v23966_v15  ;;  %v24015_v13 = vld [vmem:[%s25505_s29 + $0x4238] ss:$148 sps:$4 sm:$0xff]   ;;  %v24018_v14 = vld [vmem:[%s25505_s29 + $0x4240] ss:$148 sps:$4 sm:$0xff]  }
 0x5fb   : > { %v24023_v15 = vld [vmem:[%s25505_s29 + $0x4364] ss:$148 sps:$4 sm:$0xff]  }
 0x5fc   : > { %16374 = vmatmul.mubr.bf16.vlgmr.msra.gmra.mrb[20].mxu0 %v25613_v22  ;;  %16538 = vmatmul.mubr.bf16.vlgmr.msra.gmra.mrb[20].mxu1 %v25613_v22 }
 0x5fd   : > { %16383 = vmatpush1.bf16.msra.mxu0 %v23961_v17  ;;  %16547 = vmatpush1.bf16.msra.mxu1 %v23964_v18  ;;  %v24026_v17 = vld [vmem:[%s25505_s29 + $0x436c] ss:$148 sps:$4 sm:$0xff]  }
 0x5fe   : > { %16384 = vmatprep.subr.bf16.mxu0 %v23969_v19  ;;  %16548 = vmatprep.subr.bf16.mxu1 %v23972_v20  ;;  %v24021_v18 = vld [vmem:[%s25505_s29 + $0x4360] ss:$148 sps:$4 sm:$0xff]   ;;  %v24024_v19 = vld [vmem:[%s25505_s29 + $0x4368] ss:$148 sps:$4 sm:$0xff]  }
 0x5ff   : > { %16414 = vmatprep.mubr.bf16.mxu0 %v25761_v38  ;;  %16578 = vmatprep.mubr.bf16.mxu1 %v25761_v38  ;;  %v24029_v20 = vld [vmem:[%s25505_s29 + $0x448c] ss:$148 sps:$4 sm:$0xff]  }
 0x601   : > { %16385 = vmatpush1.bf16.msra.mxu0 %v23967_v24  ;;  %16549 = vmatpush1.bf16.msra.mxu1 %v23970_v25  ;;  %v24032_v24 = vld [vmem:[%s25505_s29 + $0x4494] ss:$148 sps:$4 sm:$0xff]  }
 0x602   : > { %16386 = vmatprep.subr.bf16.mxu0 %v23975_v26  ;;  %16550 = vmatprep.subr.bf16.mxu1 %v23978_v28  ;;  %v24027_v25 = vld [vmem:[%s25505_s29 + $0x4488] ss:$148 sps:$4 sm:$0xff]   ;;  %v24030_v26 = vld [vmem:[%s25505_s29 + $0x4490] ss:$148 sps:$4 sm:$0xff]  }
 0x603   : > { %v24035_v28 = vld [vmem:[%s25505_s29 + $0x45b4] ss:$148 sps:$4 sm:$0xff]  }
 0x605   : > { %16387 = vmatpush1.bf16.msra.mxu0 %v23973_v29  ;;  %16551 = vmatpush1.bf16.msra.mxu1 %v23976_v30  ;;  %v24038_v29 = vld [vmem:[%s25505_s29 + $0x45bc] ss:$148 sps:$4 sm:$0xff]  }
 0x606   : > { %16388 = vmatprep.subr.bf16.mxu0 %v23981_v31  ;;  %16552 = vmatprep.subr.bf16.mxu1 %v23984_v32  ;;  %v24033_v30 = vld [vmem:[%s25505_s29 + $0x45b0] ss:$148 sps:$4 sm:$0xff]   ;;  %v24036_v31 = vld [vmem:[%s25505_s29 + $0x45b8] ss:$148 sps:$4 sm:$0xff]  }
 0x607   : > { %v24041_v32 = vld [vmem:[%s25505_s29 + $0x46dc] ss:$148 sps:$4 sm:$0xff]  }
 0x609   : > { %16389 = vmatpush1.bf16.msra.mxu0 %v23979_v33  ;;  %16553 = vmatpush1.bf16.msra.mxu1 %v23982_v34  ;;  %v24044_v33 = vld [vmem:[%s25505_s29 + $0x46e4] ss:$148 sps:$4 sm:$0xff]  }
 0x60a   : > { %16390 = vmatprep.subr.bf16.mxu0 %v23987_v35  ;;  %16554 = vmatprep.subr.bf16.mxu1 %v23990_v36  ;;  %v24039_v34 = vld [vmem:[%s25505_s29 + $0x46d8] ss:$148 sps:$4 sm:$0xff]   ;;  %v24042_v35 = vld [vmem:[%s25505_s29 + $0x46e0] ss:$148 sps:$4 sm:$0xff]  }
 0x60b   : > { %v24047_v36 = vld [vmem:[%s25505_s29 + $0x4804] ss:$148 sps:$4 sm:$0xff]  }
 0x60d   : > { %16391 = vmatpush1.bf16.msra.mxu0 %v23985_v37  ;;  %16555 = vmatpush1.bf16.msra.mxu1 %v23988_v39  ;;  %v24050_v37 = vld [vmem:[%s25505_s29 + $0x480c] ss:$148 sps:$4 sm:$0xff]  }
 0x60e   : > { %16392 = vmatprep.subr.bf16.mxu0 %v23993_v40  ;;  %16556 = vmatprep.subr.bf16.mxu1 %v23996_v41  ;;  %v24045_v39 = vld [vmem:[%s25505_s29 + $0x4800] ss:$148 sps:$4 sm:$0xff]   ;;  %v24048_v40 = vld [vmem:[%s25505_s29 + $0x4808] ss:$148 sps:$4 sm:$0xff]  }
 0x60f   : > { %v16088_v49 = vpop.f32.mrb[16].mxu0  ;;  %v16252_v50 = vpop.f32.mrb[16].mxu1  ;;  %v24053_v41 = vld [vmem:[%s25505_s29 + $0x492c] ss:$148 sps:$4 sm:$0xff]  }
 0x610   : > { %v16090_v51 = vpop.f32.mrb[17].mxu0  ;;  %v16254_v52 = vpop.f32.mrb[17].mxu1 }
 0x611   : > { %v17836_v53 = vcombine.low %v16088_v49, %v16090_v51  ;;  %v17837_v54 = vcombine.low %v16252_v50, %v16254_v52  ;;  %v16092_v55 = vpop.f32.mrb[18].mxu0  ;;  %v16256_v56 = vpop.f32.mrb[18].mxu1  ;;  %16393 = vmatpush1.bf16.msra.mxu0 %v23991_v42  ;;  %16557 = vmatpush1.bf16.msra.mxu1 %v23994_v45  ;;  %v24056_v42 = vld [vmem:[%s25505_s29 + $0x4934] ss:$148 sps:$4 sm:$0xff]   ;;  %v24062_v49 = vld [vmem:[%s25505_s29 + $0x6c] ss:$148 sps:$4 sm:$0xff]  }
 0x612   : > { %v16093_v59 = vpop.f32.mrb[19].mxu0  ;;  %v16257_v60 = vpop.f32.mrb[19].mxu1  ;;  %16394 = vmatprep.subr.bf16.mxu0 %v23999_v47  ;;  %16558 = vmatprep.subr.bf16.mxu1 %v24002_v48  ;;  %v24051_v45 = vld [vmem:[%s25505_s29 + $0x4928] ss:$148 sps:$4 sm:$0xff]   ;;  %v24054_v47 = vld [vmem:[%s25505_s29 + $0x4930] ss:$148 sps:$4 sm:$0xff]  }
 0x613   : > { %v17844_v0 = vrot.slane %v17836_v53, %v26064_v46  ;;  %v17851_v1 = vrot.slane %v17837_v54, %v26064_v46  ;;  %v24059_v48 = vld [vmem:[%s25505_s29 + $0x64] ss:$148 sps:$4 sm:$0xff]   ;;  %v24057_v50 = vld [vmem:[%s25505_s29 + $0x60] ss:$148 sps:$4 sm:$0xff]   ;;  %v24060_v51 = vld [vmem:[%s25505_s29 + $0x68] ss:$148 sps:$4 sm:$0xff]  }
 0x614   : > { %v24065_v52 = vld [vmem:[%s25505_s29 + $0x18c] ss:$148 sps:$4 sm:$0xff]   ;;  %v24068_v53 = vld [vmem:[%s25505_s29 + $0x194] ss:$148 sps:$4 sm:$0xff]   ;;  %v24066_v55 = vld [vmem:[%s25505_s29 + $0x190] ss:$148 sps:$4 sm:$0xff]  }
 0x615   : > { %v17852_v3 = vcombine.low %v17844_v0, %v17851_v1  ;;  %16395 = vmatpush1.bf16.msra.mxu0 %v23997_v57  ;;  %16559 = vmatpush1.bf16.msra.mxu1 %v24000_v58  ;;  %v24063_v54 = vld [vmem:[%s25505_s29 + $0x188] ss:$148 sps:$4 sm:$0xff]   ;;  %v24069_v58 = vld [vmem:[%s25505_s29 + $0x2b0] ss:$148 sps:$4 sm:$0xff]   ;;  %v24072_v59 = vld [vmem:[%s25505_s29 + $0x2b8] ss:$148 sps:$4 sm:$0xff]  }
 0x616   : > { %16396 = vmatprep.subr.bf16.mxu0 %v24005_v62  ;;  %16560 = vmatprep.subr.bf16.mxu1 %v24008_v63  ;;  %v24071_v56 = vld [vmem:[%s25505_s29 + $0x2b4] ss:$148 sps:$4 sm:$0xff]   ;;  %v24074_v57 = vld [vmem:[%s25505_s29 + $0x2bc] ss:$148 sps:$4 sm:$0xff]   ;;  %v24080_v62 = vld [vmem:[%s25505_s29 + $0x3e4] ss:$148 sps:$4 sm:$0xff]  }
 0x617   : > { %v17942_v8 = vadd.f32 %v17852_v3, %v218_v2  ;;  %v24077_v60 = vld [vmem:[%s25505_s29 + $0x3dc] ss:$148 sps:$4 sm:$0xff]   ;;  %v24075_v63 = vld [vmem:[%s25505_s29 + $0x3d8] ss:$148 sps:$4 sm:$0xff]   ;;  %v24078_v0 = vld [vmem:[%s25505_s29 + $0x3e0] ss:$148 sps:$4 sm:$0xff]  }
 0x618   : > { %v24083_v1 = vld [vmem:[%s25505_s29 + $0x504] ss:$148 sps:$4 sm:$0xff]   ;;  %v24086_v2 = vld [vmem:[%s25505_s29 + $0x50c] ss:$148 sps:$4 sm:$0xff]  }
 0x619   : > { %17952 = vst [vmem:[#allocation2 + $0x20] sm:$0xff] %v17942_v8  ;;  %16397 = vmatpush1.bf16.msra.mxu0 %v24003_v4  ;;  %16561 = vmatpush1.bf16.msra.mxu1 %v24006_v5  ;;  %v24081_v3 = vld [vmem:[%s25505_s29 + $0x500] ss:$148 sps:$4 sm:$0xff]   ;;  %v24084_v4 = vld [vmem:[%s25505_s29 + $0x508] ss:$148 sps:$4 sm:$0xff]  }
 0x61a   : > { %16398 = vmatprep.subr.bf16.mxu0 %v24011_v6  ;;  %16562 = vmatprep.subr.bf16.mxu1 %v24014_v7  ;;  %v24089_v5 = vld [vmem:[%s25505_s29 + $0x62c] ss:$148 sps:$4 sm:$0xff]   ;;  %v24092_v6 = vld [vmem:[%s25505_s29 + $0x634] ss:$148 sps:$4 sm:$0xff]   ;;  %v24090_v8 = vld [vmem:[%s25505_s29 + $0x630] ss:$148 sps:$4 sm:$0xff]  }
 0x61b   : > { %v24087_v7 = vld [vmem:[%s25505_s29 + $0x628] ss:$148 sps:$4 sm:$0xff]  }
 0x61d   : > { %16399 = vmatpush1.bf16.msra.mxu0 %v24009_v9  ;;  %16563 = vmatpush1.bf16.msra.mxu1 %v24012_v10  ;;  %v24095_v9 = vld [vmem:[%s25505_s29 + $0x754] ss:$148 sps:$4 sm:$0xff]   ;;  %v24098_v10 = vld [vmem:[%s25505_s29 + $0x75c] ss:$148 sps:$4 sm:$0xff]  }
 0x61e   : > { %16400 = vmatprep.subr.bf16.mxu0 %v24017_v11  ;;  %16564 = vmatprep.subr.bf16.mxu1 %v24020_v12  ;;  %v24093_v11 = vld [vmem:[%s25505_s29 + $0x750] ss:$148 sps:$4 sm:$0xff]   ;;  %v24096_v12 = vld [vmem:[%s25505_s29 + $0x758] ss:$148 sps:$4 sm:$0xff]  }
 0x621   : > { %16401 = vmatpush1.bf16.msra.mxu0 %v24015_v13  ;;  %16565 = vmatpush1.bf16.msra.mxu1 %v24018_v14  ;;  %v24101_v13 = vld [vmem:[%s25505_s29 + $0x87c] ss:$148 sps:$4 sm:$0xff]   ;;  %v24104_v14 = vld [vmem:[%s25505_s29 + $0x884] ss:$148 sps:$4 sm:$0xff]  }
 0x622   : > { %16402 = vmatprep.subr.bf16.mxu0 %v24023_v15  ;;  %16566 = vmatprep.subr.bf16.mxu1 %v24026_v17  ;;  %v24099_v15 = vld [vmem:[%s25505_s29 + $0x878] ss:$148 sps:$4 sm:$0xff]   ;;  %v24102_v17 = vld [vmem:[%s25505_s29 + $0x880] ss:$148 sps:$4 sm:$0xff]  }
 0x625   : > { %16403 = vmatpush1.bf16.msra.mxu0 %v24021_v18  ;;  %16567 = vmatpush1.bf16.msra.mxu1 %v24024_v19  ;;  %v24107_v18 = vld [vmem:[%s25505_s29 + $0x9a4] ss:$148 sps:$4 sm:$0xff]   ;;  %v24110_v19 = vld [vmem:[%s25505_s29 + $0x9ac] ss:$148 sps:$4 sm:$0xff]  }
 0x626   : > { %16404 = vmatprep.subr.bf16.mxu0 %v24029_v20  ;;  %16568 = vmatprep.subr.bf16.mxu1 %v24032_v24  ;;  %v24105_v20 = vld [vmem:[%s25505_s29 + $0x9a0] ss:$148 sps:$4 sm:$0xff]   ;;  %v24108_v24 = vld [vmem:[%s25505_s29 + $0x9a8] ss:$148 sps:$4 sm:$0xff]  }
 0x629   : > { %16405 = vmatpush1.bf16.msra.mxu0 %v24027_v25  ;;  %16569 = vmatpush1.bf16.msra.mxu1 %v24030_v26  ;;  %v24113_v25 = vld [vmem:[%s25505_s29 + $0xacc] ss:$148 sps:$4 sm:$0xff]   ;;  %v24116_v26 = vld [vmem:[%s25505_s29 + $0xad4] ss:$148 sps:$4 sm:$0xff]  }
 0x62a   : > { %16406 = vmatprep.subr.bf16.mxu0 %v24035_v28  ;;  %16570 = vmatprep.subr.bf16.mxu1 %v24038_v29  ;;  %v24111_v28 = vld [vmem:[%s25505_s29 + $0xac8] ss:$148 sps:$4 sm:$0xff]   ;;  %v24114_v29 = vld [vmem:[%s25505_s29 + $0xad0] ss:$148 sps:$4 sm:$0xff]  }
 0x62d   : > { %16407 = vmatpush1.bf16.msra.mxu0 %v24033_v30  ;;  %16571 = vmatpush1.bf16.msra.mxu1 %v24036_v31  ;;  %v24119_v30 = vld [vmem:[%s25505_s29 + $0xbf4] ss:$148 sps:$4 sm:$0xff]   ;;  %v24122_v31 = vld [vmem:[%s25505_s29 + $0xbfc] ss:$148 sps:$4 sm:$0xff]  }
 0x62e   : > { %16408 = vmatprep.subr.bf16.mxu0 %v24041_v32  ;;  %16572 = vmatprep.subr.bf16.mxu1 %v24044_v33  ;;  %v24117_v32 = vld [vmem:[%s25505_s29 + $0xbf0] ss:$148 sps:$4 sm:$0xff]   ;;  %v24120_v33 = vld [vmem:[%s25505_s29 + $0xbf8] ss:$148 sps:$4 sm:$0xff]  }
 0x631   : > { %16409 = vmatpush1.bf16.msra.mxu0 %v24039_v34  ;;  %16573 = vmatpush1.bf16.msra.mxu1 %v24042_v35  ;;  %v24125_v34 = vld [vmem:[%s25505_s29 + $0xd1c] ss:$148 sps:$4 sm:$0xff]   ;;  %v24128_v35 = vld [vmem:[%s25505_s29 + $0xd24] ss:$148 sps:$4 sm:$0xff]  }
 0x632   : > { %16410 = vmatprep.subr.bf16.mxu0 %v24047_v36  ;;  %16574 = vmatprep.subr.bf16.mxu1 %v24050_v37  ;;  %v24123_v36 = vld [vmem:[%s25505_s29 + $0xd18] ss:$148 sps:$4 sm:$0xff]   ;;  %v24126_v37 = vld [vmem:[%s25505_s29 + $0xd20] ss:$148 sps:$4 sm:$0xff]  }
 0x635   : > { %16411 = vmatpush1.bf16.msra.mxu0 %v24045_v39  ;;  %16575 = vmatpush1.bf16.msra.mxu1 %v24048_v40  ;;  %v24131_v39 = vld [vmem:[%s25505_s29 + $0xe44] ss:$148 sps:$4 sm:$0xff]   ;;  %v24134_v40 = vld [vmem:[%s25505_s29 + $0xe4c] ss:$148 sps:$4 sm:$0xff]  }
 0x636   : > { %16412 = vmatprep.subr.bf16.mxu0 %v24053_v41  ;;  %16576 = vmatprep.subr.bf16.mxu1 %v24056_v42  ;;  %v24129_v41 = vld [vmem:[%s25505_s29 + $0xe40] ss:$148 sps:$4 sm:$0xff]   ;;  %v24132_v42 = vld [vmem:[%s25505_s29 + $0xe48] ss:$148 sps:$4 sm:$0xff]  }
 0x639   : > { %16413 = vmatpush1.bf16.msra.mxu0 %v24051_v45  ;;  %16577 = vmatpush1.bf16.msra.mxu1 %v24054_v47  ;;  %v24137_v45 = vld [vmem:[%s25505_s29 + $0xf6c] ss:$148 sps:$4 sm:$0xff]   ;;  %v24140_v47 = vld [vmem:[%s25505_s29 + $0xf74] ss:$148 sps:$4 sm:$0xff]  }
 0x63a   : > { %16587 = vmatprep.subr.bf16.mxu0 %v24059_v48  ;;  %16751 = vmatprep.subr.bf16.mxu1 %v24062_v49  ;;  %v24135_v48 = vld [vmem:[%s25505_s29 + $0xf68] ss:$148 sps:$4 sm:$0xff]   ;;  %v24138_v49 = vld [vmem:[%s25505_s29 + $0xf70] ss:$148 sps:$4 sm:$0xff]  }
 0x63c   : > { %16415 = vmatmul.mubr.bf16.vlgmr.msra.gmra.mrb[20].mxu0 %v25829_v43  ;;  %16579 = vmatmul.mubr.bf16.vlgmr.msra.gmra.mrb[20].mxu1 %v25829_v43 }
 0x63d   : > { %16588 = vmatpush1.bf16.msra.mxu0 %v24057_v50  ;;  %16752 = vmatpush1.bf16.msra.mxu1 %v24060_v51  ;;  %v24143_v50 = vld [vmem:[%s25505_s29 + $0x1094] ss:$148 sps:$4 sm:$0xff]   ;;  %v24146_v51 = vld [vmem:[%s25505_s29 + $0x109c] ss:$148 sps:$4 sm:$0xff]  }
 0x63e   : > { %16589 = vmatprep.subr.bf16.mxu0 %v24065_v52  ;;  %16753 = vmatprep.subr.bf16.mxu1 %v24068_v53  ;;  %v24141_v52 = vld [vmem:[%s25505_s29 + $0x1090] ss:$148 sps:$4 sm:$0xff]   ;;  %v24144_v53 = vld [vmem:[%s25505_s29 + $0x1098] ss:$148 sps:$4 sm:$0xff]  }
 0x63f   : > { %16619 = vmatprep.mubr.bf16.mxu0 %v25582_v61  ;;  %16783 = vmatprep.mubr.bf16.mxu1 %v25582_v61 }
 0x641   : > { %16590 = vmatpush1.bf16.msra.mxu0 %v24063_v54  ;;  %16754 = vmatpush1.bf16.msra.mxu1 %v24066_v55  ;;  %v24149_v54 = vld [vmem:[%s25505_s29 + $0x11bc] ss:$148 sps:$4 sm:$0xff]   ;;  %v24152_v55 = vld [vmem:[%s25505_s29 + $0x11c4] ss:$148 sps:$4 sm:$0xff]  }
 0x642   : > { %16591 = vmatprep.subr.bf16.mxu0 %v24071_v56  ;;  %16755 = vmatprep.subr.bf16.mxu1 %v24074_v57  ;;  %v24147_v56 = vld [vmem:[%s25505_s29 + $0x11b8] ss:$148 sps:$4 sm:$0xff]   ;;  %v24150_v57 = vld [vmem:[%s25505_s29 + $0x11c0] ss:$148 sps:$4 sm:$0xff]  }
 0x645   : > { %16592 = vmatpush1.bf16.msra.mxu0 %v24069_v58  ;;  %16756 = vmatpush1.bf16.msra.mxu1 %v24072_v59  ;;  %v24155_v58 = vld [vmem:[%s25505_s29 + $0x12e4] ss:$148 sps:$4 sm:$0xff]   ;;  %v24158_v59 = vld [vmem:[%s25505_s29 + $0x12ec] ss:$148 sps:$4 sm:$0xff]  }
 0x646   : > { %16593 = vmatprep.subr.bf16.mxu0 %v24077_v60  ;;  %16757 = vmatprep.subr.bf16.mxu1 %v24080_v62  ;;  %v24153_v60 = vld [vmem:[%s25505_s29 + $0x12e0] ss:$148 sps:$4 sm:$0xff]   ;;  %v24156_v62 = vld [vmem:[%s25505_s29 + $0x12e8] ss:$148 sps:$4 sm:$0xff]  }
 0x649   : > { %16594 = vmatpush1.bf16.msra.mxu0 %v24075_v63  ;;  %16758 = vmatpush1.bf16.msra.mxu1 %v24078_v0  ;;  %v24161_v63 = vld [vmem:[%s25505_s29 + $0x140c] ss:$148 sps:$4 sm:$0xff]   ;;  %v24164_v0 = vld [vmem:[%s25505_s29 + $0x1414] ss:$148 sps:$4 sm:$0xff]  }
 0x64a   : > { %16595 = vmatprep.subr.bf16.mxu0 %v24083_v1  ;;  %16759 = vmatprep.subr.bf16.mxu1 %v24086_v2  ;;  %v24159_v1 = vld [vmem:[%s25505_s29 + $0x1408] ss:$148 sps:$4 sm:$0xff]   ;;  %v24162_v2 = vld [vmem:[%s25505_s29 + $0x1410] ss:$148 sps:$4 sm:$0xff]  }
 0x64d   : > { %16596 = vmatpush1.bf16.msra.mxu0 %v24081_v3  ;;  %16760 = vmatpush1.bf16.msra.mxu1 %v24084_v4  ;;  %v24167_v3 = vld [vmem:[%s25505_s29 + $0x1534] ss:$148 sps:$4 sm:$0xff]   ;;  %v24170_v4 = vld [vmem:[%s25505_s29 + $0x153c] ss:$148 sps:$4 sm:$0xff]  }
 0x64e   : > { %16597 = vmatprep.subr.bf16.mxu0 %v24089_v5  ;;  %16761 = vmatprep.subr.bf16.mxu1 %v24092_v6  ;;  %v24165_v5 = vld [vmem:[%s25505_s29 + $0x1530] ss:$148 sps:$4 sm:$0xff]   ;;  %v24168_v6 = vld [vmem:[%s25505_s29 + $0x1538] ss:$148 sps:$4 sm:$0xff]  }
 0x651   : > { %16598 = vmatpush1.bf16.msra.mxu0 %v24087_v7  ;;  %16762 = vmatpush1.bf16.msra.mxu1 %v24090_v8  ;;  %v24173_v7 = vld [vmem:[%s25505_s29 + $0x165c] ss:$148 sps:$4 sm:$0xff]   ;;  %v24176_v8 = vld [vmem:[%s25505_s29 + $0x1664] ss:$148 sps:$4 sm:$0xff]  }
 0x652   : > { %16599 = vmatprep.subr.bf16.mxu0 %v24095_v9  ;;  %16763 = vmatprep.subr.bf16.mxu1 %v24098_v10  ;;  %v24171_v9 = vld [vmem:[%s25505_s29 + $0x1658] ss:$148 sps:$4 sm:$0xff]   ;;  %v24174_v10 = vld [vmem:[%s25505_s29 + $0x1660] ss:$148 sps:$4 sm:$0xff]  }
 0x655   : > { %16600 = vmatpush1.bf16.msra.mxu0 %v24093_v11  ;;  %16764 = vmatpush1.bf16.msra.mxu1 %v24096_v12  ;;  %v24179_v11 = vld [vmem:[%s25505_s29 + $0x1784] ss:$148 sps:$4 sm:$0xff]   ;;  %v24182_v12 = vld [vmem:[%s25505_s29 + $0x178c] ss:$148 sps:$4 sm:$0xff]  }
 0x656   : > { %16601 = vmatprep.subr.bf16.mxu0 %v24101_v13  ;;  %16765 = vmatprep.subr.bf16.mxu1 %v24104_v14  ;;  %v24177_v13 = vld [vmem:[%s25505_s29 + $0x1780] ss:$148 sps:$4 sm:$0xff]   ;;  %v24180_v14 = vld [vmem:[%s25505_s29 + $0x1788] ss:$148 sps:$4 sm:$0xff]  }
 0x659   : > { %16602 = vmatpush1.bf16.msra.mxu0 %v24099_v15  ;;  %16766 = vmatpush1.bf16.msra.mxu1 %v24102_v17  ;;  %v24185_v15 = vld [vmem:[%s25505_s29 + $0x18ac] ss:$148 sps:$4 sm:$0xff]   ;;  %v24188_v17 = vld [vmem:[%s25505_s29 + $0x18b4] ss:$148 sps:$4 sm:$0xff]  }
 0x65a   : > { %16603 = vmatprep.subr.bf16.mxu0 %v24107_v18  ;;  %16767 = vmatprep.subr.bf16.mxu1 %v24110_v19  ;;  %v24183_v18 = vld [vmem:[%s25505_s29 + $0x18a8] ss:$148 sps:$4 sm:$0xff]   ;;  %v24186_v19 = vld [vmem:[%s25505_s29 + $0x18b0] ss:$148 sps:$4 sm:$0xff]  }
 0x65d   : > { %16604 = vmatpush1.bf16.msra.mxu0 %v24105_v20  ;;  %16768 = vmatpush1.bf16.msra.mxu1 %v24108_v24  ;;  %v24191_v20 = vld [vmem:[%s25505_s29 + $0x19d4] ss:$148 sps:$4 sm:$0xff]   ;;  %v24194_v24 = vld [vmem:[%s25505_s29 + $0x19dc] ss:$148 sps:$4 sm:$0xff]  }
 0x65e   : > { %16605 = vmatprep.subr.bf16.mxu0 %v24113_v25  ;;  %16769 = vmatprep.subr.bf16.mxu1 %v24116_v26  ;;  %v24189_v25 = vld [vmem:[%s25505_s29 + $0x19d0] ss:$148 sps:$4 sm:$0xff]   ;;  %v24192_v26 = vld [vmem:[%s25505_s29 + $0x19d8] ss:$148 sps:$4 sm:$0xff]  }
 0x661   : > { %16606 = vmatpush1.bf16.msra.mxu0 %v24111_v28  ;;  %16770 = vmatpush1.bf16.msra.mxu1 %v24114_v29  ;;  %v24197_v28 = vld [vmem:[%s25505_s29 + $0x1afc] ss:$148 sps:$4 sm:$0xff]   ;;  %v24200_v29 = vld [vmem:[%s25505_s29 + $0x1b04] ss:$148 sps:$4 sm:$0xff]  }
 0x662   : > { %16607 = vmatprep.subr.bf16.mxu0 %v24119_v30  ;;  %16771 = vmatprep.subr.bf16.mxu1 %v24122_v31  ;;  %v24195_v30 = vld [vmem:[%s25505_s29 + $0x1af8] ss:$148 sps:$4 sm:$0xff]   ;;  %v24198_v31 = vld [vmem:[%s25505_s29 + $0x1b00] ss:$148 sps:$4 sm:$0xff]  }
 0x665   : > { %16608 = vmatpush1.bf16.msra.mxu0 %v24117_v32  ;;  %16772 = vmatpush1.bf16.msra.mxu1 %v24120_v33  ;;  %v24203_v32 = vld [vmem:[%s25505_s29 + $0x1c24] ss:$148 sps:$4 sm:$0xff]   ;;  %v24206_v33 = vld [vmem:[%s25505_s29 + $0x1c2c] ss:$148 sps:$4 sm:$0xff]  }
 0x666   : > { %16609 = vmatprep.subr.bf16.mxu0 %v24125_v34  ;;  %16773 = vmatprep.subr.bf16.mxu1 %v24128_v35  ;;  %v24201_v34 = vld [vmem:[%s25505_s29 + $0x1c20] ss:$148 sps:$4 sm:$0xff]   ;;  %v24204_v35 = vld [vmem:[%s25505_s29 + $0x1c28] ss:$148 sps:$4 sm:$0xff]  }
 0x669   : > { %16610 = vmatpush1.bf16.msra.mxu0 %v24123_v36  ;;  %16774 = vmatpush1.bf16.msra.mxu1 %v24126_v37  ;;  %v24209_v36 = vld [vmem:[%s25505_s29 + $0x1d4c] ss:$148 sps:$4 sm:$0xff]   ;;  %v24212_v37 = vld [vmem:[%s25505_s29 + $0x1d54] ss:$148 sps:$4 sm:$0xff]  }
 0x66a   : > { %16611 = vmatprep.subr.bf16.mxu0 %v24131_v39  ;;  %16775 = vmatprep.subr.bf16.mxu1 %v24134_v40  ;;  %v24207_v39 = vld [vmem:[%s25505_s29 + $0x1d48] ss:$148 sps:$4 sm:$0xff]   ;;  %v24210_v40 = vld [vmem:[%s25505_s29 + $0x1d50] ss:$148 sps:$4 sm:$0xff]  }
 0x66d   : > { %16612 = vmatpush1.bf16.msra.mxu0 %v24129_v41  ;;  %16776 = vmatpush1.bf16.msra.mxu1 %v24132_v42  ;;  %v24215_v41 = vld [vmem:[%s25505_s29 + $0x1e74] ss:$148 sps:$4 sm:$0xff]   ;;  %v24218_v42 = vld [vmem:[%s25505_s29 + $0x1e7c] ss:$148 sps:$4 sm:$0xff]  }
 0x66e   : > { %16613 = vmatprep.subr.bf16.mxu0 %v24137_v45  ;;  %16777 = vmatprep.subr.bf16.mxu1 %v24140_v47  ;;  %v24213_v45 = vld [vmem:[%s25505_s29 + $0x1e70] ss:$148 sps:$4 sm:$0xff]   ;;  %v24216_v47 = vld [vmem:[%s25505_s29 + $0x1e78] ss:$148 sps:$4 sm:$0xff]  }
 0x671   : > { %16614 = vmatpush1.bf16.msra.mxu0 %v24135_v48  ;;  %16778 = vmatpush1.bf16.msra.mxu1 %v24138_v49  ;;  %v24221_v48 = vld [vmem:[%s25505_s29 + $0x1f9c] ss:$148 sps:$4 sm:$0xff]   ;;  %v24224_v49 = vld [vmem:[%s25505_s29 + $0x1fa4] ss:$148 sps:$4 sm:$0xff]  }
 0x672   : > { %16615 = vmatprep.subr.bf16.mxu0 %v24143_v50  ;;  %16779 = vmatprep.subr.bf16.mxu1 %v24146_v51  ;;  %v24219_v50 = vld [vmem:[%s25505_s29 + $0x1f98] ss:$148 sps:$4 sm:$0xff]   ;;  %v24222_v51 = vld [vmem:[%s25505_s29 + $0x1fa0] ss:$148 sps:$4 sm:$0xff]  }
 0x675   : > { %16616 = vmatpush1.bf16.msra.mxu0 %v24141_v52  ;;  %16780 = vmatpush1.bf16.msra.mxu1 %v24144_v53  ;;  %v24227_v52 = vld [vmem:[%s25505_s29 + $0x20c4] ss:$148 sps:$4 sm:$0xff]   ;;  %v24230_v53 = vld [vmem:[%s25505_s29 + $0x20cc] ss:$148 sps:$4 sm:$0xff]  }
 0x676   : > { %16617 = vmatprep.subr.bf16.mxu0 %v24149_v54  ;;  %16781 = vmatprep.subr.bf16.mxu1 %v24152_v55  ;;  %v24225_v54 = vld [vmem:[%s25505_s29 + $0x20c0] ss:$148 sps:$4 sm:$0xff]   ;;  %v24228_v55 = vld [vmem:[%s25505_s29 + $0x20c8] ss:$148 sps:$4 sm:$0xff]  }
 0x679   : > { %16618 = vmatpush1.bf16.msra.mxu0 %v24147_v56  ;;  %16782 = vmatpush1.bf16.msra.mxu1 %v24150_v57  ;;  %v24233_v56 = vld [vmem:[%s25505_s29 + $0x21ec] ss:$148 sps:$4 sm:$0xff]   ;;  %v24236_v57 = vld [vmem:[%s25505_s29 + $0x21f4] ss:$148 sps:$4 sm:$0xff]  }
 0x67a   : > { %16628 = vmatprep.subr.bf16.mxu0 %v24155_v58  ;;  %16792 = vmatprep.subr.bf16.mxu1 %v24158_v59  ;;  %v24231_v58 = vld [vmem:[%s25505_s29 + $0x21e8] ss:$148 sps:$4 sm:$0xff]   ;;  %v24234_v59 = vld [vmem:[%s25505_s29 + $0x21f0] ss:$148 sps:$4 sm:$0xff]  }
 0x67c   : > { %16620 = vmatmul.mubr.bf16.vlgmr.msra.gmra.mrb[24].mxu0 %v25604_v16  ;;  %16784 = vmatmul.mubr.bf16.vlgmr.msra.gmra.mrb[24].mxu1 %v25604_v16 }
 0x67d   : > { %16629 = vmatpush1.bf16.msra.mxu0 %v24153_v60  ;;  %16793 = vmatpush1.bf16.msra.mxu1 %v24156_v62  ;;  %v24239_v60 = vld [vmem:[%s25505_s29 + $0x2314] ss:$148 sps:$4 sm:$0xff]   ;;  %v24242_v62 = vld [vmem:[%s25505_s29 + $0x231c] ss:$148 sps:$4 sm:$0xff]  }
 0x67e   : > { %16630 = vmatprep.subr.bf16.mxu0 %v24161_v63  ;;  %16794 = vmatprep.subr.bf16.mxu1 %v24164_v0  ;;  %v24237_v63 = vld [vmem:[%s25505_s29 + $0x2310] ss:$148 sps:$4 sm:$0xff]   ;;  %v24240_v0 = vld [vmem:[%s25505_s29 + $0x2318] ss:$148 sps:$4 sm:$0xff]  }
 0x67f   : > { %16660 = vmatprep.mubr.bf16.mxu0 %v25617_v23  ;;  %16824 = vmatprep.mubr.bf16.mxu1 %v25617_v23 }
 0x681   : > { %16631 = vmatpush1.bf16.msra.mxu0 %v24159_v1  ;;  %16795 = vmatpush1.bf16.msra.mxu1 %v24162_v2  ;;  %v24245_v1 = vld [vmem:[%s25505_s29 + $0x243c] ss:$148 sps:$4 sm:$0xff]   ;;  %v24248_v2 = vld [vmem:[%s25505_s29 + $0x2444] ss:$148 sps:$4 sm:$0xff]  }
 0x682   : > { %16632 = vmatprep.subr.bf16.mxu0 %v24167_v3  ;;  %16796 = vmatprep.subr.bf16.mxu1 %v24170_v4  ;;  %v24243_v3 = vld [vmem:[%s25505_s29 + $0x2438] ss:$148 sps:$4 sm:$0xff]   ;;  %v24246_v4 = vld [vmem:[%s25505_s29 + $0x2440] ss:$148 sps:$4 sm:$0xff]  }
 0x685   : > { %16633 = vmatpush1.bf16.msra.mxu0 %v24165_v5  ;;  %16797 = vmatpush1.bf16.msra.mxu1 %v24168_v6  ;;  %v24251_v5 = vld [vmem:[%s25505_s29 + $0x2564] ss:$148 sps:$4 sm:$0xff]   ;;  %v24254_v6 = vld [vmem:[%s25505_s29 + $0x256c] ss:$148 sps:$4 sm:$0xff]  }
 0x686   : > { %16634 = vmatprep.subr.bf16.mxu0 %v24173_v7  ;;  %16798 = vmatprep.subr.bf16.mxu1 %v24176_v8  ;;  %v24249_v7 = vld [vmem:[%s25505_s29 + $0x2560] ss:$148 sps:$4 sm:$0xff]   ;;  %v24252_v8 = vld [vmem:[%s25505_s29 + $0x2568] ss:$148 sps:$4 sm:$0xff]  }
 0x689   : > { %16635 = vmatpush1.bf16.msra.mxu0 %v24171_v9  ;;  %16799 = vmatpush1.bf16.msra.mxu1 %v24174_v10  ;;  %v24257_v9 = vld [vmem:[%s25505_s29 + $0x268c] ss:$148 sps:$4 sm:$0xff]   ;;  %v24260_v10 = vld [vmem:[%s25505_s29 + $0x2694] ss:$148 sps:$4 sm:$0xff]  }
 0x68a   : > { %16636 = vmatprep.subr.bf16.mxu0 %v24179_v11  ;;  %16800 = vmatprep.subr.bf16.mxu1 %v24182_v12  ;;  %v24255_v11 = vld [vmem:[%s25505_s29 + $0x2688] ss:$148 sps:$4 sm:$0xff]   ;;  %v24258_v12 = vld [vmem:[%s25505_s29 + $0x2690] ss:$148 sps:$4 sm:$0xff]  }
 0x68d   : > { %16637 = vmatpush1.bf16.msra.mxu0 %v24177_v13  ;;  %16801 = vmatpush1.bf16.msra.mxu1 %v24180_v14  ;;  %v24263_v13 = vld [vmem:[%s25505_s29 + $0x27b4] ss:$148 sps:$4 sm:$0xff]   ;;  %v24266_v14 = vld [vmem:[%s25505_s29 + $0x27bc] ss:$148 sps:$4 sm:$0xff]  }
 0x68e   : > { %16638 = vmatprep.subr.bf16.mxu0 %v24185_v15  ;;  %16802 = vmatprep.subr.bf16.mxu1 %v24188_v17  ;;  %v24261_v15 = vld [vmem:[%s25505_s29 + $0x27b0] ss:$148 sps:$4 sm:$0xff]   ;;  %v24264_v17 = vld [vmem:[%s25505_s29 + $0x27b8] ss:$148 sps:$4 sm:$0xff]  }
 0x691   : > { %16639 = vmatpush1.bf16.msra.mxu0 %v24183_v18  ;;  %16803 = vmatpush1.bf16.msra.mxu1 %v24186_v19  ;;  %v24269_v18 = vld [vmem:[%s25505_s29 + $0x28dc] ss:$148 sps:$4 sm:$0xff]   ;;  %v24272_v19 = vld [vmem:[%s25505_s29 + $0x28e4] ss:$148 sps:$4 sm:$0xff]  }
 0x692   : > { %16640 = vmatprep.subr.bf16.mxu0 %v24191_v20  ;;  %16804 = vmatprep.subr.bf16.mxu1 %v24194_v24  ;;  %v24267_v20 = vld [vmem:[%s25505_s29 + $0x28d8] ss:$148 sps:$4 sm:$0xff]   ;;  %v24270_v24 = vld [vmem:[%s25505_s29 + $0x28e0] ss:$148 sps:$4 sm:$0xff]  }
 0x695   : > { %16641 = vmatpush1.bf16.msra.mxu0 %v24189_v25  ;;  %16805 = vmatpush1.bf16.msra.mxu1 %v24192_v26  ;;  %v24275_v25 = vld [vmem:[%s25505_s29 + $0x2a04] ss:$148 sps:$4 sm:$0xff]   ;;  %v24278_v26 = vld [vmem:[%s25505_s29 + $0x2a0c] ss:$148 sps:$4 sm:$0xff]  }
 0x696   : > { %16642 = vmatprep.subr.bf16.mxu0 %v24197_v28  ;;  %16806 = vmatprep.subr.bf16.mxu1 %v24200_v29  ;;  %v24273_v28 = vld [vmem:[%s25505_s29 + $0x2a00] ss:$148 sps:$4 sm:$0xff]   ;;  %v24276_v29 = vld [vmem:[%s25505_s29 + $0x2a08] ss:$148 sps:$4 sm:$0xff]  }
 0x699   : > { %16643 = vmatpush1.bf16.msra.mxu0 %v24195_v30  ;;  %16807 = vmatpush1.bf16.msra.mxu1 %v24198_v31  ;;  %v24281_v30 = vld [vmem:[%s25505_s29 + $0x2b2c] ss:$148 sps:$4 sm:$0xff]   ;;  %v24284_v31 = vld [vmem:[%s25505_s29 + $0x2b34] ss:$148 sps:$4 sm:$0xff]  }
 0x69a   : > { %16644 = vmatprep.subr.bf16.mxu0 %v24203_v32  ;;  %16808 = vmatprep.subr.bf16.mxu1 %v24206_v33  ;;  %v24279_v32 = vld [vmem:[%s25505_s29 + $0x2b28] ss:$148 sps:$4 sm:$0xff]   ;;  %v24282_v33 = vld [vmem:[%s25505_s29 + $0x2b30] ss:$148 sps:$4 sm:$0xff]  }
 0x69d   : > { %16645 = vmatpush1.bf16.msra.mxu0 %v24201_v34  ;;  %16809 = vmatpush1.bf16.msra.mxu1 %v24204_v35  ;;  %v24287_v34 = vld [vmem:[%s25505_s29 + $0x2c54] ss:$148 sps:$4 sm:$0xff]   ;;  %v24290_v35 = vld [vmem:[%s25505_s29 + $0x2c5c] ss:$148 sps:$4 sm:$0xff]  }
 0x69e   : > { %16646 = vmatprep.subr.bf16.mxu0 %v24209_v36  ;;  %16810 = vmatprep.subr.bf16.mxu1 %v24212_v37  ;;  %v24285_v36 = vld [vmem:[%s25505_s29 + $0x2c50] ss:$148 sps:$4 sm:$0xff]   ;;  %v24288_v37 = vld [vmem:[%s25505_s29 + $0x2c58] ss:$148 sps:$4 sm:$0xff]  }
 0x6a1   : > { %16647 = vmatpush1.bf16.msra.mxu0 %v24207_v39  ;;  %16811 = vmatpush1.bf16.msra.mxu1 %v24210_v40  ;;  %v24293_v39 = vld [vmem:[%s25505_s29 + $0x2d7c] ss:$148 sps:$4 sm:$0xff]   ;;  %v24296_v40 = vld [vmem:[%s25505_s29 + $0x2d84] ss:$148 sps:$4 sm:$0xff]  }
 0x6a2   : > { %16648 = vmatprep.subr.bf16.mxu0 %v24215_v41  ;;  %16812 = vmatprep.subr.bf16.mxu1 %v24218_v42  ;;  %v24291_v41 = vld [vmem:[%s25505_s29 + $0x2d78] ss:$148 sps:$4 sm:$0xff]   ;;  %v24294_v42 = vld [vmem:[%s25505_s29 + $0x2d80] ss:$148 sps:$4 sm:$0xff]  }
 0x6a5   : > { %16649 = vmatpush1.bf16.msra.mxu0 %v24213_v45  ;;  %16813 = vmatpush1.bf16.msra.mxu1 %v24216_v47  ;;  %v24299_v45 = vld [vmem:[%s25505_s29 + $0x2ea4] ss:$148 sps:$4 sm:$0xff]   ;;  %v24302_v47 = vld [vmem:[%s25505_s29 + $0x2eac] ss:$148 sps:$4 sm:$0xff]  }
 0x6a6   : > { %16650 = vmatprep.subr.bf16.mxu0 %v24221_v48  ;;  %16814 = vmatprep.subr.bf16.mxu1 %v24224_v49  ;;  %v24297_v48 = vld [vmem:[%s25505_s29 + $0x2ea0] ss:$148 sps:$4 sm:$0xff]   ;;  %v24300_v49 = vld [vmem:[%s25505_s29 + $0x2ea8] ss:$148 sps:$4 sm:$0xff]  }
 0x6a9   : > { %16651 = vmatpush1.bf16.msra.mxu0 %v24219_v50  ;;  %16815 = vmatpush1.bf16.msra.mxu1 %v24222_v51  ;;  %v24305_v50 = vld [vmem:[%s25505_s29 + $0x2fcc] ss:$148 sps:$4 sm:$0xff]   ;;  %v24308_v51 = vld [vmem:[%s25505_s29 + $0x2fd4] ss:$148 sps:$4 sm:$0xff]  }
 0x6aa   : > { %16652 = vmatprep.subr.bf16.mxu0 %v24227_v52  ;;  %16816 = vmatprep.subr.bf16.mxu1 %v24230_v53  ;;  %v24303_v52 = vld [vmem:[%s25505_s29 + $0x2fc8] ss:$148 sps:$4 sm:$0xff]   ;;  %v24306_v53 = vld [vmem:[%s25505_s29 + $0x2fd0] ss:$148 sps:$4 sm:$0xff]  }
 0x6ad   : > { %16653 = vmatpush1.bf16.msra.mxu0 %v24225_v54  ;;  %16817 = vmatpush1.bf16.msra.mxu1 %v24228_v55  ;;  %v24311_v54 = vld [vmem:[%s25505_s29 + $0x30f4] ss:$148 sps:$4 sm:$0xff]   ;;  %v24314_v55 = vld [vmem:[%s25505_s29 + $0x30fc] ss:$148 sps:$4 sm:$0xff]  }
 0x6ae   : > { %16654 = vmatprep.subr.bf16.mxu0 %v24233_v56  ;;  %16818 = vmatprep.subr.bf16.mxu1 %v24236_v57  ;;  %v24309_v56 = vld [vmem:[%s25505_s29 + $0x30f0] ss:$148 sps:$4 sm:$0xff]   ;;  %v24312_v57 = vld [vmem:[%s25505_s29 + $0x30f8] ss:$148 sps:$4 sm:$0xff]  }
 0x6b1   : > { %16655 = vmatpush1.bf16.msra.mxu0 %v24231_v58  ;;  %16819 = vmatpush1.bf16.msra.mxu1 %v24234_v59  ;;  %v24317_v58 = vld [vmem:[%s25505_s29 + $0x321c] ss:$148 sps:$4 sm:$0xff]   ;;  %v24320_v59 = vld [vmem:[%s25505_s29 + $0x3224] ss:$148 sps:$4 sm:$0xff]  }
 0x6b2   : > { %16656 = vmatprep.subr.bf16.mxu0 %v24239_v60  ;;  %16820 = vmatprep.subr.bf16.mxu1 %v24242_v62  ;;  %v24315_v60 = vld [vmem:[%s25505_s29 + $0x3218] ss:$148 sps:$4 sm:$0xff]   ;;  %v24318_v62 = vld [vmem:[%s25505_s29 + $0x3220] ss:$148 sps:$4 sm:$0xff]  }
 0x6b5   : > { %16657 = vmatpush1.bf16.msra.mxu0 %v24237_v63  ;;  %16821 = vmatpush1.bf16.msra.mxu1 %v24240_v0  ;;  %v24323_v63 = vld [vmem:[%s25505_s29 + $0x3344] ss:$148 sps:$4 sm:$0xff]   ;;  %v24326_v0 = vld [vmem:[%s25505_s29 + $0x334c] ss:$148 sps:$4 sm:$0xff]  }
 0x6b6   : > { %16658 = vmatprep.subr.bf16.mxu0 %v24245_v1  ;;  %16822 = vmatprep.subr.bf16.mxu1 %v24248_v2  ;;  %v24321_v1 = vld [vmem:[%s25505_s29 + $0x3340] ss:$148 sps:$4 sm:$0xff]   ;;  %v24324_v2 = vld [vmem:[%s25505_s29 + $0x3348] ss:$148 sps:$4 sm:$0xff]  }
 0x6b9   : > { %16659 = vmatpush1.bf16.msra.mxu0 %v24243_v3  ;;  %16823 = vmatpush1.bf16.msra.mxu1 %v24246_v4  ;;  %v24329_v3 = vld [vmem:[%s25505_s29 + $0x346c] ss:$148 sps:$4 sm:$0xff]   ;;  %v24332_v4 = vld [vmem:[%s25505_s29 + $0x3474] ss:$148 sps:$4 sm:$0xff]  }
 0x6ba   : > { %16669 = vmatprep.subr.bf16.mxu0 %v24251_v5  ;;  %16833 = vmatprep.subr.bf16.mxu1 %v24254_v6  ;;  %v24327_v5 = vld [vmem:[%s25505_s29 + $0x3468] ss:$148 sps:$4 sm:$0xff]   ;;  %v24330_v6 = vld [vmem:[%s25505_s29 + $0x3470] ss:$148 sps:$4 sm:$0xff]  }
 0x6bc   : > { %16661 = vmatmul.mubr.bf16.vlgmr.msra.gmra.mrb[24].mxu0 %v25686_v27  ;;  %16825 = vmatmul.mubr.bf16.vlgmr.msra.gmra.mrb[24].mxu1 %v25686_v27 }
 0x6bd   : > { %16670 = vmatpush1.bf16.msra.mxu0 %v24249_v7  ;;  %16834 = vmatpush1.bf16.msra.mxu1 %v24252_v8  ;;  %v24335_v7 = vld [vmem:[%s25505_s29 + $0x3594] ss:$148 sps:$4 sm:$0xff]   ;;  %v24338_v8 = vld [vmem:[%s25505_s29 + $0x359c] ss:$148 sps:$4 sm:$0xff]  }
 0x6be   : > { %16671 = vmatprep.subr.bf16.mxu0 %v24257_v9  ;;  %16835 = vmatprep.subr.bf16.mxu1 %v24260_v10  ;;  %v24333_v9 = vld [vmem:[%s25505_s29 + $0x3590] ss:$148 sps:$4 sm:$0xff]   ;;  %v24336_v10 = vld [vmem:[%s25505_s29 + $0x3598] ss:$148 sps:$4 sm:$0xff]  }
 0x6bf   : > { %16701 = vmatprep.mubr.bf16.mxu0 %v25610_v21  ;;  %16865 = vmatprep.mubr.bf16.mxu1 %v25610_v21 }
 0x6c1   : > { %16672 = vmatpush1.bf16.msra.mxu0 %v24255_v11  ;;  %16836 = vmatpush1.bf16.msra.mxu1 %v24258_v12  ;;  %v24341_v11 = vld [vmem:[%s25505_s29 + $0x36bc] ss:$148 sps:$4 sm:$0xff]   ;;  %v24344_v12 = vld [vmem:[%s25505_s29 + $0x36c4] ss:$148 sps:$4 sm:$0xff]  }
 0x6c2   : > { %16673 = vmatprep.subr.bf16.mxu0 %v24263_v13  ;;  %16837 = vmatprep.subr.bf16.mxu1 %v24266_v14  ;;  %v24339_v13 = vld [vmem:[%s25505_s29 + $0x36b8] ss:$148 sps:$4 sm:$0xff]   ;;  %v24342_v14 = vld [vmem:[%s25505_s29 + $0x36c0] ss:$148 sps:$4 sm:$0xff]  }
 0x6c5   : > { %16674 = vmatpush1.bf16.msra.mxu0 %v24261_v15  ;;  %16838 = vmatpush1.bf16.msra.mxu1 %v24264_v17  ;;  %v24347_v15 = vld [vmem:[%s25505_s29 + $0x37e4] ss:$148 sps:$4 sm:$0xff]   ;;  %v24350_v17 = vld [vmem:[%s25505_s29 + $0x37ec] ss:$148 sps:$4 sm:$0xff]  }
 0x6c6   : > { %16675 = vmatprep.subr.bf16.mxu0 %v24269_v18  ;;  %16839 = vmatprep.subr.bf16.mxu1 %v24272_v19  ;;  %v24345_v18 = vld [vmem:[%s25505_s29 + $0x37e0] ss:$148 sps:$4 sm:$0xff]   ;;  %v24348_v19 = vld [vmem:[%s25505_s29 + $0x37e8] ss:$148 sps:$4 sm:$0xff]  }
 0x6c9   : > { %16676 = vmatpush1.bf16.msra.mxu0 %v24267_v20  ;;  %16840 = vmatpush1.bf16.msra.mxu1 %v24270_v24  ;;  %v24353_v20 = vld [vmem:[%s25505_s29 + $0x390c] ss:$148 sps:$4 sm:$0xff]   ;;  %v24356_v24 = vld [vmem:[%s25505_s29 + $0x3914] ss:$148 sps:$4 sm:$0xff]  }
 0x6ca   : > { %16677 = vmatprep.subr.bf16.mxu0 %v24275_v25  ;;  %16841 = vmatprep.subr.bf16.mxu1 %v24278_v26  ;;  %v24351_v25 = vld [vmem:[%s25505_s29 + $0x3908] ss:$148 sps:$4 sm:$0xff]   ;;  %v24354_v26 = vld [vmem:[%s25505_s29 + $0x3910] ss:$148 sps:$4 sm:$0xff]  }
 0x6cd   : > { %16678 = vmatpush1.bf16.msra.mxu0 %v24273_v28  ;;  %16842 = vmatpush1.bf16.msra.mxu1 %v24276_v29  ;;  %v24359_v28 = vld [vmem:[%s25505_s29 + $0x3a34] ss:$148 sps:$4 sm:$0xff]   ;;  %v24362_v29 = vld [vmem:[%s25505_s29 + $0x3a3c] ss:$148 sps:$4 sm:$0xff]  }
 0x6ce   : > { %16679 = vmatprep.subr.bf16.mxu0 %v24281_v30  ;;  %16843 = vmatprep.subr.bf16.mxu1 %v24284_v31  ;;  %v24357_v30 = vld [vmem:[%s25505_s29 + $0x3a30] ss:$148 sps:$4 sm:$0xff]   ;;  %v24360_v31 = vld [vmem:[%s25505_s29 + $0x3a38] ss:$148 sps:$4 sm:$0xff]  }
 0x6d1   : > { %16680 = vmatpush1.bf16.msra.mxu0 %v24279_v32  ;;  %16844 = vmatpush1.bf16.msra.mxu1 %v24282_v33  ;;  %v24365_v32 = vld [vmem:[%s25505_s29 + $0x3b5c] ss:$148 sps:$4 sm:$0xff]   ;;  %v24368_v33 = vld [vmem:[%s25505_s29 + $0x3b64] ss:$148 sps:$4 sm:$0xff]  }
 0x6d2   : > { %16681 = vmatprep.subr.bf16.mxu0 %v24287_v34  ;;  %16845 = vmatprep.subr.bf16.mxu1 %v24290_v35  ;;  %v24363_v34 = vld [vmem:[%s25505_s29 + $0x3b58] ss:$148 sps:$4 sm:$0xff]   ;;  %v24366_v35 = vld [vmem:[%s25505_s29 + $0x3b60] ss:$148 sps:$4 sm:$0xff]  }
 0x6d5   : > { %16682 = vmatpush1.bf16.msra.mxu0 %v24285_v36  ;;  %16846 = vmatpush1.bf16.msra.mxu1 %v24288_v37  ;;  %v24371_v36 = vld [vmem:[%s25505_s29 + $0x3c84] ss:$148 sps:$4 sm:$0xff]   ;;  %v24374_v37 = vld [vmem:[%s25505_s29 + $0x3c8c] ss:$148 sps:$4 sm:$0xff]  }
 0x6d6   : > { %16683 = vmatprep.subr.bf16.mxu0 %v24293_v39  ;;  %16847 = vmatprep.subr.bf16.mxu1 %v24296_v40  ;;  %v24369_v39 = vld [vmem:[%s25505_s29 + $0x3c80] ss:$148 sps:$4 sm:$0xff]   ;;  %v24372_v40 = vld [vmem:[%s25505_s29 + $0x3c88] ss:$148 sps:$4 sm:$0xff]  }
 0x6d9   : > { %16684 = vmatpush1.bf16.msra.mxu0 %v24291_v41  ;;  %16848 = vmatpush1.bf16.msra.mxu1 %v24294_v42  ;;  %v24377_v41 = vld [vmem:[%s25505_s29 + $0x3dac] ss:$148 sps:$4 sm:$0xff]   ;;  %v24380_v42 = vld [vmem:[%s25505_s29 + $0x3db4] ss:$148 sps:$4 sm:$0xff]  }
 0x6da   : > { %16685 = vmatprep.subr.bf16.mxu0 %v24299_v45  ;;  %16849 = vmatprep.subr.bf16.mxu1 %v24302_v47  ;;  %v24375_v45 = vld [vmem:[%s25505_s29 + $0x3da8] ss:$148 sps:$4 sm:$0xff]   ;;  %v24378_v47 = vld [vmem:[%s25505_s29 + $0x3db0] ss:$148 sps:$4 sm:$0xff]  }
 0x6dd   : > { %16686 = vmatpush1.bf16.msra.mxu0 %v24297_v48  ;;  %16850 = vmatpush1.bf16.msra.mxu1 %v24300_v49  ;;  %v24383_v48 = vld [vmem:[%s25505_s29 + $0x3ed4] ss:$148 sps:$4 sm:$0xff]   ;;  %v24386_v49 = vld [vmem:[%s25505_s29 + $0x3edc] ss:$148 sps:$4 sm:$0xff]  }
 0x6de   : > { %16687 = vmatprep.subr.bf16.mxu0 %v24305_v50  ;;  %16851 = vmatprep.subr.bf16.mxu1 %v24308_v51 }
 0x6e1   : > { %16688 = vmatpush1.bf16.msra.mxu0 %v24303_v52  ;;  %16852 = vmatpush1.bf16.msra.mxu1 %v24306_v53 }
 0x6e2   : > { %16689 = vmatprep.subr.bf16.mxu0 %v24311_v54  ;;  %16853 = vmatprep.subr.bf16.mxu1 %v24314_v55 }
 0x6e5   : > { %16690 = vmatpush1.bf16.msra.mxu0 %v24309_v56  ;;  %16854 = vmatpush1.bf16.msra.mxu1 %v24312_v57 }
 0x6e6   : > { %16691 = vmatprep.subr.bf16.mxu0 %v24317_v58  ;;  %16855 = vmatprep.subr.bf16.mxu1 %v24320_v59  ;;  %v24381_v58 = vld [vmem:[%s25505_s29 + $0x3ed0] ss:$148 sps:$4 sm:$0xff]   ;;  %v24384_v59 = vld [vmem:[%s25505_s29 + $0x3ed8] ss:$148 sps:$4 sm:$0xff]  }
 0x6e9   : > { %16692 = vmatpush1.bf16.msra.mxu0 %v24315_v60  ;;  %16856 = vmatpush1.bf16.msra.mxu1 %v24318_v62 }
 0x6ea   : > { %16693 = vmatprep.subr.bf16.mxu0 %v24323_v63  ;;  %16857 = vmatprep.subr.bf16.mxu1 %v24326_v0  ;;  %v24389_v63 = vld [vmem:[%s25505_s29 + $0x3ffc] ss:$148 sps:$4 sm:$0xff]   ;;  %v24392_v0 = vld [vmem:[%s25505_s29 + $0x4004] ss:$148 sps:$4 sm:$0xff]  }
 0x6ed   : > { %16694 = vmatpush1.bf16.msra.mxu0 %v24321_v1  ;;  %16858 = vmatpush1.bf16.msra.mxu1 %v24324_v2 }
 0x6ee   : > { %16695 = vmatprep.subr.bf16.mxu0 %v24329_v3  ;;  %16859 = vmatprep.subr.bf16.mxu1 %v24332_v4  ;;  %v219_v3 = vld [vmem:[#allocation2 + $0x28] sm:$0xff] }
 0x6f1   : > { %16696 = vmatpush1.bf16.msra.mxu0 %v24327_v5  ;;  %16860 = vmatpush1.bf16.msra.mxu1 %v24330_v6  ;;  %v24387_v5 = vld [vmem:[%s25505_s29 + $0x3ff8] ss:$148 sps:$4 sm:$0xff]   ;;  %v24390_v6 = vld [vmem:[%s25505_s29 + $0x4000] ss:$148 sps:$4 sm:$0xff]  }
 0x6f2   : > { %16697 = vmatprep.subr.bf16.mxu0 %v24335_v7  ;;  %16861 = vmatprep.subr.bf16.mxu1 %v24338_v8  ;;  %v24395_v7 = vld [vmem:[%s25505_s29 + $0x4124] ss:$148 sps:$4 sm:$0xff]   ;;  %v24398_v8 = vld [vmem:[%s25505_s29 + $0x412c] ss:$148 sps:$4 sm:$0xff]  }
 0x6f5   : > { %16698 = vmatpush1.bf16.msra.mxu0 %v24333_v9  ;;  %16862 = vmatpush1.bf16.msra.mxu1 %v24336_v10  ;;  %v24393_v10 = vld [vmem:[%s25505_s29 + $0x4120] ss:$148 sps:$4 sm:$0xff]  }
 0x6f6   : > { %16699 = vmatprep.subr.bf16.mxu0 %v24341_v11  ;;  %16863 = vmatprep.subr.bf16.mxu1 %v24344_v12  ;;  %v24396_v11 = vld [vmem:[%s25505_s29 + $0x4128] ss:$148 sps:$4 sm:$0xff]   ;;  %v24401_v12 = vld [vmem:[%s25505_s29 + $0x424c] ss:$148 sps:$4 sm:$0xff]  }
 0x6f9   : > { %16700 = vmatpush1.bf16.msra.mxu0 %v24339_v13  ;;  %16864 = vmatpush1.bf16.msra.mxu1 %v24342_v14  ;;  %v24404_v13 = vld [vmem:[%s25505_s29 + $0x4254] ss:$148 sps:$4 sm:$0xff]  }
 0x6fa   : > { %16710 = vmatprep.subr.bf16.mxu0 %v24347_v15  ;;  %16874 = vmatprep.subr.bf16.mxu1 %v24350_v17  ;;  %v24399_v14 = vld [vmem:[%s25505_s29 + $0x4248] ss:$148 sps:$4 sm:$0xff]   ;;  %v24402_v15 = vld [vmem:[%s25505_s29 + $0x4250] ss:$148 sps:$4 sm:$0xff]  }
 0x6fb   : > { %v24407_v17 = vld [vmem:[%s25505_s29 + $0x4374] ss:$148 sps:$4 sm:$0xff]  }
 0x6fc   : > { %16702 = vmatmul.mubr.bf16.vlgmr.msra.gmra.mrb[24].mxu0 %v25613_v22  ;;  %16866 = vmatmul.mubr.bf16.vlgmr.msra.gmra.mrb[24].mxu1 %v25613_v22 }
 0x6fd   : > { %16711 = vmatpush1.bf16.msra.mxu0 %v24345_v18  ;;  %16875 = vmatpush1.bf16.msra.mxu1 %v24348_v19  ;;  %v24410_v18 = vld [vmem:[%s25505_s29 + $0x437c] ss:$148 sps:$4 sm:$0xff]  }
 0x6fe   : > { %16712 = vmatprep.subr.bf16.mxu0 %v24353_v20  ;;  %16876 = vmatprep.subr.bf16.mxu1 %v24356_v24  ;;  %v24405_v19 = vld [vmem:[%s25505_s29 + $0x4370] ss:$148 sps:$4 sm:$0xff]   ;;  %v24408_v20 = vld [vmem:[%s25505_s29 + $0x4378] ss:$148 sps:$4 sm:$0xff]  }
 0x6ff   : > { %16742 = vmatprep.mubr.bf16.mxu0 %v25761_v38  ;;  %16906 = vmatprep.mubr.bf16.mxu1 %v25761_v38  ;;  %v24413_v24 = vld [vmem:[%s25505_s29 + $0x449c] ss:$148 sps:$4 sm:$0xff]  }
 0x701   : > { %16713 = vmatpush1.bf16.msra.mxu0 %v24351_v25  ;;  %16877 = vmatpush1.bf16.msra.mxu1 %v24354_v26  ;;  %v24416_v25 = vld [vmem:[%s25505_s29 + $0x44a4] ss:$148 sps:$4 sm:$0xff]  }
 0x702   : > { %16714 = vmatprep.subr.bf16.mxu0 %v24359_v28  ;;  %16878 = vmatprep.subr.bf16.mxu1 %v24362_v29  ;;  %v24411_v26 = vld [vmem:[%s25505_s29 + $0x4498] ss:$148 sps:$4 sm:$0xff]   ;;  %v24414_v28 = vld [vmem:[%s25505_s29 + $0x44a0] ss:$148 sps:$4 sm:$0xff]  }
 0x703   : > { %v24419_v29 = vld [vmem:[%s25505_s29 + $0x45c4] ss:$148 sps:$4 sm:$0xff]  }
 0x705   : > { %16715 = vmatpush1.bf16.msra.mxu0 %v24357_v30  ;;  %16879 = vmatpush1.bf16.msra.mxu1 %v24360_v31  ;;  %v24422_v30 = vld [vmem:[%s25505_s29 + $0x45cc] ss:$148 sps:$4 sm:$0xff]  }
 0x706   : > { %16716 = vmatprep.subr.bf16.mxu0 %v24365_v32  ;;  %16880 = vmatprep.subr.bf16.mxu1 %v24368_v33  ;;  %v24417_v31 = vld [vmem:[%s25505_s29 + $0x45c0] ss:$148 sps:$4 sm:$0xff]   ;;  %v24420_v32 = vld [vmem:[%s25505_s29 + $0x45c8] ss:$148 sps:$4 sm:$0xff]  }
 0x707   : > { %v24425_v33 = vld [vmem:[%s25505_s29 + $0x46ec] ss:$148 sps:$4 sm:$0xff]  }
 0x709   : > { %16717 = vmatpush1.bf16.msra.mxu0 %v24363_v34  ;;  %16881 = vmatpush1.bf16.msra.mxu1 %v24366_v35  ;;  %v24428_v34 = vld [vmem:[%s25505_s29 + $0x46f4] ss:$148 sps:$4 sm:$0xff]  }
 0x70a   : > { %16718 = vmatprep.subr.bf16.mxu0 %v24371_v36  ;;  %16882 = vmatprep.subr.bf16.mxu1 %v24374_v37  ;;  %v24423_v35 = vld [vmem:[%s25505_s29 + $0x46e8] ss:$148 sps:$4 sm:$0xff]   ;;  %v24426_v36 = vld [vmem:[%s25505_s29 + $0x46f0] ss:$148 sps:$4 sm:$0xff]  }
 0x70b   : > { %v24431_v37 = vld [vmem:[%s25505_s29 + $0x4814] ss:$148 sps:$4 sm:$0xff]  }
 0x70d   : > { %16719 = vmatpush1.bf16.msra.mxu0 %v24369_v39  ;;  %16883 = vmatpush1.bf16.msra.mxu1 %v24372_v40  ;;  %v24434_v39 = vld [vmem:[%s25505_s29 + $0x481c] ss:$148 sps:$4 sm:$0xff]  }
 0x70e   : > { %16720 = vmatprep.subr.bf16.mxu0 %v24377_v41  ;;  %16884 = vmatprep.subr.bf16.mxu1 %v24380_v42  ;;  %v24429_v40 = vld [vmem:[%s25505_s29 + $0x4810] ss:$148 sps:$4 sm:$0xff]   ;;  %v24432_v41 = vld [vmem:[%s25505_s29 + $0x4818] ss:$148 sps:$4 sm:$0xff]  }
 0x70f   : > { %v16416_v50 = vpop.f32.mrb[20].mxu0  ;;  %v16580_v51 = vpop.f32.mrb[20].mxu1  ;;  %v24437_v42 = vld [vmem:[%s25505_s29 + $0x493c] ss:$148 sps:$4 sm:$0xff]  }
 0x710   : > { %v16418_v52 = vpop.f32.mrb[21].mxu0  ;;  %v16582_v53 = vpop.f32.mrb[21].mxu1 }
 0x711   : > { %v17853_v54 = vcombine.low %v16416_v50, %v16418_v52  ;;  %v17854_v55 = vcombine.low %v16580_v51, %v16582_v53  ;;  %v16420_v56 = vpop.f32.mrb[22].mxu0  ;;  %v16584_v57 = vpop.f32.mrb[22].mxu1  ;;  %16721 = vmatpush1.bf16.msra.mxu0 %v24375_v45  ;;  %16885 = vmatpush1.bf16.msra.mxu1 %v24378_v47  ;;  %v24440_v45 = vld [vmem:[%s25505_s29 + $0x4944] ss:$148 sps:$4 sm:$0xff]   ;;  %v24446_v50 = vld [vmem:[%s25505_s29 + $0x7c] ss:$148 sps:$4 sm:$0xff]  }
 0x712   : > { %v16421_v60 = vpop.f32.mrb[23].mxu0  ;;  %v16585_v62 = vpop.f32.mrb[23].mxu1  ;;  %16722 = vmatprep.subr.bf16.mxu0 %v24383_v48  ;;  %16886 = vmatprep.subr.bf16.mxu1 %v24386_v49  ;;  %v24435_v47 = vld [vmem:[%s25505_s29 + $0x4938] ss:$148 sps:$4 sm:$0xff]   ;;  %v24438_v48 = vld [vmem:[%s25505_s29 + $0x4940] ss:$148 sps:$4 sm:$0xff]  }
 0x713   : > { %v17861_v1 = vrot.slane %v17853_v54, %v26064_v46  ;;  %v17868_v2 = vrot.slane %v17854_v55, %v26064_v46  ;;  %v24443_v49 = vld [vmem:[%s25505_s29 + $0x74] ss:$148 sps:$4 sm:$0xff]   ;;  %v24441_v51 = vld [vmem:[%s25505_s29 + $0x70] ss:$148 sps:$4 sm:$0xff]   ;;  %v24444_v52 = vld [vmem:[%s25505_s29 + $0x78] ss:$148 sps:$4 sm:$0xff]  }
 0x714   : > { %v24449_v53 = vld [vmem:[%s25505_s29 + $0x19c] ss:$148 sps:$4 sm:$0xff]   ;;  %v24452_v54 = vld [vmem:[%s25505_s29 + $0x1a4] ss:$148 sps:$4 sm:$0xff]   ;;  %v24450_v56 = vld [vmem:[%s25505_s29 + $0x1a0] ss:$148 sps:$4 sm:$0xff]  }
 0x715   : > { %v17869_v4 = vcombine.low %v17861_v1, %v17868_v2  ;;  %16723 = vmatpush1.bf16.msra.mxu0 %v24381_v58  ;;  %16887 = vmatpush1.bf16.msra.mxu1 %v24384_v59  ;;  %v24447_v55 = vld [vmem:[%s25505_s29 + $0x198] ss:$148 sps:$4 sm:$0xff]   ;;  %v24453_v59 = vld [vmem:[%s25505_s29 + $0x2c0] ss:$148 sps:$4 sm:$0xff]   ;;  %v24456_v60 = vld [vmem:[%s25505_s29 + $0x2c8] ss:$148 sps:$4 sm:$0xff]  }
 0x716   : > { %16724 = vmatprep.subr.bf16.mxu0 %v24389_v63  ;;  %16888 = vmatprep.subr.bf16.mxu1 %v24392_v0  ;;  %v24455_v57 = vld [vmem:[%s25505_s29 + $0x2c4] ss:$148 sps:$4 sm:$0xff]   ;;  %v24458_v58 = vld [vmem:[%s25505_s29 + $0x2cc] ss:$148 sps:$4 sm:$0xff]   ;;  %v24464_v63 = vld [vmem:[%s25505_s29 + $0x3f4] ss:$148 sps:$4 sm:$0xff]  }
 0x717   : > { %v17943_v9 = vadd.f32 %v17869_v4, %v219_v3  ;;  %v24461_v62 = vld [vmem:[%s25505_s29 + $0x3ec] ss:$148 sps:$4 sm:$0xff]   ;;  %v24459_v0 = vld [vmem:[%s25505_s29 + $0x3e8] ss:$148 sps:$4 sm:$0xff]   ;;  %v24462_v1 = vld [vmem:[%s25505_s29 + $0x3f0] ss:$148 sps:$4 sm:$0xff]  }
 0x718   : > { %v24467_v2 = vld [vmem:[%s25505_s29 + $0x514] ss:$148 sps:$4 sm:$0xff]   ;;  %v24470_v3 = vld [vmem:[%s25505_s29 + $0x51c] ss:$148 sps:$4 sm:$0xff]  }
 0x719   : > { %17953 = vst [vmem:[#allocation2 + $0x28] sm:$0xff] %v17943_v9  ;;  %16725 = vmatpush1.bf16.msra.mxu0 %v24387_v5  ;;  %16889 = vmatpush1.bf16.msra.mxu1 %v24390_v6  ;;  %v24465_v4 = vld [vmem:[%s25505_s29 + $0x510] ss:$148 sps:$4 sm:$0xff]   ;;  %v24468_v5 = vld [vmem:[%s25505_s29 + $0x518] ss:$148 sps:$4 sm:$0xff]  }
 0x71a   : > { %16726 = vmatprep.subr.bf16.mxu0 %v24395_v7  ;;  %16890 = vmatprep.subr.bf16.mxu1 %v24398_v8  ;;  %v24473_v6 = vld [vmem:[%s25505_s29 + $0x63c] ss:$148 sps:$4 sm:$0xff]   ;;  %v24476_v7 = vld [vmem:[%s25505_s29 + $0x644] ss:$148 sps:$4 sm:$0xff]   ;;  %v24474_v9 = vld [vmem:[%s25505_s29 + $0x640] ss:$148 sps:$4 sm:$0xff]  }
 0x71b   : > { %v24471_v8 = vld [vmem:[%s25505_s29 + $0x638] ss:$148 sps:$4 sm:$0xff]  }
 0x71d   : > { %16727 = vmatpush1.bf16.msra.mxu0 %v24393_v10  ;;  %16891 = vmatpush1.bf16.msra.mxu1 %v24396_v11  ;;  %v24479_v10 = vld [vmem:[%s25505_s29 + $0x764] ss:$148 sps:$4 sm:$0xff]   ;;  %v24482_v11 = vld [vmem:[%s25505_s29 + $0x76c] ss:$148 sps:$4 sm:$0xff]  }
 0x71e   : > { %16728 = vmatprep.subr.bf16.mxu0 %v24401_v12  ;;  %16892 = vmatprep.subr.bf16.mxu1 %v24404_v13  ;;  %v24477_v12 = vld [vmem:[%s25505_s29 + $0x760] ss:$148 sps:$4 sm:$0xff]   ;;  %v24480_v13 = vld [vmem:[%s25505_s29 + $0x768] ss:$148 sps:$4 sm:$0xff]  }
 0x721   : > { %16729 = vmatpush1.bf16.msra.mxu0 %v24399_v14  ;;  %16893 = vmatpush1.bf16.msra.mxu1 %v24402_v15  ;;  %v24485_v14 = vld [vmem:[%s25505_s29 + $0x88c] ss:$148 sps:$4 sm:$0xff]   ;;  %v24488_v15 = vld [vmem:[%s25505_s29 + $0x894] ss:$148 sps:$4 sm:$0xff]  }
 0x722   : > { %16730 = vmatprep.subr.bf16.mxu0 %v24407_v17  ;;  %16894 = vmatprep.subr.bf16.mxu1 %v24410_v18  ;;  %v24483_v17 = vld [vmem:[%s25505_s29 + $0x888] ss:$148 sps:$4 sm:$0xff]   ;;  %v24486_v18 = vld [vmem:[%s25505_s29 + $0x890] ss:$148 sps:$4 sm:$0xff]  }
 0x725   : > { %16731 = vmatpush1.bf16.msra.mxu0 %v24405_v19  ;;  %16895 = vmatpush1.bf16.msra.mxu1 %v24408_v20  ;;  %v24491_v19 = vld [vmem:[%s25505_s29 + $0x9b4] ss:$148 sps:$4 sm:$0xff]   ;;  %v24494_v20 = vld [vmem:[%s25505_s29 + $0x9bc] ss:$148 sps:$4 sm:$0xff]  }
 0x726   : > { %16732 = vmatprep.subr.bf16.mxu0 %v24413_v24  ;;  %16896 = vmatprep.subr.bf16.mxu1 %v24416_v25  ;;  %v24489_v24 = vld [vmem:[%s25505_s29 + $0x9b0] ss:$148 sps:$4 sm:$0xff]   ;;  %v24492_v25 = vld [vmem:[%s25505_s29 + $0x9b8] ss:$148 sps:$4 sm:$0xff]  }
 0x729   : > { %16733 = vmatpush1.bf16.msra.mxu0 %v24411_v26  ;;  %16897 = vmatpush1.bf16.msra.mxu1 %v24414_v28  ;;  %v24497_v26 = vld [vmem:[%s25505_s29 + $0xadc] ss:$148 sps:$4 sm:$0xff]   ;;  %v24500_v28 = vld [vmem:[%s25505_s29 + $0xae4] ss:$148 sps:$4 sm:$0xff]  }
 0x72a   : > { %16734 = vmatprep.subr.bf16.mxu0 %v24419_v29  ;;  %16898 = vmatprep.subr.bf16.mxu1 %v24422_v30  ;;  %v24495_v29 = vld [vmem:[%s25505_s29 + $0xad8] ss:$148 sps:$4 sm:$0xff]   ;;  %v24498_v30 = vld [vmem:[%s25505_s29 + $0xae0] ss:$148 sps:$4 sm:$0xff]  }
 0x72d   : > { %16735 = vmatpush1.bf16.msra.mxu0 %v24417_v31  ;;  %16899 = vmatpush1.bf16.msra.mxu1 %v24420_v32  ;;  %v24503_v31 = vld [vmem:[%s25505_s29 + $0xc04] ss:$148 sps:$4 sm:$0xff]   ;;  %v24506_v32 = vld [vmem:[%s25505_s29 + $0xc0c] ss:$148 sps:$4 sm:$0xff]  }
 0x72e   : > { %16736 = vmatprep.subr.bf16.mxu0 %v24425_v33  ;;  %16900 = vmatprep.subr.bf16.mxu1 %v24428_v34  ;;  %v24501_v33 = vld [vmem:[%s25505_s29 + $0xc00] ss:$148 sps:$4 sm:$0xff]   ;;  %v24504_v34 = vld [vmem:[%s25505_s29 + $0xc08] ss:$148 sps:$4 sm:$0xff]  }
 0x731   : > { %16737 = vmatpush1.bf16.msra.mxu0 %v24423_v35  ;;  %16901 = vmatpush1.bf16.msra.mxu1 %v24426_v36  ;;  %v24509_v35 = vld [vmem:[%s25505_s29 + $0xd2c] ss:$148 sps:$4 sm:$0xff]   ;;  %v24512_v36 = vld [vmem:[%s25505_s29 + $0xd34] ss:$148 sps:$4 sm:$0xff]  }
 0x732   : > { %16738 = vmatprep.subr.bf16.mxu0 %v24431_v37  ;;  %16902 = vmatprep.subr.bf16.mxu1 %v24434_v39  ;;  %v24507_v37 = vld [vmem:[%s25505_s29 + $0xd28] ss:$148 sps:$4 sm:$0xff]   ;;  %v24510_v39 = vld [vmem:[%s25505_s29 + $0xd30] ss:$148 sps:$4 sm:$0xff]  }
 0x735   : > { %16739 = vmatpush1.bf16.msra.mxu0 %v24429_v40  ;;  %16903 = vmatpush1.bf16.msra.mxu1 %v24432_v41  ;;  %v24515_v40 = vld [vmem:[%s25505_s29 + $0xe54] ss:$148 sps:$4 sm:$0xff]   ;;  %v24518_v41 = vld [vmem:[%s25505_s29 + $0xe5c] ss:$148 sps:$4 sm:$0xff]  }
 0x736   : > { %16740 = vmatprep.subr.bf16.mxu0 %v24437_v42  ;;  %16904 = vmatprep.subr.bf16.mxu1 %v24440_v45  ;;  %v24513_v42 = vld [vmem:[%s25505_s29 + $0xe50] ss:$148 sps:$4 sm:$0xff]   ;;  %v24516_v45 = vld [vmem:[%s25505_s29 + $0xe58] ss:$148 sps:$4 sm:$0xff]  }
 0x739   : > { %16741 = vmatpush1.bf16.msra.mxu0 %v24435_v47  ;;  %16905 = vmatpush1.bf16.msra.mxu1 %v24438_v48  ;;  %v24521_v47 = vld [vmem:[%s25505_s29 + $0xf7c] ss:$148 sps:$4 sm:$0xff]   ;;  %v24524_v48 = vld [vmem:[%s25505_s29 + $0xf84] ss:$148 sps:$4 sm:$0xff]  }
 0x73a   : > { %16915 = vmatprep.subr.bf16.mxu0 %v24443_v49  ;;  %17079 = vmatprep.subr.bf16.mxu1 %v24446_v50  ;;  %v24519_v49 = vld [vmem:[%s25505_s29 + $0xf78] ss:$148 sps:$4 sm:$0xff]   ;;  %v24522_v50 = vld [vmem:[%s25505_s29 + $0xf80] ss:$148 sps:$4 sm:$0xff]  }
 0x73c   : > { %16743 = vmatmul.mubr.bf16.vlgmr.msra.gmra.mrb[24].mxu0 %v25829_v43  ;;  %16907 = vmatmul.mubr.bf16.vlgmr.msra.gmra.mrb[24].mxu1 %v25829_v43 }
 0x73d   : > { %16916 = vmatpush1.bf16.msra.mxu0 %v24441_v51  ;;  %17080 = vmatpush1.bf16.msra.mxu1 %v24444_v52  ;;  %v24527_v51 = vld [vmem:[%s25505_s29 + $0x10a4] ss:$148 sps:$4 sm:$0xff]   ;;  %v24530_v52 = vld [vmem:[%s25505_s29 + $0x10ac] ss:$148 sps:$4 sm:$0xff]  }
 0x73e   : > { %16917 = vmatprep.subr.bf16.mxu0 %v24449_v53  ;;  %17081 = vmatprep.subr.bf16.mxu1 %v24452_v54  ;;  %v24525_v53 = vld [vmem:[%s25505_s29 + $0x10a0] ss:$148 sps:$4 sm:$0xff]   ;;  %v24528_v54 = vld [vmem:[%s25505_s29 + $0x10a8] ss:$148 sps:$4 sm:$0xff]  }
 0x73f   : > { %16947 = vmatprep.mubr.bf16.mxu0 %v25582_v61  ;;  %17111 = vmatprep.mubr.bf16.mxu1 %v25582_v61 }
 0x741   : > { %16918 = vmatpush1.bf16.msra.mxu0 %v24447_v55  ;;  %17082 = vmatpush1.bf16.msra.mxu1 %v24450_v56  ;;  %v24533_v55 = vld [vmem:[%s25505_s29 + $0x11cc] ss:$148 sps:$4 sm:$0xff]   ;;  %v24536_v56 = vld [vmem:[%s25505_s29 + $0x11d4] ss:$148 sps:$4 sm:$0xff]  }
 0x742   : > { %16919 = vmatprep.subr.bf16.mxu0 %v24455_v57  ;;  %17083 = vmatprep.subr.bf16.mxu1 %v24458_v58  ;;  %v24531_v57 = vld [vmem:[%s25505_s29 + $0x11c8] ss:$148 sps:$4 sm:$0xff]   ;;  %v24534_v58 = vld [vmem:[%s25505_s29 + $0x11d0] ss:$148 sps:$4 sm:$0xff]  }
 0x745   : > { %16920 = vmatpush1.bf16.msra.mxu0 %v24453_v59  ;;  %17084 = vmatpush1.bf16.msra.mxu1 %v24456_v60  ;;  %v24539_v59 = vld [vmem:[%s25505_s29 + $0x12f4] ss:$148 sps:$4 sm:$0xff]   ;;  %v24542_v60 = vld [vmem:[%s25505_s29 + $0x12fc] ss:$148 sps:$4 sm:$0xff]  }
 0x746   : > { %16921 = vmatprep.subr.bf16.mxu0 %v24461_v62  ;;  %17085 = vmatprep.subr.bf16.mxu1 %v24464_v63  ;;  %v24537_v62 = vld [vmem:[%s25505_s29 + $0x12f0] ss:$148 sps:$4 sm:$0xff]   ;;  %v24540_v63 = vld [vmem:[%s25505_s29 + $0x12f8] ss:$148 sps:$4 sm:$0xff]  }
 0x749   : > { %16922 = vmatpush1.bf16.msra.mxu0 %v24459_v0  ;;  %17086 = vmatpush1.bf16.msra.mxu1 %v24462_v1  ;;  %v24545_v0 = vld [vmem:[%s25505_s29 + $0x141c] ss:$148 sps:$4 sm:$0xff]   ;;  %v24548_v1 = vld [vmem:[%s25505_s29 + $0x1424] ss:$148 sps:$4 sm:$0xff]  }
 0x74a   : > { %16923 = vmatprep.subr.bf16.mxu0 %v24467_v2  ;;  %17087 = vmatprep.subr.bf16.mxu1 %v24470_v3  ;;  %v24543_v2 = vld [vmem:[%s25505_s29 + $0x1418] ss:$148 sps:$4 sm:$0xff]   ;;  %v24546_v3 = vld [vmem:[%s25505_s29 + $0x1420] ss:$148 sps:$4 sm:$0xff]  }
 0x74d   : > { %16924 = vmatpush1.bf16.msra.mxu0 %v24465_v4  ;;  %17088 = vmatpush1.bf16.msra.mxu1 %v24468_v5  ;;  %v24551_v4 = vld [vmem:[%s25505_s29 + $0x1544] ss:$148 sps:$4 sm:$0xff]   ;;  %v24554_v5 = vld [vmem:[%s25505_s29 + $0x154c] ss:$148 sps:$4 sm:$0xff]  }
 0x74e   : > { %16925 = vmatprep.subr.bf16.mxu0 %v24473_v6  ;;  %17089 = vmatprep.subr.bf16.mxu1 %v24476_v7  ;;  %v24549_v6 = vld [vmem:[%s25505_s29 + $0x1540] ss:$148 sps:$4 sm:$0xff]   ;;  %v24552_v7 = vld [vmem:[%s25505_s29 + $0x1548] ss:$148 sps:$4 sm:$0xff]  }
 0x751   : > { %16926 = vmatpush1.bf16.msra.mxu0 %v24471_v8  ;;  %17090 = vmatpush1.bf16.msra.mxu1 %v24474_v9  ;;  %v24557_v8 = vld [vmem:[%s25505_s29 + $0x166c] ss:$148 sps:$4 sm:$0xff]   ;;  %v24560_v9 = vld [vmem:[%s25505_s29 + $0x1674] ss:$148 sps:$4 sm:$0xff]  }
 0x752   : > { %16927 = vmatprep.subr.bf16.mxu0 %v24479_v10  ;;  %17091 = vmatprep.subr.bf16.mxu1 %v24482_v11  ;;  %v24555_v10 = vld [vmem:[%s25505_s29 + $0x1668] ss:$148 sps:$4 sm:$0xff]   ;;  %v24558_v11 = vld [vmem:[%s25505_s29 + $0x1670] ss:$148 sps:$4 sm:$0xff]  }
 0x755   : > { %16928 = vmatpush1.bf16.msra.mxu0 %v24477_v12  ;;  %17092 = vmatpush1.bf16.msra.mxu1 %v24480_v13  ;;  %v24563_v12 = vld [vmem:[%s25505_s29 + $0x1794] ss:$148 sps:$4 sm:$0xff]   ;;  %v24566_v13 = vld [vmem:[%s25505_s29 + $0x179c] ss:$148 sps:$4 sm:$0xff]  }
 0x756   : > { %16929 = vmatprep.subr.bf16.mxu0 %v24485_v14  ;;  %17093 = vmatprep.subr.bf16.mxu1 %v24488_v15  ;;  %v24561_v14 = vld [vmem:[%s25505_s29 + $0x1790] ss:$148 sps:$4 sm:$0xff]   ;;  %v24564_v15 = vld [vmem:[%s25505_s29 + $0x1798] ss:$148 sps:$4 sm:$0xff]  }
 0x759   : > { %16930 = vmatpush1.bf16.msra.mxu0 %v24483_v17  ;;  %17094 = vmatpush1.bf16.msra.mxu1 %v24486_v18  ;;  %v24569_v17 = vld [vmem:[%s25505_s29 + $0x18bc] ss:$148 sps:$4 sm:$0xff]   ;;  %v24572_v18 = vld [vmem:[%s25505_s29 + $0x18c4] ss:$148 sps:$4 sm:$0xff]  }
 0x75a   : > { %16931 = vmatprep.subr.bf16.mxu0 %v24491_v19  ;;  %17095 = vmatprep.subr.bf16.mxu1 %v24494_v20  ;;  %v24567_v19 = vld [vmem:[%s25505_s29 + $0x18b8] ss:$148 sps:$4 sm:$0xff]   ;;  %v24570_v20 = vld [vmem:[%s25505_s29 + $0x18c0] ss:$148 sps:$4 sm:$0xff]  }
 0x75d   : > { %16932 = vmatpush1.bf16.msra.mxu0 %v24489_v24  ;;  %17096 = vmatpush1.bf16.msra.mxu1 %v24492_v25  ;;  %v24575_v24 = vld [vmem:[%s25505_s29 + $0x19e4] ss:$148 sps:$4 sm:$0xff]   ;;  %v24578_v25 = vld [vmem:[%s25505_s29 + $0x19ec] ss:$148 sps:$4 sm:$0xff]  }
 0x75e   : > { %16933 = vmatprep.subr.bf16.mxu0 %v24497_v26  ;;  %17097 = vmatprep.subr.bf16.mxu1 %v24500_v28  ;;  %v24573_v26 = vld [vmem:[%s25505_s29 + $0x19e0] ss:$148 sps:$4 sm:$0xff]   ;;  %v24576_v28 = vld [vmem:[%s25505_s29 + $0x19e8] ss:$148 sps:$4 sm:$0xff]  }
 0x761   : > { %16934 = vmatpush1.bf16.msra.mxu0 %v24495_v29  ;;  %17098 = vmatpush1.bf16.msra.mxu1 %v24498_v30  ;;  %v24581_v29 = vld [vmem:[%s25505_s29 + $0x1b0c] ss:$148 sps:$4 sm:$0xff]   ;;  %v24584_v30 = vld [vmem:[%s25505_s29 + $0x1b14] ss:$148 sps:$4 sm:$0xff]  }
 0x762   : > { %16935 = vmatprep.subr.bf16.mxu0 %v24503_v31  ;;  %17099 = vmatprep.subr.bf16.mxu1 %v24506_v32  ;;  %v24579_v31 = vld [vmem:[%s25505_s29 + $0x1b08] ss:$148 sps:$4 sm:$0xff]   ;;  %v24582_v32 = vld [vmem:[%s25505_s29 + $0x1b10] ss:$148 sps:$4 sm:$0xff]  }
 0x765   : > { %16936 = vmatpush1.bf16.msra.mxu0 %v24501_v33  ;;  %17100 = vmatpush1.bf16.msra.mxu1 %v24504_v34  ;;  %v24587_v33 = vld [vmem:[%s25505_s29 + $0x1c34] ss:$148 sps:$4 sm:$0xff]   ;;  %v24590_v34 = vld [vmem:[%s25505_s29 + $0x1c3c] ss:$148 sps:$4 sm:$0xff]  }
 0x766   : > { %16937 = vmatprep.subr.bf16.mxu0 %v24509_v35  ;;  %17101 = vmatprep.subr.bf16.mxu1 %v24512_v36  ;;  %v24585_v35 = vld [vmem:[%s25505_s29 + $0x1c30] ss:$148 sps:$4 sm:$0xff]   ;;  %v24588_v36 = vld [vmem:[%s25505_s29 + $0x1c38] ss:$148 sps:$4 sm:$0xff]  }
 0x769   : > { %16938 = vmatpush1.bf16.msra.mxu0 %v24507_v37  ;;  %17102 = vmatpush1.bf16.msra.mxu1 %v24510_v39  ;;  %v24593_v37 = vld [vmem:[%s25505_s29 + $0x1d5c] ss:$148 sps:$4 sm:$0xff]   ;;  %v24596_v39 = vld [vmem:[%s25505_s29 + $0x1d64] ss:$148 sps:$4 sm:$0xff]  }
 0x76a   : > { %16939 = vmatprep.subr.bf16.mxu0 %v24515_v40  ;;  %17103 = vmatprep.subr.bf16.mxu1 %v24518_v41  ;;  %v24591_v40 = vld [vmem:[%s25505_s29 + $0x1d58] ss:$148 sps:$4 sm:$0xff]   ;;  %v24594_v41 = vld [vmem:[%s25505_s29 + $0x1d60] ss:$148 sps:$4 sm:$0xff]  }
 0x76d   : > { %16940 = vmatpush1.bf16.msra.mxu0 %v24513_v42  ;;  %17104 = vmatpush1.bf16.msra.mxu1 %v24516_v45  ;;  %v24599_v42 = vld [vmem:[%s25505_s29 + $0x1e84] ss:$148 sps:$4 sm:$0xff]   ;;  %v24602_v45 = vld [vmem:[%s25505_s29 + $0x1e8c] ss:$148 sps:$4 sm:$0xff]  }
 0x76e   : > { %16941 = vmatprep.subr.bf16.mxu0 %v24521_v47  ;;  %17105 = vmatprep.subr.bf16.mxu1 %v24524_v48  ;;  %v24597_v47 = vld [vmem:[%s25505_s29 + $0x1e80] ss:$148 sps:$4 sm:$0xff]   ;;  %v24600_v48 = vld [vmem:[%s25505_s29 + $0x1e88] ss:$148 sps:$4 sm:$0xff]  }
 0x771   : > { %16942 = vmatpush1.bf16.msra.mxu0 %v24519_v49  ;;  %17106 = vmatpush1.bf16.msra.mxu1 %v24522_v50  ;;  %v24605_v49 = vld [vmem:[%s25505_s29 + $0x1fac] ss:$148 sps:$4 sm:$0xff]   ;;  %v24608_v50 = vld [vmem:[%s25505_s29 + $0x1fb4] ss:$148 sps:$4 sm:$0xff]  }
 0x772   : > { %16943 = vmatprep.subr.bf16.mxu0 %v24527_v51  ;;  %17107 = vmatprep.subr.bf16.mxu1 %v24530_v52  ;;  %v24603_v51 = vld [vmem:[%s25505_s29 + $0x1fa8] ss:$148 sps:$4 sm:$0xff]   ;;  %v24606_v52 = vld [vmem:[%s25505_s29 + $0x1fb0] ss:$148 sps:$4 sm:$0xff]  }
 0x775   : > { %16944 = vmatpush1.bf16.msra.mxu0 %v24525_v53  ;;  %17108 = vmatpush1.bf16.msra.mxu1 %v24528_v54  ;;  %v24611_v53 = vld [vmem:[%s25505_s29 + $0x20d4] ss:$148 sps:$4 sm:$0xff]   ;;  %v24614_v54 = vld [vmem:[%s25505_s29 + $0x20dc] ss:$148 sps:$4 sm:$0xff]  }
 0x776   : > { %16945 = vmatprep.subr.bf16.mxu0 %v24533_v55  ;;  %17109 = vmatprep.subr.bf16.mxu1 %v24536_v56  ;;  %v24609_v55 = vld [vmem:[%s25505_s29 + $0x20d0] ss:$148 sps:$4 sm:$0xff]   ;;  %v24612_v56 = vld [vmem:[%s25505_s29 + $0x20d8] ss:$148 sps:$4 sm:$0xff]  }
 0x779   : > { %16946 = vmatpush1.bf16.msra.mxu0 %v24531_v57  ;;  %17110 = vmatpush1.bf16.msra.mxu1 %v24534_v58  ;;  %v24617_v57 = vld [vmem:[%s25505_s29 + $0x21fc] ss:$148 sps:$4 sm:$0xff]   ;;  %v24620_v58 = vld [vmem:[%s25505_s29 + $0x2204] ss:$148 sps:$4 sm:$0xff]  }
 0x77a   : > { %16956 = vmatprep.subr.bf16.mxu0 %v24539_v59  ;;  %17120 = vmatprep.subr.bf16.mxu1 %v24542_v60  ;;  %v24615_v59 = vld [vmem:[%s25505_s29 + $0x21f8] ss:$148 sps:$4 sm:$0xff]   ;;  %v24618_v60 = vld [vmem:[%s25505_s29 + $0x2200] ss:$148 sps:$4 sm:$0xff]  }
 0x77c   : > { %16948 = vmatmul.mubr.bf16.vlgmr.msra.gmra.mrb[28].mxu0 %v25604_v16  ;;  %17112 = vmatmul.mubr.bf16.vlgmr.msra.gmra.mrb[28].mxu1 %v25604_v16 }
 0x77d   : > { %16957 = vmatpush1.bf16.msra.mxu0 %v24537_v62  ;;  %17121 = vmatpush1.bf16.msra.mxu1 %v24540_v63  ;;  %v24623_v62 = vld [vmem:[%s25505_s29 + $0x2324] ss:$148 sps:$4 sm:$0xff]   ;;  %v24626_v63 = vld [vmem:[%s25505_s29 + $0x232c] ss:$148 sps:$4 sm:$0xff]  }
 0x77e   : > { %16958 = vmatprep.subr.bf16.mxu0 %v24545_v0  ;;  %17122 = vmatprep.subr.bf16.mxu1 %v24548_v1  ;;  %v24621_v0 = vld [vmem:[%s25505_s29 + $0x2320] ss:$148 sps:$4 sm:$0xff]   ;;  %v24624_v1 = vld [vmem:[%s25505_s29 + $0x2328] ss:$148 sps:$4 sm:$0xff]  }
 0x77f   : > { %16988 = vmatprep.mubr.bf16.mxu0 %v25617_v23  ;;  %17152 = vmatprep.mubr.bf16.mxu1 %v25617_v23 }
 0x781   : > { %16959 = vmatpush1.bf16.msra.mxu0 %v24543_v2  ;;  %17123 = vmatpush1.bf16.msra.mxu1 %v24546_v3  ;;  %v24629_v2 = vld [vmem:[%s25505_s29 + $0x244c] ss:$148 sps:$4 sm:$0xff]   ;;  %v24632_v3 = vld [vmem:[%s25505_s29 + $0x2454] ss:$148 sps:$4 sm:$0xff]  }
 0x782   : > { %16960 = vmatprep.subr.bf16.mxu0 %v24551_v4  ;;  %17124 = vmatprep.subr.bf16.mxu1 %v24554_v5  ;;  %v24627_v4 = vld [vmem:[%s25505_s29 + $0x2448] ss:$148 sps:$4 sm:$0xff]   ;;  %v24630_v5 = vld [vmem:[%s25505_s29 + $0x2450] ss:$148 sps:$4 sm:$0xff]  }
 0x785   : > { %16961 = vmatpush1.bf16.msra.mxu0 %v24549_v6  ;;  %17125 = vmatpush1.bf16.msra.mxu1 %v24552_v7  ;;  %v24635_v6 = vld [vmem:[%s25505_s29 + $0x2574] ss:$148 sps:$4 sm:$0xff]   ;;  %v24638_v7 = vld [vmem:[%s25505_s29 + $0x257c] ss:$148 sps:$4 sm:$0xff]  }
 0x786   : > { %16962 = vmatprep.subr.bf16.mxu0 %v24557_v8  ;;  %17126 = vmatprep.subr.bf16.mxu1 %v24560_v9  ;;  %v24633_v8 = vld [vmem:[%s25505_s29 + $0x2570] ss:$148 sps:$4 sm:$0xff]   ;;  %v24636_v9 = vld [vmem:[%s25505_s29 + $0x2578] ss:$148 sps:$4 sm:$0xff]  }
 0x789   : > { %16963 = vmatpush1.bf16.msra.mxu0 %v24555_v10  ;;  %17127 = vmatpush1.bf16.msra.mxu1 %v24558_v11  ;;  %v24641_v10 = vld [vmem:[%s25505_s29 + $0x269c] ss:$148 sps:$4 sm:$0xff]   ;;  %v24644_v11 = vld [vmem:[%s25505_s29 + $0x26a4] ss:$148 sps:$4 sm:$0xff]  }
 0x78a   : > { %16964 = vmatprep.subr.bf16.mxu0 %v24563_v12  ;;  %17128 = vmatprep.subr.bf16.mxu1 %v24566_v13  ;;  %v24639_v12 = vld [vmem:[%s25505_s29 + $0x2698] ss:$148 sps:$4 sm:$0xff]   ;;  %v24642_v13 = vld [vmem:[%s25505_s29 + $0x26a0] ss:$148 sps:$4 sm:$0xff]  }
 0x78d   : > { %16965 = vmatpush1.bf16.msra.mxu0 %v24561_v14  ;;  %17129 = vmatpush1.bf16.msra.mxu1 %v24564_v15  ;;  %v24647_v14 = vld [vmem:[%s25505_s29 + $0x27c4] ss:$148 sps:$4 sm:$0xff]   ;;  %v24650_v15 = vld [vmem:[%s25505_s29 + $0x27cc] ss:$148 sps:$4 sm:$0xff]  }
 0x78e   : > { %16966 = vmatprep.subr.bf16.mxu0 %v24569_v17  ;;  %17130 = vmatprep.subr.bf16.mxu1 %v24572_v18  ;;  %v24645_v17 = vld [vmem:[%s25505_s29 + $0x27c0] ss:$148 sps:$4 sm:$0xff]   ;;  %v24648_v18 = vld [vmem:[%s25505_s29 + $0x27c8] ss:$148 sps:$4 sm:$0xff]  }
 0x791   : > { %16967 = vmatpush1.bf16.msra.mxu0 %v24567_v19  ;;  %17131 = vmatpush1.bf16.msra.mxu1 %v24570_v20  ;;  %v24653_v19 = vld [vmem:[%s25505_s29 + $0x28ec] ss:$148 sps:$4 sm:$0xff]   ;;  %v24656_v20 = vld [vmem:[%s25505_s29 + $0x28f4] ss:$148 sps:$4 sm:$0xff]  }
 0x792   : > { %16968 = vmatprep.subr.bf16.mxu0 %v24575_v24  ;;  %17132 = vmatprep.subr.bf16.mxu1 %v24578_v25  ;;  %v24651_v24 = vld [vmem:[%s25505_s29 + $0x28e8] ss:$148 sps:$4 sm:$0xff]   ;;  %v24654_v25 = vld [vmem:[%s25505_s29 + $0x28f0] ss:$148 sps:$4 sm:$0xff]  }
 0x795   : > { %16969 = vmatpush1.bf16.msra.mxu0 %v24573_v26  ;;  %17133 = vmatpush1.bf16.msra.mxu1 %v24576_v28  ;;  %v24659_v26 = vld [vmem:[%s25505_s29 + $0x2a14] ss:$148 sps:$4 sm:$0xff]   ;;  %v24662_v28 = vld [vmem:[%s25505_s29 + $0x2a1c] ss:$148 sps:$4 sm:$0xff]  }
 0x796   : > { %16970 = vmatprep.subr.bf16.mxu0 %v24581_v29  ;;  %17134 = vmatprep.subr.bf16.mxu1 %v24584_v30  ;;  %v24657_v29 = vld [vmem:[%s25505_s29 + $0x2a10] ss:$148 sps:$4 sm:$0xff]   ;;  %v24660_v30 = vld [vmem:[%s25505_s29 + $0x2a18] ss:$148 sps:$4 sm:$0xff]  }
 0x799   : > { %16971 = vmatpush1.bf16.msra.mxu0 %v24579_v31  ;;  %17135 = vmatpush1.bf16.msra.mxu1 %v24582_v32  ;;  %v24665_v31 = vld [vmem:[%s25505_s29 + $0x2b3c] ss:$148 sps:$4 sm:$0xff]   ;;  %v24668_v32 = vld [vmem:[%s25505_s29 + $0x2b44] ss:$148 sps:$4 sm:$0xff]  }
 0x79a   : > { %16972 = vmatprep.subr.bf16.mxu0 %v24587_v33  ;;  %17136 = vmatprep.subr.bf16.mxu1 %v24590_v34  ;;  %v24663_v33 = vld [vmem:[%s25505_s29 + $0x2b38] ss:$148 sps:$4 sm:$0xff]   ;;  %v24666_v34 = vld [vmem:[%s25505_s29 + $0x2b40] ss:$148 sps:$4 sm:$0xff]  }
 0x79d   : > { %16973 = vmatpush1.bf16.msra.mxu0 %v24585_v35  ;;  %17137 = vmatpush1.bf16.msra.mxu1 %v24588_v36  ;;  %v24671_v35 = vld [vmem:[%s25505_s29 + $0x2c64] ss:$148 sps:$4 sm:$0xff]   ;;  %v24674_v36 = vld [vmem:[%s25505_s29 + $0x2c6c] ss:$148 sps:$4 sm:$0xff]  }
 0x79e   : > { %16974 = vmatprep.subr.bf16.mxu0 %v24593_v37  ;;  %17138 = vmatprep.subr.bf16.mxu1 %v24596_v39  ;;  %v24669_v37 = vld [vmem:[%s25505_s29 + $0x2c60] ss:$148 sps:$4 sm:$0xff]   ;;  %v24672_v39 = vld [vmem:[%s25505_s29 + $0x2c68] ss:$148 sps:$4 sm:$0xff]  }
 0x7a1   : > { %16975 = vmatpush1.bf16.msra.mxu0 %v24591_v40  ;;  %17139 = vmatpush1.bf16.msra.mxu1 %v24594_v41  ;;  %v24677_v40 = vld [vmem:[%s25505_s29 + $0x2d8c] ss:$148 sps:$4 sm:$0xff]   ;;  %v24680_v41 = vld [vmem:[%s25505_s29 + $0x2d94] ss:$148 sps:$4 sm:$0xff]  }
 0x7a2   : > { %16976 = vmatprep.subr.bf16.mxu0 %v24599_v42  ;;  %17140 = vmatprep.subr.bf16.mxu1 %v24602_v45  ;;  %v24675_v42 = vld [vmem:[%s25505_s29 + $0x2d88] ss:$148 sps:$4 sm:$0xff]   ;;  %v24678_v45 = vld [vmem:[%s25505_s29 + $0x2d90] ss:$148 sps:$4 sm:$0xff]  }
 0x7a5   : > { %16977 = vmatpush1.bf16.msra.mxu0 %v24597_v47  ;;  %17141 = vmatpush1.bf16.msra.mxu1 %v24600_v48  ;;  %v24683_v47 = vld [vmem:[%s25505_s29 + $0x2eb4] ss:$148 sps:$4 sm:$0xff]   ;;  %v24686_v48 = vld [vmem:[%s25505_s29 + $0x2ebc] ss:$148 sps:$4 sm:$0xff]  }
 0x7a6   : > { %16978 = vmatprep.subr.bf16.mxu0 %v24605_v49  ;;  %17142 = vmatprep.subr.bf16.mxu1 %v24608_v50  ;;  %v24681_v49 = vld [vmem:[%s25505_s29 + $0x2eb0] ss:$148 sps:$4 sm:$0xff]   ;;  %v24684_v50 = vld [vmem:[%s25505_s29 + $0x2eb8] ss:$148 sps:$4 sm:$0xff]  }
 0x7a9   : > { %16979 = vmatpush1.bf16.msra.mxu0 %v24603_v51  ;;  %17143 = vmatpush1.bf16.msra.mxu1 %v24606_v52  ;;  %v24689_v51 = vld [vmem:[%s25505_s29 + $0x2fdc] ss:$148 sps:$4 sm:$0xff]   ;;  %v24692_v52 = vld [vmem:[%s25505_s29 + $0x2fe4] ss:$148 sps:$4 sm:$0xff]  }
 0x7aa   : > { %16980 = vmatprep.subr.bf16.mxu0 %v24611_v53  ;;  %17144 = vmatprep.subr.bf16.mxu1 %v24614_v54  ;;  %v24687_v53 = vld [vmem:[%s25505_s29 + $0x2fd8] ss:$148 sps:$4 sm:$0xff]   ;;  %v24690_v54 = vld [vmem:[%s25505_s29 + $0x2fe0] ss:$148 sps:$4 sm:$0xff]  }
 0x7ad   : > { %16981 = vmatpush1.bf16.msra.mxu0 %v24609_v55  ;;  %17145 = vmatpush1.bf16.msra.mxu1 %v24612_v56  ;;  %v24695_v55 = vld [vmem:[%s25505_s29 + $0x3104] ss:$148 sps:$4 sm:$0xff]   ;;  %v24698_v56 = vld [vmem:[%s25505_s29 + $0x310c] ss:$148 sps:$4 sm:$0xff]  }
 0x7ae   : > { %16982 = vmatprep.subr.bf16.mxu0 %v24617_v57  ;;  %17146 = vmatprep.subr.bf16.mxu1 %v24620_v58  ;;  %v24693_v57 = vld [vmem:[%s25505_s29 + $0x3100] ss:$148 sps:$4 sm:$0xff]   ;;  %v24696_v58 = vld [vmem:[%s25505_s29 + $0x3108] ss:$148 sps:$4 sm:$0xff]  }
 0x7b1   : > { %16983 = vmatpush1.bf16.msra.mxu0 %v24615_v59  ;;  %17147 = vmatpush1.bf16.msra.mxu1 %v24618_v60  ;;  %v24701_v59 = vld [vmem:[%s25505_s29 + $0x322c] ss:$148 sps:$4 sm:$0xff]   ;;  %v24704_v60 = vld [vmem:[%s25505_s29 + $0x3234] ss:$148 sps:$4 sm:$0xff]  }
 0x7b2   : > { %16984 = vmatprep.subr.bf16.mxu0 %v24623_v62  ;;  %17148 = vmatprep.subr.bf16.mxu1 %v24626_v63  ;;  %v24699_v62 = vld [vmem:[%s25505_s29 + $0x3228] ss:$148 sps:$4 sm:$0xff]   ;;  %v24702_v63 = vld [vmem:[%s25505_s29 + $0x3230] ss:$148 sps:$4 sm:$0xff]  }
 0x7b5   : > { %16985 = vmatpush1.bf16.msra.mxu0 %v24621_v0  ;;  %17149 = vmatpush1.bf16.msra.mxu1 %v24624_v1  ;;  %v24707_v0 = vld [vmem:[%s25505_s29 + $0x3354] ss:$148 sps:$4 sm:$0xff]   ;;  %v24710_v1 = vld [vmem:[%s25505_s29 + $0x335c] ss:$148 sps:$4 sm:$0xff]  }
 0x7b6   : > { %16986 = vmatprep.subr.bf16.mxu0 %v24629_v2  ;;  %17150 = vmatprep.subr.bf16.mxu1 %v24632_v3  ;;  %v24705_v2 = vld [vmem:[%s25505_s29 + $0x3350] ss:$148 sps:$4 sm:$0xff]   ;;  %v24708_v3 = vld [vmem:[%s25505_s29 + $0x3358] ss:$148 sps:$4 sm:$0xff]  }
 0x7b9   : > { %16987 = vmatpush1.bf16.msra.mxu0 %v24627_v4  ;;  %17151 = vmatpush1.bf16.msra.mxu1 %v24630_v5  ;;  %v24713_v4 = vld [vmem:[%s25505_s29 + $0x347c] ss:$148 sps:$4 sm:$0xff]   ;;  %v24716_v5 = vld [vmem:[%s25505_s29 + $0x3484] ss:$148 sps:$4 sm:$0xff]  }
 0x7ba   : > { %16997 = vmatprep.subr.bf16.mxu0 %v24635_v6  ;;  %17161 = vmatprep.subr.bf16.mxu1 %v24638_v7  ;;  %v24711_v6 = vld [vmem:[%s25505_s29 + $0x3478] ss:$148 sps:$4 sm:$0xff]   ;;  %v24714_v7 = vld [vmem:[%s25505_s29 + $0x3480] ss:$148 sps:$4 sm:$0xff]  }
 0x7bc   : > { %16989 = vmatmul.mubr.bf16.vlgmr.msra.gmra.mrb[28].mxu0 %v25686_v27  ;;  %17153 = vmatmul.mubr.bf16.vlgmr.msra.gmra.mrb[28].mxu1 %v25686_v27 }
 0x7bd   : > { %16998 = vmatpush1.bf16.msra.mxu0 %v24633_v8  ;;  %17162 = vmatpush1.bf16.msra.mxu1 %v24636_v9  ;;  %v24719_v8 = vld [vmem:[%s25505_s29 + $0x35a4] ss:$148 sps:$4 sm:$0xff]   ;;  %v24722_v9 = vld [vmem:[%s25505_s29 + $0x35ac] ss:$148 sps:$4 sm:$0xff]  }
 0x7be   : > { %16999 = vmatprep.subr.bf16.mxu0 %v24641_v10  ;;  %17163 = vmatprep.subr.bf16.mxu1 %v24644_v11  ;;  %v24717_v10 = vld [vmem:[%s25505_s29 + $0x35a0] ss:$148 sps:$4 sm:$0xff]   ;;  %v24720_v11 = vld [vmem:[%s25505_s29 + $0x35a8] ss:$148 sps:$4 sm:$0xff]  }
 0x7bf   : > { %17029 = vmatprep.mubr.bf16.mxu0 %v25610_v21  ;;  %17193 = vmatprep.mubr.bf16.mxu1 %v25610_v21 }
 0x7c1   : > { %17000 = vmatpush1.bf16.msra.mxu0 %v24639_v12  ;;  %17164 = vmatpush1.bf16.msra.mxu1 %v24642_v13  ;;  %v24725_v12 = vld [vmem:[%s25505_s29 + $0x36cc] ss:$148 sps:$4 sm:$0xff]   ;;  %v24728_v13 = vld [vmem:[%s25505_s29 + $0x36d4] ss:$148 sps:$4 sm:$0xff]  }
 0x7c2   : > { %17001 = vmatprep.subr.bf16.mxu0 %v24647_v14  ;;  %17165 = vmatprep.subr.bf16.mxu1 %v24650_v15  ;;  %v24723_v14 = vld [vmem:[%s25505_s29 + $0x36c8] ss:$148 sps:$4 sm:$0xff]   ;;  %v24726_v15 = vld [vmem:[%s25505_s29 + $0x36d0] ss:$148 sps:$4 sm:$0xff]  }
 0x7c5   : > { %17002 = vmatpush1.bf16.msra.mxu0 %v24645_v17  ;;  %17166 = vmatpush1.bf16.msra.mxu1 %v24648_v18  ;;  %v24731_v17 = vld [vmem:[%s25505_s29 + $0x37f4] ss:$148 sps:$4 sm:$0xff]   ;;  %v24734_v18 = vld [vmem:[%s25505_s29 + $0x37fc] ss:$148 sps:$4 sm:$0xff]  }
 0x7c6   : > { %17003 = vmatprep.subr.bf16.mxu0 %v24653_v19  ;;  %17167 = vmatprep.subr.bf16.mxu1 %v24656_v20  ;;  %v24729_v19 = vld [vmem:[%s25505_s29 + $0x37f0] ss:$148 sps:$4 sm:$0xff]   ;;  %v24732_v20 = vld [vmem:[%s25505_s29 + $0x37f8] ss:$148 sps:$4 sm:$0xff]  }
 0x7c9   : > { %17004 = vmatpush1.bf16.msra.mxu0 %v24651_v24  ;;  %17168 = vmatpush1.bf16.msra.mxu1 %v24654_v25  ;;  %v24737_v24 = vld [vmem:[%s25505_s29 + $0x391c] ss:$148 sps:$4 sm:$0xff]   ;;  %v24740_v25 = vld [vmem:[%s25505_s29 + $0x3924] ss:$148 sps:$4 sm:$0xff]  }
 0x7ca   : > { %17005 = vmatprep.subr.bf16.mxu0 %v24659_v26  ;;  %17169 = vmatprep.subr.bf16.mxu1 %v24662_v28  ;;  %v24735_v26 = vld [vmem:[%s25505_s29 + $0x3918] ss:$148 sps:$4 sm:$0xff]   ;;  %v24738_v28 = vld [vmem:[%s25505_s29 + $0x3920] ss:$148 sps:$4 sm:$0xff]  }
 0x7cd   : > { %17006 = vmatpush1.bf16.msra.mxu0 %v24657_v29  ;;  %17170 = vmatpush1.bf16.msra.mxu1 %v24660_v30  ;;  %v24743_v29 = vld [vmem:[%s25505_s29 + $0x3a44] ss:$148 sps:$4 sm:$0xff]   ;;  %v24746_v30 = vld [vmem:[%s25505_s29 + $0x3a4c] ss:$148 sps:$4 sm:$0xff]  }
 0x7ce   : > { %17007 = vmatprep.subr.bf16.mxu0 %v24665_v31  ;;  %17171 = vmatprep.subr.bf16.mxu1 %v24668_v32  ;;  %v24741_v31 = vld [vmem:[%s25505_s29 + $0x3a40] ss:$148 sps:$4 sm:$0xff]   ;;  %v24744_v32 = vld [vmem:[%s25505_s29 + $0x3a48] ss:$148 sps:$4 sm:$0xff]  }
 0x7d1   : > { %17008 = vmatpush1.bf16.msra.mxu0 %v24663_v33  ;;  %17172 = vmatpush1.bf16.msra.mxu1 %v24666_v34  ;;  %v24749_v33 = vld [vmem:[%s25505_s29 + $0x3b6c] ss:$148 sps:$4 sm:$0xff]   ;;  %v24752_v34 = vld [vmem:[%s25505_s29 + $0x3b74] ss:$148 sps:$4 sm:$0xff]  }
 0x7d2   : > { %17009 = vmatprep.subr.bf16.mxu0 %v24671_v35  ;;  %17173 = vmatprep.subr.bf16.mxu1 %v24674_v36  ;;  %v24747_v35 = vld [vmem:[%s25505_s29 + $0x3b68] ss:$148 sps:$4 sm:$0xff]   ;;  %v24750_v36 = vld [vmem:[%s25505_s29 + $0x3b70] ss:$148 sps:$4 sm:$0xff]  }
 0x7d5   : > { %17010 = vmatpush1.bf16.msra.mxu0 %v24669_v37  ;;  %17174 = vmatpush1.bf16.msra.mxu1 %v24672_v39  ;;  %v24755_v37 = vld [vmem:[%s25505_s29 + $0x3c94] ss:$148 sps:$4 sm:$0xff]   ;;  %v24758_v39 = vld [vmem:[%s25505_s29 + $0x3c9c] ss:$148 sps:$4 sm:$0xff]  }
 0x7d6   : > { %17011 = vmatprep.subr.bf16.mxu0 %v24677_v40  ;;  %17175 = vmatprep.subr.bf16.mxu1 %v24680_v41  ;;  %v24753_v40 = vld [vmem:[%s25505_s29 + $0x3c90] ss:$148 sps:$4 sm:$0xff]   ;;  %v24756_v41 = vld [vmem:[%s25505_s29 + $0x3c98] ss:$148 sps:$4 sm:$0xff]  }
 0x7d9   : > { %17012 = vmatpush1.bf16.msra.mxu0 %v24675_v42  ;;  %17176 = vmatpush1.bf16.msra.mxu1 %v24678_v45  ;;  %v24761_v42 = vld [vmem:[%s25505_s29 + $0x3dbc] ss:$148 sps:$4 sm:$0xff]   ;;  %v24764_v45 = vld [vmem:[%s25505_s29 + $0x3dc4] ss:$148 sps:$4 sm:$0xff]  }
 0x7da   : > { %17013 = vmatprep.subr.bf16.mxu0 %v24683_v47  ;;  %17177 = vmatprep.subr.bf16.mxu1 %v24686_v48  ;;  %v24759_v47 = vld [vmem:[%s25505_s29 + $0x3db8] ss:$148 sps:$4 sm:$0xff]   ;;  %v24762_v48 = vld [vmem:[%s25505_s29 + $0x3dc0] ss:$148 sps:$4 sm:$0xff]  }
 0x7dd   : > { %17014 = vmatpush1.bf16.msra.mxu0 %v24681_v49  ;;  %17178 = vmatpush1.bf16.msra.mxu1 %v24684_v50  ;;  %v24767_v49 = vld [vmem:[%s25505_s29 + $0x3ee4] ss:$148 sps:$4 sm:$0xff]   ;;  %v24770_v50 = vld [vmem:[%s25505_s29 + $0x3eec] ss:$148 sps:$4 sm:$0xff]  }
 0x7de   : > { %17015 = vmatprep.subr.bf16.mxu0 %v24689_v51  ;;  %17179 = vmatprep.subr.bf16.mxu1 %v24692_v52 }
 0x7e1   : > { %17016 = vmatpush1.bf16.msra.mxu0 %v24687_v53  ;;  %17180 = vmatpush1.bf16.msra.mxu1 %v24690_v54 }
 0x7e2   : > { %17017 = vmatprep.subr.bf16.mxu0 %v24695_v55  ;;  %17181 = vmatprep.subr.bf16.mxu1 %v24698_v56 }
 0x7e5   : > { %17018 = vmatpush1.bf16.msra.mxu0 %v24693_v57  ;;  %17182 = vmatpush1.bf16.msra.mxu1 %v24696_v58 }
 0x7e6   : > { %17019 = vmatprep.subr.bf16.mxu0 %v24701_v59  ;;  %17183 = vmatprep.subr.bf16.mxu1 %v24704_v60  ;;  %v24765_v59 = vld [vmem:[%s25505_s29 + $0x3ee0] ss:$148 sps:$4 sm:$0xff]   ;;  %v24768_v60 = vld [vmem:[%s25505_s29 + $0x3ee8] ss:$148 sps:$4 sm:$0xff]  }
 0x7e9   : > { %17020 = vmatpush1.bf16.msra.mxu0 %v24699_v62  ;;  %17184 = vmatpush1.bf16.msra.mxu1 %v24702_v63 }
 0x7ea   : > { %17021 = vmatprep.subr.bf16.mxu0 %v24707_v0  ;;  %17185 = vmatprep.subr.bf16.mxu1 %v24710_v1  ;;  %v24773_v0 = vld [vmem:[%s25505_s29 + $0x400c] ss:$148 sps:$4 sm:$0xff]   ;;  %v24776_v1 = vld [vmem:[%s25505_s29 + $0x4014] ss:$148 sps:$4 sm:$0xff]  }
 0x7ed   : > { %17022 = vmatpush1.bf16.msra.mxu0 %v24705_v2  ;;  %17186 = vmatpush1.bf16.msra.mxu1 %v24708_v3 }
 0x7ee   : > { %17023 = vmatprep.subr.bf16.mxu0 %v24713_v4  ;;  %17187 = vmatprep.subr.bf16.mxu1 %v24716_v5  ;;  %v220_v4 = vld [vmem:[#allocation2 + $0x30] sm:$0xff] }
 0x7f1   : > { %17024 = vmatpush1.bf16.msra.mxu0 %v24711_v6  ;;  %17188 = vmatpush1.bf16.msra.mxu1 %v24714_v7  ;;  %v24771_v6 = vld [vmem:[%s25505_s29 + $0x4008] ss:$148 sps:$4 sm:$0xff]   ;;  %v24774_v7 = vld [vmem:[%s25505_s29 + $0x4010] ss:$148 sps:$4 sm:$0xff]  }
 0x7f2   : > { %17025 = vmatprep.subr.bf16.mxu0 %v24719_v8  ;;  %17189 = vmatprep.subr.bf16.mxu1 %v24722_v9  ;;  %v24779_v8 = vld [vmem:[%s25505_s29 + $0x4134] ss:$148 sps:$4 sm:$0xff]   ;;  %v24782_v9 = vld [vmem:[%s25505_s29 + $0x413c] ss:$148 sps:$4 sm:$0xff]  }
 0x7f5   : > { %17026 = vmatpush1.bf16.msra.mxu0 %v24717_v10  ;;  %17190 = vmatpush1.bf16.msra.mxu1 %v24720_v11  ;;  %v24777_v11 = vld [vmem:[%s25505_s29 + $0x4130] ss:$148 sps:$4 sm:$0xff]  }
 0x7f6   : > { %17027 = vmatprep.subr.bf16.mxu0 %v24725_v12  ;;  %17191 = vmatprep.subr.bf16.mxu1 %v24728_v13  ;;  %v24780_v12 = vld [vmem:[%s25505_s29 + $0x4138] ss:$148 sps:$4 sm:$0xff]   ;;  %v24785_v13 = vld [vmem:[%s25505_s29 + $0x425c] ss:$148 sps:$4 sm:$0xff]  }
 0x7f9   : > { %17028 = vmatpush1.bf16.msra.mxu0 %v24723_v14  ;;  %17192 = vmatpush1.bf16.msra.mxu1 %v24726_v15  ;;  %v24788_v14 = vld [vmem:[%s25505_s29 + $0x4264] ss:$148 sps:$4 sm:$0xff]  }
 0x7fa   : > { %17038 = vmatprep.subr.bf16.mxu0 %v24731_v17  ;;  %17202 = vmatprep.subr.bf16.mxu1 %v24734_v18  ;;  %v24783_v15 = vld [vmem:[%s25505_s29 + $0x4258] ss:$148 sps:$4 sm:$0xff]   ;;  %v24786_v17 = vld [vmem:[%s25505_s29 + $0x4260] ss:$148 sps:$4 sm:$0xff]  }
 0x7fb   : > { %v24791_v18 = vld [vmem:[%s25505_s29 + $0x4384] ss:$148 sps:$4 sm:$0xff]  }
 0x7fc   : > { %17030 = vmatmul.mubr.bf16.vlgmr.msra.gmra.mrb[28].mxu0 %v25613_v22  ;;  %17194 = vmatmul.mubr.bf16.vlgmr.msra.gmra.mrb[28].mxu1 %v25613_v22 }
 0x7fd   : > { %17039 = vmatpush1.bf16.msra.mxu0 %v24729_v19  ;;  %17203 = vmatpush1.bf16.msra.mxu1 %v24732_v20  ;;  %v24794_v19 = vld [vmem:[%s25505_s29 + $0x438c] ss:$148 sps:$4 sm:$0xff]  }
 0x7fe   : > { %17040 = vmatprep.subr.bf16.mxu0 %v24737_v24  ;;  %17204 = vmatprep.subr.bf16.mxu1 %v24740_v25  ;;  %v24789_v20 = vld [vmem:[%s25505_s29 + $0x4380] ss:$148 sps:$4 sm:$0xff]   ;;  %v24792_v24 = vld [vmem:[%s25505_s29 + $0x4388] ss:$148 sps:$4 sm:$0xff]  }
 0x7ff   : > { %17070 = vmatprep.mubr.bf16.mxu0 %v25761_v38  ;;  %17234 = vmatprep.mubr.bf16.mxu1 %v25761_v38  ;;  %v24797_v25 = vld [vmem:[%s25505_s29 + $0x44ac] ss:$148 sps:$4 sm:$0xff]  }
 0x801   : > { %17041 = vmatpush1.bf16.msra.mxu0 %v24735_v26  ;;  %17205 = vmatpush1.bf16.msra.mxu1 %v24738_v28  ;;  %v24800_v26 = vld [vmem:[%s25505_s29 + $0x44b4] ss:$148 sps:$4 sm:$0xff]  }
 0x802   : > { %17042 = vmatprep.subr.bf16.mxu0 %v24743_v29  ;;  %17206 = vmatprep.subr.bf16.mxu1 %v24746_v30  ;;  %v24795_v28 = vld [vmem:[%s25505_s29 + $0x44a8] ss:$148 sps:$4 sm:$0xff]   ;;  %v24798_v29 = vld [vmem:[%s25505_s29 + $0x44b0] ss:$148 sps:$4 sm:$0xff]  }
 0x803   : > { %v24803_v30 = vld [vmem:[%s25505_s29 + $0x45d4] ss:$148 sps:$4 sm:$0xff]  }
 0x805   : > { %17043 = vmatpush1.bf16.msra.mxu0 %v24741_v31  ;;  %17207 = vmatpush1.bf16.msra.mxu1 %v24744_v32  ;;  %v24806_v31 = vld [vmem:[%s25505_s29 + $0x45dc] ss:$148 sps:$4 sm:$0xff]  }
 0x806   : > { %17044 = vmatprep.subr.bf16.mxu0 %v24749_v33  ;;  %17208 = vmatprep.subr.bf16.mxu1 %v24752_v34  ;;  %v24801_v32 = vld [vmem:[%s25505_s29 + $0x45d0] ss:$148 sps:$4 sm:$0xff]   ;;  %v24804_v33 = vld [vmem:[%s25505_s29 + $0x45d8] ss:$148 sps:$4 sm:$0xff]  }
 0x807   : > { %v24809_v34 = vld [vmem:[%s25505_s29 + $0x46fc] ss:$148 sps:$4 sm:$0xff]  }
 0x809   : > { %17045 = vmatpush1.bf16.msra.mxu0 %v24747_v35  ;;  %17209 = vmatpush1.bf16.msra.mxu1 %v24750_v36  ;;  %v24812_v35 = vld [vmem:[%s25505_s29 + $0x4704] ss:$148 sps:$4 sm:$0xff]  }
 0x80a   : > { %17046 = vmatprep.subr.bf16.mxu0 %v24755_v37  ;;  %17210 = vmatprep.subr.bf16.mxu1 %v24758_v39  ;;  %v24807_v36 = vld [vmem:[%s25505_s29 + $0x46f8] ss:$148 sps:$4 sm:$0xff]   ;;  %v24810_v37 = vld [vmem:[%s25505_s29 + $0x4700] ss:$148 sps:$4 sm:$0xff]  }
 0x80b   : > { %v24815_v39 = vld [vmem:[%s25505_s29 + $0x4824] ss:$148 sps:$4 sm:$0xff]  }
 0x80d   : > { %17047 = vmatpush1.bf16.msra.mxu0 %v24753_v40  ;;  %17211 = vmatpush1.bf16.msra.mxu1 %v24756_v41  ;;  %v24818_v40 = vld [vmem:[%s25505_s29 + $0x482c] ss:$148 sps:$4 sm:$0xff]  }
 0x80e   : > { %17048 = vmatprep.subr.bf16.mxu0 %v24761_v42  ;;  %17212 = vmatprep.subr.bf16.mxu1 %v24764_v45  ;;  %v24813_v41 = vld [vmem:[%s25505_s29 + $0x4820] ss:$148 sps:$4 sm:$0xff]   ;;  %v24816_v42 = vld [vmem:[%s25505_s29 + $0x4828] ss:$148 sps:$4 sm:$0xff]  }
 0x80f   : > { %v16744_v51 = vpop.f32.mrb[24].mxu0  ;;  %v16908_v52 = vpop.f32.mrb[24].mxu1  ;;  %v24821_v45 = vld [vmem:[%s25505_s29 + $0x494c] ss:$148 sps:$4 sm:$0xff]  }
 0x810   : > { %v16746_v53 = vpop.f32.mrb[25].mxu0  ;;  %v16910_v54 = vpop.f32.mrb[25].mxu1 }
 0x811   : > { %v17870_v55 = vcombine.low %v16744_v51, %v16746_v53  ;;  %v17871_v56 = vcombine.low %v16908_v52, %v16910_v54  ;;  %v16748_v57 = vpop.f32.mrb[26].mxu0  ;;  %v16912_v58 = vpop.f32.mrb[26].mxu1  ;;  %17049 = vmatpush1.bf16.msra.mxu0 %v24759_v47  ;;  %17213 = vmatpush1.bf16.msra.mxu1 %v24762_v48  ;;  %v24824_v47 = vld [vmem:[%s25505_s29 + $0x4954] ss:$148 sps:$4 sm:$0xff]   ;;  %v24830_v51 = vld [vmem:[%s25505_s29 + $0x8c] ss:$148 sps:$4 sm:$0xff]  }
 0x812   : > { %v16749_v62 = vpop.f32.mrb[27].mxu0  ;;  %v16913_v63 = vpop.f32.mrb[27].mxu1  ;;  %17050 = vmatprep.subr.bf16.mxu0 %v24767_v49  ;;  %17214 = vmatprep.subr.bf16.mxu1 %v24770_v50  ;;  %v24819_v48 = vld [vmem:[%s25505_s29 + $0x4948] ss:$148 sps:$4 sm:$0xff]   ;;  %v24822_v49 = vld [vmem:[%s25505_s29 + $0x4950] ss:$148 sps:$4 sm:$0xff]  }
 0x813   : > { %v17878_v2 = vrot.slane %v17870_v55, %v26064_v46  ;;  %v17885_v3 = vrot.slane %v17871_v56, %v26064_v46  ;;  %v24827_v50 = vld [vmem:[%s25505_s29 + $0x84] ss:$148 sps:$4 sm:$0xff]   ;;  %v24825_v52 = vld [vmem:[%s25505_s29 + $0x80] ss:$148 sps:$4 sm:$0xff]   ;;  %v24828_v53 = vld [vmem:[%s25505_s29 + $0x88] ss:$148 sps:$4 sm:$0xff]  }
 0x814   : > { %v24833_v54 = vld [vmem:[%s25505_s29 + $0x1ac] ss:$148 sps:$4 sm:$0xff]   ;;  %v24836_v55 = vld [vmem:[%s25505_s29 + $0x1b4] ss:$148 sps:$4 sm:$0xff]   ;;  %v24834_v57 = vld [vmem:[%s25505_s29 + $0x1b0] ss:$148 sps:$4 sm:$0xff]  }
 0x815   : > { %v17886_v5 = vcombine.low %v17878_v2, %v17885_v3  ;;  %17051 = vmatpush1.bf16.msra.mxu0 %v24765_v59  ;;  %17215 = vmatpush1.bf16.msra.mxu1 %v24768_v60  ;;  %v24831_v56 = vld [vmem:[%s25505_s29 + $0x1a8] ss:$148 sps:$4 sm:$0xff]   ;;  %v24837_v60 = vld [vmem:[%s25505_s29 + $0x2d0] ss:$148 sps:$4 sm:$0xff]   ;;  %v24840_v62 = vld [vmem:[%s25505_s29 + $0x2d8] ss:$148 sps:$4 sm:$0xff]  }
 0x816   : > { %17052 = vmatprep.subr.bf16.mxu0 %v24773_v0  ;;  %17216 = vmatprep.subr.bf16.mxu1 %v24776_v1  ;;  %v24839_v58 = vld [vmem:[%s25505_s29 + $0x2d4] ss:$148 sps:$4 sm:$0xff]   ;;  %v24842_v59 = vld [vmem:[%s25505_s29 + $0x2dc] ss:$148 sps:$4 sm:$0xff]   ;;  %v24848_v0 = vld [vmem:[%s25505_s29 + $0x404] ss:$148 sps:$4 sm:$0xff]  }
 0x817   : > { %v17944_v10 = vadd.f32 %v17886_v5, %v220_v4  ;;  %v24845_v63 = vld [vmem:[%s25505_s29 + $0x3fc] ss:$148 sps:$4 sm:$0xff]   ;;  %v24843_v1 = vld [vmem:[%s25505_s29 + $0x3f8] ss:$148 sps:$4 sm:$0xff]   ;;  %v24846_v2 = vld [vmem:[%s25505_s29 + $0x400] ss:$148 sps:$4 sm:$0xff]  }
 0x818   : > { %v24851_v3 = vld [vmem:[%s25505_s29 + $0x524] ss:$148 sps:$4 sm:$0xff]   ;;  %v24854_v4 = vld [vmem:[%s25505_s29 + $0x52c] ss:$148 sps:$4 sm:$0xff]  }
 0x819   : > { %17954 = vst [vmem:[#allocation2 + $0x30] sm:$0xff] %v17944_v10  ;;  %17053 = vmatpush1.bf16.msra.mxu0 %v24771_v6  ;;  %17217 = vmatpush1.bf16.msra.mxu1 %v24774_v7  ;;  %v24849_v5 = vld [vmem:[%s25505_s29 + $0x520] ss:$148 sps:$4 sm:$0xff]   ;;  %v24852_v6 = vld [vmem:[%s25505_s29 + $0x528] ss:$148 sps:$4 sm:$0xff]  }
 0x81a   : > { %17054 = vmatprep.subr.bf16.mxu0 %v24779_v8  ;;  %17218 = vmatprep.subr.bf16.mxu1 %v24782_v9  ;;  %v24857_v7 = vld [vmem:[%s25505_s29 + $0x64c] ss:$148 sps:$4 sm:$0xff]   ;;  %v24860_v8 = vld [vmem:[%s25505_s29 + $0x654] ss:$148 sps:$4 sm:$0xff]   ;;  %v24858_v10 = vld [vmem:[%s25505_s29 + $0x650] ss:$148 sps:$4 sm:$0xff]  }
 0x81b   : > { %v24855_v9 = vld [vmem:[%s25505_s29 + $0x648] ss:$148 sps:$4 sm:$0xff]  }
 0x81d   : > { %17055 = vmatpush1.bf16.msra.mxu0 %v24777_v11  ;;  %17219 = vmatpush1.bf16.msra.mxu1 %v24780_v12  ;;  %v24863_v11 = vld [vmem:[%s25505_s29 + $0x774] ss:$148 sps:$4 sm:$0xff]   ;;  %v24866_v12 = vld [vmem:[%s25505_s29 + $0x77c] ss:$148 sps:$4 sm:$0xff]  }
 0x81e   : > { %17056 = vmatprep.subr.bf16.mxu0 %v24785_v13  ;;  %17220 = vmatprep.subr.bf16.mxu1 %v24788_v14  ;;  %v24861_v13 = vld [vmem:[%s25505_s29 + $0x770] ss:$148 sps:$4 sm:$0xff]   ;;  %v24864_v14 = vld [vmem:[%s25505_s29 + $0x778] ss:$148 sps:$4 sm:$0xff]  }
 0x821   : > { %17057 = vmatpush1.bf16.msra.mxu0 %v24783_v15  ;;  %17221 = vmatpush1.bf16.msra.mxu1 %v24786_v17  ;;  %v24869_v15 = vld [vmem:[%s25505_s29 + $0x89c] ss:$148 sps:$4 sm:$0xff]   ;;  %v24872_v17 = vld [vmem:[%s25505_s29 + $0x8a4] ss:$148 sps:$4 sm:$0xff]  }
 0x822   : > { %17058 = vmatprep.subr.bf16.mxu0 %v24791_v18  ;;  %17222 = vmatprep.subr.bf16.mxu1 %v24794_v19  ;;  %v24867_v18 = vld [vmem:[%s25505_s29 + $0x898] ss:$148 sps:$4 sm:$0xff]   ;;  %v24870_v19 = vld [vmem:[%s25505_s29 + $0x8a0] ss:$148 sps:$4 sm:$0xff]  }
 0x825   : > { %17059 = vmatpush1.bf16.msra.mxu0 %v24789_v20  ;;  %17223 = vmatpush1.bf16.msra.mxu1 %v24792_v24  ;;  %v24875_v20 = vld [vmem:[%s25505_s29 + $0x9c4] ss:$148 sps:$4 sm:$0xff]   ;;  %v24878_v24 = vld [vmem:[%s25505_s29 + $0x9cc] ss:$148 sps:$4 sm:$0xff]  }
 0x826   : > { %17060 = vmatprep.subr.bf16.mxu0 %v24797_v25  ;;  %17224 = vmatprep.subr.bf16.mxu1 %v24800_v26  ;;  %v24873_v25 = vld [vmem:[%s25505_s29 + $0x9c0] ss:$148 sps:$4 sm:$0xff]   ;;  %v24876_v26 = vld [vmem:[%s25505_s29 + $0x9c8] ss:$148 sps:$4 sm:$0xff]  }
 0x829   : > { %17061 = vmatpush1.bf16.msra.mxu0 %v24795_v28  ;;  %17225 = vmatpush1.bf16.msra.mxu1 %v24798_v29  ;;  %v24881_v28 = vld [vmem:[%s25505_s29 + $0xaec] ss:$148 sps:$4 sm:$0xff]   ;;  %v24884_v29 = vld [vmem:[%s25505_s29 + $0xaf4] ss:$148 sps:$4 sm:$0xff]  }
 0x82a   : > { %17062 = vmatprep.subr.bf16.mxu0 %v24803_v30  ;;  %17226 = vmatprep.subr.bf16.mxu1 %v24806_v31  ;;  %v24879_v30 = vld [vmem:[%s25505_s29 + $0xae8] ss:$148 sps:$4 sm:$0xff]   ;;  %v24882_v31 = vld [vmem:[%s25505_s29 + $0xaf0] ss:$148 sps:$4 sm:$0xff]  }
 0x82d   : > { %17063 = vmatpush1.bf16.msra.mxu0 %v24801_v32  ;;  %17227 = vmatpush1.bf16.msra.mxu1 %v24804_v33  ;;  %v24887_v32 = vld [vmem:[%s25505_s29 + $0xc14] ss:$148 sps:$4 sm:$0xff]   ;;  %v24890_v33 = vld [vmem:[%s25505_s29 + $0xc1c] ss:$148 sps:$4 sm:$0xff]  }
 0x82e   : > { %17064 = vmatprep.subr.bf16.mxu0 %v24809_v34  ;;  %17228 = vmatprep.subr.bf16.mxu1 %v24812_v35  ;;  %v24885_v34 = vld [vmem:[%s25505_s29 + $0xc10] ss:$148 sps:$4 sm:$0xff]   ;;  %v24888_v35 = vld [vmem:[%s25505_s29 + $0xc18] ss:$148 sps:$4 sm:$0xff]  }
 0x831   : > { %17065 = vmatpush1.bf16.msra.mxu0 %v24807_v36  ;;  %17229 = vmatpush1.bf16.msra.mxu1 %v24810_v37  ;;  %v24893_v36 = vld [vmem:[%s25505_s29 + $0xd3c] ss:$148 sps:$4 sm:$0xff]   ;;  %v24896_v37 = vld [vmem:[%s25505_s29 + $0xd44] ss:$148 sps:$4 sm:$0xff]  }
 0x832   : > { %17066 = vmatprep.subr.bf16.mxu0 %v24815_v39  ;;  %17230 = vmatprep.subr.bf16.mxu1 %v24818_v40  ;;  %v24891_v39 = vld [vmem:[%s25505_s29 + $0xd38] ss:$148 sps:$4 sm:$0xff]   ;;  %v24894_v40 = vld [vmem:[%s25505_s29 + $0xd40] ss:$148 sps:$4 sm:$0xff]  }
 0x835   : > { %17067 = vmatpush1.bf16.msra.mxu0 %v24813_v41  ;;  %17231 = vmatpush1.bf16.msra.mxu1 %v24816_v42  ;;  %v24899_v41 = vld [vmem:[%s25505_s29 + $0xe64] ss:$148 sps:$4 sm:$0xff]   ;;  %v24902_v42 = vld [vmem:[%s25505_s29 + $0xe6c] ss:$148 sps:$4 sm:$0xff]  }
 0x836   : > { %17068 = vmatprep.subr.bf16.mxu0 %v24821_v45  ;;  %17232 = vmatprep.subr.bf16.mxu1 %v24824_v47  ;;  %v24897_v45 = vld [vmem:[%s25505_s29 + $0xe60] ss:$148 sps:$4 sm:$0xff]   ;;  %v24900_v47 = vld [vmem:[%s25505_s29 + $0xe68] ss:$148 sps:$4 sm:$0xff]  }
 0x839   : > { %17069 = vmatpush1.bf16.msra.mxu0 %v24819_v48  ;;  %17233 = vmatpush1.bf16.msra.mxu1 %v24822_v49  ;;  %v24905_v48 = vld [vmem:[%s25505_s29 + $0xf8c] ss:$148 sps:$4 sm:$0xff]   ;;  %v24908_v49 = vld [vmem:[%s25505_s29 + $0xf94] ss:$148 sps:$4 sm:$0xff]  }
 0x83a   : > { %17243 = vmatprep.subr.bf16.mxu0 %v24827_v50  ;;  %17407 = vmatprep.subr.bf16.mxu1 %v24830_v51  ;;  %v24903_v50 = vld [vmem:[%s25505_s29 + $0xf88] ss:$148 sps:$4 sm:$0xff]   ;;  %v24906_v51 = vld [vmem:[%s25505_s29 + $0xf90] ss:$148 sps:$4 sm:$0xff]  }
 0x83c   : > { %17071 = vmatmul.mubr.bf16.vlgmr.msra.gmra.mrb[28].mxu0 %v25829_v43  ;;  %17235 = vmatmul.mubr.bf16.vlgmr.msra.gmra.mrb[28].mxu1 %v25829_v43 }
 0x83d   : > { %17244 = vmatpush1.bf16.msra.mxu0 %v24825_v52  ;;  %17408 = vmatpush1.bf16.msra.mxu1 %v24828_v53  ;;  %v24911_v52 = vld [vmem:[%s25505_s29 + $0x10b4] ss:$148 sps:$4 sm:$0xff]   ;;  %v24914_v53 = vld [vmem:[%s25505_s29 + $0x10bc] ss:$148 sps:$4 sm:$0xff]  }
 0x83e   : > { %17245 = vmatprep.subr.bf16.mxu0 %v24833_v54  ;;  %17409 = vmatprep.subr.bf16.mxu1 %v24836_v55  ;;  %v24909_v54 = vld [vmem:[%s25505_s29 + $0x10b0] ss:$148 sps:$4 sm:$0xff]   ;;  %v24912_v55 = vld [vmem:[%s25505_s29 + $0x10b8] ss:$148 sps:$4 sm:$0xff]  }
 0x83f   : > { %17275 = vmatprep.mubr.bf16.mxu0 %v25582_v61  ;;  %17439 = vmatprep.mubr.bf16.mxu1 %v25582_v61 }
 0x841   : > { %17246 = vmatpush1.bf16.msra.mxu0 %v24831_v56  ;;  %17410 = vmatpush1.bf16.msra.mxu1 %v24834_v57  ;;  %v24917_v56 = vld [vmem:[%s25505_s29 + $0x11dc] ss:$148 sps:$4 sm:$0xff]   ;;  %v24920_v57 = vld [vmem:[%s25505_s29 + $0x11e4] ss:$148 sps:$4 sm:$0xff]  }
 0x842   : > { %17247 = vmatprep.subr.bf16.mxu0 %v24839_v58  ;;  %17411 = vmatprep.subr.bf16.mxu1 %v24842_v59  ;;  %v24915_v58 = vld [vmem:[%s25505_s29 + $0x11d8] ss:$148 sps:$4 sm:$0xff]   ;;  %v24918_v59 = vld [vmem:[%s25505_s29 + $0x11e0] ss:$148 sps:$4 sm:$0xff]  }
 0x845   : > { %17248 = vmatpush1.bf16.msra.mxu0 %v24837_v60  ;;  %17412 = vmatpush1.bf16.msra.mxu1 %v24840_v62  ;;  %v24923_v60 = vld [vmem:[%s25505_s29 + $0x1304] ss:$148 sps:$4 sm:$0xff]   ;;  %v24926_v62 = vld [vmem:[%s25505_s29 + $0x130c] ss:$148 sps:$4 sm:$0xff]  }
 0x846   : > { %17249 = vmatprep.subr.bf16.mxu0 %v24845_v63  ;;  %17413 = vmatprep.subr.bf16.mxu1 %v24848_v0  ;;  %v24921_v63 = vld [vmem:[%s25505_s29 + $0x1300] ss:$148 sps:$4 sm:$0xff]   ;;  %v24924_v0 = vld [vmem:[%s25505_s29 + $0x1308] ss:$148 sps:$4 sm:$0xff]  }
 0x849   : > { %17250 = vmatpush1.bf16.msra.mxu0 %v24843_v1  ;;  %17414 = vmatpush1.bf16.msra.mxu1 %v24846_v2  ;;  %v24929_v1 = vld [vmem:[%s25505_s29 + $0x142c] ss:$148 sps:$4 sm:$0xff]   ;;  %v24932_v2 = vld [vmem:[%s25505_s29 + $0x1434] ss:$148 sps:$4 sm:$0xff]  }
 0x84a   : > { %17251 = vmatprep.subr.bf16.mxu0 %v24851_v3  ;;  %17415 = vmatprep.subr.bf16.mxu1 %v24854_v4  ;;  %v24927_v3 = vld [vmem:[%s25505_s29 + $0x1428] ss:$148 sps:$4 sm:$0xff]   ;;  %v24930_v4 = vld [vmem:[%s25505_s29 + $0x1430] ss:$148 sps:$4 sm:$0xff]  }
 0x84d   : > { %17252 = vmatpush1.bf16.msra.mxu0 %v24849_v5  ;;  %17416 = vmatpush1.bf16.msra.mxu1 %v24852_v6  ;;  %v24935_v5 = vld [vmem:[%s25505_s29 + $0x1554] ss:$148 sps:$4 sm:$0xff]   ;;  %v24938_v6 = vld [vmem:[%s25505_s29 + $0x155c] ss:$148 sps:$4 sm:$0xff]  }
 0x84e   : > { %17253 = vmatprep.subr.bf16.mxu0 %v24857_v7  ;;  %17417 = vmatprep.subr.bf16.mxu1 %v24860_v8  ;;  %v24933_v7 = vld [vmem:[%s25505_s29 + $0x1550] ss:$148 sps:$4 sm:$0xff]   ;;  %v24936_v8 = vld [vmem:[%s25505_s29 + $0x1558] ss:$148 sps:$4 sm:$0xff]  }
 0x851   : > { %17254 = vmatpush1.bf16.msra.mxu0 %v24855_v9  ;;  %17418 = vmatpush1.bf16.msra.mxu1 %v24858_v10  ;;  %v24941_v9 = vld [vmem:[%s25505_s29 + $0x167c] ss:$148 sps:$4 sm:$0xff]   ;;  %v24944_v10 = vld [vmem:[%s25505_s29 + $0x1684] ss:$148 sps:$4 sm:$0xff]  }
 0x852   : > { %17255 = vmatprep.subr.bf16.mxu0 %v24863_v11  ;;  %17419 = vmatprep.subr.bf16.mxu1 %v24866_v12  ;;  %v24939_v11 = vld [vmem:[%s25505_s29 + $0x1678] ss:$148 sps:$4 sm:$0xff]   ;;  %v24942_v12 = vld [vmem:[%s25505_s29 + $0x1680] ss:$148 sps:$4 sm:$0xff]  }
 0x855   : > { %17256 = vmatpush1.bf16.msra.mxu0 %v24861_v13  ;;  %17420 = vmatpush1.bf16.msra.mxu1 %v24864_v14  ;;  %v24947_v13 = vld [vmem:[%s25505_s29 + $0x17a4] ss:$148 sps:$4 sm:$0xff]   ;;  %v24950_v14 = vld [vmem:[%s25505_s29 + $0x17ac] ss:$148 sps:$4 sm:$0xff]  }
 0x856   : > { %17257 = vmatprep.subr.bf16.mxu0 %v24869_v15  ;;  %17421 = vmatprep.subr.bf16.mxu1 %v24872_v17  ;;  %v24945_v15 = vld [vmem:[%s25505_s29 + $0x17a0] ss:$148 sps:$4 sm:$0xff]   ;;  %v24948_v17 = vld [vmem:[%s25505_s29 + $0x17a8] ss:$148 sps:$4 sm:$0xff]  }
 0x859   : > { %17258 = vmatpush1.bf16.msra.mxu0 %v24867_v18  ;;  %17422 = vmatpush1.bf16.msra.mxu1 %v24870_v19  ;;  %v24953_v18 = vld [vmem:[%s25505_s29 + $0x18cc] ss:$148 sps:$4 sm:$0xff]   ;;  %v24956_v19 = vld [vmem:[%s25505_s29 + $0x18d4] ss:$148 sps:$4 sm:$0xff]  }
 0x85a   : > { %17259 = vmatprep.subr.bf16.mxu0 %v24875_v20  ;;  %17423 = vmatprep.subr.bf16.mxu1 %v24878_v24  ;;  %v24951_v20 = vld [vmem:[%s25505_s29 + $0x18c8] ss:$148 sps:$4 sm:$0xff]   ;;  %v24954_v24 = vld [vmem:[%s25505_s29 + $0x18d0] ss:$148 sps:$4 sm:$0xff]  }
 0x85d   : > { %17260 = vmatpush1.bf16.msra.mxu0 %v24873_v25  ;;  %17424 = vmatpush1.bf16.msra.mxu1 %v24876_v26  ;;  %v24959_v25 = vld [vmem:[%s25505_s29 + $0x19f4] ss:$148 sps:$4 sm:$0xff]   ;;  %v24962_v26 = vld [vmem:[%s25505_s29 + $0x19fc] ss:$148 sps:$4 sm:$0xff]  }
 0x85e   : > { %17261 = vmatprep.subr.bf16.mxu0 %v24881_v28  ;;  %17425 = vmatprep.subr.bf16.mxu1 %v24884_v29  ;;  %v24957_v28 = vld [vmem:[%s25505_s29 + $0x19f0] ss:$148 sps:$4 sm:$0xff]   ;;  %v24960_v29 = vld [vmem:[%s25505_s29 + $0x19f8] ss:$148 sps:$4 sm:$0xff]  }
 0x861   : > { %17262 = vmatpush1.bf16.msra.mxu0 %v24879_v30  ;;  %17426 = vmatpush1.bf16.msra.mxu1 %v24882_v31  ;;  %v24965_v30 = vld [vmem:[%s25505_s29 + $0x1b1c] ss:$148 sps:$4 sm:$0xff]   ;;  %v24968_v31 = vld [vmem:[%s25505_s29 + $0x1b24] ss:$148 sps:$4 sm:$0xff]  }
 0x862   : > { %17263 = vmatprep.subr.bf16.mxu0 %v24887_v32  ;;  %17427 = vmatprep.subr.bf16.mxu1 %v24890_v33  ;;  %v24963_v32 = vld [vmem:[%s25505_s29 + $0x1b18] ss:$148 sps:$4 sm:$0xff]   ;;  %v24966_v33 = vld [vmem:[%s25505_s29 + $0x1b20] ss:$148 sps:$4 sm:$0xff]  }
 0x865   : > { %17264 = vmatpush1.bf16.msra.mxu0 %v24885_v34  ;;  %17428 = vmatpush1.bf16.msra.mxu1 %v24888_v35  ;;  %v24971_v34 = vld [vmem:[%s25505_s29 + $0x1c44] ss:$148 sps:$4 sm:$0xff]   ;;  %v24974_v35 = vld [vmem:[%s25505_s29 + $0x1c4c] ss:$148 sps:$4 sm:$0xff]  }
 0x866   : > { %17265 = vmatprep.subr.bf16.mxu0 %v24893_v36  ;;  %17429 = vmatprep.subr.bf16.mxu1 %v24896_v37  ;;  %v24969_v36 = vld [vmem:[%s25505_s29 + $0x1c40] ss:$148 sps:$4 sm:$0xff]   ;;  %v24972_v37 = vld [vmem:[%s25505_s29 + $0x1c48] ss:$148 sps:$4 sm:$0xff]  }
 0x869   : > { %17266 = vmatpush1.bf16.msra.mxu0 %v24891_v39  ;;  %17430 = vmatpush1.bf16.msra.mxu1 %v24894_v40  ;;  %v24977_v39 = vld [vmem:[%s25505_s29 + $0x1d6c] ss:$148 sps:$4 sm:$0xff]   ;;  %v24980_v40 = vld [vmem:[%s25505_s29 + $0x1d74] ss:$148 sps:$4 sm:$0xff]  }
 0x86a   : > { %17267 = vmatprep.subr.bf16.mxu0 %v24899_v41  ;;  %17431 = vmatprep.subr.bf16.mxu1 %v24902_v42  ;;  %v24975_v41 = vld [vmem:[%s25505_s29 + $0x1d68] ss:$148 sps:$4 sm:$0xff]   ;;  %v24978_v42 = vld [vmem:[%s25505_s29 + $0x1d70] ss:$148 sps:$4 sm:$0xff]  }
 0x86d   : > { %17268 = vmatpush1.bf16.msra.mxu0 %v24897_v45  ;;  %17432 = vmatpush1.bf16.msra.mxu1 %v24900_v47  ;;  %v24983_v45 = vld [vmem:[%s25505_s29 + $0x1e94] ss:$148 sps:$4 sm:$0xff]   ;;  %v24986_v47 = vld [vmem:[%s25505_s29 + $0x1e9c] ss:$148 sps:$4 sm:$0xff]  }
 0x86e   : > { %17269 = vmatprep.subr.bf16.mxu0 %v24905_v48  ;;  %17433 = vmatprep.subr.bf16.mxu1 %v24908_v49  ;;  %v24981_v48 = vld [vmem:[%s25505_s29 + $0x1e90] ss:$148 sps:$4 sm:$0xff]   ;;  %v24984_v49 = vld [vmem:[%s25505_s29 + $0x1e98] ss:$148 sps:$4 sm:$0xff]  }
 0x871   : > { %17270 = vmatpush1.bf16.msra.mxu0 %v24903_v50  ;;  %17434 = vmatpush1.bf16.msra.mxu1 %v24906_v51  ;;  %v24989_v50 = vld [vmem:[%s25505_s29 + $0x1fbc] ss:$148 sps:$4 sm:$0xff]   ;;  %v24992_v51 = vld [vmem:[%s25505_s29 + $0x1fc4] ss:$148 sps:$4 sm:$0xff]  }
 0x872   : > { %17271 = vmatprep.subr.bf16.mxu0 %v24911_v52  ;;  %17435 = vmatprep.subr.bf16.mxu1 %v24914_v53  ;;  %v24987_v52 = vld [vmem:[%s25505_s29 + $0x1fb8] ss:$148 sps:$4 sm:$0xff]   ;;  %v24990_v53 = vld [vmem:[%s25505_s29 + $0x1fc0] ss:$148 sps:$4 sm:$0xff]  }
 0x875   : > { %17272 = vmatpush1.bf16.msra.mxu0 %v24909_v54  ;;  %17436 = vmatpush1.bf16.msra.mxu1 %v24912_v55  ;;  %v24995_v54 = vld [vmem:[%s25505_s29 + $0x20e4] ss:$148 sps:$4 sm:$0xff]   ;;  %v24998_v55 = vld [vmem:[%s25505_s29 + $0x20ec] ss:$148 sps:$4 sm:$0xff]  }
 0x876   : > { %17273 = vmatprep.subr.bf16.mxu0 %v24917_v56  ;;  %17437 = vmatprep.subr.bf16.mxu1 %v24920_v57  ;;  %v24993_v56 = vld [vmem:[%s25505_s29 + $0x20e0] ss:$148 sps:$4 sm:$0xff]   ;;  %v24996_v57 = vld [vmem:[%s25505_s29 + $0x20e8] ss:$148 sps:$4 sm:$0xff]  }
 0x879   : > { %17274 = vmatpush1.bf16.msra.mxu0 %v24915_v58  ;;  %17438 = vmatpush1.bf16.msra.mxu1 %v24918_v59  ;;  %v25001_v58 = vld [vmem:[%s25505_s29 + $0x220c] ss:$148 sps:$4 sm:$0xff]   ;;  %v25004_v59 = vld [vmem:[%s25505_s29 + $0x2214] ss:$148 sps:$4 sm:$0xff]  }
 0x87a   : > { %17284 = vmatprep.subr.bf16.mxu0 %v24923_v60  ;;  %17448 = vmatprep.subr.bf16.mxu1 %v24926_v62  ;;  %v24999_v60 = vld [vmem:[%s25505_s29 + $0x2208] ss:$148 sps:$4 sm:$0xff]   ;;  %v25002_v62 = vld [vmem:[%s25505_s29 + $0x2210] ss:$148 sps:$4 sm:$0xff]  }
 0x87c   : > { %17276 = vmatmul.mubr.bf16.vlgmr.msra.gmra.mrb[32].mxu0 %v25604_v16  ;;  %17440 = vmatmul.mubr.bf16.vlgmr.msra.gmra.mrb[32].mxu1 %v25604_v16 }
 0x87d   : > { %17285 = vmatpush1.bf16.msra.mxu0 %v24921_v63  ;;  %17449 = vmatpush1.bf16.msra.mxu1 %v24924_v0  ;;  %v25007_v63 = vld [vmem:[%s25505_s29 + $0x2334] ss:$148 sps:$4 sm:$0xff]   ;;  %v25010_v0 = vld [vmem:[%s25505_s29 + $0x233c] ss:$148 sps:$4 sm:$0xff]  }
 0x87e   : > { %17286 = vmatprep.subr.bf16.mxu0 %v24929_v1  ;;  %17450 = vmatprep.subr.bf16.mxu1 %v24932_v2  ;;  %v25005_v1 = vld [vmem:[%s25505_s29 + $0x2330] ss:$148 sps:$4 sm:$0xff]   ;;  %v25008_v2 = vld [vmem:[%s25505_s29 + $0x2338] ss:$148 sps:$4 sm:$0xff]  }
 0x87f   : > { %17316 = vmatprep.mubr.bf16.mxu0 %v25617_v23  ;;  %17480 = vmatprep.mubr.bf16.mxu1 %v25617_v23 }
 0x881   : > { %17287 = vmatpush1.bf16.msra.mxu0 %v24927_v3  ;;  %17451 = vmatpush1.bf16.msra.mxu1 %v24930_v4  ;;  %v25013_v3 = vld [vmem:[%s25505_s29 + $0x245c] ss:$148 sps:$4 sm:$0xff]   ;;  %v25016_v4 = vld [vmem:[%s25505_s29 + $0x2464] ss:$148 sps:$4 sm:$0xff]  }
 0x882   : > { %17288 = vmatprep.subr.bf16.mxu0 %v24935_v5  ;;  %17452 = vmatprep.subr.bf16.mxu1 %v24938_v6  ;;  %v25011_v5 = vld [vmem:[%s25505_s29 + $0x2458] ss:$148 sps:$4 sm:$0xff]   ;;  %v25014_v6 = vld [vmem:[%s25505_s29 + $0x2460] ss:$148 sps:$4 sm:$0xff]  }
 0x885   : > { %17289 = vmatpush1.bf16.msra.mxu0 %v24933_v7  ;;  %17453 = vmatpush1.bf16.msra.mxu1 %v24936_v8  ;;  %v25019_v7 = vld [vmem:[%s25505_s29 + $0x2584] ss:$148 sps:$4 sm:$0xff]   ;;  %v25022_v8 = vld [vmem:[%s25505_s29 + $0x258c] ss:$148 sps:$4 sm:$0xff]  }
 0x886   : > { %17290 = vmatprep.subr.bf16.mxu0 %v24941_v9  ;;  %17454 = vmatprep.subr.bf16.mxu1 %v24944_v10  ;;  %v25017_v9 = vld [vmem:[%s25505_s29 + $0x2580] ss:$148 sps:$4 sm:$0xff]   ;;  %v25020_v10 = vld [vmem:[%s25505_s29 + $0x2588] ss:$148 sps:$4 sm:$0xff]  }
 0x889   : > { %17291 = vmatpush1.bf16.msra.mxu0 %v24939_v11  ;;  %17455 = vmatpush1.bf16.msra.mxu1 %v24942_v12  ;;  %v25025_v11 = vld [vmem:[%s25505_s29 + $0x26ac] ss:$148 sps:$4 sm:$0xff]   ;;  %v25028_v12 = vld [vmem:[%s25505_s29 + $0x26b4] ss:$148 sps:$4 sm:$0xff]  }
 0x88a   : > { %17292 = vmatprep.subr.bf16.mxu0 %v24947_v13  ;;  %17456 = vmatprep.subr.bf16.mxu1 %v24950_v14  ;;  %v25023_v13 = vld [vmem:[%s25505_s29 + $0x26a8] ss:$148 sps:$4 sm:$0xff]   ;;  %v25026_v14 = vld [vmem:[%s25505_s29 + $0x26b0] ss:$148 sps:$4 sm:$0xff]  }
 0x88d   : > { %17293 = vmatpush1.bf16.msra.mxu0 %v24945_v15  ;;  %17457 = vmatpush1.bf16.msra.mxu1 %v24948_v17  ;;  %v25031_v15 = vld [vmem:[%s25505_s29 + $0x27d4] ss:$148 sps:$4 sm:$0xff]   ;;  %v25034_v17 = vld [vmem:[%s25505_s29 + $0x27dc] ss:$148 sps:$4 sm:$0xff]  }
 0x88e   : > { %17294 = vmatprep.subr.bf16.mxu0 %v24953_v18  ;;  %17458 = vmatprep.subr.bf16.mxu1 %v24956_v19  ;;  %v25029_v18 = vld [vmem:[%s25505_s29 + $0x27d0] ss:$148 sps:$4 sm:$0xff]   ;;  %v25032_v19 = vld [vmem:[%s25505_s29 + $0x27d8] ss:$148 sps:$4 sm:$0xff]  }
 0x891   : > { %17295 = vmatpush1.bf16.msra.mxu0 %v24951_v20  ;;  %17459 = vmatpush1.bf16.msra.mxu1 %v24954_v24  ;;  %v25037_v20 = vld [vmem:[%s25505_s29 + $0x28fc] ss:$148 sps:$4 sm:$0xff]   ;;  %v25040_v24 = vld [vmem:[%s25505_s29 + $0x2904] ss:$148 sps:$4 sm:$0xff]  }
 0x892   : > { %17296 = vmatprep.subr.bf16.mxu0 %v24959_v25  ;;  %17460 = vmatprep.subr.bf16.mxu1 %v24962_v26  ;;  %v25035_v25 = vld [vmem:[%s25505_s29 + $0x28f8] ss:$148 sps:$4 sm:$0xff]   ;;  %v25038_v26 = vld [vmem:[%s25505_s29 + $0x2900] ss:$148 sps:$4 sm:$0xff]  }
 0x895   : > { %17297 = vmatpush1.bf16.msra.mxu0 %v24957_v28  ;;  %17461 = vmatpush1.bf16.msra.mxu1 %v24960_v29  ;;  %v25043_v28 = vld [vmem:[%s25505_s29 + $0x2a24] ss:$148 sps:$4 sm:$0xff]   ;;  %v25046_v29 = vld [vmem:[%s25505_s29 + $0x2a2c] ss:$148 sps:$4 sm:$0xff]  }
 0x896   : > { %17298 = vmatprep.subr.bf16.mxu0 %v24965_v30  ;;  %17462 = vmatprep.subr.bf16.mxu1 %v24968_v31  ;;  %v25041_v30 = vld [vmem:[%s25505_s29 + $0x2a20] ss:$148 sps:$4 sm:$0xff]   ;;  %v25044_v31 = vld [vmem:[%s25505_s29 + $0x2a28] ss:$148 sps:$4 sm:$0xff]  }
 0x899   : > { %17299 = vmatpush1.bf16.msra.mxu0 %v24963_v32  ;;  %17463 = vmatpush1.bf16.msra.mxu1 %v24966_v33  ;;  %v25049_v32 = vld [vmem:[%s25505_s29 + $0x2b4c] ss:$148 sps:$4 sm:$0xff]   ;;  %v25052_v33 = vld [vmem:[%s25505_s29 + $0x2b54] ss:$148 sps:$4 sm:$0xff]  }
 0x89a   : > { %17300 = vmatprep.subr.bf16.mxu0 %v24971_v34  ;;  %17464 = vmatprep.subr.bf16.mxu1 %v24974_v35  ;;  %v25047_v34 = vld [vmem:[%s25505_s29 + $0x2b48] ss:$148 sps:$4 sm:$0xff]   ;;  %v25050_v35 = vld [vmem:[%s25505_s29 + $0x2b50] ss:$148 sps:$4 sm:$0xff]  }
 0x89d   : > { %17301 = vmatpush1.bf16.msra.mxu0 %v24969_v36  ;;  %17465 = vmatpush1.bf16.msra.mxu1 %v24972_v37  ;;  %v25055_v36 = vld [vmem:[%s25505_s29 + $0x2c74] ss:$148 sps:$4 sm:$0xff]   ;;  %v25058_v37 = vld [vmem:[%s25505_s29 + $0x2c7c] ss:$148 sps:$4 sm:$0xff]  }
 0x89e   : > { %17302 = vmatprep.subr.bf16.mxu0 %v24977_v39  ;;  %17466 = vmatprep.subr.bf16.mxu1 %v24980_v40  ;;  %v25053_v39 = vld [vmem:[%s25505_s29 + $0x2c70] ss:$148 sps:$4 sm:$0xff]   ;;  %v25056_v40 = vld [vmem:[%s25505_s29 + $0x2c78] ss:$148 sps:$4 sm:$0xff]  }
 0x8a1   : > { %17303 = vmatpush1.bf16.msra.mxu0 %v24975_v41  ;;  %17467 = vmatpush1.bf16.msra.mxu1 %v24978_v42  ;;  %v25061_v41 = vld [vmem:[%s25505_s29 + $0x2d9c] ss:$148 sps:$4 sm:$0xff]   ;;  %v25064_v42 = vld [vmem:[%s25505_s29 + $0x2da4] ss:$148 sps:$4 sm:$0xff]  }
 0x8a2   : > { %17304 = vmatprep.subr.bf16.mxu0 %v24983_v45  ;;  %17468 = vmatprep.subr.bf16.mxu1 %v24986_v47  ;;  %v25059_v45 = vld [vmem:[%s25505_s29 + $0x2d98] ss:$148 sps:$4 sm:$0xff]   ;;  %v25062_v47 = vld [vmem:[%s25505_s29 + $0x2da0] ss:$148 sps:$4 sm:$0xff]  }
 0x8a5   : > { %17305 = vmatpush1.bf16.msra.mxu0 %v24981_v48  ;;  %17469 = vmatpush1.bf16.msra.mxu1 %v24984_v49  ;;  %v25067_v48 = vld [vmem:[%s25505_s29 + $0x2ec4] ss:$148 sps:$4 sm:$0xff]   ;;  %v25070_v49 = vld [vmem:[%s25505_s29 + $0x2ecc] ss:$148 sps:$4 sm:$0xff]  }
 0x8a6   : > { %17306 = vmatprep.subr.bf16.mxu0 %v24989_v50  ;;  %17470 = vmatprep.subr.bf16.mxu1 %v24992_v51  ;;  %v25065_v50 = vld [vmem:[%s25505_s29 + $0x2ec0] ss:$148 sps:$4 sm:$0xff]   ;;  %v25068_v51 = vld [vmem:[%s25505_s29 + $0x2ec8] ss:$148 sps:$4 sm:$0xff]  }
 0x8a9   : > { %17307 = vmatpush1.bf16.msra.mxu0 %v24987_v52  ;;  %17471 = vmatpush1.bf16.msra.mxu1 %v24990_v53  ;;  %v25073_v52 = vld [vmem:[%s25505_s29 + $0x2fec] ss:$148 sps:$4 sm:$0xff]   ;;  %v25076_v53 = vld [vmem:[%s25505_s29 + $0x2ff4] ss:$148 sps:$4 sm:$0xff]  }
 0x8aa   : > { %17308 = vmatprep.subr.bf16.mxu0 %v24995_v54  ;;  %17472 = vmatprep.subr.bf16.mxu1 %v24998_v55  ;;  %v25071_v54 = vld [vmem:[%s25505_s29 + $0x2fe8] ss:$148 sps:$4 sm:$0xff]   ;;  %v25074_v55 = vld [vmem:[%s25505_s29 + $0x2ff0] ss:$148 sps:$4 sm:$0xff]  }
 0x8ad   : > { %17309 = vmatpush1.bf16.msra.mxu0 %v24993_v56  ;;  %17473 = vmatpush1.bf16.msra.mxu1 %v24996_v57  ;;  %v25079_v56 = vld [vmem:[%s25505_s29 + $0x3114] ss:$148 sps:$4 sm:$0xff]   ;;  %v25082_v57 = vld [vmem:[%s25505_s29 + $0x311c] ss:$148 sps:$4 sm:$0xff]  }
 0x8ae   : > { %17310 = vmatprep.subr.bf16.mxu0 %v25001_v58  ;;  %17474 = vmatprep.subr.bf16.mxu1 %v25004_v59  ;;  %v25077_v58 = vld [vmem:[%s25505_s29 + $0x3110] ss:$148 sps:$4 sm:$0xff]   ;;  %v25080_v59 = vld [vmem:[%s25505_s29 + $0x3118] ss:$148 sps:$4 sm:$0xff]  }
 0x8b1   : > { %17311 = vmatpush1.bf16.msra.mxu0 %v24999_v60  ;;  %17475 = vmatpush1.bf16.msra.mxu1 %v25002_v62  ;;  %v25085_v60 = vld [vmem:[%s25505_s29 + $0x323c] ss:$148 sps:$4 sm:$0xff]   ;;  %v25088_v62 = vld [vmem:[%s25505_s29 + $0x3244] ss:$148 sps:$4 sm:$0xff]  }
 0x8b2   : > { %17312 = vmatprep.subr.bf16.mxu0 %v25007_v63  ;;  %17476 = vmatprep.subr.bf16.mxu1 %v25010_v0  ;;  %v25083_v63 = vld [vmem:[%s25505_s29 + $0x3238] ss:$148 sps:$4 sm:$0xff]   ;;  %v25086_v0 = vld [vmem:[%s25505_s29 + $0x3240] ss:$148 sps:$4 sm:$0xff]  }
 0x8b5   : > { %17313 = vmatpush1.bf16.msra.mxu0 %v25005_v1  ;;  %17477 = vmatpush1.bf16.msra.mxu1 %v25008_v2  ;;  %v25091_v1 = vld [vmem:[%s25505_s29 + $0x3364] ss:$148 sps:$4 sm:$0xff]   ;;  %v25094_v2 = vld [vmem:[%s25505_s29 + $0x336c] ss:$148 sps:$4 sm:$0xff]  }
 0x8b6   : > { %17314 = vmatprep.subr.bf16.mxu0 %v25013_v3  ;;  %17478 = vmatprep.subr.bf16.mxu1 %v25016_v4  ;;  %v25089_v3 = vld [vmem:[%s25505_s29 + $0x3360] ss:$148 sps:$4 sm:$0xff]   ;;  %v25092_v4 = vld [vmem:[%s25505_s29 + $0x3368] ss:$148 sps:$4 sm:$0xff]  }
 0x8b9   : > { %17315 = vmatpush1.bf16.msra.mxu0 %v25011_v5  ;;  %17479 = vmatpush1.bf16.msra.mxu1 %v25014_v6  ;;  %v25097_v5 = vld [vmem:[%s25505_s29 + $0x348c] ss:$148 sps:$4 sm:$0xff]   ;;  %v25100_v6 = vld [vmem:[%s25505_s29 + $0x3494] ss:$148 sps:$4 sm:$0xff]  }
 0x8ba   : > { %17325 = vmatprep.subr.bf16.mxu0 %v25019_v7  ;;  %17489 = vmatprep.subr.bf16.mxu1 %v25022_v8  ;;  %v25095_v7 = vld [vmem:[%s25505_s29 + $0x3488] ss:$148 sps:$4 sm:$0xff]   ;;  %v25098_v8 = vld [vmem:[%s25505_s29 + $0x3490] ss:$148 sps:$4 sm:$0xff]  }
 0x8bc   : > { %17317 = vmatmul.mubr.bf16.vlgmr.msra.gmra.mrb[32].mxu0 %v25686_v27  ;;  %17481 = vmatmul.mubr.bf16.vlgmr.msra.gmra.mrb[32].mxu1 %v25686_v27 }
 0x8bd   : > { %17326 = vmatpush1.bf16.msra.mxu0 %v25017_v9  ;;  %17490 = vmatpush1.bf16.msra.mxu1 %v25020_v10  ;;  %v25103_v9 = vld [vmem:[%s25505_s29 + $0x35b4] ss:$148 sps:$4 sm:$0xff]   ;;  %v25106_v10 = vld [vmem:[%s25505_s29 + $0x35bc] ss:$148 sps:$4 sm:$0xff]  }
 0x8be   : > { %17327 = vmatprep.subr.bf16.mxu0 %v25025_v11  ;;  %17491 = vmatprep.subr.bf16.mxu1 %v25028_v12  ;;  %v25101_v11 = vld [vmem:[%s25505_s29 + $0x35b0] ss:$148 sps:$4 sm:$0xff]   ;;  %v25104_v12 = vld [vmem:[%s25505_s29 + $0x35b8] ss:$148 sps:$4 sm:$0xff]  }
 0x8bf   : > { %17357 = vmatprep.mubr.bf16.mxu0 %v25610_v21  ;;  %17521 = vmatprep.mubr.bf16.mxu1 %v25610_v21 }
 0x8c1   : > { %17328 = vmatpush1.bf16.msra.mxu0 %v25023_v13  ;;  %17492 = vmatpush1.bf16.msra.mxu1 %v25026_v14  ;;  %v25109_v13 = vld [vmem:[%s25505_s29 + $0x36dc] ss:$148 sps:$4 sm:$0xff]   ;;  %v25112_v14 = vld [vmem:[%s25505_s29 + $0x36e4] ss:$148 sps:$4 sm:$0xff]  }
 0x8c2   : > { %17329 = vmatprep.subr.bf16.mxu0 %v25031_v15  ;;  %17493 = vmatprep.subr.bf16.mxu1 %v25034_v17  ;;  %v25107_v15 = vld [vmem:[%s25505_s29 + $0x36d8] ss:$148 sps:$4 sm:$0xff]   ;;  %v25110_v17 = vld [vmem:[%s25505_s29 + $0x36e0] ss:$148 sps:$4 sm:$0xff]  }
 0x8c5   : > { %17330 = vmatpush1.bf16.msra.mxu0 %v25029_v18  ;;  %17494 = vmatpush1.bf16.msra.mxu1 %v25032_v19  ;;  %v25115_v18 = vld [vmem:[%s25505_s29 + $0x3804] ss:$148 sps:$4 sm:$0xff]   ;;  %v25118_v19 = vld [vmem:[%s25505_s29 + $0x380c] ss:$148 sps:$4 sm:$0xff]  }
 0x8c6   : > { %17331 = vmatprep.subr.bf16.mxu0 %v25037_v20  ;;  %17495 = vmatprep.subr.bf16.mxu1 %v25040_v24  ;;  %v25113_v20 = vld [vmem:[%s25505_s29 + $0x3800] ss:$148 sps:$4 sm:$0xff]   ;;  %v25116_v24 = vld [vmem:[%s25505_s29 + $0x3808] ss:$148 sps:$4 sm:$0xff]  }
 0x8c9   : > { %17332 = vmatpush1.bf16.msra.mxu0 %v25035_v25  ;;  %17496 = vmatpush1.bf16.msra.mxu1 %v25038_v26  ;;  %v25121_v25 = vld [vmem:[%s25505_s29 + $0x392c] ss:$148 sps:$4 sm:$0xff]   ;;  %v25124_v26 = vld [vmem:[%s25505_s29 + $0x3934] ss:$148 sps:$4 sm:$0xff]  }
 0x8ca   : > { %17333 = vmatprep.subr.bf16.mxu0 %v25043_v28  ;;  %17497 = vmatprep.subr.bf16.mxu1 %v25046_v29  ;;  %v25119_v28 = vld [vmem:[%s25505_s29 + $0x3928] ss:$148 sps:$4 sm:$0xff]   ;;  %v25122_v29 = vld [vmem:[%s25505_s29 + $0x3930] ss:$148 sps:$4 sm:$0xff]  }
 0x8cd   : > { %17334 = vmatpush1.bf16.msra.mxu0 %v25041_v30  ;;  %17498 = vmatpush1.bf16.msra.mxu1 %v25044_v31  ;;  %v25127_v30 = vld [vmem:[%s25505_s29 + $0x3a54] ss:$148 sps:$4 sm:$0xff]   ;;  %v25130_v31 = vld [vmem:[%s25505_s29 + $0x3a5c] ss:$148 sps:$4 sm:$0xff]  }
 0x8ce   : > { %17335 = vmatprep.subr.bf16.mxu0 %v25049_v32  ;;  %17499 = vmatprep.subr.bf16.mxu1 %v25052_v33  ;;  %v25125_v32 = vld [vmem:[%s25505_s29 + $0x3a50] ss:$148 sps:$4 sm:$0xff]   ;;  %v25128_v33 = vld [vmem:[%s25505_s29 + $0x3a58] ss:$148 sps:$4 sm:$0xff]  }
 0x8d1   : > { %17336 = vmatpush1.bf16.msra.mxu0 %v25047_v34  ;;  %17500 = vmatpush1.bf16.msra.mxu1 %v25050_v35  ;;  %v25133_v34 = vld [vmem:[%s25505_s29 + $0x3b7c] ss:$148 sps:$4 sm:$0xff]   ;;  %v25136_v35 = vld [vmem:[%s25505_s29 + $0x3b84] ss:$148 sps:$4 sm:$0xff]  }
 0x8d2   : > { %17337 = vmatprep.subr.bf16.mxu0 %v25055_v36  ;;  %17501 = vmatprep.subr.bf16.mxu1 %v25058_v37  ;;  %v25131_v36 = vld [vmem:[%s25505_s29 + $0x3b78] ss:$148 sps:$4 sm:$0xff]   ;;  %v25134_v37 = vld [vmem:[%s25505_s29 + $0x3b80] ss:$148 sps:$4 sm:$0xff]  }
 0x8d5   : > { %17338 = vmatpush1.bf16.msra.mxu0 %v25053_v39  ;;  %17502 = vmatpush1.bf16.msra.mxu1 %v25056_v40  ;;  %v25139_v39 = vld [vmem:[%s25505_s29 + $0x3ca4] ss:$148 sps:$4 sm:$0xff]   ;;  %v25142_v40 = vld [vmem:[%s25505_s29 + $0x3cac] ss:$148 sps:$4 sm:$0xff]  }
 0x8d6   : > { %17339 = vmatprep.subr.bf16.mxu0 %v25061_v41  ;;  %17503 = vmatprep.subr.bf16.mxu1 %v25064_v42  ;;  %v25137_v41 = vld [vmem:[%s25505_s29 + $0x3ca0] ss:$148 sps:$4 sm:$0xff]   ;;  %v25140_v42 = vld [vmem:[%s25505_s29 + $0x3ca8] ss:$148 sps:$4 sm:$0xff]  }
 0x8d9   : > { %17340 = vmatpush1.bf16.msra.mxu0 %v25059_v45  ;;  %17504 = vmatpush1.bf16.msra.mxu1 %v25062_v47  ;;  %v25145_v45 = vld [vmem:[%s25505_s29 + $0x3dcc] ss:$148 sps:$4 sm:$0xff]   ;;  %v25148_v47 = vld [vmem:[%s25505_s29 + $0x3dd4] ss:$148 sps:$4 sm:$0xff]  }
 0x8da   : > { %17341 = vmatprep.subr.bf16.mxu0 %v25067_v48  ;;  %17505 = vmatprep.subr.bf16.mxu1 %v25070_v49  ;;  %v25143_v48 = vld [vmem:[%s25505_s29 + $0x3dc8] ss:$148 sps:$4 sm:$0xff]   ;;  %v25146_v49 = vld [vmem:[%s25505_s29 + $0x3dd0] ss:$148 sps:$4 sm:$0xff]  }
 0x8dd   : > { %17342 = vmatpush1.bf16.msra.mxu0 %v25065_v50  ;;  %17506 = vmatpush1.bf16.msra.mxu1 %v25068_v51  ;;  %v25151_v50 = vld [vmem:[%s25505_s29 + $0x3ef4] ss:$148 sps:$4 sm:$0xff]   ;;  %v25154_v51 = vld [vmem:[%s25505_s29 + $0x3efc] ss:$148 sps:$4 sm:$0xff]  }
 0x8de   : > { %17343 = vmatprep.subr.bf16.mxu0 %v25073_v52  ;;  %17507 = vmatprep.subr.bf16.mxu1 %v25076_v53 }
 0x8e1   : > { %17344 = vmatpush1.bf16.msra.mxu0 %v25071_v54  ;;  %17508 = vmatpush1.bf16.msra.mxu1 %v25074_v55 }
 0x8e2   : > { %17345 = vmatprep.subr.bf16.mxu0 %v25079_v56  ;;  %17509 = vmatprep.subr.bf16.mxu1 %v25082_v57 }
 0x8e5   : > { %17346 = vmatpush1.bf16.msra.mxu0 %v25077_v58  ;;  %17510 = vmatpush1.bf16.msra.mxu1 %v25080_v59 }
 0x8e6   : > { %17347 = vmatprep.subr.bf16.mxu0 %v25085_v60  ;;  %17511 = vmatprep.subr.bf16.mxu1 %v25088_v62  ;;  %v25149_v60 = vld [vmem:[%s25505_s29 + $0x3ef0] ss:$148 sps:$4 sm:$0xff]   ;;  %v25152_v62 = vld [vmem:[%s25505_s29 + $0x3ef8] ss:$148 sps:$4 sm:$0xff]  }
 0x8e9   : > { %17348 = vmatpush1.bf16.msra.mxu0 %v25083_v63  ;;  %17512 = vmatpush1.bf16.msra.mxu1 %v25086_v0 }
 0x8ea   : > { %17349 = vmatprep.subr.bf16.mxu0 %v25091_v1  ;;  %17513 = vmatprep.subr.bf16.mxu1 %v25094_v2  ;;  %v25157_v1 = vld [vmem:[%s25505_s29 + $0x401c] ss:$148 sps:$4 sm:$0xff]   ;;  %v25160_v2 = vld [vmem:[%s25505_s29 + $0x4024] ss:$148 sps:$4 sm:$0xff]  }
 0x8ed   : > { %17350 = vmatpush1.bf16.msra.mxu0 %v25089_v3  ;;  %17514 = vmatpush1.bf16.msra.mxu1 %v25092_v4 }
 0x8ee   : > { %17351 = vmatprep.subr.bf16.mxu0 %v25097_v5  ;;  %17515 = vmatprep.subr.bf16.mxu1 %v25100_v6  ;;  %v221_v5 = vld [vmem:[#allocation2 + $0x38] sm:$0xff] }
 0x8f1   : > { %17352 = vmatpush1.bf16.msra.mxu0 %v25095_v7  ;;  %17516 = vmatpush1.bf16.msra.mxu1 %v25098_v8  ;;  %v25155_v7 = vld [vmem:[%s25505_s29 + $0x4018] ss:$148 sps:$4 sm:$0xff]   ;;  %v25158_v8 = vld [vmem:[%s25505_s29 + $0x4020] ss:$148 sps:$4 sm:$0xff]  }
 0x8f2   : > { %17353 = vmatprep.subr.bf16.mxu0 %v25103_v9  ;;  %17517 = vmatprep.subr.bf16.mxu1 %v25106_v10  ;;  %v25163_v9 = vld [vmem:[%s25505_s29 + $0x4144] ss:$148 sps:$4 sm:$0xff]   ;;  %v25166_v10 = vld [vmem:[%s25505_s29 + $0x414c] ss:$148 sps:$4 sm:$0xff]  }
 0x8f5   : > { %17354 = vmatpush1.bf16.msra.mxu0 %v25101_v11  ;;  %17518 = vmatpush1.bf16.msra.mxu1 %v25104_v12  ;;  %v25161_v12 = vld [vmem:[%s25505_s29 + $0x4140] ss:$148 sps:$4 sm:$0xff]  }
 0x8f6   : > { %17355 = vmatprep.subr.bf16.mxu0 %v25109_v13  ;;  %17519 = vmatprep.subr.bf16.mxu1 %v25112_v14  ;;  %v25164_v13 = vld [vmem:[%s25505_s29 + $0x4148] ss:$148 sps:$4 sm:$0xff]   ;;  %v25169_v14 = vld [vmem:[%s25505_s29 + $0x426c] ss:$148 sps:$4 sm:$0xff]  }
 0x8f9   : > { %17356 = vmatpush1.bf16.msra.mxu0 %v25107_v15  ;;  %17520 = vmatpush1.bf16.msra.mxu1 %v25110_v17  ;;  %v25172_v15 = vld [vmem:[%s25505_s29 + $0x4274] ss:$148 sps:$4 sm:$0xff]  }
 0x8fa   : > { %17366 = vmatprep.subr.bf16.mxu0 %v25115_v18  ;;  %17530 = vmatprep.subr.bf16.mxu1 %v25118_v19  ;;  %v25167_v17 = vld [vmem:[%s25505_s29 + $0x4268] ss:$148 sps:$4 sm:$0xff]   ;;  %v25170_v18 = vld [vmem:[%s25505_s29 + $0x4270] ss:$148 sps:$4 sm:$0xff]  }
 0x8fb   : > { %v25175_v19 = vld [vmem:[%s25505_s29 + $0x4394] ss:$148 sps:$4 sm:$0xff]  }
 0x8fc   : > { %17358 = vmatmul.mubr.bf16.vlgmr.msra.gmra.mrb[32].mxu0 %v25613_v22  ;;  %17522 = vmatmul.mubr.bf16.vlgmr.msra.gmra.mrb[32].mxu1 %v25613_v22 }
 0x8fd   : > { %17367 = vmatpush1.bf16.msra.mxu0 %v25113_v20  ;;  %17531 = vmatpush1.bf16.msra.mxu1 %v25116_v24  ;;  %v25178_v20 = vld [vmem:[%s25505_s29 + $0x439c] ss:$148 sps:$4 sm:$0xff]  }
 0x8fe   : > { %17368 = vmatprep.subr.bf16.mxu0 %v25121_v25  ;;  %17532 = vmatprep.subr.bf16.mxu1 %v25124_v26  ;;  %v25173_v24 = vld [vmem:[%s25505_s29 + $0x4390] ss:$148 sps:$4 sm:$0xff]   ;;  %v25176_v25 = vld [vmem:[%s25505_s29 + $0x4398] ss:$148 sps:$4 sm:$0xff]  }
 0x8ff   : > { %17398 = vmatprep.mubr.bf16.mxu0 %v25761_v38  ;;  %17562 = vmatprep.mubr.bf16.mxu1 %v25761_v38  ;;  %v25181_v26 = vld [vmem:[%s25505_s29 + $0x44bc] ss:$148 sps:$4 sm:$0xff]  }
 0x901   : > { %17369 = vmatpush1.bf16.msra.mxu0 %v25119_v28  ;;  %17533 = vmatpush1.bf16.msra.mxu1 %v25122_v29  ;;  %v25184_v28 = vld [vmem:[%s25505_s29 + $0x44c4] ss:$148 sps:$4 sm:$0xff]  }
 0x902   : > { %17370 = vmatprep.subr.bf16.mxu0 %v25127_v30  ;;  %17534 = vmatprep.subr.bf16.mxu1 %v25130_v31  ;;  %v25179_v29 = vld [vmem:[%s25505_s29 + $0x44b8] ss:$148 sps:$4 sm:$0xff]   ;;  %v25182_v30 = vld [vmem:[%s25505_s29 + $0x44c0] ss:$148 sps:$4 sm:$0xff]  }
 0x903   : > { %v25187_v31 = vld [vmem:[%s25505_s29 + $0x45e4] ss:$148 sps:$4 sm:$0xff]  }
 0x905   : > { %17371 = vmatpush1.bf16.msra.mxu0 %v25125_v32  ;;  %17535 = vmatpush1.bf16.msra.mxu1 %v25128_v33  ;;  %v25190_v32 = vld [vmem:[%s25505_s29 + $0x45ec] ss:$148 sps:$4 sm:$0xff]  }
 0x906   : > { %17372 = vmatprep.subr.bf16.mxu0 %v25133_v34  ;;  %17536 = vmatprep.subr.bf16.mxu1 %v25136_v35  ;;  %v25185_v33 = vld [vmem:[%s25505_s29 + $0x45e0] ss:$148 sps:$4 sm:$0xff]   ;;  %v25188_v34 = vld [vmem:[%s25505_s29 + $0x45e8] ss:$148 sps:$4 sm:$0xff]  }
 0x907   : > { %v25193_v35 = vld [vmem:[%s25505_s29 + $0x470c] ss:$148 sps:$4 sm:$0xff]  }
 0x909   : > { %17373 = vmatpush1.bf16.msra.mxu0 %v25131_v36  ;;  %17537 = vmatpush1.bf16.msra.mxu1 %v25134_v37  ;;  %v25196_v36 = vld [vmem:[%s25505_s29 + $0x4714] ss:$148 sps:$4 sm:$0xff]  }
 0x90a   : > { %17374 = vmatprep.subr.bf16.mxu0 %v25139_v39  ;;  %17538 = vmatprep.subr.bf16.mxu1 %v25142_v40  ;;  %v25191_v37 = vld [vmem:[%s25505_s29 + $0x4708] ss:$148 sps:$4 sm:$0xff]   ;;  %v25194_v39 = vld [vmem:[%s25505_s29 + $0x4710] ss:$148 sps:$4 sm:$0xff]  }
 0x90b   : > { %v25199_v40 = vld [vmem:[%s25505_s29 + $0x4834] ss:$148 sps:$4 sm:$0xff]  }
 0x90d   : > { %17375 = vmatpush1.bf16.msra.mxu0 %v25137_v41  ;;  %17539 = vmatpush1.bf16.msra.mxu1 %v25140_v42  ;;  %v25202_v41 = vld [vmem:[%s25505_s29 + $0x483c] ss:$148 sps:$4 sm:$0xff]  }
 0x90e   : > { %17376 = vmatprep.subr.bf16.mxu0 %v25145_v45  ;;  %17540 = vmatprep.subr.bf16.mxu1 %v25148_v47  ;;  %v25197_v42 = vld [vmem:[%s25505_s29 + $0x4830] ss:$148 sps:$4 sm:$0xff]   ;;  %v25200_v45 = vld [vmem:[%s25505_s29 + $0x4838] ss:$148 sps:$4 sm:$0xff]  }
 0x90f   : > { %v17072_v52 = vpop.f32.mrb[28].mxu0  ;;  %v17236_v53 = vpop.f32.mrb[28].mxu1  ;;  %v25205_v47 = vld [vmem:[%s25505_s29 + $0x495c] ss:$148 sps:$4 sm:$0xff]  }
 0x910   : > { %v17074_v54 = vpop.f32.mrb[29].mxu0  ;;  %v17238_v55 = vpop.f32.mrb[29].mxu1 }
 0x911   : > { %v17887_v56 = vcombine.low %v17072_v52, %v17074_v54  ;;  %v17888_v57 = vcombine.low %v17236_v53, %v17238_v55  ;;  %v17076_v58 = vpop.f32.mrb[30].mxu0  ;;  %v17240_v59 = vpop.f32.mrb[30].mxu1  ;;  %17377 = vmatpush1.bf16.msra.mxu0 %v25143_v48  ;;  %17541 = vmatpush1.bf16.msra.mxu1 %v25146_v49  ;;  %v25208_v48 = vld [vmem:[%s25505_s29 + $0x4964] ss:$148 sps:$4 sm:$0xff]  }
 0x912   : > { %v17077_v63 = vpop.f32.mrb[31].mxu0  ;;  %v17241_v0 = vpop.f32.mrb[31].mxu1  ;;  %17378 = vmatprep.subr.bf16.mxu0 %v25151_v50  ;;  %17542 = vmatprep.subr.bf16.mxu1 %v25154_v51  ;;  %v25203_v49 = vld [vmem:[%s25505_s29 + $0x4958] ss:$148 sps:$4 sm:$0xff]   ;;  %v25206_v50 = vld [vmem:[%s25505_s29 + $0x4960] ss:$148 sps:$4 sm:$0xff]  }
 0x913   : > { %v17895_v3 = vrot.slane %v17887_v56, %v26064_v46  ;;  %v17902_v4 = vrot.slane %v17888_v57, %v26064_v46  ;;  %v25209_v51 = vld [vmem:[%s25505_s29 + $0x9d0] ss:$148 sps:$4 sm:$0xff]   ;;  %v25213_v55 = vld [vmem:[%s25505_s29 + $0xaf8] ss:$148 sps:$4 sm:$0xff]   ;;  %v25217_v59 = vld [vmem:[%s25505_s29 + $0xc20] ss:$148 sps:$4 sm:$0xff]  }
 0x914   : > { %v25210_v52 = vld [vmem:[%s25505_s29 + $0x1c50] ss:$148 sps:$4 sm:$0xff]   ;;  %v25214_v56 = vld [vmem:[%s25505_s29 + $0x1d78] ss:$148 sps:$4 sm:$0xff]   ;;  %v25220_v63 = vld [vmem:[%s25505_s29 + $0x1560] ss:$148 sps:$4 sm:$0xff]  }
 0x915   : > { %v17903_v6 = vcombine.low %v17895_v3, %v17902_v4  ;;  %17379 = vmatpush1.bf16.msra.mxu0 %v25149_v60  ;;  %17543 = vmatpush1.bf16.msra.mxu1 %v25152_v62  ;;  %v25211_v53 = vld [vmem:[%s25505_s29 + $0x90] ss:$148 sps:$4 sm:$0xff]   ;;  %v25215_v57 = vld [vmem:[%s25505_s29 + $0x1b8] ss:$148 sps:$4 sm:$0xff]   ;;  %v25218_v60 = vld [vmem:[%s25505_s29 + $0x1ea0] ss:$148 sps:$4 sm:$0xff]  }
 0x916   : > { %17380 = vmatprep.subr.bf16.mxu0 %v25157_v1  ;;  %17544 = vmatprep.subr.bf16.mxu1 %v25160_v2  ;;  %v25212_v54 = vld [vmem:[%s25505_s29 + $0x1310] ss:$148 sps:$4 sm:$0xff]   ;;  %v25216_v58 = vld [vmem:[%s25505_s29 + $0x1438] ss:$148 sps:$4 sm:$0xff]   ;;  %v25219_v62 = vld [vmem:[%s25505_s29 + $0x2e0] ss:$148 sps:$4 sm:$0xff]  }
 0x917   : > { %v17945_v11 = vadd.f32 %v17903_v6, %v221_v5  ;;  %v25221_v0 = vld [vmem:[%s25505_s29 + $0xd48] ss:$148 sps:$4 sm:$0xff]   ;;  %v25226_v3 = vld [vmem:[%s25505_s29 + $0x20f0] ss:$148 sps:$4 sm:$0xff]   ;;  %v25229_v6 = vld [vmem:[%s25505_s29 + $0xf98] ss:$148 sps:$4 sm:$0xff]  }
 0x918   : > { %v25222_v1 = vld [vmem:[%s25505_s29 + $0x1fc8] ss:$148 sps:$4 sm:$0xff]   ;;  %v25227_v4 = vld [vmem:[%s25505_s29 + $0x530] ss:$148 sps:$4 sm:$0xff]  }
 0x919   : > { %17955 = vst [vmem:[#allocation2 + $0x38] sm:$0xff] %v17945_v11  ;;  %17381 = vmatpush1.bf16.msra.mxu0 %v25155_v7  ;;  %17545 = vmatpush1.bf16.msra.mxu1 %v25158_v8  ;;  %v25223_v2 = vld [vmem:[%s25505_s29 + $0x408] ss:$148 sps:$4 sm:$0xff]   ;;  %v25228_v5 = vld [vmem:[%s25505_s29 + $0x17b0] ss:$148 sps:$4 sm:$0xff]  }
 0x91a   : > { %17382 = vmatprep.subr.bf16.mxu0 %v25163_v9  ;;  %17546 = vmatprep.subr.bf16.mxu1 %v25166_v10  ;;  %v25230_v7 = vld [vmem:[%s25505_s29 + $0x2218] ss:$148 sps:$4 sm:$0xff]   ;;  %v25233_v10 = vld [vmem:[%s25505_s29 + $0x10c0] ss:$148 sps:$4 sm:$0xff]  }
 0x91b   : > { %v25231_v8 = vld [vmem:[%s25505_s29 + $0x658] ss:$148 sps:$4 sm:$0xff]   ;;  %v25234_v11 = vld [vmem:[%s25505_s29 + $0x2340] ss:$148 sps:$4 sm:$0xff]  }
 0x91c   : > { %v25232_v9 = vld [vmem:[%s25505_s29 + $0x18d8] ss:$148 sps:$4 sm:$0xff]  }
 0x91d   : > { %17383 = vmatpush1.bf16.msra.mxu0 %v25161_v12  ;;  %17547 = vmatpush1.bf16.msra.mxu1 %v25164_v13  ;;  %v25235_v12 = vld [vmem:[%s25505_s29 + $0x780] ss:$148 sps:$4 sm:$0xff]  }
 0x91e   : > { %17384 = vmatprep.subr.bf16.mxu0 %v25169_v14  ;;  %17548 = vmatprep.subr.bf16.mxu1 %v25172_v15  ;;  %v25236_v13 = vld [vmem:[%s25505_s29 + $0x1a00] ss:$148 sps:$4 sm:$0xff]   ;;  %v25237_v14 = vld [vmem:[%s25505_s29 + $0x11e8] ss:$148 sps:$4 sm:$0xff]  }
 0x91f   : > { %v25238_v15 = vld [vmem:[%s25505_s29 + $0x2468] ss:$148 sps:$4 sm:$0xff]  }
 0x921   : > { %17385 = vmatpush1.bf16.msra.mxu0 %v25167_v17  ;;  %17549 = vmatpush1.bf16.msra.mxu1 %v25170_v18  ;;  %v25239_v17 = vld [vmem:[%s25505_s29 + $0x8a8] ss:$148 sps:$4 sm:$0xff]  }
 0x922   : > { %17386 = vmatprep.subr.bf16.mxu0 %v25175_v19  ;;  %17550 = vmatprep.subr.bf16.mxu1 %v25178_v20  ;;  %v25240_v18 = vld [vmem:[%s25505_s29 + $0x1b28] ss:$148 sps:$4 sm:$0xff]   ;;  %v25241_v19 = vld [vmem:[%s25505_s29 + $0x2ed0] ss:$148 sps:$4 sm:$0xff]  }
 0x923   : > { %v25242_v20 = vld [vmem:[%s25505_s29 + $0x4150] ss:$148 sps:$4 sm:$0xff]  }
 0x925   : > { %17387 = vmatpush1.bf16.msra.mxu0 %v25173_v24  ;;  %17551 = vmatpush1.bf16.msra.mxu1 %v25176_v25  ;;  %v25243_v24 = vld [vmem:[%s25505_s29 + $0x2590] ss:$148 sps:$4 sm:$0xff]  }
 0x926   : > { %17388 = vmatprep.subr.bf16.mxu0 %v25181_v26  ;;  %17552 = vmatprep.subr.bf16.mxu1 %v25184_v28  ;;  %v25244_v25 = vld [vmem:[%s25505_s29 + $0x3810] ss:$148 sps:$4 sm:$0xff]   ;;  %v25245_v26 = vld [vmem:[%s25505_s29 + $0x2ff8] ss:$148 sps:$4 sm:$0xff]  }
 0x927   : > { %v25246_v28 = vld [vmem:[%s25505_s29 + $0x4278] ss:$148 sps:$4 sm:$0xff]  }
 0x929   : > { %17389 = vmatpush1.bf16.msra.mxu0 %v25179_v29  ;;  %17553 = vmatpush1.bf16.msra.mxu1 %v25182_v30  ;;  %v25247_v29 = vld [vmem:[%s25505_s29 + $0x26b8] ss:$148 sps:$4 sm:$0xff]  }
 0x92a   : > { %17390 = vmatprep.subr.bf16.mxu0 %v25187_v31  ;;  %17554 = vmatprep.subr.bf16.mxu1 %v25190_v32  ;;  %v25248_v30 = vld [vmem:[%s25505_s29 + $0x3938] ss:$148 sps:$4 sm:$0xff]   ;;  %v25249_v31 = vld [vmem:[%s25505_s29 + $0x3120] ss:$148 sps:$4 sm:$0xff]  }
 0x92b   : > { %v25250_v32 = vld [vmem:[%s25505_s29 + $0x43a0] ss:$148 sps:$4 sm:$0xff]  }
 0x92d   : > { %17391 = vmatpush1.bf16.msra.mxu0 %v25185_v33  ;;  %17555 = vmatpush1.bf16.msra.mxu1 %v25188_v34  ;;  %v25253_v33 = vld [vmem:[%s25505_s29 + $0x3248] ss:$148 sps:$4 sm:$0xff]  }
 0x92e   : > { %17392 = vmatprep.subr.bf16.mxu0 %v25193_v35  ;;  %17556 = vmatprep.subr.bf16.mxu1 %v25196_v36  ;;  %v25254_v34 = vld [vmem:[%s25505_s29 + $0x44c8] ss:$148 sps:$4 sm:$0xff]   ;;  %v25258_v36 = vld [vmem:[%s25505_s29 + $0x45f0] ss:$148 sps:$4 sm:$0xff]  }
 0x92f   : > { %v25255_v35 = vld [vmem:[%s25505_s29 + $0x2908] ss:$148 sps:$4 sm:$0xff]  }
 0x931   : > { %17393 = vmatpush1.bf16.msra.mxu0 %v25191_v37  ;;  %17557 = vmatpush1.bf16.msra.mxu1 %v25194_v39  ;;  %v25259_v37 = vld [vmem:[%s25505_s29 + $0x2a30] ss:$148 sps:$4 sm:$0xff]  }
 0x932   : > { %17394 = vmatprep.subr.bf16.mxu0 %v25199_v40  ;;  %17558 = vmatprep.subr.bf16.mxu1 %v25202_v41  ;;  %v25260_v39 = vld [vmem:[%s25505_s29 + $0x3cb0] ss:$148 sps:$4 sm:$0xff]   ;;  %v25261_v40 = vld [vmem:[%s25505_s29 + $0x3498] ss:$148 sps:$4 sm:$0xff]  }
 0x933   : > { %v25262_v41 = vld [vmem:[%s25505_s29 + $0x4718] ss:$148 sps:$4 sm:$0xff]  }
 0x935   : > { %17395 = vmatpush1.bf16.msra.mxu0 %v25197_v42  ;;  %17559 = vmatpush1.bf16.msra.mxu1 %v25200_v45  ;;  %v25263_v42 = vld [vmem:[%s25505_s29 + $0x2b58] ss:$148 sps:$4 sm:$0xff]  }
 0x936   : > { %17396 = vmatprep.subr.bf16.mxu0 %v25205_v47  ;;  %17560 = vmatprep.subr.bf16.mxu1 %v25208_v48  ;;  %v25264_v45 = vld [vmem:[%s25505_s29 + $0x3dd8] ss:$148 sps:$4 sm:$0xff]   ;;  %v25265_v47 = vld [vmem:[%s25505_s29 + $0x35c0] ss:$148 sps:$4 sm:$0xff]  }
 0x937   : > { %v25266_v48 = vld [vmem:[%s25505_s29 + $0x4840] ss:$148 sps:$4 sm:$0xff]  }
 0x939   : > { %17397 = vmatpush1.bf16.msra.mxu0 %v25203_v49  ;;  %17561 = vmatpush1.bf16.msra.mxu1 %v25206_v50  ;;  %v25267_v49 = vld [vmem:[%s25505_s29 + $0x2c80] ss:$148 sps:$4 sm:$0xff]  }
 0x93a   : > { %21393 = vmatprep.subr.bf16.mxu0 %v25209_v51  ;;  %21415 = vmatprep.subr.bf16.mxu1 %v25210_v52  ;;  %v25268_v50 = vld [vmem:[%s25505_s29 + $0x3f00] ss:$148 sps:$4 sm:$0xff]   ;;  %v25269_v51 = vld [vmem:[%s25505_s29 + $0x36e8] ss:$148 sps:$4 sm:$0xff]  }
 0x93b   : > { %v25270_v52 = vld [vmem:[%s25505_s29 + $0x4968] ss:$148 sps:$4 sm:$0xff]  }
 0x93c   : > { %17399 = vmatmul.mubr.bf16.vlgmr.msra.gmra.mrb[32].mxu0 %v25829_v43  ;;  %17563 = vmatmul.mubr.bf16.vlgmr.msra.gmra.mrb[32].mxu1 %v25829_v43 }
 0x93d   : > { %21394 = vmatpush3.bf16.msra.mxu0 %v25211_v53  ;;  %21416 = vmatpush3.bf16.msra.mxu1 %v25212_v54  ;;  %v25271_v53 = vld [vmem:[%s25505_s29 + $0x2da8] ss:$148 sps:$4 sm:$0xff]  }
 0x93e   : > { %21395 = vmatprep.subr.bf16.mxu0 %v25213_v55  ;;  %21417 = vmatprep.subr.bf16.mxu1 %v25214_v56  ;;  %v25272_v54 = vld [vmem:[%s25505_s29 + $0x4028] ss:$148 sps:$4 sm:$0xff]  }
 0x93f   : > { %17603 = vmatprep.mubr.bf16.mxu0 %v25582_v61  ;;  %17643 = vmatprep.mubr.bf16.mxu1 %v25617_v23  ;;  %v25224_v61 = vld [vmem:[%s25505_s29 + $0x1688] ss:$148 sps:$4 sm:$0xff]   ;;  %v25225_v23 = vld [vmem:[%s25505_s29 + $0xe70] ss:$148 sps:$4 sm:$0xff]  }
 0x941   : > { %21396 = vmatpush3.bf16.msra.mxu0 %v25215_v57  ;;  %21418 = vmatpush3.bf16.msra.mxu1 %v25216_v58 }
 0x942   : > { %21397 = vmatprep.subr.bf16.mxu0 %v25217_v59  ;;  %21419 = vmatprep.subr.bf16.mxu1 %v25218_v60 }
 0x945   : > { %21398 = vmatpush3.bf16.msra.mxu0 %v25219_v62  ;;  %21420 = vmatpush3.bf16.msra.mxu1 %v25220_v63 }
 0x946   : > { %21399 = vmatprep.subr.bf16.mxu0 %v25221_v0  ;;  %21421 = vmatprep.subr.bf16.mxu1 %v25222_v1 }
 0x949   : > { %21400 = vmatpush3.bf16.msra.mxu0 %v25223_v2  ;;  %21422 = vmatpush3.bf16.msra.mxu1 %v25224_v61 }
 0x94a   : > { %21401 = vmatprep.subr.bf16.mxu0 %v25225_v23  ;;  %21423 = vmatprep.subr.bf16.mxu1 %v25226_v3  ;;  %v222_v23 = vld [vmem:[#allocation2 + $0x40] sm:$0xff] }
 0x94d   : > { %21402 = vmatpush3.bf16.msra.mxu0 %v25227_v4  ;;  %21424 = vmatpush3.bf16.msra.mxu1 %v25228_v5 }
 0x94e   : > { %21403 = vmatprep.subr.bf16.mxu0 %v25229_v6  ;;  %21425 = vmatprep.subr.bf16.mxu1 %v25230_v7 }
 0x951   : > { %21404 = vmatpush3.bf16.msra.mxu0 %v25231_v8  ;;  %21426 = vmatpush3.bf16.msra.mxu1 %v25232_v9 }
 0x952   : > { %21405 = vmatprep.subr.bf16.mxu0 %v25233_v10  ;;  %21427 = vmatprep.subr.bf16.mxu1 %v25234_v11 }
 0x955   : > { %21406 = vmatpush3.bf16.msra.mxu0 %v25235_v12  ;;  %21428 = vmatpush3.bf16.msra.mxu1 %v25236_v13 }
 0x956   : > { %21407 = vmatprep.subr.bf16.mxu0 %v25237_v14  ;;  %21429 = vmatprep.subr.bf16.mxu1 %v25238_v15 }
 0x959   : > { %21408 = vmatpush3.bf16.msra.mxu0 %v25239_v17  ;;  %21430 = vmatpush3.bf16.msra.mxu1 %v25240_v18 }
 0x95a   : > { %21437 = vmatprep.subr.bf16.mxu0 %v25241_v19  ;;  %21459 = vmatprep.subr.bf16.mxu1 %v25242_v20 }
 0x95c   : > { %17604 = vmatmul.mubr.bf16.vlgmr.msra.gmra.mrb[36].mxu0 %v25604_v16  ;;  %17644 = vmatmul.mubr.bf16.vlgmr.msra.gmra.mrb[36].mxu1 %v25686_v27  ;;  %v25251_v16 = vld [vmem:[%s25505_s29 + $0x27e0] ss:$148 sps:$4 sm:$0xff]  }
 0x95d   : > { %21438 = vmatpush3.bf16.msra.mxu0 %v25243_v24  ;;  %21460 = vmatpush3.bf16.msra.mxu1 %v25244_v25  ;;  %v25252_v27 = vld [vmem:[%s25505_s29 + $0x3a60] ss:$148 sps:$4 sm:$0xff]  }
 0x95e   : > { %21439 = vmatprep.subr.bf16.mxu0 %v25245_v26  ;;  %21461 = vmatprep.subr.bf16.mxu1 %v25246_v28 }
 0x95f   : > { %17683 = vmatprep.mubr.bf16.mxu0 %v25610_v21  ;;  %17723 = vmatprep.mubr.bf16.mxu1 %v25761_v38  ;;  %v25256_v21 = vld [vmem:[%s25505_s29 + $0x3b88] ss:$148 sps:$4 sm:$0xff]   ;;  %v25257_v38 = vld [vmem:[%s25505_s29 + $0x3370] ss:$148 sps:$4 sm:$0xff]  }
 0x961   : > { %21440 = vmatpush3.bf16.msra.mxu0 %v25247_v29  ;;  %21462 = vmatpush3.bf16.msra.mxu1 %v25248_v30 }
 0x962   : > { %21441 = vmatprep.subr.bf16.mxu0 %v25249_v31  ;;  %21463 = vmatprep.subr.bf16.mxu1 %v25250_v32  ;;  %v223_v31 = vld [vmem:[#allocation2 + $0x48] sm:$0x3] }
 0x965   : > { %21442 = vmatpush3.bf16.msra.mxu0 %v25251_v16  ;;  %21464 = vmatpush3.bf16.msra.mxu1 %v25252_v27  ;;  %v28104_v27 = vsub.s32 (!%p21388_p7), 0, %v25558_v44 }
 0x966   : > { %21443 = vmatprep.subr.bf16.mxu0 %v25253_v33  ;;  %21465 = vmatprep.subr.bf16.mxu1 %v25254_v34  ;;  %v28107_v33 = vsub.s32 (!%p21388_p7), 1, %v25558_v44  ;;  %v28110_v34 = vsub.s32 (!%p21388_p7), 2, %v25558_v44 }
 0x969   : > { %21444 = vmatpush3.bf16.msra.mxu0 %v25255_v35  ;;  %21466 = vmatpush3.bf16.msra.mxu1 %v25256_v21  ;;  %v28113_v35 = vsub.s32 (!%p21388_p7), 3, %v25558_v44  ;;  %v28116_v21 = vsub.s32 (!%p21388_p7), 4, %v25558_v44 }
 0x96a   : > { %21445 = vmatprep.subr.bf16.mxu0 %v25257_v38  ;;  %21467 = vmatprep.subr.bf16.mxu1 %v25258_v36  ;;  %v28119_v38 = vsub.s32 (!%p21388_p7), 5, %v25558_v44  ;;  %v28122_v36 = vsub.s32 (!%p21388_p7), 6, %v25558_v44 }
 0x96d   : > { %21446 = vmatpush3.bf16.msra.mxu0 %v25259_v37  ;;  %21468 = vmatpush3.bf16.msra.mxu1 %v25260_v39  ;;  %v28125_v37 = vsub.s32 (!%p21388_p7), 7, %v25558_v44  ;;  %v17973_v39 = vld [vmem:[%s28527_s2] sm:$0xff] (!%p21388_p7) }
 0x96e   : > { %21447 = vmatprep.subr.bf16.mxu0 %v25261_v40  ;;  %21469 = vmatprep.subr.bf16.mxu1 %v25262_v41  ;;  %v17974_v40 = vld [vmem:[%s28527_s2 + $0x8] sm:$0xff] (!%p21388_p7)  ;;  %v17986_v41 = vrot.slane (!%p21388_p7), %v17973_v39, %v28104_v27 }
 0x971   : > { %21448 = vmatpush3.bf16.msra.mxu0 %v25263_v42  ;;  %21470 = vmatpush3.bf16.msra.mxu1 %v25264_v45  ;;  %v17990_v42 = vrot.slane (!%p21388_p7), %v17973_v39, %v28107_v33  ;;  %v17994_v45 = vrot.slane (!%p21388_p7), %v17973_v39, %v28110_v34 }
 0x972   : > { %21449 = vmatprep.subr.bf16.mxu0 %v25265_v47  ;;  %21471 = vmatprep.subr.bf16.mxu1 %v25266_v48  ;;  %v17998_v47 = vrot.slane (!%p21388_p7), %v17973_v39, %v28113_v35  ;;  %v17975_v48 = vld [vmem:[%s28527_s2 + $0x10] sm:$0xff] (!%p21388_p7) }
 0x975   : > { %21450 = vmatpush3.bf16.msra.mxu0 %v25267_v49  ;;  %21472 = vmatpush3.bf16.msra.mxu1 %v25268_v50  ;;  %v18002_v49 = vrot.slane (!%p21388_p7), %v17973_v39, %v28116_v21  ;;  %v18006_v50 = vrot.slane (!%p21388_p7), %v17973_v39, %v28119_v38 }
 0x976   : > { %21451 = vmatprep.subr.bf16.mxu0 %v25269_v51  ;;  %21473 = vmatprep.subr.bf16.mxu1 %v25270_v52  ;;  %v18010_v51 = vrot.slane (!%p21388_p7), %v17973_v39, %v28122_v36  ;;  %v18014_v52 = vrot.slane (!%p21388_p7), %v17973_v39, %v28125_v37 }
 0x979   : > { %21452 = vmatpush3.bf16.msra.mxu0 %v25271_v53  ;;  %21474 = vmatpush3.bf16.msra.mxu1 %v25272_v54  ;;  %v18018_v53 = vrot.slane (!%p21388_p7), %v17974_v40, %v28104_v27  ;;  %v18022_v54 = vrot.slane (!%p21388_p7), %v17974_v40, %v28107_v33 }
 0x97c   : > { %17684 = vmatmul.mubr.bf16.vlgmr.msra.gmra.mrb[40].mxu0 %v25613_v22  ;;  %17724 = vmatmul.mubr.bf16.vlgmr.msra.gmra.mrb[40].mxu1 %v25829_v43 }
 0xa0f   : > { %v17400_v55 = vpop.f32.mrb[32].mxu0  ;;  %v17564_v56 = vpop.f32.mrb[32].mxu1 }
 0xa10   : > { %v17402_v57 = vpop.f32.mrb[33].mxu0  ;;  %v17566_v58 = vpop.f32.mrb[33].mxu1 }
 0xa11   : > { %v17904_v59 = vcombine.low %v17400_v55, %v17402_v57  ;;  %v17905_v60 = vcombine.low %v17564_v56, %v17566_v58  ;;  %v17404_v62 = vpop.f32.mrb[34].mxu0  ;;  %v17568_v63 = vpop.f32.mrb[34].mxu1  ;;  %v18026_v55 = vrot.slane (!%p21388_p7), %v17974_v40, %v28110_v34  ;;  %v18030_v56 = vrot.slane (!%p21388_p7), %v17974_v40, %v28113_v35  ;;  %v28151_v57 = vld [vmem:[%s28527_s2 + $0x18] sm:$0xff] (!%p21388_p7) }
 0xa12   : > { %v17405_v0 = vpop.f32.mrb[35].mxu0  ;;  %v17569_v1 = vpop.f32.mrb[35].mxu1  ;;  %v18034_v58 = vrot.slane (!%p21388_p7), %v17974_v40, %v28116_v21  ;;  %v18046_v62 = vrot.slane (!%p21388_p7), %v17974_v40, %v28125_v37  ;;  %v18050_v63 = vrot.slane (!%p21388_p7), %v17975_v48, %v28104_v27 }
 0xa13   : > { %v17912_v2 = vrot.slane %v17904_v59, %v26064_v46  ;;  %v17919_v61 = vrot.slane %v17905_v60, %v26064_v46  ;;  %v18038_v59 = vrot.slane (!%p21388_p7), %v17974_v40, %v28119_v38  ;;  %v18042_v60 = vrot.slane (!%p21388_p7), %v17974_v40, %v28122_v36 }
 0xa14   : > { %v18054_v0 = vrot.slane (!%p21388_p7), %v17975_v48, %v28107_v33  ;;  %v18058_v1 = vrot.slane (!%p21388_p7), %v17975_v48, %v28110_v34 }
 0xa15   : > { %v17920_v3 = vcombine.low %v17912_v2, %v17919_v61  ;;  %v18062_v2 = vrot.slane (!%p21388_p7), %v17975_v48, %v28113_v35  ;;  %v28164_v61 = vld [vmem:[%s28527_s2 + $0x20] sm:$0x1f] (!%p21388_p7) }
 0xa17   : > { %v17946_v4 = vadd.f32 %v17920_v3, %v222_v23  ;;  %v18066_v23 = vrot.slane (!%p21388_p7), %v17975_v48, %v28116_v21  ;;  %v18070_v3 = vrot.slane (!%p21388_p7), %v17975_v48, %v28119_v38 }
 0xa19   : > { %17956 = vst [vmem:[#allocation2 + $0x40] sm:$0xff] %v17946_v4  ;;  %v18074_v4 = vrot.slane (!%p21388_p7), %v17975_v48, %v28122_v36  ;;  %v18216_v40 = vcombine.low (!%p21388_p7), %v18066_v23, %v18070_v3  ;;  %v17969_v23 = vld [vmem:[#allocation2 + $0x30] sm:$0xff] (!%p21388_p7) }
 0xa2f   : > { %v21409_v22 = vpop.f32.mrb[36].mxu0  ;;  %v21431_v43 = vpop.f32.mrb[36].mxu1 }
 0xa30   : > { %v21410_v5 = vpop.f32.mrb[37].mxu0  ;;  %v21432_v6 = vpop.f32.mrb[37].mxu1 }
 0xa31   : > { %v21411_v7 = vadd.f32 %v21410_v5, %v21409_v22  ;;  %v21433_v8 = vadd.f32 %v21432_v6, %v21431_v43  ;;  %v21412_v9 = vpop.f32.mrb[38].mxu0  ;;  %v21434_v10 = vpop.f32.mrb[38].mxu1  ;;  %v18078_v22 = vrot.slane (!%p21388_p7), %v17975_v48, %v28125_v37  ;;  %v18082_v43 = vrot.slane (!%p21388_p7), %v28151_v57, %v28104_v27 }
 0xa32   : > { %v21413_v11 = vpop.f32.mrb[39].mxu0  ;;  %v21435_v12 = vpop.f32.mrb[39].mxu1  ;;  %v18086_v5 = vrot.slane (!%p21388_p7), %v28151_v57, %v28107_v33  ;;  %v18090_v6 = vrot.slane (!%p21388_p7), %v28151_v57, %v28110_v34  ;;  %v18102_v9 = vrot.slane (!%p21388_p7), %v28151_v57, %v28119_v38  ;;  %v18106_v10 = vrot.slane (!%p21388_p7), %v28151_v57, %v28122_v36 }
 0xa33   : > { %v17646_v13 = vadd.f32 %v21433_v8, %v21411_v7  ;;  %v18094_v7 = vrot.slane (!%p21388_p7), %v28151_v57, %v28113_v35  ;;  %v18098_v8 = vrot.slane (!%p21388_p7), %v28151_v57, %v28116_v21  ;;  %v18110_v11 = vrot.slane (!%p21388_p7), %v28151_v57, %v28125_v37 }
 0xa34   : > { %v18114_v12 = vrot.slane (!%p21388_p7), %v28164_v61, %v28104_v27  ;;  %v18199_v38 = vcombine.low (!%p21388_p7), %v18050_v63, %v18054_v0  ;;  %v18200_v36 = vcombine.low (!%p21388_p7), %v18058_v1, %v18062_v2  ;;  %v18233_v48 = vcombine.low (!%p21388_p7), %v18082_v43, %v18086_v5  ;;  %v17968_v63 = vld [vmem:[#allocation2 + $0x28] sm:$0xff] (!%p21388_p7) }
 0xa36   : > { %v18241_v57 = vrot.slane (!%p21388_p7), %v18233_v48, %v26064_v46 }
 0xa4f   : > { %v21453_v14 = vpop.f32.mrb[40].mxu0  ;;  %v21475_v15 = vpop.f32.mrb[40].mxu1 }
 0xa50   : > { %v21454_v17 = vpop.f32.mrb[41].mxu0  ;;  %v21476_v18 = vpop.f32.mrb[41].mxu1 }
 0xa51   : > { %v21455_v19 = vadd.f32 %v21454_v17, %v21453_v14  ;;  %v21477_v20 = vadd.f32 %v21476_v18, %v21475_v15  ;;  %v21456_v24 = vpop.f32.mrb[42].mxu0  ;;  %v21478_v25 = vpop.f32.mrb[42].mxu1  ;;  %v18122_v14 = vrot.slane (!%p21388_p7), %v28164_v61, %v28110_v34  ;;  %v18126_v15 = vrot.slane (!%p21388_p7), %v28164_v61, %v28113_v35 }
 0xa52   : > { %v21457_v26 = vpop.f32.mrb[43].mxu0  ;;  %v21479_v28 = vpop.f32.mrb[43].mxu1  ;;  %v18130_v17 = vrot.slane (!%p21388_p7), %v28164_v61, %v28116_v21  ;;  %v18131_v18 = vcombine.low (!%p21388_p7), %v17986_v41, %v17990_v42  ;;  %v18149_v24 = vcombine.low (!%p21388_p7), %v18010_v51, %v18014_v52  ;;  %v18165_v25 = vcombine.low (!%p21388_p7), %v18018_v53, %v18022_v54  ;;  %v17964_v54 = vld [vmem:[#allocation2 + $0x8] sm:$0xff] (!%p21388_p7) }
 0xa53   : > { %v17686_v29 = vadd.f32 %v21455_v19, %v17646_v13  ;;  %v18118_v13 = vrot.slane (!%p21388_p7), %v28164_v61, %v28107_v33  ;;  %v18132_v19 = vcombine.low (!%p21388_p7), %v17994_v45, %v17998_v47  ;;  %v18166_v26 = vcombine.low (!%p21388_p7), %v18026_v55, %v18030_v56  ;;  %v17965_v55 = vld [vmem:[#allocation2 + $0x10] sm:$0xff] (!%p21388_p7) }
 0xa54   : > { %v18182_v28 = vcombine.low (!%p21388_p7), %v18034_v58, %v18038_v59  ;;  %v18173_v27 = vrot.slane (!%p21388_p7), %v18165_v25, %v26064_v46  ;;  %v18217_v41 = vcombine.low (!%p21388_p7), %v18074_v4, %v18078_v22  ;;  %v18207_v45 = vrot.slane (!%p21388_p7), %v18199_v38, %v26064_v46 }
 0xa55   : > { %v17726_v30 = vadd.f32 %v21477_v20, %v17686_v29  ;;  %17962 = sbr.rel (%p21388_p7) target bundleno = 3089 (0xc11), region = 44  ;;  %v18148_v20 = vcombine.low (!%p21388_p7), %v18002_v49, %v18006_v50  ;;  %v18139_v29 = vrot.slane (!%p21388_p7), %v18131_v18, %v26064_v46  ;;  %v18180_v33 = vrot.slane (!%p21388_p7), %v18166_v26, %v26064_v46  ;;  %v17963_v49 = vld [vmem:[#allocation2] sm:$0xff] (!%p21388_p7) }
 0xa56   : > { %v18190_v34 = vrot.slane (!%p21388_p7), %v18182_v28, %v26064_v46  ;;  %v18214_v47 = vrot.slane (!%p21388_p7), %v18200_v36, %v26064_v46  ;;  %v18224_v50 = vrot.slane (!%p21388_p7), %v18216_v40, %v26064_v46  ;;  %v18231_v51 = vrot.slane (!%p21388_p7), %v18217_v41, %v26064_v46 }
 0xa57   : > { %v17927_v32 = vrot.slane %v17726_v30, %v26064_v46  ;;  %v18146_v30 = vrot.slane (!%p21388_p7), %v18132_v19, %v26064_v46  ;;  %v18181_v39 = vcombine.low (!%p21388_p7), %v18173_v27, %v18180_v33  ;;  %v18234_v52 = vcombine.low (!%p21388_p7), %v18090_v6, %v18094_v7  ;;  %v17970_v6 = vld [vmem:[#allocation2 + $0x38] sm:$0xff] (!%p21388_p7) }
 0xa58   : > { %v18250_v53 = vcombine.low (!%p21388_p7), %v18098_v8, %v18102_v9  ;;  %v18215_v56 = vcombine.low (!%p21388_p7), %v18207_v45, %v18214_v47  ;;  %v18251_v58 = vcombine.low (!%p21388_p7), %v18106_v10, %v18110_v11  ;;  %v18267_v59 = vcombine.low (!%p21388_p7), %v18114_v12, %v18118_v13  ;;  %v17971_v11 = vld [vmem:[#allocation2 + $0x40] sm:$0xff] (!%p21388_p7) }
 0xa59   : > { %v17947_v16 = vadd.f32 %v17927_v32, %v223_v31  ;;  %v18156_v31 = vrot.slane (!%p21388_p7), %v18148_v20, %v26064_v46  ;;  %v18183_v32 = vcombine.low (!%p21388_p7), %v18042_v60, %v18046_v62  ;;  %v18147_v35 = vcombine.low (!%p21388_p7), %v18139_v29, %v18146_v30  ;;  %v17966_v60 = vld [vmem:[#allocation2 + $0x18] sm:$0xff] (!%p21388_p7)  ;;  %v17967_v62 = vld [vmem:[#allocation2 + $0x20] sm:$0xff] (!%p21388_p7) }
 0xa5a   : > { %v18232_v0 = vcombine.low (!%p21388_p7), %v18224_v50, %v18231_v51  ;;  %v18248_v1 = vrot.slane (!%p21388_p7), %v18234_v52, %v26064_v46  ;;  %v18258_v2 = vrot.slane (!%p21388_p7), %v18250_v53, %v26064_v46  ;;  %v18268_v61 = vcombine.low (!%p21388_p7), %v18122_v14, %v18126_v15 }
 0xa5b   : > { %17958 = vst.msk [vmem:[#allocation2 + $0x48] sm:$0x3] %vm17957_vm1, %v17947_v16  ;;  %v18163_v16 = vrot.slane (!%p21388_p7), %v18149_v24, %v26064_v46  ;;  %v18197_v21 = vrot.slane (!%p21388_p7), %v18183_v32, %v26064_v46  ;;  %v18265_v4 = vrot.slane (!%p21388_p7), %v18251_v58, %v26064_v46  ;;  %v18275_v22 = vrot.slane (!%p21388_p7), %v18267_v59, %v26064_v46 }
 0xa5c   : > { %v18290_v43 = vrot.slane %v18130_v17, %v26064_v46  ;;  %v28214_v5 = vadd.f32 %v18147_v35, %v17963_v49  ;;  %v18249_v7 = vcombine.low %v18241_v57, %v18248_v1  ;;  %v18282_v8 = vrot.slane %v18268_v61, %v26064_v46 }
 0xa5d   : > { %v18164_v37 = vcombine.low %v18156_v31, %v18163_v16  ;;  %v18198_v42 = vcombine.low %v18190_v34, %v18197_v21  ;;  %v28219_v10 = vadd.f32 %v18181_v39, %v17965_v55  ;;  %v18266_v12 = vcombine.low %v18258_v2, %v18265_v4 }
 0xa5e   : > { %v28223_v14 = vadd.f32 %v18215_v56, %v17967_v62  ;;  %v28225_v15 = vadd.f32 %v18232_v0, %v17968_v63  ;;  %v18283_v18 = vcombine.low %v18275_v22, %v18282_v8  ;;  %v28227_v17 = vadd.f32 %v18249_v7, %v17969_v23 }
 0xa5f   : > { %v28217_v9 = vadd.f32 %v18164_v37, %v17964_v54  ;;  %v28221_v13 = vadd.f32 %v18198_v42, %v17966_v60  ;;  %v18321_v20 = vcombine.high %v28214_v5, %v28214_v5  ;;  %v28233_v24 = vadd.f32 %v18266_v12, %v17970_v6 }
 0xa60   : > { %v18328_v25 = vrot.slane %v28214_v5, %v26064_v46  ;;  %v28241_v29 = vadd.f32 %v18283_v18, %v17971_v11  ;;  %v18355_v31 = vcombine.high %v28219_v10, %v28219_v10  ;;  %v18362_v32 = vrot.slane %v28219_v10, %v26064_v46 }
 0xa61   : > { %v18338_v26 = vcombine.high %v28217_v9, %v28217_v9  ;;  %v18345_v28 = vrot.slane %v28217_v9, %v26064_v46  ;;  %v18335_v30 = vrot.slane %v18321_v20, %v26064_v46  ;;  %v18372_v34 = vcombine.high %v28221_v13, %v28221_v13 }
 0xa62   : > { %v17972_v3 = vld [vmem:[#allocation2 + $0x48] sm:$0x3]  ;;  %v18336_v16 = vcombine.high %v18328_v25, %v18328_v25  ;;  %v18369_v21 = vrot.slane %v18355_v31, %v26064_v46  ;;  %v18370_v38 = vcombine.high %v18362_v32, %v18362_v32  ;;  %v18379_v36 = vrot.slane %v28221_v13, %v26064_v46 }
 0xa63   : > { %v28229_v19 = vadd.f32 %v18290_v43, %v17972_v3  ;;  %v18352_v27 = vrot.slane %v18338_v26, %v26064_v46  ;;  %v18353_v33 = vcombine.high %v18345_v28, %v18345_v28  ;;  %v18337_v35 = vcombine.high %v18335_v30, %v18335_v30 }
 0xa64   : > { %v18386_v39 = vrot.slane %v18372_v34, %v26064_v46  ;;  %v18389_v40 = vcombine.high %v28223_v14, %v28223_v14  ;;  %v18396_v41 = vrot.slane %v28223_v14, %v26064_v46  ;;  %v18371_v42 = vcombine.high %v18369_v21, %v18369_v21 }
 0xa65   : > { %v18354_v37 = vcombine.high %v18352_v27, %v18352_v27  ;;  %v18387_v45 = vcombine.high %v18379_v36, %v18379_v36  ;;  %v18406_v47 = vcombine.high %v28225_v15, %v28225_v15  ;;  %v28263_v48 = vrot.slane %v28225_v15, %v26064_v46 }
 0xa66   : > { %v18388_v49 = vcombine.high %v18386_v39, %v18386_v39  ;;  %v18403_v50 = vrot.slane %v18389_v40, %v26064_v46  ;;  %v18404_v51 = vcombine.high %v18396_v41, %v18396_v41  ;;  %v18423_v52 = vcombine.high %v28227_v17, %v28227_v17 }
 0xa67   : > { %v18420_v53 = vrot.slane %v18406_v47, %v26064_v46  ;;  %v18421_v54 = vcombine.high %v28263_v48, %v28263_v48  ;;  %v28273_v55 = vrot.slane %v28227_v17, %v26064_v46  ;;  %v18440_v56 = vcombine.high %v28233_v24, %v28233_v24 }
 0xa68   : > { %v18405_v57 = vcombine.high %v18403_v50, %v18403_v50  ;;  %v28278_v58 = vrot.slane %v18423_v52, %v26064_v46  ;;  %v28282_v59 = vrot.slane %v28233_v24, %v26064_v46  ;;  %v18457_v60 = vcombine.high %v28241_v29, %v28241_v29 }
 0xa69   : > { %v18422_v62 = vcombine.high %v18420_v53, %v18420_v53  ;;  %v18438_v63 = vcombine.high %v28273_v55, %v28273_v55  ;;  %v28289_v0 = vrot.slane %v18440_v56, %v26064_v46  ;;  %v28293_v1 = vrot.slane %v28241_v29, %v26064_v46 }
 0xa6a   : > { %v18439_v2 = vcombine.high %v28278_v58, %v28278_v58  ;;  %v18455_v61 = vcombine.high %v28282_v59, %v28282_v59  ;;  %v28300_v23 = vrot.slane %v18457_v60, %v26064_v46  ;;  %v18480_v3 = vrot.slane %v28229_v19, %v26064_v46 }
 0xa6b   : > { %v18456_v4 = vcombine.high %v28289_v0, %v28289_v0  ;;  %v18472_v22 = vcombine.high %v28293_v1, %v28293_v1  ;;  %v18519_v43 = vsel %vm18518_vm2, %v18328_v25, -inf  ;;  %v18520_v6 = vsel %vm18518_vm2, %v18336_v16, -inf }
 0xa6c   : > { %v18473_v7 = vcombine.high %v28300_v23, %v28300_v23  ;;  %v18521_v8 = vsel %vm18518_vm2, %v18335_v30, -inf  ;;  %v18522_v11 = vsel %vm18518_vm2, %v18337_v35, -inf  ;;  %v18523_v12 = vsel %vm18518_vm2, %v18345_v28, -inf }
 0xa6d   : > { %v18524_v18 = vmax.f32 %v18519_v43, %v18523_v12  ;;  %v18525_v20 = vsel %vm18518_vm2, %v18353_v33, -inf  ;;  %v18527_v26 = vsel %vm18518_vm2, %v18352_v27, -inf  ;;  %v18529_v31 = vsel %vm18518_vm2, %v18354_v37, -inf }
 0xa6e   : > { %v18526_v34 = vmax.f32 %v18520_v6, %v18525_v20  ;;  %v18528_v25 = vmax.f32 %v18521_v8, %v18527_v26  ;;  %v18530_v40 = vmax.f32 %v18522_v11, %v18529_v31  ;;  %v18531_v16 = vsel %vm18518_vm2, %v18362_v32, -inf }
 0xa6f   : > { %v18532_v47 = vmax.f32 %v18524_v18, %v18531_v16  ;;  %v18533_v52 = vsel %vm18518_vm2, %v18370_v38, -inf  ;;  %v18535_v30 = vsel %vm18518_vm2, %v18369_v21, -inf  ;;  %v18537_v35 = vsel %vm18518_vm2, %v18371_v42, -inf }
 0xa70   : > { %v18534_v28 = vmax.f32 %v18526_v34, %v18533_v52  ;;  %v18536_v56 = vmax.f32 %v18528_v25, %v18535_v30  ;;  %v18538_v60 = vmax.f32 %v18530_v40, %v18537_v35  ;;  %v18539_v33 = vsel %vm18518_vm2, %v18379_v36, -inf }
 0xa71   : > { %v18540_v27 = vmax.f32 %v18532_v47, %v18539_v33  ;;  %v18541_v37 = vsel %vm18518_vm2, %v18387_v45, -inf  ;;  %v18543_v43 = vsel %vm18518_vm2, %v18386_v39, -inf  ;;  %v18545_v6 = vsel %vm18518_vm2, %v18388_v49, -inf }
 0xa72   : > { %v18542_v32 = vmax.f32 %v18534_v28, %v18541_v37  ;;  %v18544_v8 = vmax.f32 %v18536_v56, %v18543_v43  ;;  %v18546_v11 = vmax.f32 %v18538_v60, %v18545_v6  ;;  %v18547_v38 = vsel %vm18518_vm2, %v18396_v41, -inf }
 0xa73   : > { %v18548_v21 = vmax.f32 %v18540_v27, %v18547_v38  ;;  %v18549_v42 = vsel %vm18518_vm2, %v18404_v51, -inf  ;;  %v18551_v12 = vsel %vm18518_vm2, %v18403_v50, -inf  ;;  %v18553_v18 = vsel %vm18518_vm2, %v18405_v57, -inf }
 0xa74   : > { %v18550_v36 = vmax.f32 %v18542_v32, %v18549_v42  ;;  %v18552_v20 = vmax.f32 %v18544_v8, %v18551_v12  ;;  %v18554_v26 = vmax.f32 %v18546_v11, %v18553_v18  ;;  %v18555_v39 = vsel %vm18518_vm2, %v28263_v48, -inf }
 0xa75   : > { %v18556_v45 = vmax.f32 %v18548_v21, %v18555_v39  ;;  %v18557_v49 = vsel %vm18518_vm2, %v18421_v54, -inf  ;;  %v18559_v31 = vsel %vm18518_vm2, %v18420_v53, -inf  ;;  %v18561_v41 = vsel %vm18518_vm2, %v18422_v62, -inf }
 0xa76   : > { %v18558_v34 = vmax.f32 %v18550_v36, %v18557_v49  ;;  %v18560_v25 = vmax.f32 %v18552_v20, %v18559_v31  ;;  %v18562_v51 = vmax.f32 %v18554_v26, %v18561_v41  ;;  %v18563_v50 = vsel %vm18518_vm2, %v28273_v55, -inf }
 0xa77   : > { %v18564_v57 = vmax.f32 %v18556_v45, %v18563_v50  ;;  %v18565_v40 = vsel %vm18518_vm2, %v18438_v63, -inf  ;;  %v18567_v16 = vsel %vm18518_vm2, %v28278_v58, -inf  ;;  %v18569_v48 = vsel %vm18518_vm2, %v18439_v2, -inf }
 0xa78   : > { %v18566_v47 = vmax.f32 %v18558_v34, %v18565_v40  ;;  %v18568_v54 = vmax.f32 %v18560_v25, %v18567_v16  ;;  %v18570_v52 = vmax.f32 %v18562_v51, %v18569_v48  ;;  %v18571_v53 = vsel %vm18518_vm2, %v28282_v59, -inf }
 0xa79   : > { %v18572_v62 = vmax.f32 %v18564_v57, %v18571_v53  ;;  %v18573_v30 = vsel %vm18518_vm2, %v18455_v61, -inf  ;;  %v18575_v55 = vsel %vm18518_vm2, %v28289_v0, -inf  ;;  %v18577_v35 = vsel %vm18518_vm2, %v18456_v4, -inf }
 0xa7a   : > { %v18574_v63 = vmax.f32 %v18566_v47, %v18573_v30  ;;  %v18576_v28 = vmax.f32 %v18568_v54, %v18575_v55  ;;  %v18578_v56 = vmax.f32 %v18570_v52, %v18577_v35  ;;  %v18579_v58 = vsel %vm18518_vm2, %v28293_v1, -inf }
 0xa7b   : > { %v18580_v2 = vmax.f32 %v18572_v62, %v18579_v58  ;;  %v18581_v59 = vsel %vm18518_vm2, %v18472_v22, -inf  ;;  %v18583_v61 = vsel %vm18518_vm2, %v28300_v23, -inf  ;;  %v18585_v0 = vsel %vm18518_vm2, %v18473_v7, -inf }
 0xa7c   : > { %v18582_v4 = vmax.f32 %v18574_v63, %v18581_v59  ;;  %v18584_v60 = vmax.f32 %v18576_v28, %v18583_v61  ;;  %v18586_v33 = vmax.f32 %v18578_v56, %v18585_v0  ;;  %v18587_v27 = vsel %vm17957_vm1, %v18480_v3, -inf }
 0xa7d   : > { %v18588_v37 = vmax.f32 %v18580_v2, %v18587_v27  ;;  %v25397_v6 = vmov 269488144  }
 0xa7e   : > { %v18590_v1 = vmax.f32 %v18584_v60, %v18586_v33  ;;  %v18596_v32 = vunpack.c.l.s4 %v25397_v6 }
 0xa7f   : > { %v18589_v43 = vmax.f32 %v18588_v37, %v18582_v4 }
 0xa80   : > { %v18597_v8 = vunpack.c.0.s8 %v18596_v32 }
 0xa81   : > { %v18591_v22 = vmax.f32 %v18589_v43, %v18590_v1 }
 0xa82   : > { %v28364_v23 = vsub.s32 %v18597_v8, %v25558_v44 }
 0xa83   : > { %18592 = vmax.xlane.f32.xlu0 %v18591_v22 }
 0xb10   : > { %v18593_v7 = vpop.xlane.xlu0 %18592 }
 0xb11   : > { %v28367_v11 = vrot.slane %v18593_v7, %v28364_v23 }
 0xb13   : > { %v18603_v38 = vsub.f32 %v28214_v5, %v28367_v11  ;;  %v18604_v3 = vsub.f32 %v28217_v9, %v28367_v11  ;;  %v18605_v12 = vsub.f32 %v28219_v10, %v28367_v11  ;;  %v18606_v5 = vsub.f32 %v28221_v13, %v28367_v11 }
 0xb14   : > { %v18607_v51 = vsub.f32 %v28223_v14, %v28367_v11  ;;  %v18608_v28 = vsub.f32 %v28225_v15, %v28367_v11  ;;  %v18609_v6 = vsub.f32 %v28227_v17, %v28367_v11 }
 0xb15   : > { %v18613_v21 = vmul.f32 1.442695, %v18603_v38  ;;  %v18615_v42 = vmul.f32 1.442695, %v18604_v3  ;;  %v18617_v44 = vmul.f32 1.442695, %v18605_v12 }
 0xb16   : > { %v18619_v45 = vmul.f32 1.442695, %v18606_v5  ;;  %v18621_v52 = vmul.f32 1.442695, %v18607_v51  ;;  %v18623_v60 = vmul.f32 1.442695, %v18608_v28 }
 0xb17   : > { %25273 = vpow2.f32 %v18613_v21  ;;  %v18625_v12 = vmul.f32 1.442695, %v18609_v6 }
 0xb18   : > { %25275 = vpow2.f32 %v18615_v42 }
 0xb19   : > { %25277 = vpow2.f32 %v18617_v44 }
 0xb1a   : > { %25279 = vpow2.f32 %v18619_v45  ;;  %v18610_v45 = vsub.f32 %v28233_v24, %v28367_v11 }
 0xb1b   : > { %25281 = vpow2.f32 %v18621_v52  ;;  %v18611_v52 = vsub.f32 %v28241_v29, %v28367_v11 }
 0xb1c   : > { %25283 = vpow2.f32 %v18623_v60  ;;  %v18627_v51 = vmul.f32 1.442695, %v18610_v45 }
 0xb1d   : > { %25285 = vpow2.f32 %v18625_v12  ;;  %v18629_v28 = vmul.f32 1.442695, %v18611_v52 }
 0xb1e   : > { %25287 = vpow2.f32 %v18627_v51 }
 0xb1f   : > { %25289 = vpow2.f32 %v18629_v28 }
 0xb21   : > { %v28375_v18 = vpop.eup %25273 }
 0xb22   : > { %v18643_v36 = vcombine.high %v28375_v18, %v28375_v18  ;;  %v18650_v20 = vrot.slane %v28375_v18, %v26064_v46  ;;  %v28383_v9 = vpop.eup %25275 }
 0xb23   : > { %v18660_v10 = vcombine.high %v28383_v9, %v28383_v9  ;;  %v18667_v31 = vrot.slane %v28383_v9, %v26064_v46  ;;  %v28397_v48 = vpop.eup %25277 }
 0xb24   : > { %v18657_v26 = vrot.slane %v18643_v36, %v26064_v46  ;;  %v18658_v39 = vcombine.high %v18650_v20, %v18650_v20  ;;  %v18840_v41 = vsel %vm18518_vm2, %v18650_v20, 0.0  ;;  %v18677_v30 = vcombine.high %v28397_v48, %v28397_v48  ;;  %v28410_v61 = vpop.eup %25279 }
 0xb25   : > { %v18674_v57 = vrot.slane %v18660_v10, %v26064_v46  ;;  %v18675_v40 = vcombine.high %v18667_v31, %v18667_v31  ;;  %v18847_v54 = vsel %vm18518_vm2, %v18667_v31, 0.0  ;;  %v18684_v14 = vrot.slane %v28397_v48, %v26064_v46  ;;  %v28423_v21 = vpop.eup %25281 }
 0xb26   : > { %v18659_v49 = vcombine.high %v18657_v26, %v18657_v26  ;;  %v18841_v34 = vsel %vm18518_vm2, %v18658_v39, 0.0  ;;  %v18843_v13 = vsel %vm18518_vm2, %v18657_v26, 0.0  ;;  %v18691_v58 = vrot.slane %v18677_v30, %v26064_v46 }
 0xb27   : > { %v18842_v25 = vadd.f32 %v18841_v34, %v18840_v41  ;;  %v18676_v62 = vcombine.high %v18674_v57, %v18674_v57  ;;  %v18849_v55 = vsel %vm18518_vm2, %v18675_v40, 0.0  ;;  %v18851_v63 = vsel %vm18518_vm2, %v18674_v57, 0.0  ;;  %v28436_v34 = vpop.eup %25283 }
 0xb28   : > { %v18845_v16 = vsel %vm18518_vm2, %v18659_v49, 0.0  ;;  %v18692_v2 = vcombine.high %v18684_v14, %v18684_v14  ;;  %v18855_v4 = vsel %vm18518_vm2, %v18684_v14, 0.0  ;;  %v18693_v27 = vcombine.high %v18691_v58, %v18691_v58 }
 0xb29   : > { %v18844_v50 = vadd.f32 %v18843_v13, %v18842_v25  ;;  %v18853_v59 = vsel %vm18518_vm2, %v18676_v62, 0.0  ;;  %v18694_v37 = vcombine.high %v28410_v61, %v28410_v61  ;;  %v18701_v15 = vrot.slane %v28410_v61, %v26064_v46 }
 0xb2a   : > { %v18857_v1 = vsel %vm18518_vm2, %v18692_v2, 0.0  ;;  %v18859_v22 = vsel %vm18518_vm2, %v18691_v58, 0.0  ;;  %v18861_v38 = vsel %vm18518_vm2, %v18693_v27, 0.0  ;;  %v18711_v20 = vcombine.high %v28423_v21, %v28423_v21 }
 0xb2b   : > { %v18846_v47 = vadd.f32 %v18845_v16, %v18844_v50  ;;  %v18708_v8 = vrot.slane %v18694_v37, %v26064_v46  ;;  %v18709_v7 = vcombine.high %v18701_v15, %v18701_v15  ;;  %v18863_v42 = vsel %vm18518_vm2, %v18701_v15, 0.0 }
 0xb2c   : > { %v18718_v17 = vrot.slane %v28423_v21, %v26064_v46  ;;  %v18725_v49 = vrot.slane %v18711_v20, %v26064_v46  ;;  %v18728_v40 = vcombine.high %v28436_v34, %v28436_v34  ;;  %v18735_v24 = vrot.slane %v28436_v34, %v26064_v46 }
 0xb2d   : > { %v18848_v53 = vadd.f32 %v18847_v54, %v18846_v47  ;;  %v18710_v36 = vcombine.high %v18708_v8, %v18708_v8  ;;  %v18865_v5 = vsel %vm18518_vm2, %v18709_v7, 0.0  ;;  %v18867_v39 = vsel %vm18518_vm2, %v18708_v8, 0.0 }
 0xb2e   : > { %v18726_v31 = vcombine.high %v18718_v17, %v18718_v17  ;;  %v18871_v13 = vsel %vm18518_vm2, %v18718_v17, 0.0  ;;  %v18727_v57 = vcombine.high %v18725_v49, %v18725_v49  ;;  %v18875_v54 = vsel %vm18518_vm2, %v18725_v49, 0.0 }
 0xb2f   : > { %v18850_v35 = vadd.f32 %v18849_v55, %v18848_v53  ;;  %v18869_v41 = vsel %vm18518_vm2, %v18710_v36, 0.0  ;;  %v18742_v62 = vrot.slane %v18728_v40, %v26064_v46  ;;  %v18743_v30 = vcombine.high %v18735_v24, %v18735_v24  ;;  %v28449_v55 = vpop.eup %25285 }
 0xb30   : > { %v18873_v16 = vsel %vm18518_vm2, %v18726_v31, 0.0  ;;  %v18877_v14 = vsel %vm18518_vm2, %v18727_v57, 0.0  ;;  %v18745_v2 = vcombine.high %v28449_v55, %v28449_v55  ;;  %v18752_v29 = vrot.slane %v28449_v55, %v26064_v46  ;;  %v25288_v15 = vpop.eup %25287 }
 0xb31   : > { %v18852_v56 = vadd.f32 %v18851_v63, %v18850_v35  ;;  %v18879_v63 = vsel %vm18518_vm2, %v18735_v24, 0.0  ;;  %v18744_v58 = vcombine.high %v18742_v62, %v18742_v62  ;;  %v18762_v8 = vcombine.high %v25288_v15, %v25288_v15 }
 0xb32   : > { %v18760_v27 = vcombine.high %v18752_v29, %v18752_v29  ;;  %v18769_v7 = vrot.slane %v25288_v15, %v26064_v46 }
 0xb33   : > { %v18854_v0 = vadd.f32 %v18853_v59, %v18852_v56  ;;  %v18881_v59 = vsel %vm18518_vm2, %v18743_v30, 0.0  ;;  %v18885_v37 = vsel %vm18518_vm2, %v18744_v58, 0.0  ;;  %v18776_v36 = vrot.slane %v18762_v8, %v26064_v46 }
 0xb34   : > { %v18777_v20 = vcombine.high %v18769_v7, %v18769_v7 }
 0xb35   : > { %v18856_v33 = vadd.f32 %v18855_v4, %v18854_v0  ;;  %v18883_v4 = vsel %vm18518_vm2, %v18742_v62, 0.0 }
 0xb36   : > { %v18897_v49 = vsel %vm18518_vm2, %v18777_v20, 0.0 }
 0xb37   : > { %v18858_v43 = vadd.f32 %v18857_v1, %v18856_v33  ;;  %v18759_v33 = vrot.slane %v18745_v2, %v26064_v46  ;;  %v18612_v1 = vsub.f32 %v28229_v19, %v28367_v11  ;;  %v25290_v11 = vpop.eup %25289 }
 0xb38   : > { %v18779_v45 = vcombine.high %v25290_v11, %v25290_v11 }
 0xb39   : > { %v18860_v32 = vadd.f32 %v18859_v22, %v18858_v43  ;;  %v18887_v22 = vsel %vm18518_vm2, %v18752_v29, 0.0  ;;  %v18891_v12 = vsel %vm18518_vm2, %v18759_v33, 0.0 }
 0xb3b   : > { %v18862_v3 = vadd.f32 %v18861_v38, %v18860_v32  ;;  %v18761_v32 = vcombine.high %v18759_v33, %v18759_v33  ;;  %v18889_v38 = vsel %vm18518_vm2, %v18760_v27, 0.0 }
 0xb3d   : > { %v18864_v44 = vadd.f32 %v18863_v42, %v18862_v3  ;;  %v18631_v3 = vmul.f32 1.442695, %v18612_v1  ;;  %v18893_v19 = vsel %vm18518_vm2, %v18761_v32, 0.0 }
 0xb3f   : > { %v18866_v26 = vadd.f32 %v18865_v5, %v18864_v44  ;;  %25291 = vpow2.f32 %v18631_v3  ;;  %v18895_v5 = vsel %vm18518_vm2, %v18769_v7, 0.0 }
 0xb41   : > { %v18868_v10 = vadd.f32 %v18867_v39, %v18866_v26  ;;  %v18778_v39 = vcombine.high %v18776_v36, %v18776_v36 }
 0xb43   : > { %v18870_v25 = vadd.f32 %v18869_v41, %v18868_v10  ;;  %v18786_v10 = vrot.slane %v25290_v11, %v26064_v46  ;;  %v18899_v41 = vsel %vm18518_vm2, %v18776_v36, 0.0 }
 0xb45   : > { %v18872_v50 = vadd.f32 %v18871_v13, %v18870_v25  ;;  %v18793_v13 = vrot.slane %v18779_v45, %v26064_v46  ;;  %v18794_v51 = vcombine.high %v18786_v10, %v18786_v10  ;;  %v18903_v40 = vsel %vm18518_vm2, %v18786_v10, 0.0 }
 0xb47   : > { %v18874_v47 = vadd.f32 %v18873_v16, %v18872_v50  ;;  %v18901_v50 = vsel %vm18518_vm2, %v18778_v39, 0.0  ;;  %v18907_v62 = vsel %vm18518_vm2, %v18793_v13, 0.0 }
 0xb49   : > { %v18876_v53 = vadd.f32 %v18875_v54, %v18874_v47  ;;  %v25292_v24 = vpop.eup %25291  ;;  %v18795_v47 = vcombine.high %v18793_v13, %v18793_v13  ;;  %v18905_v54 = vsel %vm18518_vm2, %v18794_v51, 0.0 }
 0xb4b   : > { %v18878_v35 = vadd.f32 %v18877_v14, %v18876_v53  ;;  %v18802_v53 = vrot.slane %v25292_v24, %v26064_v46  ;;  %v18909_v14 = vsel %vm18518_vm2, %v18795_v47, 0.0 }
 0xb4d   : > { %v18880_v56 = vadd.f32 %v18879_v63, %v18878_v35  ;;  %v18911_v63 = vsel %vm17957_vm1, %v18802_v53, 0.0 }
 0xb4f   : > { %v18882_v0 = vadd.f32 %v18881_v59, %v18880_v56 }
 0xb51   : > { %v18884_v60 = vadd.f32 %v18883_v4, %v18882_v0 }
 0xb53   : > { %v18886_v43 = vadd.f32 %v18885_v37, %v18884_v60 }
 0xb55   : > { %v18888_v6 = vadd.f32 %v18887_v22, %v18886_v43 }
 0xb57   : > { %v18890_v42 = vadd.f32 %v18889_v38, %v18888_v6 }
 0xb59   : > { %v18892_v44 = vadd.f32 %v18891_v12, %v18890_v42 }
 0xb5b   : > { %v18894_v17 = vadd.f32 %v18893_v19, %v18892_v44 }
 0xb5d   : > { %v18896_v26 = vadd.f32 %v18895_v5, %v18894_v17 }
 0xb5f   : > { %v18898_v31 = vadd.f32 %v18897_v49, %v18896_v26 }
 0xb61   : > { %v18900_v25 = vadd.f32 %v18899_v41, %v18898_v31 }
 0xb63   : > { %v18902_v57 = vadd.f32 %v18901_v50, %v18900_v25 }
 0xb65   : > { %v18904_v16 = vadd.f32 %v18903_v40, %v18902_v57 }
 0xb67   : > { %v18906_v52 = vadd.f32 %v18905_v54, %v18904_v16 }
 0xb69   : > { %v18908_v30 = vadd.f32 %v18907_v62, %v18906_v52 }
 0xb6b   : > { %v18910_v35 = vadd.f32 %v18909_v14, %v18908_v30 }
 0xb6d   : > { %v18912_v28 = vadd.f32 %v18911_v63, %v18910_v35 }
 0xb6f   : > { %18913 = vadd.xlane.f32.xlu0 %v18912_v28 }
 0xbfc   : > { %v18914_v56 = vpop.xlane.xlu0 %18913 }
 0xbfd   : > { %25293 = vrcp.f32 %v18914_v56 }
 0xc07   : > { %v25294_v58 = vpop.eup %25293 }
 0xc08   : > { %v18923_v2 = vrot.slane %v25294_v58, %v28364_v23 }
 0xc0a   : > { %v18925_v29 = vmul.f32 %v28375_v18, %v18923_v2  ;;  %v18926_v59 = vmul.f32 %v28383_v9, %v18923_v2  ;;  %v18927_v46 = vmul.f32 %v28397_v48, %v18923_v2  ;;  %v18928_v0 = vmul.f32 %v28410_v61, %v18923_v2 }
 0xc0b   : > { %v18929_v4 = vmul.f32 %v28423_v21, %v18923_v2  ;;  %v18930_v60 = vmul.f32 %v28436_v34, %v18923_v2  ;;  %v18931_v33 = vmul.f32 %v28449_v55, %v18923_v2  ;;  %v18932_v27 = vmul.f32 %v25288_v15, %v18923_v2 }
 0xc0c   : > { %v18933_v37 = vmul.f32 %v25290_v11, %v18923_v2  ;;  %v18934_v1 = vmul.f32 %v25292_v24, %v18923_v2  ;;  %18935 = vst [vmem:[#allocation6] sm:$0xff] %v18925_v29  ;;  %18936 = vst [vmem:[#allocation6 + $0x8] sm:$0xff] %v18926_v59 }
 0xc0d   : > { %18937 = vst [vmem:[#allocation6 + $0x10] sm:$0xff] %v18927_v46  ;;  %18938 = vst [vmem:[#allocation6 + $0x18] sm:$0xff] %v18928_v0 }
 0xc0e   : > { %18939 = vst [vmem:[#allocation6 + $0x20] sm:$0xff] %v18929_v4  ;;  %18940 = vst [vmem:[#allocation6 + $0x28] sm:$0xff] %v18930_v60 }
 0xc0f   : > { %18941 = vst [vmem:[#allocation6 + $0x30] sm:$0xff] %v18931_v33  ;;  %18942 = vst [vmem:[#allocation6 + $0x38] sm:$0xff] %v18932_v27 }
 0xc10   : > { %18943 = vst [vmem:[#allocation6 + $0x40] sm:$0xff] %v18933_v37  ;;  %18944 = vst.msk [vmem:[#allocation6 + $0x48] sm:$0x3] %vm17957_vm1, %v18934_v1 }
 0xc11 PF: > { %p21711_p4 = scmp.eq.s32.totalorder %s25438_s16, 7  ;;  %s25398_s22 = smov [#allocation6]  }
 0xc12   : > { %s18952_s23 = sshll.u32 %s25398_s22, 4  ;;  %s18953_s23 = int_to_ptr.vmem [resolvable:$true] %s18952_s23 }
 0xc13   : > { %s25325_s24 = scalar_lea.vmem %s18953_s23, 1184  ;;  %p25332_p12 = scmp.lt.s32.totalorder %s18953_s23, %s18953_s23 }
 0xc14   : > { %p25326_p5 = scmp.ne.s32.totalorder %s18953_s23, %s25325_s24  ;;  %p25333_p0 = scmp.lt.s32.totalorder %s25325_s24, %s25325_s24 }
 0xc16   : > { %p25327_p6 = pnand %p25326_p5, %p21711_p4  ;;  %p25334_p1 = por %p25333_p0, %p25332_p12 }
 0xc18   : > { %p25328_p10 = pneg %p25327_p6 }
 0xc1a   : > { %p25335_p2 = pnand %p25334_p1, %p25328_p10 }
 0xc1c   : > { %25338 = shalt.err (!%p25335_p2)
}
 0xc1d   : > { %s25339_s29 = scalar_lea.hbm %s28528_s3, 1184 }
 0xc1e   : > { %p25340_p11 = scmp.ne.s32.totalorder %s28528_s3, %s25339_s29  ;;  %p25345_p9 = scmp.lt.u32.totalorder %s25339_s29, %s28528_s3 }
 0xc20   : > { %p25341_p13 = pnand %p25340_p11, %p21711_p4 }
 0xc22   : > { %p25342_p3 = pneg %p25341_p13 }
 0xc24   : > { %p25347_p8 = pnand %p25345_p9, %p25342_p3 }
 0xc26   : > { %25350 = shalt.err (!%p25347_p8)
}
 0xc27   : > { %21703 = dma.vmem_to_hbm [thread:$0]  (%p21711_p4), %s18953_s23, 1184, %s28528_s3, [#allocation5]  }
 0xc28   : > { %25372 = dma.done.wait (%p21711_p4), [#allocation5], 1184  }
 0xc29   : > { %25374 = vsyncadd (%p21711_p4), [#allocation5], 4294966112 }
 0xc2a PF: > { %p14_p7 = scmp.ge.s32.totalorder %s25441_s17, 10   ;;  %s28532_s12 = smov %s25381_s13 }
 0xc2b   : > { %s28533_s13 = smov %s25385_s14  ;;  %s28534_s14 = smov %s25451_s20 }
 0xc2c   : > { %s28535_s15 = smov %s25441_s17  ;;  %16 = sbr.rel (!%p14_p7) target bundleno = 4 (0x4), region = 80 }
 0xc33   :  { %18965 = vsyncpa [#allocation4], 1 }
 0xc34   :  { %18967 = vsyncpa [#allocation4 + $0x1], 1 }
 0xc35   :  { %18968 = vsyncpa [#allocation5], 1 }
 0xc36   :  { %18970 = vsyncpa [#allocation5 + $0x1], 1 }

</bundles_post_ra>
